<compile_context>
chip_gen: v7x
topology: tpu7x:2x2x1
jax: 0.10.0
libtpu: 0.0.40
codegen_flags: <defaults>
</compile_context>

<pallas_src>
import functools

import jax
import jax.numpy as jnp
from jax import lax
from jax.experimental import pallas as pl
from jax.experimental.pallas import tpu as pltpu


# ---------------------------------------------------------------------------
# Pallas kernel: one batch block per grid step, everything in VMEM.
# ---------------------------------------------------------------------------
def net_correct_kernel(x1_ref, w1_ref, b1_ref, w2_ref, b2_ref,
                       wd_ref, bd_ref, wf_ref, bf_ref, out_ref,
                       *, NB, KH, KW, Ho1, Wo1, Ho2, Wo2, Hp, Wp):
    F1 = w1_ref.shape[-1]
    F2 = w2_ref.shape[-1]
    K1 = x1_ref.shape[-1]

    # ---- conv1 + ReLU: im2col prebuilt in the wrapper -> one K=16 matmul ----
    # (kept f32: K=16 gains nothing from bf16 and it preserves accuracy margin)
    h1 = jnp.dot(x1_ref[...].reshape(Ho1 * Wo1 * NB, K1), w1_ref[...],
                 preferred_element_type=jnp.float32)
    h1 = jnp.maximum(h1 + b1_ref[...], 0.0)
    # Spatial-major (i, j, n, c); cast once to bf16 so the tap concat moves half
    # the bytes and the big conv2 matmul runs bf16.  The reshape (and its
    # inverses below) is a pure view whenever NB % 8 == 0.
    h1 = h1.astype(jnp.bfloat16).reshape(Ho1, Wo1, NB, F1)

    # ---- conv2 + ReLU: taps are outer-dim slices (free) -> K=512 matmul -----
    taps = [h1[kh:kh + Ho2, kw:kw + Wo2]
            for kh in range(KH) for kw in range(KW)]
    patches = jnp.concatenate(taps, axis=-1).reshape(Ho2 * Wo2 * NB, KH * KW * F1)
    h2 = jnp.dot(patches, w2_ref[...], preferred_element_type=jnp.float32)
    h2 = jnp.maximum(h2 + b2_ref[...], 0.0).reshape(Ho2, Wo2, NB, F2)

    # ---- MaxPool(2): outer-dim splits + selects only (no sublane/lane work) -
    mw = h2.reshape(Ho2, Wp, 2, NB, F2)
    mw = jnp.maximum(mw[:, :, 0], mw[:, :, 1])          # pool along W
    ph = mw.reshape(Hp, 2, Wp, NB, F2)
    pooled = jnp.maximum(ph[:, 0], ph[:, 1])            # pool along H -> (Hp,Wp,NB,F2)

    # ---- Linear(flat, 128): contract (pool-position, channel) without the ----
    # ---- 800-lane flatten: batched dot over the 25 positions, then reduce ----
    pooled = pooled.reshape(Hp * Wp, NB, F2)            # outer-dim merge: free
    part = jnp.einsum('pnc,pcd->pnd', pooled, wd_ref[...],
                      preferred_element_type=jnp.float32)
    dense = jnp.sum(part, axis=0) + bd_ref[...]         # (NB, 128)

    # ---- fc: ReLU -> (Dropout = identity) -> Linear(128, 10), lane-padded ---
    hfc = jnp.maximum(dense, 0.0)
    logits = jnp.dot(hfc, wf_ref[...],
                     preferred_element_type=jnp.float32) + bf_ref[...]
    out_ref[...] = logits.astype(out_ref.dtype)


# ---------------------------------------------------------------------------
# Wrapper: parameter / input layout plumbing (plain XLA glue) + pallas_call
# ---------------------------------------------------------------------------
def net_correct_pallas(x_nchw, params):
    """x_nchw: (N, Cin, H, W) float32.  params: PyTorch-layout weights."""
    w1, b1, w2, b2, wd, bd, wf, bf = params
    N, Cin, H, W = x_nchw.shape
    F1, _, KH, KW = w1.shape
    F2 = w2.shape[0]
    Ho1, Wo1 = H - KH + 1, W - KW + 1
    Ho2, Wo2 = Ho1 - KH + 1, Wo1 - KW + 1
    Hp, Wp = Ho2 // 2, Wo2 // 2
    Dh = wd.shape[0]                        # 128
    nb_classes = wf.shape[0]                # 10
    n_out = 128 * pl.cdiv(nb_classes, 128)  # lane-dense padded head width (128)

    # Batch block: full batch when small; 64-sample blocks (multiple of 8 so the
    # in-kernel batch-axis merges are pure views) once N grows.  v7x: 64 keeps
    # live intermediates well under the 64 MiB VMEM even with double-buffering.
    if N <= 64:
        NB = N
    else:
        NB = 64
        assert N % NB == 0, "TODO(synk): pad the batch to a multiple of 64"
    grid = (N // NB,)

    # conv1 im2col, spatial-major rows (i, j, n): wrapper-side XLA plumbing.
    # TODO(synk): at large batch, build this inside the kernel from x_nhwc (or
    # at least emit it in bf16) to avoid the KH*KW-fold HBM expansion of x.
    x_nhwc = jnp.transpose(x_nchw, (0, 2, 3, 1))                 # (N, H, W, Cin)
    taps = [x_nhwc[:, kh:kh + Ho1, kw:kw + Wo1, :]
            for kh in range(KH) for kw in range(KW)]
    x1col = jnp.concatenate(taps, axis=-1)                       # (N,Ho1,Wo1,KH*KW*Cin)
    x1col = jnp.transpose(x1col, (1, 2, 0, 3)).reshape(
        Ho1 * Wo1, N, KH * KW * Cin)

    # Weights, pre-permuted to the kernel's tap / (position, channel) orders.
    w1_k = jnp.transpose(w1, (2, 3, 1, 0)).reshape(KH * KW * Cin, F1)
    w2_k = jnp.transpose(w2, (2, 3, 1, 0)).reshape(KH * KW * F1, F2).astype(jnp.bfloat16)
    # PyTorch flattens (C, H, W); re-index dense weight to (pos=(pi,pj), c, d).
    wd3 = jnp.transpose(wd.reshape(Dh, F2, Hp, Wp),
                        (2, 3, 1, 0)).reshape(Hp * Wp, F2, Dh)   # f32 (K=800 path)
    wf_k = jnp.zeros((Dh, n_out), jnp.float32).at[:, :nb_classes].set(wf.T)
    b1_k = b1.reshape(1, F1)
    b2_k = b2.reshape(1, F2)
    bd_k = bd.reshape(1, Dh)
    bf_k = jnp.zeros((1, n_out), jnp.float32).at[:, :nb_classes].set(
        bf.reshape(1, -1))

    kernel = functools.partial(
        net_correct_kernel, NB=NB, KH=KH, KW=KW,
        Ho1=Ho1, Wo1=Wo1, Ho2=Ho2, Wo2=Wo2, Hp=Hp, Wp=Wp)

    # Weights: full-array blocks with constant index_map -> stay VMEM-resident
    # across the batch grid (no re-DMA).
    def full(shape):
        return pl.BlockSpec(shape, lambda b, _s=shape: (0,) * len(_s))

    out_pad = pl.pallas_call(
        kernel,
        out_shape=jax.ShapeDtypeStruct((N, n_out), jnp.float32),
        grid=grid,
        in_specs=[
            pl.BlockSpec((Ho1 * Wo1, NB, KH * KW * Cin), lambda b: (0, b, 0)),
            full(w1_k.shape), full(b1_k.shape),
            full(w2_k.shape), full(b2_k.shape),
            full(wd3.shape), full(bd_k.shape),
            full(wf_k.shape), full(bf_k.shape),
        ],
        out_specs=pl.BlockSpec((NB, n_out), lambda b: (b, 0)),
        compiler_params=pltpu.CompilerParams(
            dimension_semantics=("parallel",),   # shard batch blocks over TCs
            # Raise the scoped-VMEM default only when the batch block needs it;
            # stay <= 48 MiB so v7x's 64 MiB physical VMEM is never exceeded.
            vmem_limit_bytes=None if NB <= 16 else 48 * 1024 * 1024),
    )(x1col, w1_k, b1_k, w2_k, b2_k, wd3, bd_k, wf_k, bf_k)

    return out_pad[:, :nb_classes]


# ---------------------------------------------------------------------------
# Pure-JAX reference (PyTorch NCHW semantics) for a correctness check
# ---------------------------------------------------------------------------
def net_correct_ref(x_nchw, params):
    w1, b1, w2, b2, wd, bd, wf, bf = params
    hp = lax.Precision.HIGHEST
    dn = ('NCHW', 'OIHW', 'NCHW')
    y = lax.conv_general_dilated(x_nchw, w1, (1, 1), 'VALID',
                                 dimension_numbers=dn, precision=hp)
    y = jnp.maximum(y + b1[None, :, None, None], 0.0)
    y = lax.conv_general_dilated(y, w2, (1, 1), 'VALID',
                                 dimension_numbers=dn, precision=hp)
    y = jnp.maximum(y + b2[None, :, None, None], 0.0)
    y = lax.reduce_window(y, -jnp.inf, lax.max,
                          (1, 1, 2, 2), (1, 1, 2, 2), 'VALID')
    y = y.reshape(y.shape[0], -1)                # CHW flatten, like torch .view
    y = jnp.dot(y, wd.T, precision=hp) + bd      # Linear(flat, 128)
    y = jnp.maximum(y, 0.0)                      # ReLU (Dropout = identity)
    return jnp.dot(y, wf.T, precision=hp) + bf   # Linear(128, 10)


def init_params(key, cin, h, w, kernel=4, nb_filters=32, hidden=128, nb_classes=10):
    """Deterministic PyTorch-layout parameter init (uniform +-1/sqrt(fan_in))."""
    ho2 = (h - kernel + 1) - kernel + 1
    wo2 = (w - kernel + 1) - kernel + 1
    flat = nb_filters * (ho2 // 2) * (wo2 // 2)

    def uni(k, shape, fan_in):
        bound = 1.0 / jnp.sqrt(jnp.float32(fan_in))
        return jax.random.uniform(k, shape, jnp.float32, -bound, bound)

    ks = jax.random.split(key, 8)
    w1 = uni(ks[0], (nb_filters, cin, kernel, kernel), cin * kernel * kernel)
    b1 = uni(ks[1], (nb_filters,), cin * kernel * kernel)
    w2 = uni(ks[2], (nb_filters, nb_filters, kernel, kernel),
             nb_filters * kernel * kernel)
    b2 = uni(ks[3], (nb_filters,), nb_filters * kernel * kernel)
    wd = uni(ks[4], (hidden, flat), flat)
    bd = uni(ks[5], (hidden,), flat)
    wf = uni(ks[6], (nb_classes, hidden), hidden)
    bf = uni(ks[7], (nb_classes,), hidden)
    return (w1, b1, w2, b2, wd, bd, wf, bf)


if __name__ == "__main__":
    # Small MNIST-like shapes: batch=2, 1 input channel, 16x16 spatial.
    N, CIN, H, W = 2, 1, 16, 16
    key = jax.random.PRNGKey(0)
    kx, kp = jax.random.split(key)
    x = jax.random.normal(kx, (N, CIN, H, W), jnp.float32)     # NCHW like PyTorch
    params = init_params(kp, CIN, H, W)

    out = jax.block_until_ready(net_correct_pallas(x, params))
    ref = jax.block_until_ready(net_correct_ref(x, params))

    assert out.shape == (N, 10), out.shape
    assert jnp.allclose(out, ref, atol=2e-3, rtol=2e-3), (
        f"max abs diff {jnp.max(jnp.abs(out - ref))}")
    print("KERNEL_OK")
</pallas_src>

<mosaic_0001>
module attributes {stable_mosaic.version = 11 : i64} {
  func.func @net_correct_kernel(%arg0: i32, %arg1: memref<169x2x16xf32, #tpu.memory_space<vmem>>, %arg2: memref<16x32xf32, #tpu.memory_space<vmem>>, %arg3: memref<1x32xf32, #tpu.memory_space<vmem>>, %arg4: memref<512x32xbf16, #tpu.memory_space<vmem>>, %arg5: memref<1x32xf32, #tpu.memory_space<vmem>>, %arg6: memref<25x32x128xf32, #tpu.memory_space<vmem>>, %arg7: memref<1x128xf32, #tpu.memory_space<vmem>>, %arg8: memref<128x128xf32, #tpu.memory_space<vmem>>, %arg9: memref<1x128xf32, #tpu.memory_space<vmem>>, %arg10: memref<2x128xf32, #tpu.memory_space<vmem>>) attributes {dimension_semantics = [#tpu.dimension_semantics<parallel>], iteration_bounds = array<i64: 1>, scalar_prefetch = 0 : i64, scratch_operands = 0 : i64, tpu.core_type = #tpu.core_type<tc>, window_params = [{transform_indices = @transform_0, window_bounds = array<i64: 169, 2, 16>}, {pipeline_mode = #tpu.pipeline_mode<synchronous>, transform_indices = @transform_1, window_bounds = array<i64: 16, 32>}, {pipeline_mode = #tpu.pipeline_mode<synchronous>, transform_indices = @transform_2, window_bounds = array<i64: 1, 32>}, {pipeline_mode = #tpu.pipeline_mode<synchronous>, transform_indices = @transform_3, window_bounds = array<i64: 512, 32>}, {pipeline_mode = #tpu.pipeline_mode<synchronous>, transform_indices = @transform_4, window_bounds = array<i64: 1, 32>}, {pipeline_mode = #tpu.pipeline_mode<synchronous>, transform_indices = @transform_5, window_bounds = array<i64: 25, 32, 128>}, {pipeline_mode = #tpu.pipeline_mode<synchronous>, transform_indices = @transform_6, window_bounds = array<i64: 1, 128>}, {pipeline_mode = #tpu.pipeline_mode<synchronous>, transform_indices = @transform_7, window_bounds = array<i64: 128, 128>}, {pipeline_mode = #tpu.pipeline_mode<synchronous>, transform_indices = @transform_8, window_bounds = array<i64: 1, 128>}, {transform_indices = @transform_9, window_bounds = array<i64: 2, 128>}]} {
    %c0 = arith.constant 0 : index
    %c0_0 = arith.constant 0 : index
    %c0_1 = arith.constant 0 : index
    %0 = vector.load %arg1[%c0, %c0_0, %c0_1] : memref<169x2x16xf32, #tpu.memory_space<vmem>>, vector<169x2x16xf32>
    %1 = vector.shape_cast %0 : vector<169x2x16xf32> to vector<338x16xf32>
    %c0_2 = arith.constant 0 : index
    %c0_3 = arith.constant 0 : index
    %2 = vector.load %arg2[%c0_2, %c0_3] : memref<16x32xf32, #tpu.memory_space<vmem>>, vector<16x32xf32>
    %cst = arith.constant dense<0.000000e+00> : vector<338x32xf32>
    %3 = tpu.matmul %1, %2, %cst {dimension_numbers = #tpu.dot_dimension_numbers<[1], [0], [0], [1], [0, 0, 1, 1], [], []>} : vector<338x16xf32>, vector<16x32xf32>, vector<338x32xf32> -> vector<338x32xf32>
    %c0_4 = arith.constant 0 : index
    %c0_5 = arith.constant 0 : index
    %4 = vector.load %arg3[%c0_4, %c0_5] : memref<1x32xf32, #tpu.memory_space<vmem>>, vector<1x32xf32>
    %5 = vector.broadcast %4 : vector<1x32xf32> to vector<338x32xf32>
    %6 = arith.addf %3, %5 : vector<338x32xf32>
    %cst_6 = arith.constant 0.000000e+00 : f32
    %7 = vector.broadcast %cst_6 : f32 to vector<338x32xf32>
    %8 = arith.maximumf %6, %7 : vector<338x32xf32>
    %9 = arith.truncf %8 : vector<338x32xf32> to vector<338x32xbf16>
    %10 = vector.shape_cast %9 : vector<338x32xbf16> to vector<13x13x2x32xbf16>
    %11 = vector.extract_strided_slice %10 {offsets = [0, 0, 0, 0], sizes = [10, 10, 2, 32], strides = [1, 1, 1, 1]} : vector<13x13x2x32xbf16> to vector<10x10x2x32xbf16>
    %12 = vector.extract_strided_slice %10 {offsets = [0, 1, 0, 0], sizes = [10, 10, 2, 32], strides = [1, 1, 1, 1]} : vector<13x13x2x32xbf16> to vector<10x10x2x32xbf16>
    %13 = vector.extract_strided_slice %10 {offsets = [0, 2, 0, 0], sizes = [10, 10, 2, 32], strides = [1, 1, 1, 1]} : vector<13x13x2x32xbf16> to vector<10x10x2x32xbf16>
    %14 = vector.extract_strided_slice %10 {offsets = [0, 3, 0, 0], sizes = [10, 10, 2, 32], strides = [1, 1, 1, 1]} : vector<13x13x2x32xbf16> to vector<10x10x2x32xbf16>
    %15 = vector.extract_strided_slice %10 {offsets = [1, 0, 0, 0], sizes = [10, 10, 2, 32], strides = [1, 1, 1, 1]} : vector<13x13x2x32xbf16> to vector<10x10x2x32xbf16>
    %16 = vector.extract_strided_slice %10 {offsets = [1, 1, 0, 0], sizes = [10, 10, 2, 32], strides = [1, 1, 1, 1]} : vector<13x13x2x32xbf16> to vector<10x10x2x32xbf16>
    %17 = vector.extract_strided_slice %10 {offsets = [1, 2, 0, 0], sizes = [10, 10, 2, 32], strides = [1, 1, 1, 1]} : vector<13x13x2x32xbf16> to vector<10x10x2x32xbf16>
    %18 = vector.extract_strided_slice %10 {offsets = [1, 3, 0, 0], sizes = [10, 10, 2, 32], strides = [1, 1, 1, 1]} : vector<13x13x2x32xbf16> to vector<10x10x2x32xbf16>
    %19 = vector.extract_strided_slice %10 {offsets = [2, 0, 0, 0], sizes = [10, 10, 2, 32], strides = [1, 1, 1, 1]} : vector<13x13x2x32xbf16> to vector<10x10x2x32xbf16>
    %20 = vector.extract_strided_slice %10 {offsets = [2, 1, 0, 0], sizes = [10, 10, 2, 32], strides = [1, 1, 1, 1]} : vector<13x13x2x32xbf16> to vector<10x10x2x32xbf16>
    %21 = vector.extract_strided_slice %10 {offsets = [2, 2, 0, 0], sizes = [10, 10, 2, 32], strides = [1, 1, 1, 1]} : vector<13x13x2x32xbf16> to vector<10x10x2x32xbf16>
    %22 = vector.extract_strided_slice %10 {offsets = [2, 3, 0, 0], sizes = [10, 10, 2, 32], strides = [1, 1, 1, 1]} : vector<13x13x2x32xbf16> to vector<10x10x2x32xbf16>
    %23 = vector.extract_strided_slice %10 {offsets = [3, 0, 0, 0], sizes = [10, 10, 2, 32], strides = [1, 1, 1, 1]} : vector<13x13x2x32xbf16> to vector<10x10x2x32xbf16>
    %24 = vector.extract_strided_slice %10 {offsets = [3, 1, 0, 0], sizes = [10, 10, 2, 32], strides = [1, 1, 1, 1]} : vector<13x13x2x32xbf16> to vector<10x10x2x32xbf16>
    %25 = vector.extract_strided_slice %10 {offsets = [3, 2, 0, 0], sizes = [10, 10, 2, 32], strides = [1, 1, 1, 1]} : vector<13x13x2x32xbf16> to vector<10x10x2x32xbf16>
    %26 = vector.extract_strided_slice %10 {offsets = [3, 3, 0, 0], sizes = [10, 10, 2, 32], strides = [1, 1, 1, 1]} : vector<13x13x2x32xbf16> to vector<10x10x2x32xbf16>
    %27 = tpu.concatenate %11, %12, %13, %14, %15, %16, %17, %18, %19, %20, %21, %22, %23, %24, %25, %26 in 3 : vector<10x10x2x32xbf16>, vector<10x10x2x32xbf16>, vector<10x10x2x32xbf16>, vector<10x10x2x32xbf16>, vector<10x10x2x32xbf16>, vector<10x10x2x32xbf16>, vector<10x10x2x32xbf16>, vector<10x10x2x32xbf16>, vector<10x10x2x32xbf16>, vector<10x10x2x32xbf16>, vector<10x10x2x32xbf16>, vector<10x10x2x32xbf16>, vector<10x10x2x32xbf16>, vector<10x10x2x32xbf16>, vector<10x10x2x32xbf16>, vector<10x10x2x32xbf16> -> vector<10x10x2x512xbf16>
    %28 = vector.shape_cast %27 : vector<10x10x2x512xbf16> to vector<200x512xbf16>
    %c0_7 = arith.constant 0 : index
    %c0_8 = arith.constant 0 : index
    %29 = vector.load %arg4[%c0_7, %c0_8] : memref<512x32xbf16, #tpu.memory_space<vmem>>, vector<512x32xbf16>
    %cst_9 = arith.constant dense<0.000000e+00> : vector<200x32xf32>
    %30 = tpu.matmul %28, %29, %cst_9 {dimension_numbers = #tpu.dot_dimension_numbers<[1], [0], [0], [1], [0, 0, 1, 1], [], []>} : vector<200x512xbf16>, vector<512x32xbf16>, vector<200x32xf32> -> vector<200x32xf32>
    %c0_10 = arith.constant 0 : index
    %c0_11 = arith.constant 0 : index
    %31 = vector.load %arg5[%c0_10, %c0_11] : memref<1x32xf32, #tpu.memory_space<vmem>>, vector<1x32xf32>
    %32 = vector.broadcast %31 : vector<1x32xf32> to vector<200x32xf32>
    %33 = arith.addf %30, %32 : vector<200x32xf32>
    %cst_12 = arith.constant 0.000000e+00 : f32
    %34 = vector.broadcast %cst_12 : f32 to vector<200x32xf32>
    %35 = arith.maximumf %33, %34 : vector<200x32xf32>
    %36 = vector.shape_cast %35 : vector<200x32xf32> to vector<10x10x2x32xf32>
    %37 = vector.shape_cast %36 : vector<10x10x2x32xf32> to vector<10x5x2x2x32xf32>
    %38 = vector.extract_strided_slice %37 {offsets = [0, 0, 0, 0, 0], sizes = [10, 5, 1, 2, 32], strides = [1, 1, 1, 1, 1]} : vector<10x5x2x2x32xf32> to vector<10x5x1x2x32xf32>
    %39 = vector.shape_cast %38 : vector<10x5x1x2x32xf32> to vector<10x5x2x32xf32>
    %40 = vector.extract_strided_slice %37 {offsets = [0, 0, 1, 0, 0], sizes = [10, 5, 1, 2, 32], strides = [1, 1, 1, 1, 1]} : vector<10x5x2x2x32xf32> to vector<10x5x1x2x32xf32>
    %41 = vector.shape_cast %40 : vector<10x5x1x2x32xf32> to vector<10x5x2x32xf32>
    %42 = arith.maximumf %39, %41 : vector<10x5x2x32xf32>
    %43 = vector.shape_cast %42 : vector<10x5x2x32xf32> to vector<5x2x5x2x32xf32>
    %44 = vector.extract_strided_slice %43 {offsets = [0, 0, 0, 0, 0], sizes = [5, 1, 5, 2, 32], strides = [1, 1, 1, 1, 1]} : vector<5x2x5x2x32xf32> to vector<5x1x5x2x32xf32>
    %45 = vector.shape_cast %44 : vector<5x1x5x2x32xf32> to vector<5x5x2x32xf32>
    %46 = vector.extract_strided_slice %43 {offsets = [0, 1, 0, 0, 0], sizes = [5, 1, 5, 2, 32], strides = [1, 1, 1, 1, 1]} : vector<5x2x5x2x32xf32> to vector<5x1x5x2x32xf32>
    %47 = vector.shape_cast %46 : vector<5x1x5x2x32xf32> to vector<5x5x2x32xf32>
    %48 = arith.maximumf %45, %47 : vector<5x5x2x32xf32>
    %49 = vector.shape_cast %48 : vector<5x5x2x32xf32> to vector<25x2x32xf32>
    %c0_13 = arith.constant 0 : index
    %c0_14 = arith.constant 0 : index
    %c0_15 = arith.constant 0 : index
    %50 = vector.load %arg6[%c0_13, %c0_14, %c0_15] : memref<25x32x128xf32, #tpu.memory_space<vmem>>, vector<25x32x128xf32>
    "tpu.trace_start"() <{level = 10 : i32, message = "pnc,pcd->pnd"}> : () -> ()
    %cst_16 = arith.constant dense<0.000000e+00> : vector<25x2x128xf32>
    %51 = tpu.matmul %49, %50, %cst_16 {dimension_numbers = #tpu.dot_dimension_numbers<[2], [1], [1], [2], [0, 0, 0, 1, 1, 2], [0], [0]>} : vector<25x2x32xf32>, vector<25x32x128xf32>, vector<25x2x128xf32> -> vector<25x2x128xf32>
    "tpu.trace_stop"() : () -> ()
    %cst_17 = arith.constant dense<0.000000e+00> : vector<2x128xf32>
    %52 = vector.multi_reduction <add>, %51, %cst_17 [0] : vector<25x2x128xf32> to vector<2x128xf32>
    %c0_18 = arith.constant 0 : index
    %c0_19 = arith.constant 0 : index
    %53 = vector.load %arg7[%c0_18, %c0_19] : memref<1x128xf32, #tpu.memory_space<vmem>>, vector<1x128xf32>
    %54 = vector.broadcast %53 : vector<1x128xf32> to vector<2x128xf32>
    %55 = arith.addf %52, %54 : vector<2x128xf32>
    %cst_20 = arith.constant 0.000000e+00 : f32
    %56 = vector.broadcast %cst_20 : f32 to vector<2x128xf32>
    %57 = arith.maximumf %55, %56 : vector<2x128xf32>
    %c0_21 = arith.constant 0 : index
    %c0_22 = arith.constant 0 : index
    %58 = vector.load %arg8[%c0_21, %c0_22] : memref<128x128xf32, #tpu.memory_space<vmem>>, vector<128x128xf32>
    %cst_23 = arith.constant dense<0.000000e+00> : vector<2x128xf32>
    %59 = tpu.matmul %57, %58, %cst_23 {dimension_numbers = #tpu.dot_dimension_numbers<[1], [0], [0], [1], [0, 0, 1, 1], [], []>} : vector<2x128xf32>, vector<128x128xf32>, vector<2x128xf32> -> vector<2x128xf32>
    %c0_24 = arith.constant 0 : index
    %c0_25 = arith.constant 0 : index
    %60 = vector.load %arg9[%c0_24, %c0_25] : memref<1x128xf32, #tpu.memory_space<vmem>>, vector<1x128xf32>
    %61 = vector.broadcast %60 : vector<1x128xf32> to vector<2x128xf32>
    %62 = arith.addf %59, %61 : vector<2x128xf32>
    %c0_26 = arith.constant 0 : index
    %c0_27 = arith.constant 0 : index
    %63 = vector.load %arg10[%c0_26, %c0_27] : memref<2x128xf32, #tpu.memory_space<vmem>>, vector<2x128xf32>
    tpu.vector_store %arg10[%c0_26, %c0_27], %62 {strides = array<i32>} : memref<2x128xf32, #tpu.memory_space<vmem>>, vector<2x128xf32>,
    return
  }
  func.func @transform_0(%arg0: i32) -> (i32, i32, i32) {
    %c0_i32 = arith.constant 0 : i32
    %c0_i32_0 = arith.constant 0 : i32
    %c0_i32_1 = arith.constant 0 : i32
    return %c0_i32, %arg0, %c0_i32_0 : i32, i32, i32
  }
  func.func @transform_1(%arg0: i32) -> (i32, i32) {
    %c0_i32 = arith.constant 0 : i32
    %c0_i32_0 = arith.constant 0 : i32
    %c0_i32_1 = arith.constant 0 : i32
    return %c0_i32, %c0_i32_0 : i32, i32
  }
  func.func @transform_2(%arg0: i32) -> (i32, i32) {
    %c0_i32 = arith.constant 0 : i32
    %c0_i32_0 = arith.constant 0 : i32
    %c0_i32_1 = arith.constant 0 : i32
    return %c0_i32, %c0_i32_0 : i32, i32
  }
  func.func @transform_3(%arg0: i32) -> (i32, i32) {
    %c0_i32 = arith.constant 0 : i32
    %c0_i32_0 = arith.constant 0 : i32
    %c0_i32_1 = arith.constant 0 : i32
    return %c0_i32, %c0_i32_0 : i32, i32
  }
  func.func @transform_4(%arg0: i32) -> (i32, i32) {
    %c0_i32 = arith.constant 0 : i32
    %c0_i32_0 = arith.constant 0 : i32
    %c0_i32_1 = arith.constant 0 : i32
    return %c0_i32, %c0_i32_0 : i32, i32
  }
  func.func @transform_5(%arg0: i32) -> (i32, i32, i32) {
    %c0_i32 = arith.constant 0 : i32
    %c0_i32_0 = arith.constant 0 : i32
    %c0_i32_1 = arith.constant 0 : i32
    %c0_i32_2 = arith.constant 0 : i32
    return %c0_i32, %c0_i32_0, %c0_i32_1 : i32, i32, i32
  }
  func.func @transform_6(%arg0: i32) -> (i32, i32) {
    %c0_i32 = arith.constant 0 : i32
    %c0_i32_0 = arith.constant 0 : i32
    %c0_i32_1 = arith.constant 0 : i32
    return %c0_i32, %c0_i32_0 : i32, i32
  }
  func.func @transform_7(%arg0: i32) -> (i32, i32) {
    %c0_i32 = arith.constant 0 : i32
    %c0_i32_0 = arith.constant 0 : i32
    %c0_i32_1 = arith.constant 0 : i32
    return %c0_i32, %c0_i32_0 : i32, i32
  }
  func.func @transform_8(%arg0: i32) -> (i32, i32) {
    %c0_i32 = arith.constant 0 : i32
    %c0_i32_0 = arith.constant 0 : i32
    %c0_i32_1 = arith.constant 0 : i32
    return %c0_i32, %c0_i32_0 : i32, i32
  }
  func.func @transform_9(%arg0: i32) -> (i32, i32) {
    %c0_i32 = arith.constant 0 : i32
    %c0_i32_0 = arith.constant 0 : i32
    return %arg0, %c0_i32 : i32, i32
  }
}

</mosaic_0001>

<bundles_post_ra>
// kernel: tpu_custom_call.1
= control target key start
LH: loop header
LB: loop body
LE: loop exit
PB: predicated region body
PF: predicated region fallthrough
CT: control target
= control target key end

     0   :  { %14 = vsyncpa [#allocation3], 0  ;;  %s19775_s0 = inlined_call_operand.vmem [shape: f32[169,2,16], index: 0, kind: input, shape index: {}]   ;;  %s19776_s1 = inlined_call_operand.vmem [shape: f32[16,32], index: 1, kind: input, shape index: {}]   ;;  %s19777_s2 = inlined_call_operand.vmem [shape: f32[1,32], index: 2, kind: input, shape index: {}]   ;;  %s19778_s3 = inlined_call_operand.vmem [shape: bf16[512,32], index: 3, kind: input, shape index: {}]   ;;  %s19779_s4 = inlined_call_operand.vmem [shape: f32[1,32], index: 4, kind: input, shape index: {}]   ;;  %s19780_s5 = inlined_call_operand.hbm [shape: f32[25,32,128], index: 5, kind: input, shape index: {}]   ;;  %s19781_s6 = inlined_call_operand.vmem [shape: f32[1,128], index: 6, kind: input, shape index: {}]   ;;  %s19782_s7 = inlined_call_operand.vmem [shape: f32[128,128], index: 7, kind: input, shape index: {}]   ;;  %s19783_s8 = inlined_call_operand.vmem [shape: f32[1,128], index: 8, kind: input, shape index: {}]   ;;  %s19784_s9 = inlined_call_operand.hbm [shape: f32[2,128], index: 9, kind: output, shape index: {}]  }
   0x1   :  { %15 = vsyncpa [#allocation4], 0  ;;  %s13793_s30 = smov [#allocation2]   ;;  %s13745_s13 = scalar_lea.hbm %s19780_s5, 12800 }
   0x2   :  { %s31_s10 = sshll.u32 %s13793_s30, 4  ;;  %p13746_p0 = scmp.ne.s32.totalorder %s19780_s5, %s13745_s13  ;;  %s32_s10 = int_to_ptr.vmem [resolvable:$true] %s31_s10 }
   0x3   :  { %p13749_p1 = scmp.lt.u32.totalorder %s13745_s13, %s19780_s5 }
   0x5   :  { %p13751_p2 = pnand %p13749_p1, %p13746_p0 }
   0x7   :  { %13754 = shalt.err (!%p13751_p2)
}
   0x8   :  { %s13755_s18 = scalar_lea.vmem %s32_s10, 12800  ;;  %p13760_p4 = scmp.lt.s32.totalorder %s32_s10, %s32_s10 }
   0x9   :  { %p13756_p3 = scmp.ne.s32.totalorder %s32_s10, %s13755_s18  ;;  %p13761_p5 = scmp.lt.s32.totalorder %s13755_s18, %s13755_s18 }
   0xb   :  { %p13762_p6 = por %p13761_p5, %p13760_p4 }
   0xd   :  { %p13763_p7 = pnand %p13762_p6, %p13756_p3 }
   0xf   :  { %13766 = shalt.err (!%p13763_p7)
}
  0x10   :  { %s13794_s19 = smov 128   ;;  %s13795_s20 = smov 8  }
  0x11   :  { %37 = dma.hbm_to_vmem [thread:$0]  %s19780_s5, 12800, %s32_s10, [#allocation3], %s13794_s19, %s13794_s19, %s13795_s20  }
  0x12   :  { %13789 = dma.done.wait [#allocation3], 12800  }
  0x13   :  { %13790 = vsyncadd [#allocation3], 4294954496  ;;  %v400_v0 = vlaneseq  ;;  %v19785_v1 = vmov 0.0|0.0   ;;  %vm13797_vm0 = vmmov 0   ;;  %v19787_v2 = vmov 0.0   ;;  %v217_v7 = vld [vmem:[%s19776_s1] sm:$0xff] }
  0x14   :  { %13504 = vmatprep.subr.bf16.mxu0 %v19785_v1  ;;  %13065 = vmatprep.mubr.msk.f32.mxu0 %vm13797_vm0, %v19787_v2  ;;  %v13799_v3 = vmov 1983009808   ;;  %v218_v8 = vld [vmem:[%s19776_s1 + $0x8] sm:$0xff]  ;;  %v48_v9 = vld [vmem:[%s19775_s0] sm:$0x3]  ;;  %vm1116_vm1 = vcmask 130048  }
  0x15   :  { %v398_v4 = vunpack.c.l.s4 %v13799_v3  ;;  %v13870_v5 = vshrl.u32 %v400_v0, 7  ;;  %v13505_v11 = vpack.c.bf16 %v218_v8, %v217_v7  ;;  %v49_v12 = vld [vmem:[%s19775_s0 + $0x2] sm:$0x3]  ;;  %v50_v13 = vld [vmem:[%s19775_s0 + $0x4] sm:$0x3]  ;;  %s13801_s14 = smov 96  }
  0x16   :  { %v51_v14 = vld [vmem:[%s19775_s0 + $0x6] sm:$0x3]  ;;  %v395_v15 = vcombine.low %v48_v9, %v49_v12  ;;  %v52_v17 = vld [vmem:[%s19775_s0 + $0x8] sm:$0x3]  ;;  %v53_v18 = vld [vmem:[%s19775_s0 + $0xa] sm:$0x3] }
  0x17   :  { %v399_v6 = vunpack.c.0.s8 %v398_v4  ;;  %v396_v16 = vcombine.low %v50_v13, %v51_v14  ;;  %v54_v19 = vld [vmem:[%s19775_s0 + $0xc] sm:$0x3]  ;;  %13506 = vmatpush3.bf16.msra.mxu0 %v13505_v11  ;;  %v55_v20 = vld [vmem:[%s19775_s0 + $0xe] sm:$0x3]  ;;  %v412_v21 = vcombine.low %v52_v17, %v53_v18  ;;  %v56_v22 = vld [vmem:[%s19775_s0 + $0x10] sm:$0x3] }
  0x18   :  { %v57_v23 = vld [vmem:[%s19775_s0 + $0x12] sm:$0x3]  ;;  %v413_v26 = vcombine.low %v54_v19, %v55_v20  ;;  %v58_v27 = vld [vmem:[%s19775_s0 + $0x14] sm:$0x3]  ;;  %v59_v28 = vld [vmem:[%s19775_s0 + $0x16] sm:$0x3] }
  0x19   :  { %v13882_v10 = vsub.s32 %v399_v6, %v13870_v5  ;;  %v429_v29 = vcombine.low %v56_v22, %v57_v23  ;;  %v60_v30 = vld [vmem:[%s19775_s0 + $0x18] sm:$0x3]  ;;  %v430_v32 = vcombine.low %v58_v27, %v59_v28  ;;  %v61_v33 = vld [vmem:[%s19775_s0 + $0x1a] sm:$0x3]  ;;  %v62_v34 = vld [vmem:[%s19775_s0 + $0x1c] sm:$0x3] }
  0x1a   :  { %v63_v35 = vld [vmem:[%s19775_s0 + $0x1e] sm:$0x3]  ;;  %v446_v41 = vcombine.low %v60_v30, %v61_v33  ;;  %v64_v43 = vld [vmem:[%s19775_s0 + $0x20] sm:$0x3]  ;;  %v65_v44 = vld [vmem:[%s19775_s0 + $0x22] sm:$0x3] }
  0x1b   :  { %20000 = vst [vmem:[#allocation8_spill] sm:$0xff] %v13882_v10  ;;  %v403_v24 = vrot.slane %v395_v15, %v13882_v10  ;;  %v410_v25 = vrot.slane %v396_v16, %v13882_v10  ;;  %v420_v31 = vrot.slane %v412_v21, %v13882_v10  ;;  %v427_v37 = vrot.slane %v413_v26, %v13882_v10  ;;  %v66_v45 = vld [vmem:[%s19775_s0 + $0x24] sm:$0x3]  ;;  %v67_v46 = vld [vmem:[%s19775_s0 + $0x26] sm:$0x3]  ;;  %s13802_s15 = smov 32  }
  0x1c   :  { %v437_v38 = vrot.slane %v429_v29, %v13882_v10  ;;  %v444_v40 = vrot.slane %v430_v32, %v13882_v10  ;;  %v447_v42 = vcombine.low %v62_v34, %v63_v35  ;;  %v463_v47 = vcombine.low %v64_v43, %v65_v44  ;;  %v68_v52 = vld [vmem:[%s19775_s0 + $0x28] sm:$0x3]  ;;  %v69_v53 = vld [vmem:[%s19775_s0 + $0x2a] sm:$0x3]  ;;  %v70_v54 = vld [vmem:[%s19775_s0 + $0x2c] sm:$0x3] }
  0x1d   :  { %v411_v36 = vcombine.low %v403_v24, %v410_v25  ;;  %v428_v39 = vcombine.low %v420_v31, %v427_v37  ;;  %v454_v49 = vrot.slane %v446_v41, %v13882_v10  ;;  %v464_v51 = vcombine.low %v66_v45, %v67_v46  ;;  %v71_v55 = vld [vmem:[%s19775_s0 + $0x2e] sm:$0x3]  ;;  %v72_v61 = vld [vmem:[%s19775_s0 + $0x30] sm:$0x3]  ;;  %v73_v62 = vld [vmem:[%s19775_s0 + $0x32] sm:$0x3] }
  0x1e   :  { %v445_v48 = vcombine.low %v437_v38, %v444_v40  ;;  %v461_v50 = vrot.slane %v447_v42, %v13882_v10  ;;  %v480_v56 = vcombine.low %v68_v52, %v69_v53  ;;  %v471_v58 = vrot.slane %v463_v47, %v13882_v10  ;;  %v74_v63 = vld [vmem:[%s19775_s0 + $0x34] sm:$0x3]  ;;  %v75_v0 = vld [vmem:[%s19775_s0 + $0x36] sm:$0x3]  ;;  %v76_v9 = vld [vmem:[%s19775_s0 + $0x38] sm:$0x3] }
  0x1f   :  { %13066 = vmatmul.mubr.msk.f32.vlgmr.msra.gmra.mrb[0].mxu0 %vm1116_vm1, %v411_v36  ;;  %v478_v59 = vrot.slane %v464_v51, %v13882_v10  ;;  %v481_v60 = vcombine.low %v70_v54, %v71_v55  ;;  %v497_v7 = vcombine.low %v72_v61, %v73_v62  ;;  %v498_v8 = vcombine.low %v74_v63, %v75_v0  ;;  %v77_v11 = vld [vmem:[%s19775_s0 + $0x3a] sm:$0x3]  ;;  %v78_v12 = vld [vmem:[%s19775_s0 + $0x3c] sm:$0x3]  ;;  %v79_v13 = vld [vmem:[%s19775_s0 + $0x3e] sm:$0x3] }
  0x20   :  { %13068 = vmatprep.mubr.msk.f32.mxu0 %vm13797_vm0, %v19787_v2  ;;  %v462_v57 = vcombine.low %v454_v49, %v461_v50  ;;  %v488_v3 = vrot.slane %v480_v56, %v13882_v10  ;;  %v514_v14 = vcombine.low %v76_v9, %v77_v11  ;;  %v80_v15 = vld [vmem:[%s19775_s0 + $0x40] sm:$0x3]  ;;  %v81_v16 = vld [vmem:[%s19775_s0 + $0x42] sm:$0x3]  ;;  %v82_v17 = vld [vmem:[%s19775_s0 + $0x44] sm:$0x3]  ;;  %v515_v22 = vcombine.low %v78_v12, %v79_v13 }
  0x21   :  { %v479_v4 = vcombine.low %v471_v58, %v478_v59  ;;  %v495_v6 = vrot.slane %v481_v60, %v13882_v10  ;;  %v83_v18 = vld [vmem:[%s19775_s0 + $0x46] sm:$0x3]  ;;  %v505_v20 = vrot.slane %v497_v7, %v13882_v10  ;;  %v512_v21 = vrot.slane %v498_v8, %v13882_v10  ;;  %v84_v23 = vld [vmem:[%s19775_s0 + $0x48] sm:$0x3]  ;;  %v85_v24 = vld [vmem:[%s19775_s0 + $0x4a] sm:$0x3] }
  0x22   :  { %v522_v25 = vrot.slane %v514_v14, %v13882_v10  ;;  %v86_v26 = vld [vmem:[%s19775_s0 + $0x4c] sm:$0x3]  ;;  %v87_v27 = vld [vmem:[%s19775_s0 + $0x4e] sm:$0x3]  ;;  %v529_v29 = vrot.slane %v515_v22, %v13882_v10  ;;  %v531_v30 = vcombine.low %v80_v15, %v81_v16  ;;  %v532_v31 = vcombine.low %v82_v17, %v83_v18  ;;  %v88_v32 = vld [vmem:[%s19775_s0 + $0x50] sm:$0x3] }
  0x23   :  { %13069 = vmatmul.mubr.msk.f32.gmra.mrb[2].mxu0 %vm1116_vm1, %v428_v39  ;;  %v496_v19 = vcombine.low %v488_v3, %v495_v6  ;;  %v513_v28 = vcombine.low %v505_v20, %v512_v21  ;;  %v89_v33 = vld [vmem:[%s19775_s0 + $0x52] sm:$0x3]  ;;  %v548_v34 = vcombine.low %v84_v23, %v85_v24  ;;  %v90_v35 = vld [vmem:[%s19775_s0 + $0x54] sm:$0x3]  ;;  %v91_v36 = vld [vmem:[%s19775_s0 + $0x56] sm:$0x3]  ;;  %v549_v40 = vcombine.low %v86_v26, %v87_v27 }
  0x24   :  { %13071 = vmatprep.mubr.msk.f32.mxu0 %vm13797_vm0, %v19787_v2  ;;  %v530_v37 = vcombine.low %v522_v25, %v529_v29  ;;  %v539_v38 = vrot.slane %v531_v30, %v13882_v10  ;;  %v546_v39 = vrot.slane %v532_v31, %v13882_v10  ;;  %v565_v41 = vcombine.low %v88_v32, %v89_v33  ;;  %v92_v42 = vld [vmem:[%s19775_s0 + $0x58] sm:$0x3]  ;;  %v93_v43 = vld [vmem:[%s19775_s0 + $0x5a] sm:$0x3]  ;;  %v94_v44 = vld [vmem:[%s19775_s0 + $0x5c] sm:$0x3] }
  0x25   :  { %v95_v45 = vld [vmem:[%s19775_s0 + $0x5e] sm:$0x3]  ;;  %v556_v47 = vrot.slane %v548_v34, %v13882_v10  ;;  %v566_v49 = vcombine.low %v90_v35, %v91_v36  ;;  %v96_v50 = vld [vmem:[%s19775_s0 + $0x60] sm:$0x3]  ;;  %v97_v51 = vld [vmem:[%s19775_s0 + $0x62] sm:$0x3] }
  0x26   :  { %v547_v46 = vcombine.low %v539_v38, %v546_v39  ;;  %v573_v52 = vrot.slane %v565_v41, %v13882_v10  ;;  %v98_v53 = vld [vmem:[%s19775_s0 + $0x64] sm:$0x3]  ;;  %v99_v54 = vld [vmem:[%s19775_s0 + $0x66] sm:$0x3]  ;;  %v583_v58 = vcombine.low %v94_v44, %v95_v45  ;;  %v599_v59 = vcombine.low %v96_v50, %v97_v51  ;;  %v100_v0 = vld [vmem:[%s19775_s0 + $0x68] sm:$0x3] }
  0x27   :  { %13072 = vmatmul.mubr.msk.f32.gmra.mrb[4].mxu0 %vm1116_vm1, %v445_v48  ;;  %v563_v48 = vrot.slane %v549_v40, %v13882_v10  ;;  %v580_v56 = vrot.slane %v566_v49, %v13882_v10  ;;  %v600_v63 = vcombine.low %v98_v53, %v99_v54  ;;  %v101_v3 = vld [vmem:[%s19775_s0 + $0x6a] sm:$0x3]  ;;  %v103_v6 = vld [vmem:[%s19775_s0 + $0x6e] sm:$0x3]  ;;  %v104_v13 = vld [vmem:[%s19775_s0 + $0x70] sm:$0x3] }
  0x28   :  { %13074 = vmatprep.mubr.msk.f32.mxu0 %vm13797_vm0, %v19787_v2  ;;  %v597_v62 = vrot.slane %v583_v58, %v13882_v10  ;;  %v616_v7 = vcombine.low %v100_v0, %v101_v3  ;;  %v607_v9 = vrot.slane %v599_v59, %v13882_v10  ;;  %v105_v14 = vld [vmem:[%s19775_s0 + $0x72] sm:$0x3]  ;;  %v106_v15 = vld [vmem:[%s19775_s0 + $0x74] sm:$0x3]  ;;  %v107_v16 = vld [vmem:[%s19775_s0 + $0x76] sm:$0x3] }
  0x29   :  { %v564_v55 = vcombine.low %v556_v47, %v563_v48  ;;  %v581_v60 = vcombine.low %v573_v52, %v580_v56  ;;  %v614_v11 = vrot.slane %v600_v63, %v13882_v10  ;;  %v633_v20 = vcombine.low %v104_v13, %v105_v14  ;;  %v108_v22 = vld [vmem:[%s19775_s0 + $0x78] sm:$0x3]  ;;  %v109_v23 = vld [vmem:[%s19775_s0 + $0x7a] sm:$0x3]  ;;  %v110_v24 = vld [vmem:[%s19775_s0 + $0x7c] sm:$0x3] }
  0x2a   :  { %v624_v17 = vrot.slane %v616_v7, %v13882_v10  ;;  %v634_v21 = vcombine.low %v106_v15, %v107_v16  ;;  %v111_v25 = vld [vmem:[%s19775_s0 + $0x7e] sm:$0x3]  ;;  %v650_v26 = vcombine.low %v108_v22, %v109_v23  ;;  %v112_v35 = vld [vmem:[%s19775_s0 + $0x80] sm:$0x3]  ;;  %v113_v36 = vld [vmem:[%s19775_s0 + $0x82] sm:$0x3] }
  0x2b   :  { %13075 = vmatmul.mubr.msk.f32.gmra.mrb[6].mxu0 %vm1116_vm1, %v462_v57  ;;  %v582_v57 = vcombine.low %v92_v42, %v93_v43  ;;  %v615_v18 = vcombine.low %v607_v9, %v614_v11  ;;  %v651_v30 = vcombine.low %v110_v24, %v111_v25  ;;  %v115_v38 = vld [vmem:[%s19775_s0 + $0x86] sm:$0x3]  ;;  %v667_v39 = vcombine.low %v112_v35, %v113_v36  ;;  %v116_v43 = vld [vmem:[%s19775_s0 + $0x88] sm:$0x3]  ;;  %v117_v44 = vld [vmem:[%s19775_s0 + $0x8a] sm:$0x3] }
  0x2c   :  { %13077 = vmatprep.mubr.msk.f32.mxu0 %vm13797_vm0, %v19787_v2  ;;  %v648_v29 = vrot.slane %v634_v21, %v13882_v10  ;;  %v658_v32 = vrot.slane %v650_v26, %v13882_v10  ;;  %v118_v45 = vld [vmem:[%s19775_s0 + $0x8c] sm:$0x3]  ;;  %v684_v47 = vcombine.low %v116_v43, %v117_v44  ;;  %v120_v53 = vld [vmem:[%s19775_s0 + $0x90] sm:$0x3]  ;;  %v121_v54 = vld [vmem:[%s19775_s0 + $0x92] sm:$0x3] }
  0x2d   :  { %v590_v61 = vrot.slane %v582_v57, %v13882_v10  ;;  %v665_v33 = vrot.slane %v651_v30, %v13882_v10  ;;  %v675_v41 = vrot.slane %v667_v39, %v13882_v10  ;;  %v123_v56 = vld [vmem:[%s19775_s0 + $0x96] sm:$0x3]  ;;  %v701_v57 = vcombine.low %v120_v53, %v121_v54  ;;  %v126_v63 = vld [vmem:[%s19775_s0 + $0x9c] sm:$0x3]  ;;  %v127_v0 = vld [vmem:[%s19775_s0 + $0x9e] sm:$0x3] }
  0x2e   :  { %v692_v50 = vrot.slane %v684_v47, %v13882_v10  ;;  %v128_v11 = vld [vmem:[%s19775_s0 + $0xa0] sm:$0x3]  ;;  %v130_v13 = vld [vmem:[%s19775_s0 + $0xa4] sm:$0x3]  ;;  %v131_v14 = vld [vmem:[%s19775_s0 + $0xa6] sm:$0x3] }
  0x2f   :  { %13078 = vmatmul.mubr.msk.f32.gmra.mrb[8].mxu0 %vm1116_vm1, %v479_v4  ;;  %v102_v4 = vld [vmem:[%s19775_s0 + $0x6c] sm:$0x3]  ;;  %v598_v8 = vcombine.low %v590_v61, %v597_v62  ;;  %v666_v34 = vcombine.low %v658_v32, %v665_v33  ;;  %v709_v59 = vrot.slane %v701_v57, %v13882_v10  ;;  %v124_v61 = vld [vmem:[%s19775_s0 + $0x98] sm:$0x3]  ;;  %v125_v62 = vld [vmem:[%s19775_s0 + $0x9a] sm:$0x3]  ;;  %v736_v16 = vcombine.low %v130_v13, %v131_v14 }
  0x30   :  { %13080 = vmatprep.mubr.msk.f32.mxu0 %vm13797_vm0, %v19787_v2  ;;  %v617_v12 = vcombine.low %v102_v4, %v103_v6  ;;  %v718_v3 = vcombine.low %v124_v61, %v125_v62  ;;  %v719_v6 = vcombine.low %v126_v63, %v127_v0  ;;  %v134_v21 = vld [vmem:[%s19775_s0 + $0xac] sm:$0x3]  ;;  %v135_v22 = vld [vmem:[%s19775_s0 + $0xae] sm:$0x3]  ;;  %v137_v30 = vld [vmem:[%s19775_s0 + $0xb2] sm:$0x3] }
  0x31   :  { %v753_v25 = vcombine.low %v134_v21, %v135_v22  ;;  %v14267_v32 = vld [vmem:[%s19777_s2] ss:$0 sm:$0xff]  ;;  %v142_v44 = vld [vmem:[%s19775_s0 + $0xbc] sm:$0x3]  ;;  %s13803_s16 = smov 64   ;;  %vm5577_vm2 = vcmask 261120  }
  0x32   :  { %v726_v7 = vrot.slane %v718_v3, %v13882_v10  ;;  %vm5878_vm3 = vcmask 523264   ;;  %vm6079_vm4 = vcmask 785408   ;;  %vm12392_vm5 = vcmask 1041408   ;;  %s13804_s13 = smov [#allocation5]  }
  0x33   :  { %13081 = vmatmul.mubr.msk.f32.gmra.mrb[10].mxu0 %vm1116_vm1, %v496_v19  ;;  %v631_v19 = vrot.slane %v617_v12, %v13882_v10  ;;  %v129_v12 = vld [vmem:[%s19775_s0 + $0xa2] sm:$0x3] }
  0x34   :  { %13083 = vmatprep.mubr.msk.f32.mxu0 %vm13797_vm0, %v19787_v2  ;;  %v735_v15 = vcombine.low %v128_v11, %v129_v12 }
  0x35   :  { %v632_v27 = vcombine.low %v624_v17, %v631_v19  ;;  %v132_v19 = vld [vmem:[%s19775_s0 + $0xa8] sm:$0x3] }
  0x36   :  { %v743_v17 = vrot.slane %v735_v15, %v13882_v10 }
  0x37   :  { %13084 = vmatmul.mubr.msk.f32.gmra.mrb[12].mxu0 %vm1116_vm1, %v513_v28  ;;  %v641_v28 = vrot.slane %v633_v20, %v13882_v10  ;;  %v133_v20 = vld [vmem:[%s19775_s0 + $0xaa] sm:$0x3] }
  0x38   :  { %13086 = vmatprep.mubr.msk.f32.mxu0 %vm13797_vm0, %v19787_v2  ;;  %v752_v23 = vcombine.low %v132_v19, %v133_v20 }
  0x39   :  { %v649_v31 = vcombine.low %v641_v28, %v648_v29  ;;  %v136_v29 = vld [vmem:[%s19775_s0 + $0xb0] sm:$0x3] }
  0x3a   :  { %v760_v26 = vrot.slane %v752_v23, %v13882_v10  ;;  %v769_v35 = vcombine.low %v136_v29, %v137_v30 }
  0x3b   :  { %13087 = vmatmul.mubr.msk.f32.gmra.mrb[14].mxu0 %vm1116_vm1, %v530_v37  ;;  %v114_v37 = vld [vmem:[%s19775_s0 + $0x84] sm:$0x3] }
  0x3c   :  { %13089 = vmatprep.mubr.msk.f32.mxu0 %vm13797_vm0, %v19787_v2  ;;  %v668_v40 = vcombine.low %v114_v37, %v115_v38  ;;  %v777_v38 = vrot.slane %v769_v35, %v13882_v10 }
  0x3e   :  { %v682_v42 = vrot.slane %v668_v40, %v13882_v10 }
  0x3f   :  { %13090 = vmatmul.mubr.msk.f32.gmra.mrb[16].mxu0 %vm1116_vm1, %v547_v46  ;;  %v119_v46 = vld [vmem:[%s19775_s0 + $0x8e] sm:$0x3] }
  0x40   :  { %13092 = vmatprep.mubr.msk.f32.mxu0 %vm13797_vm0, %v19787_v2  ;;  %v683_v48 = vcombine.low %v675_v41, %v682_v42  ;;  %v685_v49 = vcombine.low %v118_v45, %v119_v46  ;;  %v140_v41 = vld [vmem:[%s19775_s0 + $0xb8] sm:$0x3]  ;;  %v141_v42 = vld [vmem:[%s19775_s0 + $0xba] sm:$0x3]  ;;  %v143_v45 = vld [vmem:[%s19775_s0 + $0xbe] sm:$0x3] }
  0x41   :  { %v786_v46 = vcombine.low %v140_v41, %v141_v42 }
  0x42   :  { %v699_v51 = vrot.slane %v685_v49, %v13882_v10 }
  0x43   :  { %13093 = vmatmul.mubr.msk.f32.gmra.mrb[18].mxu0 %vm1116_vm1, %v564_v55  ;;  %v122_v55 = vld [vmem:[%s19775_s0 + $0x94] sm:$0x3] }
  0x44   :  { %13095 = vmatprep.mubr.msk.f32.mxu0 %vm13797_vm0, %v19787_v2  ;;  %v700_v52 = vcombine.low %v692_v50, %v699_v51  ;;  %v702_v58 = vcombine.low %v122_v55, %v123_v56  ;;  %v787_v50 = vcombine.low %v142_v44, %v143_v45  ;;  %v794_v51 = vrot.slane %v786_v46, %v13882_v10 }
  0x46   :  { %v801_v54 = vrot.slane %v787_v50, %v13882_v10 }
  0x47   :  { %13096 = vmatmul.mubr.msk.f32.gmra.mrb[20].mxu0 %vm1116_vm1, %v581_v60  ;;  %v716_v60 = vrot.slane %v702_v58, %v13882_v10 }
  0x48   :  { %13098 = vmatprep.mubr.msk.f32.mxu0 %vm13797_vm0, %v19787_v2  ;;  %v802_v58 = vcombine.low %v794_v51, %v801_v54 }
  0x49   :  { %v717_v4 = vcombine.low %v709_v59, %v716_v60  ;;  %v13800_v59 = vmov 1966171168  }
  0x4a   :  { %v1572_v60 = vunpack.c.l.s4 %v13800_v59 }
  0x4b   :  { %13099 = vmatmul.mubr.msk.f32.gmra.mrb[22].mxu0 %vm1116_vm1, %v598_v8  ;;  %v733_v8 = vrot.slane %v719_v6, %v13882_v10 }
  0x4c   :  { %13101 = vmatprep.mubr.msk.f32.mxu0 %vm13797_vm0, %v19787_v2  ;;  %v1573_v0 = vunpack.c.0.s8 %v1572_v60 }
  0x4d   :  { %v734_v9 = vcombine.low %v726_v7, %v733_v8 }
  0x4e   :  { %v14305_v11 = vsub.s32 %v1573_v0, %v13870_v5 }
  0x4f   :  { %13102 = vmatmul.mubr.msk.f32.gmra.mrb[24].mxu0 %vm1116_vm1, %v615_v18  ;;  %v750_v18 = vrot.slane %v736_v16, %v13882_v10 }
  0x50   :  { %13104 = vmatprep.mubr.msk.f32.mxu0 %vm13797_vm0, %v19787_v2 }
  0x51   :  { %v751_v24 = vcombine.low %v743_v17, %v750_v18 }
  0x53   :  { %13105 = vmatmul.mubr.msk.f32.gmra.mrb[26].mxu0 %vm1116_vm1, %v632_v27  ;;  %v767_v27 = vrot.slane %v753_v25, %v13882_v10 }
  0x54   :  { %13107 = vmatprep.mubr.msk.f32.mxu0 %vm13797_vm0, %v19787_v2 }
  0x55   :  { %v768_v28 = vcombine.low %v760_v26, %v767_v27 }
  0x57   :  { %13108 = vmatmul.mubr.msk.f32.gmra.mrb[28].mxu0 %vm1116_vm1, %v649_v31  ;;  %v138_v31 = vld [vmem:[%s19775_s0 + $0xb4] sm:$0x3] }
  0x58   :  { %13110 = vmatprep.mubr.msk.f32.mxu0 %vm13797_vm0, %v19787_v2 }
  0x5b   :  { %13111 = vmatmul.mubr.msk.f32.gmra.mrb[30].mxu0 %vm1116_vm1, %v666_v34  ;;  %v139_v34 = vld [vmem:[%s19775_s0 + $0xb6] sm:$0x3] }
  0x5c   :  { %13113 = vmatprep.mubr.msk.f32.mxu0 %vm13797_vm0, %v19787_v2  ;;  %v770_v37 = vcombine.low %v138_v31, %v139_v34 }
  0x5e   :  { %v784_v40 = vrot.slane %v770_v37, %v13882_v10 }
  0x5f   :  { %13114 = vmatmul.mubr.msk.f32.gmra.mrb[32].mxu0 %vm1116_vm1, %v683_v48 }
  0x60   :  { %13116 = vmatprep.mubr.msk.f32.mxu0 %vm13797_vm0, %v19787_v2  ;;  %v785_v49 = vcombine.low %v777_v38, %v784_v40 }
  0x63   :  { %13117 = vmatmul.mubr.msk.f32.gmra.mrb[34].mxu0 %vm1116_vm1, %v700_v52 }
  0x64   :  { %13119 = vmatprep.mubr.msk.f32.mxu0 %vm13797_vm0, %v19787_v2 }
  0x67   :  { %13120 = vmatmul.mubr.msk.f32.gmra.mrb[36].mxu0 %vm1116_vm1, %v717_v4 }
  0x68   :  { %13122 = vmatprep.mubr.msk.f32.mxu0 %vm13797_vm0, %v19787_v2 }
  0x6b   :  { %13123 = vmatmul.mubr.msk.f32.gmra.mrb[38].mxu0 %vm1116_vm1, %v734_v9 }
  0x6c   :  { %13125 = vmatprep.mubr.msk.f32.mxu0 %vm13797_vm0, %v19787_v2 }
  0x6f   :  { %13126 = vmatmul.mubr.msk.f32.gmra.mrb[40].mxu0 %vm1116_vm1, %v751_v24 }
  0x70   :  { %13128 = vmatprep.mubr.msk.f32.mxu0 %vm13797_vm0, %v19787_v2 }
  0x73   :  { %13129 = vmatmul.mubr.msk.f32.gmra.mrb[42].mxu0 %vm1116_vm1, %v768_v28 }
  0x74   :  { %13131 = vmatprep.mubr.msk.f32.mxu0 %vm13797_vm0, %v19787_v2 }
  0x77   :  { %13132 = vmatmul.mubr.msk.f32.gmra.mrb[44].mxu0 %vm1116_vm1, %v785_v49 }
  0x78   :  { %13134 = vmatprep.mubr.msk.f32.mxu0 %vm13797_vm0, %v19787_v2 }
  0x7b   :  { %13135 = vmatmul.mubr.msk.f32.gmra.mrb[46].mxu0 %vm1116_vm1, %v802_v58 }
  0x7c   :  { %13137 = vmatprep.mubr.msk.f32.mxu0 %vm13797_vm0, %v19787_v2 }
  0xf2   :  { %v1269_v33 = vpop.f32.mrb[0].mxu0 }
  0xf3   :  { %v13067_v36 = vpop.f32.mrb[1].mxu0  ;;  %v1270_v39 = vadd.f32 %v14267_v32, %v1269_v33 }
  0xf5   :  { %v1483_v52 = vmax.f32 %v1270_v39, 0.0 }
  0xf6   :  { %v1274_v43 = vpop.f32.mrb[2].mxu0 }
  0xf7   :  { %v1275_v47 = vadd.f32 %v14267_v32, %v1274_v43  ;;  %v13070_v48 = vpop.f32.mrb[3].mxu0 }
  0xf9   :  { %v14289_v53 = vmax.f32 %v1275_v47, 0.0 }
  0xfa   :  { %v1279_v55 = vpop.f32.mrb[4].mxu0 }
  0xfb   :  { %20001 = vst [vmem:[#allocation9_spill] sm:$0xff] %v14289_v53  ;;  %v14296_v56 = vpack.c.bf16 %v14289_v53, %v1483_v52  ;;  %v13073_v57 = vpop.f32.mrb[5].mxu0  ;;  %v1280_v61 = vadd.f32 %v14267_v32, %v1279_v55 }
  0xfd   :  { %20002 = vst [vmem:[#allocation10_spill] sm:$0xff] %v14296_v56  ;;  %v1485_v4 = vmax.f32 %v1280_v61, 0.0 }
  0xfe   :  { %v1284_v62 = vpop.f32.mrb[6].mxu0 }
  0xff   :  { %v13076_v63 = vpop.f32.mrb[7].mxu0  ;;  %v1285_v3 = vadd.f32 %v14267_v32, %v1284_v62 }
 0x101   :  { %v1486_v6 = vmax.f32 %v1285_v3, 0.0 }
 0x102   :  { %v1289_v7 = vpop.f32.mrb[8].mxu0 }
 0x103   :  { %v1290_v8 = vadd.f32 %v14267_v32, %v1289_v7  ;;  %v13079_v9 = vpop.f32.mrb[9].mxu0  ;;  %v1527_v12 = vpack.c.bf16 %v1486_v6, %v1485_v4  ;;  %v12606_v13 = vpack.c.bf16 %v1486_v6, %v1486_v6 }
 0x105   :  { %v1626_v14 = vrot.slane %v1527_v12, %v14305_v11  ;;  %v1633_v15 = vrot.slane %v12606_v13, %v14305_v11  ;;  %v1487_v17 = vmax.f32 %v1290_v8, 0.0 }
 0x106   :  { %v1294_v16 = vpop.f32.mrb[10].mxu0 }
 0x107   :  { %v1295_v18 = vadd.f32 %v14267_v32, %v1294_v16  ;;  %v13082_v19 = vpop.f32.mrb[11].mxu0  ;;  %v1634_v20 = vcombine.high %v1626_v14, %v1626_v14  ;;  %v1635_v21 = vcombine.high %v1633_v15, %v1633_v15  ;;  %v14311_v22 = vrot.slane %v1626_v14, %v14305_v11 }
 0x108   :  { %v1649_v23 = vrot.slane %v1633_v15, %v14305_v11 }
 0x109   :  { %20003 = vst [vmem:[#allocation11_spill] sm:$0xff] %v14311_v22  ;;  %v1488_v5 = vmax.f32 %v1295_v18, 0.0  ;;  %v14315_v24 = vrot.slane %v1634_v20, %v14305_v11  ;;  %v14318_v25 = vrot.slane %v1635_v21, %v14305_v11  ;;  %v1664_v30 = vcombine.high %v14311_v22, %v14311_v22 }
 0x10a   :  { %v4559_v26 = vrot.slane %v1649_v23, %v14305_v11  ;;  %v14321_v27 = vcombine.high %v1649_v23, %v1649_v23  ;;  %v1299_v28 = vpop.f32.mrb[12].mxu0 }
 0x10b   :  { %v1528_v29 = vpack.c.bf16 %v1488_v5, %v1487_v17  ;;  %v1300_v31 = vadd.f32 %v14267_v32, %v1299_v28  ;;  %v13085_v33 = vpop.f32.mrb[13].mxu0  ;;  %v2731_v35 = vrot.slane %v14315_v24, %v14305_v11  ;;  %v14333_v37 = vcombine.high %v14318_v25, %v14318_v25 }
 0x10c   :  { %v4566_v34 = vrot.slane %v4559_v26, %v14305_v11  ;;  %v2759_v36 = vrot.slane %v14321_v27, %v14305_v11  ;;  %v2745_v39 = vrot.slane %v1664_v30, %v14305_v11  ;;  %v12607_v41 = vpack.c.bf16 %v1488_v5, %v1488_v5 }
 0x10d   :  { %v14337_v38 = vrot.slane %v2731_v35, %v14305_v11  ;;  %v1675_v42 = vrot.slane %v1528_v29, %v14305_v11  ;;  %v1666_v43 = vcombine.high %v14315_v24, %v14315_v24  ;;  %v2773_v46 = vrot.slane %v14333_v37, %v14305_v11  ;;  %v144_v29 = vld [vmem:[%s19775_s0 + $0xc0] sm:$0x3]  ;;  %v145_v35 = vld [vmem:[%s19775_s0 + $0xc2] sm:$0x3] }
 0x10e   :  { %4711 = vrot.lane.b32.xlu1 %v4566_v34, %s13801_s14  ;;  %v1304_v40 = vpop.f32.mrb[14].mxu0  ;;  %v2766_v45 = vrot.slane %v2759_v36, %v14305_v11  ;;  %v1489_v47 = vmax.f32 %v1300_v31, 0.0  ;;  %v14351_v49 = vrot.slane %v2745_v39, %v14305_v11  ;;  %v1682_v52 = vrot.slane %v12607_v41, %v14305_v11  ;;  %v146_v36 = vld [vmem:[%s19775_s0 + $0xc4] sm:$0x3]  ;;  %v147_v39 = vld [vmem:[%s19775_s0 + $0xc6] sm:$0x3] }
 0x10f   :  { %20004 = vst [vmem:[#allocation12_spill] sm:$0xff] %v14337_v38  ;;  %v13088_v44 = vpop.f32.mrb[15].mxu0  ;;  %4029 = vrot.lane.b32.xlu0 %v14337_v38, %s13802_s15  ;;  %v1305_v48 = vadd.f32 %v14267_v32, %v1304_v40  ;;  %v14357_v55 = vrot.slane %v1675_v42, %v14305_v11  ;;  %v2780_v57 = vrot.slane %v2773_v46, %v14305_v11  ;;  %v148_v40 = vld [vmem:[%s19775_s0 + $0xc8] sm:$0x3]  ;;  %v149_v41 = vld [vmem:[%s19775_s0 + $0xca] sm:$0x3] }
 0x110   :  { %20005 = vst [vmem:[#allocation13_spill] sm:$0xff] %v14351_v49  ;;  %v4219_v58 = vrot.slane %v1666_v43, %v14305_v11  ;;  %v1683_v0 = vcombine.high %v1675_v42, %v1675_v42  ;;  %v14370_v3 = vrot.slane %v1682_v52, %v14305_v11  ;;  %v1684_v30 = vcombine.high %v1682_v52, %v1682_v52 }
 0x111   :  { %v14353_v50 = vmax.f32 %v1305_v48, 0.0  ;;  %v2787_v6 = vrot.slane %v14357_v55, %v14305_v11  ;;  %v14394_v19 = vcombine.high %v14357_v55, %v14357_v55  ;;  %v803_v42 = vcombine.low %v144_v29, %v145_v35  ;;  %v151_v48 = vld [vmem:[%s19775_s0 + $0xce] sm:$0x3] }
 0x112   :  { %4033 = vrot.lane.b32.xlu1 %v2766_v45, %s13802_s15  ;;  %v1309_v51 = vpop.f32.mrb[16].mxu0  ;;  %20006 = vst [vmem:[#allocation14_spill] sm:$0xff] %v14370_v3  ;;  %v4226_v4 = vrot.slane %v4219_v58, %v14305_v11  ;;  %v14384_v14 = vrot.slane %v1683_v0, %v14305_v11  ;;  %v2843_v16 = vrot.slane %v14370_v3, %v14305_v11 }
 0x113   :  { %v13091_v54 = vpop.f32.mrb[17].mxu0  ;;  %4031 = vrot.lane.b32.xlu0 %v14351_v49, %s13802_s15  ;;  %v14364_v59 = vpack.c.bf16 %v14353_v50, %v1489_v47  ;;  %v1310_v61 = vadd.f32 %v14267_v32, %v1309_v51  ;;  %v2794_v15 = vrot.slane %v2787_v6, %v14305_v11  ;;  %v2815_v33 = vrot.slane %v14394_v19, %v14305_v11  ;;  %v150_v47 = vld [vmem:[%s19775_s0 + $0xcc] sm:$0x3] }
 0x114   :  { %20007 = vst [vmem:[#allocation15_spill] sm:$0xff] %v14384_v14  ;;  %v2850_v21 = vrot.slane %v2843_v16, %v14305_v11  ;;  %v2801_v23 = vrot.slane %v14384_v14, %v14305_v11  ;;  %v804_v43 = vcombine.low %v146_v36, %v147_v39  ;;  %v14431_v45 = vrot.slane %v1684_v30, %v14305_v11 }
 0x115   :  { %v1491_v7 = vmax.f32 %v1310_v61, 0.0  ;;  %v2822_v46 = vrot.slane %v2815_v33, %v14305_v11  ;;  %v811_v52 = vrot.slane %v803_v42, %v13882_v10  ;;  %v14453_v6 = vcombine.high %v14370_v3, %v14370_v3 }
 0x116   :  { %4035 = vrot.lane.b32.xlu1 %v2780_v57, %s13802_s15  ;;  %v1314_v60 = vpop.f32.mrb[18].mxu0  ;;  %v2808_v31 = vrot.slane %v2801_v23, %v14305_v11  ;;  %20008 = vst [vmem:[#allocation16_spill] sm:$0xff] %v14431_v45  ;;  %v818_v54 = vrot.slane %v804_v43, %v13882_v10  ;;  %v12608_v29 = vpack.c.bf16 %v14353_v50, %v14353_v50 }
 0x117   :  { %v1315_v62 = vadd.f32 %v14267_v32, %v1314_v60  ;;  %v13094_v63 = vpop.f32.mrb[19].mxu0  ;;  %4369 = vrot.lane.b32.xlu0 %v14351_v49, %s13803_s16  ;;  %20009 = vst [vmem:[#allocation17_spill] sm:$0xff] %v14453_v6 }
 0x118   :  { %v819_v61 = vcombine.low %v811_v52, %v818_v54  ;;  %v2857_v63 = vrot.slane %v14431_v45, %v14305_v11  ;;  %v1731_v35 = vrot.slane %v12608_v29, %v14305_v11 }
 0x119   :  { %v14377_v8 = vmax.f32 %v1315_v62, 0.0  ;;  %v821_v62 = vcombine.low %v150_v47, %v151_v48  ;;  %v152_v48 = vld [vmem:[%s19775_s0 + $0xd0] sm:$0x3] }
 0x11a   :  { %4371 = vrot.lane.b32.xlu1 %v4226_v4, %s13803_s16  ;;  %v1319_v9 = vpop.f32.mrb[20].mxu0  ;;  %13138 = vmatmul.mubr.msk.f32.gmra.mrb[48].mxu0 %vm1116_vm1, %v819_v61  ;;  %v14495_v39 = vrot.slane %v1731_v35, %v14305_v11 }
 0x11b   :  { %v14381_v12 = vpack.c.bf16 %v14377_v8, %v1491_v7  ;;  %v13097_v13 = vpop.f32.mrb[21].mxu0  ;;  %4373 = vrot.lane.b32.xlu0 %v2780_v57, %s13803_s16  ;;  %v1320_v17 = vadd.f32 %v14267_v32, %v1319_v9  ;;  %v820_v57 = vcombine.low %v148_v40, %v149_v41  ;;  %13140 = vmatprep.mubr.msk.f32.mxu0 %vm13797_vm0, %v19787_v2 }
 0x11c   :  { %20010 = vst [vmem:[#allocation18_spill] sm:$0xff] %v14495_v39  ;;  %v2913_v43 = vrot.slane %v14495_v39, %v14305_v11 }
 0x11d   :  { %v1493_v5 = vmax.f32 %v1320_v17, 0.0  ;;  %v828_v0 = vrot.slane %v820_v57, %v13882_v10  ;;  %v155_v57 = vld [vmem:[%s19775_s0 + $0xd6] sm:$0x3] }
 0x11e   :  { %4375 = vrot.lane.b32.xlu1 %v2794_v15, %s13803_s16  ;;  %v1324_v18 = vpop.f32.mrb[22].mxu0  ;;  %v2920_v61 = vrot.slane %v2913_v43, %v14305_v11 }
 0x11f   :  { %v13100_v20 = vpop.f32.mrb[23].mxu0  ;;  %4709 = vrot.lane.b32.xlu0 %v4226_v4, %s13801_s14  ;;  %v1325_v26 = vadd.f32 %v14267_v32, %v1324_v18  ;;  %v835_v4 = vrot.slane %v821_v62, %v13882_v10  ;;  %v2871_v18 = vrot.slane %v14453_v6, %v14305_v11 }
 0x121   :  { %v14402_v28 = vmax.f32 %v1325_v26, 0.0  ;;  %v836_v9 = vcombine.low %v828_v0, %v835_v4  ;;  %v2878_v23 = vrot.slane %v2871_v18, %v14305_v11  ;;  %v1716_v26 = vcombine.high %v14431_v45, %v14431_v45  ;;  %v156_v4 = vld [vmem:[%s19775_s0 + $0xd8] sm:$0x3]  ;;  %v159_v18 = vld [vmem:[%s19775_s0 + $0xde] sm:$0x3] }
 0x122   :  { %4383 = vrot.lane.b32.xlu1 %v2850_v21, %s13803_s16  ;;  %v1329_v44 = vpop.f32.mrb[24].mxu0  ;;  %v188_v45 = vld [vmem:[%s19775_s0 + $0x118] sm:$0x3] }
 0x123   :  { %4037 = vrot.lane.b32.xlu0 %v2794_v15, %s13802_s15  ;;  %v14412_v34 = vpack.c.bf16 %v14402_v28, %v1493_v5  ;;  %v13103_v51 = vpop.f32.mrb[25].mxu0  ;;  %v1330_v7 = vadd.f32 %v14267_v32, %v1329_v44  ;;  %13141 = vmatmul.mubr.msk.f32.gmra.mrb[50].mxu0 %vm1116_vm1, %v836_v9  ;;  %v2885_v33 = vrot.slane %v1716_v26, %v14305_v11  ;;  %v158_v9 = vld [vmem:[%s19775_s0 + $0xdc] sm:$0x3] }
 0x124   :  { %13143 = vmatprep.mubr.msk.f32.mxu0 %vm13797_vm0, %v19787_v2  ;;  %v154_v51 = vld [vmem:[%s19775_s0 + $0xd4] sm:$0x3]  ;;  %v855_v26 = vcombine.low %v158_v9, %v159_v18 }
 0x125   :  { %v1495_v16 = vmax.f32 %v1330_v7, 0.0  ;;  %v2892_v36 = vrot.slane %v2885_v33, %v14305_v11  ;;  %v157_v7 = vld [vmem:[%s19775_s0 + $0xda] sm:$0x3] }
 0x126   :  { %4039 = vrot.lane.b32.xlu1 %v2808_v31, %s13802_s15  ;;  %v1334_v58 = vpop.f32.mrb[26].mxu0  ;;  %v869_v33 = vrot.slane %v855_v26, %v13882_v10  ;;  %v162_v26 = vld [vmem:[%s19775_s0 + $0xe4] sm:$0x3] }
 0x127   :  { %4713 = vrot.lane.b32.xlu0 %v2794_v15, %s13801_s14  ;;  %v13106_v60 = vpop.f32.mrb[27].mxu0  ;;  %v1335_v13 = vadd.f32 %v14267_v32, %v1334_v58  ;;  %v2864_v15 = vrot.slane %v2857_v63, %v14305_v11 }
 0x128   :  { %v838_v60 = vcombine.low %v154_v51, %v155_v57 }
 0x129   :  { %v14462_v17 = vmax.f32 %v1335_v13, 0.0  ;;  %v1733_v13 = vcombine.high %v1731_v35, %v1731_v35 }
 0x12a   :  { %4379 = vrot.lane.b32.xlu1 %v2822_v46, %s13803_s16  ;;  %v1339_v50 = vpop.f32.mrb[28].mxu0  ;;  %v852_v0 = vrot.slane %v838_v60, %v13882_v10 }
 0x12b   :  { %4721 = vrot.lane.b32.xlu0 %v2850_v21, %s13801_s14  ;;  %v14470_v20 = vpack.c.bf16 %v14462_v17, %v1495_v16  ;;  %v1340_v40 = vadd.f32 %v14267_v32, %v1339_v50  ;;  %v13109_v41 = vpop.f32.mrb[29].mxu0  ;;  %v14545_v16 = vcombine.high %v14495_v39, %v14495_v39  ;;  %v14555_v35 = vrot.slane %v1733_v13, %v14305_v11 }
 0x12d   :  { %v1497_v44 = vmax.f32 %v1340_v40, 0.0  ;;  %20011 = vst [vmem:[#allocation19_spill] sm:$0xff] %v14545_v16  ;;  %20012 = vst [vmem:[#allocation20_spill] sm:$0xff] %v14555_v35  ;;  %v2941_v40 = vrot.slane %v14545_v16, %v14305_v11 }
 0x12e   :  { %4715 = vrot.lane.b32.xlu1 %v2808_v31, %s13801_s14  ;;  %v1344_v42 = vpop.f32.mrb[30].mxu0 }
 0x12f   :  { %4045 = vrot.lane.b32.xlu0 %v2850_v21, %s13802_s15  ;;  %v14475_v21 = vcombine.high %v14384_v14, %v14384_v14  ;;  %v13112_v47 = vpop.f32.mrb[31].mxu0  ;;  %v2948_v41 = vrot.slane %v2941_v40, %v14305_v11 }
 0x130   :  { %v1773_v47 = vrot.slane %v14381_v12, %v14305_v11 }
 0x131   :  { %v2829_v5 = vrot.slane %v14475_v21, %v14305_v11 }
 0x132   :  { %4723 = vrot.lane.b32.xlu1 %v2864_v15, %s13801_s14  ;;  %v1781_v9 = vcombine.high %v1773_v47, %v1773_v47 }
 0x133   :  { %4041 = vrot.lane.b32.xlu0 %v2822_v46, %s13802_s15  ;;  %v2836_v30 = vrot.slane %v2829_v5, %v14305_v11 }
 0x134   :  { %v14618_v18 = vrot.slane %v1781_v9, %v14305_v11 }
 0x136   :  { %4047 = vrot.lane.b32.xlu1 %v2864_v15, %s13802_s15  ;;  %20016 = vst [vmem:[#allocation24_spill] sm:$0xff] %v14618_v18 }
 0x137   :  { %4049 = vrot.lane.b32.xlu0 %v2878_v23, %s13802_s15 }
 0x13a   :  { %4387 = vrot.lane.b32.xlu1 %v2878_v23, %s13803_s16 }
 0x13b   :  { %4377 = vrot.lane.b32.xlu0 %v2808_v31, %s13803_s16  ;;  %v1724_v31 = vrot.slane %v14364_v59, %v14305_v11  ;;  %v153_v59 = vld [vmem:[%s19775_s0 + $0xd2] sm:$0x3] }
 0x13c   :  { %v837_v58 = vcombine.low %v152_v48, %v153_v59  ;;  %v14585_v59 = vcombine.high %v14555_v35, %v14555_v35 }
 0x13d   :  { %v14516_v52 = vrot.slane %v1724_v31, %v14305_v11  ;;  %v1732_v29 = vcombine.high %v1724_v31, %v1724_v31 }
 0x13e   :  { %4043 = vrot.lane.b32.xlu1 %v2836_v30, %s13802_s15  ;;  %v845_v63 = vrot.slane %v837_v58, %v13882_v10  ;;  %20013 = vst [vmem:[#allocation21_spill] sm:$0xff] %v14585_v59  ;;  %v14592_v58 = vrot.slane %v1773_v47, %v14305_v11  ;;  %v166_v47 = vld [vmem:[%s19775_s0 + $0xec] sm:$0x3] }
 0x13f   :  { %4717 = vrot.lane.b32.xlu0 %v2822_v46, %s13801_s14  ;;  %v1345_v46 = vadd.f32 %v14267_v32, %v1344_v42  ;;  %v1754_v42 = vrot.slane %v1732_v29, %v14305_v11  ;;  %v163_v29 = vld [vmem:[%s19775_s0 + $0xe6] sm:$0x3] }
 0x140   :  { %v853_v5 = vcombine.low %v845_v63, %v852_v0  ;;  %20015 = vst [vmem:[#allocation23_spill] sm:$0xff] %v14592_v58  ;;  %v2969_v63 = vrot.slane %v14592_v58, %v14305_v11 }
 0x141   :  { %v14519_v54 = vmax.f32 %v1345_v46, 0.0  ;;  %v12609_v46 = vpack.c.bf16 %v14377_v8, %v14377_v8  ;;  %v14588_v51 = vcombine.high %v1754_v42, %v1754_v42  ;;  %v2955_v8 = vrot.slane %v14585_v59, %v14305_v11 }
 0x142   :  { %4051 = vrot.lane.b32.xlu1 %v2892_v36, %s13802_s15  ;;  %13144 = vmatmul.mubr.msk.f32.gmra.mrb[52].mxu0 %vm1116_vm1, %v853_v5  ;;  %v161_v5 = vld [vmem:[%s19775_s0 + $0xe2] sm:$0x3] }
 0x143   :  { %4385 = vrot.lane.b32.xlu0 %v2864_v15, %s13803_s16  ;;  %v14527_v62 = vpack.c.bf16 %v14519_v54, %v1497_v44  ;;  %v4233_v15 = vrot.slane %v14516_v52, %v14305_v11  ;;  %13146 = vmatprep.mubr.msk.f32.mxu0 %vm13797_vm0, %v19787_v2  ;;  %v4573_v44 = vrot.slane %v1754_v42, %v14305_v11 }
 0x144   :  { %20014 = vst [vmem:[#allocation22_spill] sm:$0xff] %v14588_v51  ;;  %v1780_v57 = vrot.slane %v12609_v46, %v14305_v11  ;;  %v2899_v12 = vrot.slane %v14588_v51, %v14305_v11  ;;  %v165_v46 = vld [vmem:[%s19775_s0 + $0xea] sm:$0x3] }
 0x145   :  { %v4240_v50 = vrot.slane %v4233_v15, %v14305_v11  ;;  %v4580_v48 = vrot.slane %v4573_v44, %v14305_v11  ;;  %v164_v44 = vld [vmem:[%s19775_s0 + $0xe8] sm:$0x3] }
 0x146   :  { %4719 = vrot.lane.b32.xlu1 %v2836_v30, %s13801_s14  ;;  %v14601_v60 = vrot.slane %v1780_v57, %v14305_v11  ;;  %v2906_v0 = vrot.slane %v2899_v12, %v14305_v11  ;;  %v1782_v15 = vcombine.high %v1780_v57, %v1780_v57  ;;  %v888_v57 = vcombine.low %v164_v44, %v165_v46  ;;  %v171_v44 = vld [vmem:[%s19775_s0 + $0xf6] sm:$0x3] }
 0x147   :  { %4725 = vrot.lane.b32.xlu0 %v2878_v23, %s13801_s14  ;;  %v854_v23 = vcombine.low %v156_v4, %v157_v7  ;;  %v2976_v4 = vrot.slane %v2969_v63, %v14305_v11 }
 0x148   :  { %v3025_v7 = vrot.slane %v14601_v60, %v14305_v11  ;;  %v14638_v40 = vrot.slane %v1782_v15, %v14305_v11 }
 0x14a   :  { %4727 = vrot.lane.b32.xlu1 %v2892_v36, %s13801_s14  ;;  %v3032_v13 = vrot.slane %v3025_v7, %v14305_v11  ;;  %v4247_v63 = vrot.slane %v14638_v40, %v14305_v11  ;;  %v896_v7 = vrot.slane %v888_v57, %v13882_v10  ;;  %v14711_v57 = vcombine.high %v14618_v18, %v14618_v18 }
 0x14b   :  { %4381 = vrot.lane.b32.xlu0 %v2836_v30, %s13803_s16  ;;  %v862_v30 = vrot.slane %v854_v23, %v13882_v10  ;;  %v160_v23 = vld [vmem:[%s19775_s0 + $0xe0] sm:$0x3] }
 0x14c   :  { %20018 = vst [vmem:[#allocation26_spill] sm:$0xff] %v14711_v57 }
 0x14d   :  { %v870_v31 = vcombine.low %v862_v30, %v869_v33  ;;  %v871_v30 = vcombine.low %v160_v23, %v161_v5  ;;  %v872_v33 = vcombine.low %v162_v26, %v163_v29  ;;  %v4254_v29 = vrot.slane %v4247_v63, %v14305_v11  ;;  %v172_v63 = vld [vmem:[%s19775_s0 + $0xf8] sm:$0x3] }
 0x14e   :  { %4055 = vrot.lane.b32.xlu1 %v2920_v61, %s13802_s15 }
 0x14f   :  { %4389 = vrot.lane.b32.xlu0 %v2892_v36, %s13803_s16  ;;  %13147 = vmatmul.mubr.msk.f32.gmra.mrb[54].mxu0 %vm1116_vm1, %v870_v31  ;;  %v2927_v36 = vrot.slane %v14555_v35, %v14305_v11  ;;  %v1349_v31 = vpop.f32.mrb[32].mxu0 }
 0x150   :  { %13149 = vmatprep.mubr.msk.f32.mxu0 %vm13797_vm0, %v19787_v2  ;;  %v13115_v42 = vpop.f32.mrb[33].mxu0 }
 0x151   :  { %v2934_v43 = vrot.slane %v2927_v36, %v14305_v11  ;;  %v1350_v36 = vadd.f32 %v14267_v32, %v1349_v31  ;;  %v12610_v31 = vpack.c.bf16 %v14402_v28, %v14402_v28 }
 0x152   :  { %4391 = vrot.lane.b32.xlu1 %v4240_v50, %s13803_s16 }
 0x153   :  { %4393 = vrot.lane.b32.xlu0 %v2920_v61, %s13803_s16  ;;  %v2962_v61 = vrot.slane %v2955_v8, %v14305_v11  ;;  %v1499_v9 = vmax.f32 %v1350_v36, 0.0  ;;  %v170_v36 = vld [vmem:[%s19775_s0 + $0xf4] sm:$0x3] }
 0x156   :  { %4059 = vrot.lane.b32.xlu1 %v2948_v41, %s13802_s15 }
 0x157   :  { %4729 = vrot.lane.b32.xlu0 %v4240_v50, %s13801_s14  ;;  %v2983_v50 = vrot.slane %v14618_v18, %v14305_v11 }
 0x15a   :  { %4395 = vrot.lane.b32.xlu1 %v2934_v43, %s13803_s16 }
 0x15b   :  { %4057 = vrot.lane.b32.xlu0 %v2934_v43, %s13802_s15 }
 0x15e   :  { %4731 = vrot.lane.b32.xlu1 %v4580_v48, %s13801_s14  ;;  %v167_v48 = vld [vmem:[%s19775_s0 + $0xee] sm:$0x3] }
 0x15f   :  { %4397 = vrot.lane.b32.xlu0 %v2948_v41, %s13803_s16  ;;  %v889_v12 = vcombine.low %v166_v47, %v167_v48  ;;  %v1829_v47 = vrot.slane %v12610_v31, %v14305_v11 }
 0x162   :  { %4735 = vrot.lane.b32.xlu1 %v2948_v41, %s13801_s14  ;;  %v879_v41 = vrot.slane %v871_v30, %v13882_v10 }
 0x163   :  { %4733 = vrot.lane.b32.xlu0 %v2934_v43, %s13801_s14  ;;  %v886_v43 = vrot.slane %v872_v33, %v13882_v10  ;;  %v1812_v33 = vcombine.high %v14601_v60, %v14601_v60  ;;  %v169_v60 = vld [vmem:[%s19775_s0 + $0xf2] sm:$0x3] }
 0x165   :  { %v887_v8 = vcombine.low %v879_v41, %v886_v43  ;;  %v168_v41 = vld [vmem:[%s19775_s0 + $0xf0] sm:$0x3]  ;;  %v4587_v43 = vrot.slane %v1812_v33, %v14305_v11  ;;  %v14734_v33 = vrot.slane %v1829_v47, %v14305_v11 }
 0x166   :  { %4399 = vrot.lane.b32.xlu1 %v2962_v61, %s13803_s16  ;;  %v905_v46 = vcombine.low %v168_v41, %v169_v60 }
 0x167   :  { %4053 = vrot.lane.b32.xlu0 %v2906_v0, %s13802_s15  ;;  %v14662_v0 = vcombine.high %v14592_v58, %v14592_v58  ;;  %13150 = vmatmul.mubr.msk.f32.gmra.mrb[56].mxu0 %vm1116_vm1, %v887_v8  ;;  %v906_v8 = vcombine.low %v170_v36, %v171_v44  ;;  %20019 = vst [vmem:[#allocation27_spill] sm:$0xff] %v14734_v33 }
 0x168   :  { %13152 = vmatprep.mubr.msk.f32.mxu0 %vm13797_vm0, %v19787_v2  ;;  %v14807_v1 = vcombine.high %v14734_v33, %v14734_v33 }
 0x169   :  { %20017 = vst [vmem:[#allocation25_spill] sm:$0xff] %v14662_v0  ;;  %v2997_v30 = vrot.slane %v14662_v0, %v14305_v11 }
 0x16a   :  { %4063 = vrot.lane.b32.xlu1 %v2976_v4, %s13802_s15  ;;  %20025 = vst [vmem:[#allocation33_spill] sm:$0xff] %v14807_v1  ;;  %v3123_v58 = vrot.slane %v14807_v1, %v14305_v11 }
 0x16b   :  { %4061 = vrot.lane.b32.xlu0 %v2962_v61, %s13802_s15  ;;  %v3004_v28 = vrot.slane %v2997_v30, %v14305_v11 }
 0x16e   :  { %4071 = vrot.lane.b32.xlu1 %v3032_v13, %s13802_s15 }
 0x16f   :  { %4737 = vrot.lane.b32.xlu0 %v2962_v61, %s13801_s14  ;;  %v2990_v61 = vrot.slane %v2983_v50, %v14305_v11 }
 0x172   :  { %4739 = vrot.lane.b32.xlu1 %v2976_v4, %s13801_s14 }
 0x173   :  { %4401 = vrot.lane.b32.xlu0 %v2976_v4, %s13803_s16  ;;  %v1354_v4 = vpop.f32.mrb[34].mxu0 }
 0x174   :  { %v1355_v15 = vadd.f32 %v14267_v32, %v1354_v4  ;;  %v13118_v23 = vpop.f32.mrb[35].mxu0  ;;  %v173_v4 = vld [vmem:[%s19775_s0 + $0xfa] sm:$0x3] }
 0x175   :  { %v4594_v23 = vrot.slane %v4587_v43, %v14305_v11 }
 0x176   :  { %4747 = vrot.lane.b32.xlu1 %v3032_v13, %s13801_s14  ;;  %v14671_v5 = vmax.f32 %v1355_v15, 0.0 }
 0x177   :  { %4409 = vrot.lane.b32.xlu0 %v3032_v13, %s13803_s16  ;;  %v903_v13 = vrot.slane %v889_v12, %v13882_v10  ;;  %v913_v12 = vrot.slane %v905_v46, %v13882_v10 }
 0x178   :  { %v14680_v50 = vpack.c.bf16 %v14671_v5, %v1499_v9  ;;  %v1822_v9 = vrot.slane %v14412_v34, %v14305_v11  ;;  %v3011_v34 = vrot.slane %v14711_v57, %v14305_v11 }
 0x179   :  { %v904_v26 = vcombine.low %v896_v7, %v903_v13  ;;  %v174_v7 = vld [vmem:[%s19775_s0 + $0xfc] sm:$0x3]  ;;  %v920_v13 = vrot.slane %v906_v8, %v13882_v10 }
 0x17a   :  { %4403 = vrot.lane.b32.xlu1 %v2990_v61, %s13803_s16  ;;  %v1830_v36 = vcombine.high %v1822_v9, %v1822_v9  ;;  %v14750_v46 = vrot.slane %v1822_v9, %v14305_v11 }
 0x17b   :  { %4741 = vrot.lane.b32.xlu0 %v2990_v61, %s13801_s14  ;;  %13153 = vmatmul.mubr.msk.f32.gmra.mrb[58].mxu0 %vm1116_vm1, %v904_v26  ;;  %v175_v26 = vld [vmem:[%s19775_s0 + $0xfe] sm:$0x3] }
 0x17c   :  { %13155 = vmatprep.mubr.msk.f32.mxu0 %vm13797_vm0, %v19787_v2  ;;  %v923_v30 = vcombine.low %v174_v7, %v175_v26  ;;  %20020 = vst [vmem:[#allocation28_spill] sm:$0xff] %v14750_v46  ;;  %v14759_v7 = vrot.slane %v1830_v36, %v14305_v11  ;;  %v14793_v36 = vcombine.high %v14750_v46, %v14750_v46 }
 0x17e   :  { %4411 = vrot.lane.b32.xlu1 %v4254_v29, %s13803_s16  ;;  %v937_v60 = vrot.slane %v923_v30, %v13882_v10  ;;  %20021 = vst [vmem:[#allocation29_spill] sm:$0xff] %v14759_v7  ;;  %20024 = vst [vmem:[#allocation32_spill] sm:$0xff] %v14793_v36 }
 0x17f   :  { %4749 = vrot.lane.b32.xlu0 %v4254_v29, %s13801_s14  ;;  %v922_v29 = vcombine.low %v172_v63, %v173_v4  ;;  %v3095_v63 = vrot.slane %v14734_v33, %v14305_v11  ;;  %v1831_v4 = vcombine.high %v1829_v47, %v1829_v47  ;;  %v3039_v47 = vrot.slane %v14750_v46, %v14305_v11 }
 0x180   :  { %v14697_v42 = vpop.permute.xlu1 %4711 }
 0x181   :  { %v14706_v48 = vpop.permute.xlu0 %4029  ;;  %v930_v41 = vrot.slane %v922_v29, %v13882_v10  ;;  %v3053_v29 = vrot.slane %v14759_v7, %v14305_v11 }
 0x182   :  { %4743 = vrot.lane.b32.xlu1 %v3004_v28, %s13801_s14 }
 0x183   :  { %4065 = vrot.lane.b32.xlu0 %v2990_v61, %s13802_s15  ;;  %v921_v61 = vcombine.low %v913_v12, %v920_v13  ;;  %v938_v44 = vcombine.low %v930_v41, %v937_v60  ;;  %v3018_v12 = vrot.slane %v3011_v34, %v14305_v11  ;;  %v14774_v13 = vrot.slane %v1831_v4, %v14305_v11 }
 0x184   :  { %v14725_v15 = vpop.permute.xlu1 %4033  ;;  %v3046_v34 = vrot.slane %v3039_v47, %v14305_v11  ;;  %v3060_v41 = vrot.slane %v3053_v29, %v14305_v11 }
 0x185   :  { %v14736_v31 = vpop.permute.xlu0 %4031  ;;  %13156 = vmatmul.mubr.msk.f32.gmra.mrb[60].mxu0 %vm1116_vm1, %v921_v61  ;;  %20022 = vst [vmem:[#allocation30_spill] sm:$0xff] %v14774_v13  ;;  %v3109_v60 = vrot.slane %v14774_v13, %v14305_v11 }
 0x186   :  { %4751 = vrot.lane.b32.xlu1 %v4594_v23, %s13801_s14  ;;  %13158 = vmatprep.mubr.msk.f32.mxu0 %vm13797_vm0, %v19787_v2 }
 0x187   :  { %4405 = vrot.lane.b32.xlu0 %v3004_v28, %s13803_s16  ;;  %v3116_v29 = vrot.slane %v3109_v60, %v14305_v11 }
 0x188   :  { %v14743_v43 = vpop.permute.xlu1 %4035 }
 0x189   :  { %v14752_v8 = vpop.permute.xlu0 %4369  ;;  %13159 = vmatmul.mubr.msk.f32.gmra.mrb[62].mxu0 %vm1116_vm1, %v938_v44  ;;  %v1359_v44 = vpop.f32.mrb[36].mxu0 }
 0x18a   :  { %4067 = vrot.lane.b32.xlu1 %v3004_v28, %s13802_s15  ;;  %13161 = vmatprep.mubr.msk.f32.mxu0 %vm13797_vm0, %v19787_v2  ;;  %v3102_v28 = vrot.slane %v3095_v63, %v14305_v11  ;;  %v13121_v63 = vpop.f32.mrb[37].mxu0 }
 0x18b   :  { %4069 = vrot.lane.b32.xlu0 %v3018_v12, %s13802_s15  ;;  %v1364_v2 = vpop.f32.mrb[38].mxu0 }
 0x18c   :  { %v14761_v23 = vpop.permute.xlu1 %4371  ;;  %v1365_v63 = vadd.f32 %v14267_v32, %v1364_v2  ;;  %v13124_v49 = vpop.f32.mrb[39].mxu0 }
 0x18d   :  { %v14767_v9 = vpop.permute.xlu0 %4373  ;;  %v1369_v51 = vpop.f32.mrb[40].mxu0 }
 0x18e   :  { %4407 = vrot.lane.b32.xlu1 %v3018_v12, %s13803_s16  ;;  %v14813_v56 = vmax.f32 %v1365_v63, 0.0  ;;  %v3130_v63 = vrot.slane %v3123_v58, %v14305_v11  ;;  %v14848_v58 = vcombine.high %v14774_v13, %v14774_v13  ;;  %v1871_v13 = vrot.slane %v14470_v20, %v14305_v11  ;;  %v179_v20 = vld [vmem:[%s19775_s0 + $0x106] sm:$0x3] }
 0x18f   :  { %4745 = vrot.lane.b32.xlu0 %v3018_v12, %s13801_s14  ;;  %v1360_v12 = vadd.f32 %v14267_v32, %v1359_v44 }
 0x190   :  { %v14776_v26 = vpop.permute.xlu1 %4375  ;;  %20029 = vst [vmem:[#allocation37_spill] sm:$0xff] %v14848_v58  ;;  %v1879_v59 = vcombine.high %v1871_v13, %v1871_v13 }
 0x191   :  { %v14781_v30 = vpop.permute.xlu0 %4709  ;;  %v1501_v44 = vmax.f32 %v1360_v12, 0.0 }
 0x192   :  { %4419 = vrot.lane.b32.xlu1 %v3102_v28, %s13803_s16 }
 0x193   :  { %4073 = vrot.lane.b32.xlu0 %v3046_v34, %s13802_s15  ;;  %v3067_v34 = vrot.slane %v14793_v36, %v14305_v11  ;;  %v14822_v12 = vpack.c.bf16 %v14813_v56, %v1501_v44 }
 0x194   :  { %v14785_v61 = vpop.permute.xlu1 %4383 }
 0x195   :  { %20023 = vst [vmem:[#allocation31_spill] sm:$0xff] %v14785_v61  ;;  %v14796_v4 = vpop.permute.xlu0 %4037  ;;  %v3074_v60 = vrot.slane %v3067_v34, %v14305_v11 }
 0x196   :  { %4075 = vrot.lane.b32.xlu1 %v3060_v41, %s13802_s15 }
 0x197   :  { %4081 = vrot.lane.b32.xlu0 %v3102_v28, %s13802_s15 }
 0x198   :  { %v14799_v47 = vpop.permute.xlu1 %4039 }
 0x199   :  { %v14810_v38 = vpop.permute.xlu0 %4713 }
 0x19a   :  { %4083 = vrot.lane.b32.xlu1 %v3116_v29, %s13802_s15 }
 0x19b   :  { %4757 = vrot.lane.b32.xlu0 %v3102_v28, %s13801_s14  ;;  %v14833_v28 = vcombine.high %v14759_v7, %v14759_v7 }
 0x19c   :  { %v14815_v53 = vpop.permute.xlu1 %4379 }
 0x19d   :  { %v14824_v2 = vpop.permute.xlu0 %4721  ;;  %20027 = vst [vmem:[#allocation35_spill] sm:$0xff] %v14833_v28  ;;  %v3081_v1 = vrot.slane %v14833_v28, %v14305_v11  ;;  %v12611_v28 = vpack.c.bf16 %v14462_v17, %v14462_v17 }
 0x19e   :  { %20026 = vst [vmem:[#allocation34_spill] sm:$0xff] %v14824_v2  ;;  %4415 = vrot.lane.b32.xlu1 %v3074_v60, %s13803_s16  ;;  %v14884_v2 = vrot.slane %v1871_v13, %v14305_v11  ;;  %v182_v13 = vld [vmem:[%s19775_s0 + $0x10c] sm:$0x3] }
 0x19f   :  { %4077 = vrot.lane.b32.xlu0 %v3074_v60, %s13802_s15  ;;  %v3088_v36 = vrot.slane %v3081_v1, %v14305_v11  ;;  %v176_v1 = vld [vmem:[%s19775_s0 + $0x100] sm:$0x3]  ;;  %v1878_v0 = vrot.slane %v12611_v28, %v14305_v11  ;;  %v181_v28 = vld [vmem:[%s19775_s0 + $0x10a] sm:$0x3] }
 0x1a0   :  { %v14827_v49 = vpop.permute.xlu1 %4715  ;;  %20034 = vst [vmem:[#allocation42_spill] sm:$0xff] %v14884_v2 }
 0x1a1   :  { %v14835_v34 = vpop.permute.xlu0 %4045 }
 0x1a2   :  { %4423 = vrot.lane.b32.xlu1 %v3130_v63, %s13803_s16 }
 0x1a3   :  { %4413 = vrot.lane.b32.xlu0 %v3060_v41, %s13803_s16  ;;  %v3137_v41 = vrot.slane %v14848_v58, %v14305_v11  ;;  %v178_v58 = vld [vmem:[%s19775_s0 + $0x104] sm:$0x3] }
 0x1a4   :  { %v14838_v44 = vpop.permute.xlu1 %4723  ;;  %v940_v16 = vcombine.low %v178_v58, %v179_v20 }
 0x1a5   :  { %20028 = vst [vmem:[#allocation36_spill] sm:$0xff] %v14838_v44  ;;  %v14843_v18 = vpop.permute.xlu0 %4041  ;;  %v3144_v57 = vrot.slane %v3137_v41, %v14305_v11 }
 0x1a6   :  { %4759 = vrot.lane.b32.xlu1 %v3116_v29, %s13801_s14  ;;  %v954_v44 = vrot.slane %v940_v16, %v13882_v10  ;;  %v183_v16 = vld [vmem:[%s19775_s0 + $0x10e] sm:$0x3] }
 0x1a7   :  { %4421 = vrot.lane.b32.xlu0 %v3116_v29, %s13803_s16  ;;  %v177_v29 = vld [vmem:[%s19775_s0 + $0x102] sm:$0x3]  ;;  %v957_v20 = vcombine.low %v182_v13, %v183_v16 }
 0x1a8   :  { %v14850_v33 = vpop.permute.xlu1 %4047 }
 0x1a9   :  { %20030 = vst [vmem:[#allocation38_spill] sm:$0xff] %v14850_v33  ;;  %v14854_v7 = vpop.permute.xlu0 %4049 }
 0x1aa   :  { %20031 = vst [vmem:[#allocation39_spill] sm:$0xff] %v14854_v7  ;;  %4079 = vrot.lane.b32.xlu1 %v3088_v36, %s13802_s15 }
 0x1ab   :  { %4753 = vrot.lane.b32.xlu0 %v3074_v60, %s13801_s14  ;;  %v939_v60 = vcombine.low %v176_v1, %v177_v29  ;;  %v180_v1 = vld [vmem:[%s19775_s0 + $0x108] sm:$0x3] }
 0x1ac   :  { %v14863_v46 = vpop.permute.xlu1 %4387  ;;  %v956_v41 = vcombine.low %v180_v1, %v181_v28  ;;  %v971_v1 = vrot.slane %v957_v20, %v13882_v10 }
 0x1ad   :  { %20032 = vst [vmem:[#allocation40_spill] sm:$0xff] %v14863_v46  ;;  %v14875_v17 = vpop.permute.xlu0 %4377  ;;  %v947_v39 = vrot.slane %v939_v60, %v13882_v10  ;;  %v14907_v60 = vrot.slane %v1878_v0, %v14305_v11  ;;  %v3151_v46 = vrot.slane %v14884_v2, %v14305_v11 }
 0x1ae   :  { %20033 = vst [vmem:[#allocation41_spill] sm:$0xff] %v14875_v17  ;;  %4755 = vrot.lane.b32.xlu1 %v3088_v36, %s13801_s14  ;;  %v964_v6 = vrot.slane %v956_v41, %v13882_v10 }
 0x1af   :  { %4761 = vrot.lane.b32.xlu0 %v3130_v63, %s13801_s14  ;;  %v955_v29 = vcombine.low %v947_v39, %v954_v44  ;;  %20036 = vst [vmem:[#allocation44_spill] sm:$0xff] %v14907_v60  ;;  %v1370_v39 = vadd.f32 %v14267_v32, %v1369_v51  ;;  %v13127_v44 = vpop.f32.mrb[41].mxu0  ;;  %v14931_v51 = vcombine.high %v14907_v60, %v14907_v60 }
 0x1b0   :  { %v14886_v35 = vpop.permute.xlu1 %4043  ;;  %v972_v13 = vcombine.low %v964_v6, %v971_v1  ;;  %v1880_v6 = vcombine.high %v1878_v0, %v1878_v0  ;;  %v1909_v0 = vcombine.high %v14884_v2, %v14884_v2  ;;  %v1920_v60 = vrot.slane %v14527_v62, %v14305_v11 }
 0x1b1   :  { %v14900_v58 = vpop.permute.xlu0 %4717  ;;  %13162 = vmatmul.mubr.msk.f32.gmra.mrb[64].mxu0 %vm1116_vm1, %v955_v29  ;;  %20041 = vst [vmem:[#allocation48_spill] sm:$0xff] %v14931_v51  ;;  %v1374_v29 = vpop.f32.mrb[42].mxu0  ;;  %v1503_v20 = vmax.f32 %v1370_v39, 0.0 }
 0x1b2   :  { %20035 = vst [vmem:[#allocation43_spill] sm:$0xff] %v14900_v58  ;;  %4763 = vrot.lane.b32.xlu1 %v3144_v57, %s13801_s14  ;;  %v1901_v58 = vrot.slane %v1879_v59, %v14305_v11  ;;  %v3158_v59 = vrot.slane %v3151_v46, %v14305_v11  ;;  %v1375_v44 = vadd.f32 %v14267_v32, %v1374_v29 }
 0x1b3   :  { %4085 = vrot.lane.b32.xlu0 %v3130_v63, %s13802_s15  ;;  %v20039_v63 = vmov 0.0   ;;  %v3193_v32 = vrot.slane %v14931_v51, %v14305_v11 }
 0x1b4   :  { %v14909_v17 = vpop.permute.xlu1 %4051  ;;  %13164 = vmatprep.mubr.msk.f32.mxu0 %vm13797_vm0, %v20039_v63  ;;  %v3165_v41 = vrot.slane %v1901_v58, %v14305_v11  ;;  %v14940_v46 = vmax.f32 %v1375_v44, 0.0  ;;  %v1911_v2 = vcombine.high %v1901_v58, %v1901_v58 }
 0x1b5   :  { %20037 = vst [vmem:[#allocation45_spill] sm:$0xff] %v14909_v17  ;;  %v14919_v28 = vpop.permute.xlu0 %4385  ;;  %13165 = vmatmul.mubr.msk.f32.gmra.mrb[66].mxu0 %vm1116_vm1, %v972_v13  ;;  %v14954_v13 = vrot.slane %v1880_v6, %v14305_v11 }
 0x1b6   :  { %20038 = vst [vmem:[#allocation46_spill] sm:$0xff] %v14919_v28  ;;  %4087 = vrot.lane.b32.xlu1 %v3144_v57, %s13802_s15  ;;  %v13130_v28 = vpop.f32.mrb[43].mxu0  ;;  %13167 = vmatprep.mubr.msk.f32.mxu0 %vm13797_vm0, %v20039_v63  ;;  %v3172_v39 = vrot.slane %v3165_v41, %v14305_v11  ;;  %v4261_v41 = vrot.slane %v1909_v0, %v14305_v11 }
 0x1b7   :  { %4417 = vrot.lane.b32.xlu0 %v3088_v36, %s13803_s16  ;;  %v14951_v28 = vpack.c.bf16 %v14940_v46, %v1503_v20  ;;  %20044 = vst [vmem:[#allocation51_spill] sm:$0xff] %v14954_v13  ;;  %v3179_v20 = vrot.slane %v14954_v13, %v14305_v11  ;;  %v14975_v51 = vcombine.high %v14954_v13, %v14954_v13 }
 0x1b8   :  { %v14924_v16 = vpop.permute.xlu1 %4719  ;;  %v12612_v13 = vpack.c.bf16 %v14519_v54, %v14519_v54  ;;  %v15007_v54 = vld [vmem:[%s19777_s2] ss:$0 sm:$0xff] }
 0x1b9   :  { %20040 = vst [vmem:[#allocation47_spill] sm:$0xff] %v14924_v16  ;;  %v14935_v1 = vpop.permute.xlu0 %4725  ;;  %20049 = vst [vmem:[#allocation56_spill] sm:$0xff] %v14975_v51  ;;  %v3186_v0 = vrot.slane %v3179_v20, %v14305_v11  ;;  %v14994_v20 = vrot.slane %v1920_v60, %v14305_v11 }
 0x1ba   :  { %20042 = vst [vmem:[#allocation49_spill] sm:$0xff] %v14935_v1  ;;  %4427 = vrot.lane.b32.xlu1 %v3158_v59, %s13803_s16  ;;  %v4268_v1 = vrot.slane %v4261_v41, %v14305_v11 }
 0x1bb   :  { %4425 = vrot.lane.b32.xlu0 %v3144_v57, %s13803_s16  ;;  %v3200_v57 = vrot.slane %v3193_v32, %v14305_v11  ;;  %20052 = vst [vmem:[#allocation59_spill] sm:$0xff] %v14994_v20 }
 0x1bc   :  { %v14942_v36 = vpop.permute.xlu1 %4727 }
 0x1bd   :  { %20043 = vst [vmem:[#allocation50_spill] sm:$0xff] %v14942_v36  ;;  %v14956_v29 = vpop.permute.xlu0 %4381 }
 0x1be   :  { %20045 = vst [vmem:[#allocation52_spill] sm:$0xff] %v14956_v29  ;;  %4091 = vrot.lane.b32.xlu1 %v3172_v39, %s13802_s15 }
 0x1bf   :  { %4089 = vrot.lane.b32.xlu0 %v3158_v59, %s13802_s15 }
 0x1c0   :  { %v14959_v44 = vpop.permute.xlu1 %4055 }
 0x1c1   :  { %20046 = vst [vmem:[#allocation53_spill] sm:$0xff] %v14959_v44  ;;  %v14964_v36 = vpop.permute.xlu0 %4389 }
 0x1c2   :  { %20047 = vst [vmem:[#allocation54_spill] sm:$0xff] %v14964_v36  ;;  %4095 = vrot.lane.b32.xlu1 %v3200_v57, %s13802_s15 }
 0x1c3   :  { %4765 = vrot.lane.b32.xlu0 %v3158_v59, %s13801_s14  ;;  %v3207_v59 = vrot.slane %v14975_v51, %v14305_v11 }
 0x1c4   :  { %v14969_v6 = vpop.permute.xlu1 %4391 }
 0x1c5   :  { %20048 = vst [vmem:[#allocation55_spill] sm:$0xff] %v14969_v6  ;;  %v14977_v32 = vpop.permute.xlu0 %4393  ;;  %v3214_v62 = vrot.slane %v3207_v59, %v14305_v11  ;;  %v3221_v59 = vrot.slane %v14994_v20, %v14305_v11 }
 0x1c6   :  { %4431 = vrot.lane.b32.xlu1 %v4268_v1, %s13803_s16 }
 0x1c7   :  { %4093 = vrot.lane.b32.xlu0 %v3186_v0, %s13802_s15  ;;  %v4601_v0 = vrot.slane %v1911_v2, %v14305_v11 }
 0x1c8   :  { %v14983_v16 = vpop.permute.xlu1 %4059 }
 0x1c9   :  { %20050 = vst [vmem:[#allocation57_spill] sm:$0xff] %v14983_v16  ;;  %v14988_v41 = vpop.permute.xlu0 %4729  ;;  %v1379_v16 = vpop.f32.mrb[44].mxu0  ;;  %v4608_v2 = vrot.slane %v4601_v0, %v14305_v11  ;;  %v186_v0 = vld [vmem:[%s19775_s0 + $0x114] sm:$0x3] }
 0x1ca   :  { %20051 = vst [vmem:[#allocation58_spill] sm:$0xff] %v14988_v41  ;;  %4767 = vrot.lane.b32.xlu1 %v3172_v39, %s13801_s14  ;;  %v1380_v29 = vadd.f32 %v15007_v54, %v1379_v16  ;;  %v13133_v41 = vpop.f32.mrb[45].mxu0 }
 0x1cb   :  { %4429 = vrot.lane.b32.xlu0 %v3172_v39, %s13803_s16  ;;  %v3228_v41 = vrot.slane %v3221_v59, %v14305_v11 }
 0x1cc   :  { %v14996_v58 = vpop.permute.xlu1 %4395  ;;  %v1505_v6 = vmax.f32 %v1380_v29, 0.0 }
 0x1cd   :  { %20053 = vst [vmem:[#allocation60_spill] sm:$0xff] %v14996_v58  ;;  %v15001_v51 = vpop.permute.xlu0 %4057  ;;  %v15011_v58 = vrot.slane %v12612_v13, %v14305_v11 }
 0x1ce   :  { %20054 = vst [vmem:[#allocation61_spill] sm:$0xff] %v15001_v51  ;;  %4435 = vrot.lane.b32.xlu1 %v3214_v62, %s13803_s16  ;;  %v1384_v51 = vpop.f32.mrb[46].mxu0 }
 0x1cf   :  { %4433 = vrot.lane.b32.xlu0 %v3200_v57, %s13803_s16  ;;  %v1385_v36 = vadd.f32 %v15007_v54, %v1384_v51  ;;  %v13136_v44 = vpop.f32.mrb[47].mxu0  ;;  %v15027_v13 = vrot.slane %v15011_v58, %v14305_v11 }
 0x1d0   :  { %v15013_v39 = vpop.permute.xlu1 %4731 }
 0x1d1   :  { %20055 = vst [vmem:[#allocation62_spill] sm:$0xff] %v15013_v39  ;;  %v15020_v17 = vpop.permute.xlu0 %4397  ;;  %v15023_v16 = vmax.f32 %v1385_v36, 0.0  ;;  %20058 = vst [vmem:[#allocation65_spill] sm:$0xff] %v15027_v13  ;;  %v3277_v36 = vrot.slane %v15027_v13, %v14305_v11  ;;  %v15065_v39 = vcombine.high %v14994_v20, %v14994_v20 }
 0x1d2   :  { %20056 = vst [vmem:[#allocation63_spill] sm:$0xff] %v15020_v17  ;;  %4771 = vrot.lane.b32.xlu1 %v4608_v2, %s13801_s14  ;;  %v1928_v2 = vcombine.high %v1920_v60, %v1920_v60 }
 0x1d3   :  { %20057 = vst [vmem:[#allocation64_spill] sm:$0xff] %v15023_v16  ;;  %4769 = vrot.lane.b32.xlu0 %v4268_v1, %s13801_s14  ;;  %v15034_v29 = vpack.c.bf16 %v15023_v16, %v1505_v6  ;;  %v184_v1 = vld [vmem:[%s19775_s0 + $0x110] sm:$0x3]  ;;  %v185_v6 = vld [vmem:[%s19775_s0 + $0x112] sm:$0x3]  ;;  %v3284_v16 = vrot.slane %v3277_v36, %v14305_v11  ;;  %20063 = vst [vmem:[#allocation70_spill] sm:$0xff] %v15065_v39 }
 0x1d4   :  { %v15029_v57 = vpop.permute.xlu1 %4735  ;;  %v973_v17 = vcombine.low %v184_v1, %v185_v6  ;;  %v189_v1 = vld [vmem:[%s19775_s0 + $0x11a] sm:$0x3]  ;;  %v15078_v36 = vrot.slane %v1928_v2, %v14305_v11  ;;  %v3249_v2 = vrot.slane %v15065_v39, %v14305_v11 }
 0x1d5   :  { %20059 = vst [vmem:[#allocation66_spill] sm:$0xff] %v15029_v57  ;;  %20060 = vst [vmem:[#allocation67_spill] sm:$0xff] %v15034_v29  ;;  %v15036_v51 = vpop.permute.xlu0 %4733 }
 0x1d6   :  { %4099 = vrot.lane.b32.xlu1 %v3228_v41, %s13802_s15  ;;  %v981_v61 = vrot.slane %v973_v17, %v13882_v10  ;;  %20064 = vst [vmem:[#allocation71_spill] sm:$0xff] %v15078_v36 }
 0x1d7   :  { %4097 = vrot.lane.b32.xlu0 %v3214_v62, %s13802_s15 }
 0x1d8   :  { %v15039_v44 = vpop.permute.xlu1 %4399 }
 0x1d9   :  { %20061 = vst [vmem:[#allocation68_spill] sm:$0xff] %v15039_v44  ;;  %v15053_v59 = vpop.permute.xlu0 %4053  ;;  %v187_v44 = vld [vmem:[%s19775_s0 + $0x116] sm:$0x3] }
 0x1da   :  { %4775 = vrot.lane.b32.xlu1 %v3228_v41, %s13801_s14  ;;  %v974_v60 = vcombine.low %v186_v0, %v187_v44  ;;  %v191_v44 = vld [vmem:[%s19775_s0 + $0x11e] sm:$0x3]  ;;  %v990_v0 = vcombine.low %v188_v45, %v189_v1  ;;  %v3235_v45 = vrot.slane %v15078_v36, %v14305_v11 }
 0x1db   :  { %4773 = vrot.lane.b32.xlu0 %v3214_v62, %s13801_s14  ;;  %v190_v62 = vld [vmem:[%s19775_s0 + $0x11c] sm:$0x3] }
 0x1dc   :  { %v15059_v57 = vpop.permute.xlu1 %4063  ;;  %v988_v17 = vrot.slane %v974_v60, %v13882_v10  ;;  %v991_v20 = vcombine.low %v190_v62, %v191_v44  ;;  %v3242_v62 = vrot.slane %v3235_v45, %v14305_v11  ;;  %v13711_v44 = vld [vmem:[%s19778_s3 + $0x48] sm:$0xff]  }
 0x1dd   :  { %20062 = vst [vmem:[#allocation69_spill] sm:$0xff] %v15059_v57  ;;  %v15080_v6 = vpop.permute.xlu0 %4061 }
 0x1de   :  { %20065 = vst [vmem:[#allocation72_spill] sm:$0xff] %v15080_v6  ;;  %4783 = vrot.lane.b32.xlu1 %v3284_v16, %s13801_s14  ;;  %v989_v7 = vcombine.low %v981_v61, %v988_v17  ;;  %v998_v6 = vrot.slane %v990_v0, %v13882_v10  ;;  %v1005_v3 = vrot.slane %v991_v20, %v13882_v10  ;;  %v13712_v0 = vld [vmem:[%s19778_s3 + $0x8] sm:$0xff]  }
 0x1df   :  { %4437 = vrot.lane.b32.xlu0 %v3228_v41, %s13803_s16  ;;  %v3256_v61 = vrot.slane %v3249_v2, %v14305_v11  ;;  %v1929_v20 = vcombine.high %v15011_v58, %v15011_v58  ;;  %v1959_v58 = vcombine.high %v15027_v13, %v15027_v13 }
 0x1e0   :  { %v15087_v57 = vpop.permute.xlu1 %4071  ;;  %13168 = vmatmul.mubr.msk.f32.gmra.mrb[68].mxu0 %vm1116_vm1, %v989_v7  ;;  %v1006_v41 = vcombine.low %v998_v6, %v1005_v3  ;;  %v13709_v3 = vld [vmem:[%s19778_s3 + $0x40] sm:$0xff]  }
 0x1e1   :  { %20066 = vst [vmem:[#allocation73_spill] sm:$0xff] %v15087_v57  ;;  %v15094_v33 = vpop.permute.xlu0 %4737  ;;  %13170 = vmatprep.mubr.msk.f32.mxu0 %vm13797_vm0, %v20039_v63  ;;  %13681 = vmatprep.subr.bf16.mxu1 %v13709_v3  ;;  %v15127_v6 = vrot.slane %v1929_v20, %v14305_v11  ;;  %v3305_v45 = vrot.slane %v1959_v58, %v14305_v11 }
 0x1e2   :  { %20067 = vst [vmem:[#allocation74_spill] sm:$0xff] %v15094_v33  ;;  %4107 = vrot.lane.b32.xlu1 %v3284_v16, %s13802_s15  ;;  %12731 = vmatprep.subr.bf16.mxu0 %v13709_v3  ;;  %v13713_v3 = vld [vmem:[%s19778_s3 + $0x50] sm:$0xff]  }
 0x1e3   :  { %4445 = vrot.lane.b32.xlu0 %v3284_v16, %s13803_s16  ;;  %v13710_v16 = vld [vmem:[%s19778_s3] sm:$0xff]   ;;  %20071 = vst [vmem:[#allocation78_spill] sm:$0xff] %v15127_v6  ;;  %v3291_v20 = vrot.slane %v15127_v6, %v14305_v11  ;;  %v3312_v58 = vrot.slane %v3305_v45, %v14305_v11 }
 0x1e4   :  { %v15102_v60 = vpop.permute.xlu1 %4739  ;;  %13171 = vmatmul.mubr.msk.f32.gmra.mrb[70].mxu0 %vm1116_vm1, %v1006_v41  ;;  %13689 = vmatpush3.bf16.msra.mxu1 %v13710_v16 }
 0x1e5   :  { %20068 = vst [vmem:[#allocation75_spill] sm:$0xff] %v15102_v60  ;;  %v15108_v1 = vpop.permute.xlu0 %4401  ;;  %13173 = vmatprep.mubr.msk.f32.mxu0 %vm13797_vm0, %v20039_v63  ;;  %12732 = vmatpush3.bf16.msra.mxu0 %v13710_v16  ;;  %v3298_v13 = vrot.slane %v3291_v20, %v14305_v11  ;;  %v13716_v20 = vld [vmem:[%s19778_s3 + $0x18] sm:$0xff]  }
 0x1e6   :  { %20069 = vst [vmem:[#allocation76_spill] sm:$0xff] %v15108_v1  ;;  %4103 = vrot.lane.b32.xlu1 %v3256_v61, %s13802_s15  ;;  %13682 = vmatprep.subr.bf16.mxu1 %v13711_v44 }
 0x1e7   :  { %4101 = vrot.lane.b32.xlu0 %v3242_v62, %s13802_s15  ;;  %12733 = vmatprep.subr.bf16.mxu0 %v13711_v44  ;;  %v13714_v44 = vld [vmem:[%s19778_s3 + $0x10] sm:$0xff]  }
 0x1e8   :  { %v15118_v7 = vpop.permute.xlu1 %4747  ;;  %13690 = vmatpush3.bf16.msra.mxu1 %v13712_v0 }
 0x1e9   :  { %20070 = vst [vmem:[#allocation77_spill] sm:$0xff] %v15118_v7  ;;  %v15129_v17 = vpop.permute.xlu0 %4409  ;;  %12734 = vmatpush3.bf16.msra.mxu0 %v13712_v0  ;;  %13683 = vmatprep.subr.bf16.mxu1 %v13713_v3  ;;  %v12613_v0 = vpack.c.bf16 %v14671_v5, %v14671_v5 }
 0x1ea   :  { %20072 = vst [vmem:[#allocation79_spill] sm:$0xff] %v15129_v17  ;;  %4439 = vrot.lane.b32.xlu1 %v3242_v62, %s13803_s16  ;;  %12735 = vmatprep.subr.bf16.mxu0 %v13713_v3  ;;  %v15171_v3 = vcombine.high %v15078_v36, %v15078_v36 }
 0x1eb   :  { %4441 = vrot.lane.b32.xlu0 %v3256_v61, %s13803_s16  ;;  %v1976_v5 = vrot.slane %v12613_v0, %v14305_v11  ;;  %v1961_v0 = vcombine.high %v15127_v6, %v15127_v6  ;;  %v13719_v6 = vld [vmem:[%s19778_s3 + $0x68] sm:$0xff]  }
 0x1ec   :  { %v15138_v2 = vpop.permute.xlu1 %4403  ;;  %13691 = vmatpush3.bf16.msra.mxu1 %v13714_v44  ;;  %20078 = vst [vmem:[#allocation85_spill] sm:$0xff] %v15171_v3  ;;  %v3263_v36 = vrot.slane %v15171_v3, %v14305_v11  ;;  %v15201_v3 = vrot.slane %v14680_v50, %v14305_v11 }
 0x1ed   :  { %20073 = vst [vmem:[#allocation80_spill] sm:$0xff] %v15138_v2  ;;  %v15142_v41 = vpop.permute.xlu0 %4741  ;;  %12736 = vmatpush3.bf16.msra.mxu0 %v13714_v44  ;;  %v13717_v44 = vld [vmem:[%s19778_s3 + $0x60] sm:$0xff]   ;;  %v13722_v2 = vld [vmem:[%s19778_s3 + $0x30] sm:$0xff]  }
 0x1ee   :  { %20074 = vst [vmem:[#allocation81_spill] sm:$0xff] %v15142_v41  ;;  %4779 = vrot.lane.b32.xlu1 %v3256_v61, %s13801_s14  ;;  %v1389_v41 = vpop.f32.mrb[48].mxu0  ;;  %v1977_v33 = vcombine.high %v15201_v3, %v15201_v3 }
 0x1ef   :  { %4777 = vrot.lane.b32.xlu0 %v3242_v62, %s13801_s14  ;;  %v13715_v62 = vld [vmem:[%s19778_s3 + $0x58] sm:$0xff]   ;;  %v1390_v1 = vadd.f32 %v15007_v54, %v1389_v41  ;;  %v192_v41 = vld [vmem:[%s19775_s0 + $0x120] sm:$0x3] }
 0x1f0   :  { %v15150_v16 = vpop.permute.xlu1 %4411  ;;  %13684 = vmatprep.subr.bf16.mxu1 %v13715_v62  ;;  %12737 = vmatprep.subr.bf16.mxu0 %v13715_v62  ;;  %v13718_v62 = vld [vmem:[%s19778_s3 + $0x20] sm:$0xff]   ;;  %v15304_v14 = vrot.slane %v1977_v33, %v14305_v11 }
 0x1f1   :  { %20075 = vst [vmem:[#allocation82_spill] sm:$0xff] %v15150_v16  ;;  %v15157_v61 = vpop.permute.xlu0 %4749  ;;  %13692 = vmatpush3.bf16.msra.mxu1 %v13716_v20  ;;  %12738 = vmatpush3.bf16.msra.mxu0 %v13716_v20 }
 0x1f2   :  { %20076 = vst [vmem:[#allocation83_spill] sm:$0xff] %v15157_v61  ;;  %4111 = vrot.lane.b32.xlu1 %v3312_v58, %s13802_s15  ;;  %13685 = vmatprep.subr.bf16.mxu1 %v13717_v44  ;;  %v13139_v61 = vpop.f32.mrb[49].mxu0  ;;  %20096 = vst [vmem:[#allocation102_spill] sm:$0xff] %v15304_v14 }
 0x1f3   :  { %4109 = vrot.lane.b32.xlu0 %v3298_v13, %s13802_s15  ;;  %12739 = vmatprep.subr.bf16.mxu0 %v13717_v44  ;;  %v3270_v44 = vrot.slane %v3263_v36, %v14305_v11  ;;  %v13721_v36 = vld [vmem:[%s19778_s3 + $0x70] sm:$0xff]   ;;  %v193_v61 = vld [vmem:[%s19775_s0 + $0x122] sm:$0x3] }
 0x1f4   :  { %v15166_v45 = vpop.permute.xlu1 %4743  ;;  %v1007_v16 = vcombine.low %v192_v41, %v193_v61  ;;  %v20092_v61 = vmov 0.0|0.0  }
 0x1f5   :  { %20077 = vst [vmem:[#allocation84_spill] sm:$0xff] %v15166_v45  ;;  %v15177_v39 = vpop.permute.xlu0 %4065  ;;  %13693 = vmatpush3.bf16.msra.mxu1 %v13718_v62  ;;  %12740 = vmatpush3.bf16.msra.mxu0 %v13718_v62 }
 0x1f6   :  { %20079 = vst [vmem:[#allocation86_spill] sm:$0xff] %v15177_v39  ;;  %4447 = vrot.lane.b32.xlu1 %v3298_v13, %s13803_s16  ;;  %v15194_v39 = vrot.slane %v1976_v5, %v14305_v11  ;;  %13686 = vmatprep.subr.bf16.mxu1 %v13719_v6 }
 0x1f7   :  { %4449 = vrot.lane.b32.xlu0 %v3312_v58, %s13803_s16  ;;  %12741 = vmatprep.subr.bf16.mxu0 %v13719_v6 }
 0x1f8   :  { %v15183_v7 = vpop.permute.xlu1 %4751  ;;  %20081 = vst [vmem:[#allocation88_spill] sm:$0xff] %v15194_v39  ;;  %v3347_v62 = vrot.slane %v15194_v39, %v14305_v11 }
 0x1f9   :  { %20080 = vst [vmem:[#allocation87_spill] sm:$0xff] %v15183_v7  ;;  %v15196_v20 = vpop.permute.xlu0 %4405  ;;  %v194_v7 = vld [vmem:[%s19775_s0 + $0x124] sm:$0x3] }
 0x1fa   :  { %20082 = vst [vmem:[#allocation89_spill] sm:$0xff] %v15196_v20  ;;  %4787 = vrot.lane.b32.xlu1 %v3312_v58, %s13801_s14  ;;  %v4275_v20 = vrot.slane %v1961_v0, %v14305_v11  ;;  %v13720_v58 = vld [vmem:[%s19778_s3 + $0x28] sm:$0xff]   ;;  %v1978_v0 = vcombine.high %v1976_v5, %v1976_v5  ;;  %v3354_v5 = vrot.slane %v3347_v62, %v14305_v11 }
 0x1fb   :  { %4785 = vrot.lane.b32.xlu0 %v3298_v13, %s13801_s14  ;;  %13694 = vmatpush3.bf16.msra.mxu1 %v13720_v58  ;;  %v1985_v13 = vrot.slane %v15201_v3, %v14305_v11  ;;  %v198_v3 = vld [vmem:[%s19775_s0 + $0x12c] sm:$0x3] }
 0x1fc   :  { %v15206_v45 = vpop.permute.xlu1 %4067  ;;  %12742 = vmatpush3.bf16.msra.mxu0 %v13720_v58  ;;  %v4282_v6 = vrot.slane %v4275_v20, %v14305_v11  ;;  %13687 = vmatprep.subr.bf16.mxu1 %v13721_v36  ;;  %v13723_v20 = vld [vmem:[%s19778_s3 + $0x78] sm:$0xff]  }
 0x1fd   :  { %20083 = vst [vmem:[#allocation90_spill] sm:$0xff] %v15206_v45  ;;  %v15214_v50 = vpop.permute.xlu0 %4069  ;;  %12743 = vmatprep.subr.bf16.mxu0 %v13721_v36  ;;  %v4615_v58 = vrot.slane %v1985_v13, %v14305_v11  ;;  %v15247_v36 = vrot.slane %v1978_v0, %v14305_v11  ;;  %v1507_v0 = vmax.f32 %v1390_v1, 0.0 }
 0x1fe   :  { %20084 = vst [vmem:[#allocation91_spill] sm:$0xff] %v15214_v50  ;;  %4443 = vrot.lane.b32.xlu1 %v3270_v44, %s13803_s16  ;;  %v1015_v50 = vrot.slane %v1007_v16, %v13882_v10 }
 0x1ff   :  { %4781 = vrot.lane.b32.xlu0 %v3270_v44, %s13801_s14  ;;  %13695 = vmatpush3.bf16.msra.mxu1 %v13722_v2  ;;  %20087 = vst [vmem:[#allocation94_spill] sm:$0xff] %v15247_v36  ;;  %v4622_v29 = vrot.slane %v4615_v58, %v14305_v11  ;;  %v3361_v16 = vrot.slane %v15247_v36, %v14305_v11  ;;  %v199_v58 = vld [vmem:[%s19775_s0 + $0x12e] sm:$0x3] }
 0x200   :  { %v15224_v45 = vpop.permute.xlu1 %4407  ;;  %12744 = vmatpush3.bf16.msra.mxu0 %v13722_v2  ;;  %v195_v2 = vld [vmem:[%s19775_s0 + $0x126] sm:$0x3]  ;;  %13688 = vmatprep.subr.bf16.mxu1 %v13723_v20 }
 0x201   :  { %20085 = vst [vmem:[#allocation92_spill] sm:$0xff] %v15224_v45  ;;  %v15232_v17 = vpop.permute.xlu0 %4745  ;;  %v13724_v45 = vld [vmem:[%s19778_s3 + $0x38] sm:$0xff]   ;;  %12745 = vmatprep.subr.bf16.mxu0 %v13723_v20 }
 0x202   :  { %20086 = vst [vmem:[#allocation93_spill] sm:$0xff] %v15232_v17  ;;  %4451 = vrot.lane.b32.xlu1 %v4282_v6, %s13803_s16  ;;  %v1394_v17 = vpop.f32.mrb[50].mxu0 }
 0x203   :  { %4105 = vrot.lane.b32.xlu0 %v3270_v44, %s13802_s15  ;;  %v1395_v60 = vadd.f32 %v15007_v54, %v1394_v17  ;;  %v1008_v44 = vcombine.low %v194_v7, %v195_v2  ;;  %13696 = vmatpush3.bf16.msra.mxu1 %v13724_v45  ;;  %v196_v7 = vld [vmem:[%s19775_s0 + $0x128] sm:$0x3]  ;;  %v197_v17 = vld [vmem:[%s19775_s0 + $0x12a] sm:$0x3]  ;;  %v15297_v2 = vcombine.high %v1985_v13, %v1985_v13 }
 0x204   :  { %v15249_v62 = vpop.permute.xlu1 %4419  ;;  %12746 = vmatpush3.bf16.msra.mxu0 %v13724_v45  ;;  %v1024_v45 = vcombine.low %v196_v7, %v197_v17  ;;  %v15323_v17 = vcombine.high %v15304_v14, %v15304_v14 }
 0x205   :  { %20088 = vst [vmem:[#allocation95_spill] sm:$0xff] %v15249_v62  ;;  %v13142_v62 = vpop.f32.mrb[51].mxu0  ;;  %v15262_v57 = vpop.permute.xlu0 %4073  ;;  %v15269_v41 = vmax.f32 %v1395_v60, 0.0  ;;  %v1022_v1 = vrot.slane %v1008_v44, %v13882_v10  ;;  %v15285_v60 = vcombine.high %v15194_v39, %v15194_v39  ;;  %13507 = vmatprep.subr.bf16.mxu0 %v20092_v61  ;;  %20094 = vst [vmem:[#allocation100_spill] sm:$0xff] %v15297_v2 }
 0x206   :  { %4455 = vrot.lane.b32.xlu1 %v3354_v5, %s13803_s16  ;;  %v1025_v39 = vcombine.low %v198_v3, %v199_v58  ;;  %v3319_v33 = vrot.slane %v15297_v2, %v14305_v11  ;;  %20099 = vst [vmem:[#allocation105_spill] sm:$0xff] %v15323_v17 }
 0x207   :  { %20089 = vst [vmem:[#allocation96_spill] sm:$0xff] %v15269_v41  ;;  %4789 = vrot.lane.b32.xlu0 %v4282_v6, %s13801_s14  ;;  %20091 = vst [vmem:[#allocation98_spill] sm:$0xff] %v15285_v60  ;;  %v15295_v6 = vpack.c.bf16 %v15269_v41, %v1507_v0  ;;  %v1023_v62 = vcombine.low %v1015_v50, %v1022_v1  ;;  %v3368_v50 = vrot.slane %v3361_v16, %v14305_v11 }
 0x208   :  { %v15278_v20 = vpop.permute.xlu1 %4075  ;;  %v3375_v13 = vrot.slane %v15285_v60, %v14305_v11 }
 0x209   :  { %20090 = vst [vmem:[#allocation97_spill] sm:$0xff] %v15278_v20  ;;  %20093 = vst [vmem:[#allocation99_spill] sm:$0xff] %v15295_v6  ;;  %v15299_v44 = vpop.permute.xlu0 %4081  ;;  %v1032_v20 = vrot.slane %v1024_v45, %v13882_v10  ;;  %13174 = vmatmul.mubr.msk.f32.gmra.mrb[72].mxu0 %vm1116_vm1, %v1023_v62  ;;  %v15343_v45 = vcombine.high %v15247_v36, %v15247_v36 }
 0x20a   :  { %20095 = vst [vmem:[#allocation101_spill] sm:$0xff] %v15299_v44  ;;  %4791 = vrot.lane.b32.xlu1 %v4622_v29, %s13801_s14  ;;  %13176 = vmatprep.mubr.msk.f32.mxu0 %vm13797_vm0, %v20039_v63  ;;  %v1039_v29 = vrot.slane %v1025_v39, %v13882_v10  ;;  %v3382_v3 = vrot.slane %v3375_v13, %v14305_v11 }
 0x20b   :  { %4117 = vrot.lane.b32.xlu0 %v3354_v5, %s13802_s15  ;;  %20101 = vst [vmem:[#allocation107_spill] sm:$0xff] %v15343_v45  ;;  %v1762_v13 = vcombine.high %v14516_v52, %v14516_v52  ;;  %v3389_v61 = vrot.slane %v15343_v45, %v14305_v11 }
 0x20c   :  { %v15307_v7 = vpop.permute.xlu1 %4083  ;;  %v1040_v1 = vcombine.low %v1032_v20, %v1039_v29  ;;  %v3326_v20 = vrot.slane %v3319_v33, %v14305_v11  ;;  %v12614_v29 = vpack.c.bf16 %v14813_v56, %v14813_v56  ;;  %v2018_v33 = vrot.slane %v14822_v12, %v14305_v11 }
 0x20d   :  { %20097 = vst [vmem:[#allocation103_spill] sm:$0xff] %v15307_v7  ;;  %v15316_v0 = vpop.permute.xlu0 %4757  ;;  %v5640_v36 = vsel %vm5577_vm2, %v1762_v13, %v15053_v59  ;;  %v1814_v56 = vcombine.high %v14638_v40, %v14638_v40  ;;  %v3396_v59 = vrot.slane %v3389_v61, %v14305_v11 }
 0x20e   :  { %20098 = vst [vmem:[#allocation104_spill] sm:$0xff] %v15316_v0  ;;  %4119 = vrot.lane.b32.xlu1 %v3368_v50, %s13802_s15  ;;  %13177 = vmatmul.mubr.msk.f32.gmra.mrb[74].mxu0 %vm1116_vm1, %v1040_v1  ;;  %v5920_v52 = vsel %vm5878_vm3, %v5640_v36, %v14977_v32  ;;  %v15368_v12 = vrot.slane %v12614_v29, %v14305_v11 }
 0x20f   :  { %4793 = vrot.lane.b32.xlu0 %v3354_v5, %s13801_s14  ;;  %13179 = vmatprep.mubr.msk.f32.mxu0 %vm13797_vm0, %v20039_v63  ;;  %v3333_v5 = vrot.slane %v15323_v17, %v14305_v11  ;;  %v5670_v13 = vsel %vm5577_vm2, %v1814_v56, %v15262_v57  ;;  %v15383_v32 = vsel %vm6079_vm4, %v5920_v52, %v15036_v51  ;;  %v200_v51 = vld [vmem:[%s19775_s0 + $0x130] sm:$0x3] }
 0x210   :  { %v15325_v16 = vpop.permute.xlu1 %4415  ;;  %20105 = vst [vmem:[#allocation111_spill] sm:$0xff] %v15383_v32  ;;  %v2026_v29 = vcombine.high %v2018_v33, %v2018_v33  ;;  %v15390_v61 = vrot.slane %v15368_v12, %v14305_v11 }
 0x211   :  { %v15332_v39 = vpop.permute.xlu0 %4077 }
 0x212   :  { %4459 = vrot.lane.b32.xlu1 %v3382_v3, %s13803_s16  ;;  %20106 = vst [vmem:[#allocation112_spill] sm:$0xff] %v15390_v61  ;;  %v15416_v17 = vrot.slane %v2026_v29, %v14305_v11  ;;  %v4289_v41 = vrot.slane %v15390_v61, %v14305_v11  ;;  %v205_v29 = vld [vmem:[%s19775_s0 + $0x13a] sm:$0x3] }
 0x213   :  { %4113 = vrot.lane.b32.xlu0 %v3326_v20, %s13802_s15  ;;  %v3340_v20 = vrot.slane %v3333_v5, %v14305_v11 }
 0x214   :  { %v15336_v58 = vpop.permute.xlu1 %4423  ;;  %20109 = vst [vmem:[#allocation115_spill] sm:$0xff] %v15416_v17  ;;  %v3417_v7 = vrot.slane %v15416_v17, %v14305_v11 }
 0x215   :  { %20100 = vst [vmem:[#allocation106_spill] sm:$0xff] %v15336_v58  ;;  %v4414_v62 = vpop.permute.xlu0 %4413 }
 0x216   :  { %4795 = vrot.lane.b32.xlu1 %v3368_v50, %s13801_s14  ;;  %v5940_v40 = vsel %vm5878_vm3, %v5670_v13, %v4414_v62  ;;  %v203_v13 = vld [vmem:[%s19775_s0 + $0x136] sm:$0x3] }
 0x217   :  { %4457 = vrot.lane.b32.xlu0 %v3368_v50, %s13803_s16  ;;  %v15371_v50 = vrot.slane %v2018_v33, %v14305_v11  ;;  %v202_v33 = vld [vmem:[%s19775_s0 + $0x134] sm:$0x3] }
 0x218   :  { %v15352_v1 = vpop.permute.xlu1 %4759  ;;  %v1042_v2 = vcombine.low %v202_v33, %v203_v13 }
 0x219   :  { %20102 = vst [vmem:[#allocation108_spill] sm:$0xff] %v15352_v1  ;;  %v15360_v60 = vpop.permute.xlu0 %4421  ;;  %20104 = vst [vmem:[#allocation110_spill] sm:$0xff] %v15371_v50  ;;  %v3403_v62 = vrot.slane %v15371_v50, %v14305_v11  ;;  %v15450_v44 = vcombine.high %v15371_v50, %v15371_v50 }
 0x21a   :  { %20103 = vst [vmem:[#allocation109_spill] sm:$0xff] %v15360_v60  ;;  %4115 = vrot.lane.b32.xlu1 %v3340_v20, %s13802_s15 }
 0x21b   :  { %4797 = vrot.lane.b32.xlu0 %v3382_v3, %s13801_s14  ;;  %20113 = vst [vmem:[#allocation119_spill] sm:$0xff] %v15450_v44 }
 0x21c   :  { %v15373_v5 = vpop.permute.xlu1 %4079 }
 0x21d   :  { %v4754_v45 = vpop.permute.xlu0 %4753 }
 0x21e   :  { %4799 = vrot.lane.b32.xlu1 %v3396_v59, %s13801_s14  ;;  %v15386_v36 = vsel %vm6079_vm4, %v5940_v40, %v4754_v45  ;;  %v201_v45 = vld [vmem:[%s19775_s0 + $0x132] sm:$0x3] }
 0x21f   :  { %4121 = vrot.lane.b32.xlu0 %v3382_v3, %s13802_s15  ;;  %v1399_v3 = vpop.f32.mrb[52].mxu0  ;;  %v1041_v40 = vcombine.low %v200_v51, %v201_v45  ;;  %v1056_v51 = vrot.slane %v1042_v2, %v13882_v10  ;;  %v207_v2 = vld [vmem:[%s19775_s0 + $0x13e] sm:$0x3] }
 0x220   :  { %v15394_v56 = vpop.permute.xlu1 %4755  ;;  %v1400_v57 = vadd.f32 %v15007_v54, %v1399_v3  ;;  %v13145_v14 = vpop.f32.mrb[53].mxu0 }
 0x221   :  { %20107 = vst [vmem:[#allocation113_spill] sm:$0xff] %v15394_v56  ;;  %v15408_v52 = vpop.permute.xlu0 %4761  ;;  %v1049_v60 = vrot.slane %v1041_v40, %v13882_v10  ;;  %v204_v14 = vld [vmem:[%s19775_s0 + $0x138] sm:$0x3] }
 0x222   :  { %20108 = vst [vmem:[#allocation114_spill] sm:$0xff] %v15408_v52  ;;  %4123 = vrot.lane.b32.xlu1 %v3396_v59, %s13802_s15  ;;  %v3410_v52 = vrot.slane %v3403_v62, %v14305_v11  ;;  %v1404_v33 = vpop.f32.mrb[54].mxu0  ;;  %v1058_v62 = vcombine.low %v204_v14, %v205_v29  ;;  %v1509_v3 = vmax.f32 %v1400_v57, 0.0 }
 0x223   :  { %4453 = vrot.lane.b32.xlu0 %v3340_v20, %s13803_s16  ;;  %v206_v20 = vld [vmem:[%s19775_s0 + $0x13c] sm:$0x3]  ;;  %v1405_v13 = vadd.f32 %v15007_v54, %v1404_v33  ;;  %v1057_v40 = vcombine.low %v1049_v60, %v1056_v51  ;;  %v13148_v61 = vpop.f32.mrb[55].mxu0  ;;  %v2027_v51 = vcombine.high %v15368_v12, %v15368_v12  ;;  %v3431_v33 = vrot.slane %v15450_v44, %v14305_v11 }
 0x224   :  { %v15420_v6 = vpop.permute.xlu1 %4763  ;;  %v1066_v57 = vrot.slane %v1058_v62, %v13882_v10 }
 0x225   :  { %20110 = vst [vmem:[#allocation116_spill] sm:$0xff] %v15420_v6  ;;  %v15432_v45 = vpop.permute.xlu0 %4085  ;;  %v1059_v6 = vcombine.low %v206_v20, %v207_v2  ;;  %v15453_v14 = vmax.f32 %v1405_v13, 0.0  ;;  %13180 = vmatmul.mubr.msk.f32.gmra.mrb[76].mxu0 %vm1116_vm1, %v1057_v40  ;;  %v2055_v12 = vrot.slane %v2027_v51, %v14305_v11  ;;  %v2058_v40 = vcombine.high %v15416_v17, %v15416_v17 }
 0x226   :  { %20111 = vst [vmem:[#allocation117_spill] sm:$0xff] %v15432_v45  ;;  %4463 = vrot.lane.b32.xlu1 %v3410_v52, %s13803_s16  ;;  %v4296_v45 = vrot.slane %v4289_v41, %v14305_v11  ;;  %13182 = vmatprep.mubr.msk.f32.mxu0 %vm13797_vm0, %v20039_v63 }
 0x227   :  { %4461 = vrot.lane.b32.xlu0 %v3396_v59, %s13803_s16  ;;  %20114 = vst [vmem:[#allocation120_spill] sm:$0xff] %v15453_v14  ;;  %v1073_v60 = vrot.slane %v1059_v6, %v13882_v10  ;;  %v15463_v41 = vpack.c.bf16 %v15453_v14, %v1509_v3  ;;  %v3424_v6 = vrot.slane %v3417_v7, %v14305_v11 }
 0x228   :  { %v15442_v58 = vpop.permute.xlu1 %4087  ;;  %v3438_v7 = vrot.slane %v3431_v33, %v14305_v11  ;;  %v4629_v13 = vrot.slane %v2055_v12, %v14305_v11  ;;  %v15503_v51 = vcombine.high %v2055_v12, %v2055_v12  ;;  %v209_v12 = vld [vmem:[%s19775_s0 + $0x142] sm:$0x3] }
 0x229   :  { %20112 = vst [vmem:[#allocation118_spill] sm:$0xff] %v15442_v58  ;;  %v15457_v61 = vpop.permute.xlu0 %4417  ;;  %20115 = vst [vmem:[#allocation121_spill] sm:$0xff] %v15463_v41  ;;  %v1074_v59 = vcombine.low %v1066_v57, %v1073_v60 }
 0x22a   :  { %4471 = vrot.lane.b32.xlu1 %v4296_v45, %s13803_s16  ;;  %20119 = vst [vmem:[#allocation125_spill] sm:$0xff] %v15503_v51 }
 0x22b   :  { %4125 = vrot.lane.b32.xlu0 %v3410_v52, %s13802_s15  ;;  %13183 = vmatmul.mubr.msk.f32.gmra.mrb[78].mxu0 %vm1116_vm1, %v1074_v59  ;;  %v4636_v59 = vrot.slane %v4629_v13, %v14305_v11  ;;  %v208_v13 = vld [vmem:[%s19775_s0 + $0x140] sm:$0x3] }
 0x22c   :  { %v15467_v29 = vpop.permute.xlu1 %4427  ;;  %13185 = vmatprep.mubr.msk.f32.mxu0 %vm13797_vm0, %v20039_v63 }
 0x22d   :  { %20116 = vst [vmem:[#allocation122_spill] sm:$0xff] %v15467_v29  ;;  %v15474_v20 = vpop.permute.xlu0 %4425 }
 0x22e   :  { %20117 = vst [vmem:[#allocation123_spill] sm:$0xff] %v15474_v20  ;;  %4127 = vrot.lane.b32.xlu1 %v3424_v6, %s13802_s15  ;;  %v212_v20 = vld [vmem:[%s19775_s0 + $0x148] sm:$0x3] }
 0x22f   :  { %4801 = vrot.lane.b32.xlu0 %v3410_v52, %s13801_s14  ;;  %v2067_v52 = vrot.slane %v14951_v28, %v14305_v11 }
 0x230   :  { %v15480_v2 = vpop.permute.xlu1 %4091 }
 0x231   :  { %v15484_v62 = vpop.permute.xlu0 %4089  ;;  %v2075_v17 = vcombine.high %v2067_v52, %v2067_v52  ;;  %v15509_v44 = vrot.slane %v2067_v52, %v14305_v11 }
 0x232   :  { %4467 = vrot.lane.b32.xlu1 %v3438_v7, %s13803_s16 }
 0x233   :  { %4809 = vrot.lane.b32.xlu0 %v4296_v45, %s13801_s14  ;;  %v3445_v45 = vrot.slane %v2058_v40, %v14305_v11  ;;  %20120 = vst [vmem:[#allocation126_spill] sm:$0xff] %v15509_v44  ;;  %v210_v40 = vld [vmem:[%s19775_s0 + $0x144] sm:$0x3]  ;;  %v15533_v41 = vrot.slane %v2075_v17, %v14305_v11  ;;  %v213_v17 = vld [vmem:[%s19775_s0 + $0x14a] sm:$0x3] }
 0x234   :  { %v15487_v3 = vpop.permute.xlu1 %4095 }
 0x235   :  { %v15493_v57 = vpop.permute.xlu0 %4765  ;;  %v3452_v28 = vrot.slane %v3445_v45, %v14305_v11  ;;  %v1075_v45 = vcombine.low %v208_v13, %v209_v12  ;;  %20122 = vst [vmem:[#allocation128_spill] sm:$0xff] %v15533_v41  ;;  %v214_v13 = vld [vmem:[%s19775_s0 + $0x14c] sm:$0x3]  ;;  %v3487_v56 = vrot.slane %v15533_v41, %v14305_v11 }
 0x236   :  { %20118 = vst [vmem:[#allocation124_spill] sm:$0xff] %v15493_v57  ;;  %4803 = vrot.lane.b32.xlu1 %v3424_v6, %s13801_s14  ;;  %v3473_v57 = vrot.slane %v15509_v44, %v14305_v11 }
 0x237   :  { %4129 = vrot.lane.b32.xlu0 %v3438_v7, %s13802_s15  ;;  %v1083_v29 = vrot.slane %v1075_v45, %v13882_v10 }
 0x238   :  { %v15498_v60 = vpop.permute.xlu1 %4431  ;;  %v3480_v0 = vrot.slane %v3473_v57, %v14305_v11 }
 0x239   :  { %v15505_v33 = vpop.permute.xlu0 %4093 }
 0x23a   :  { %4811 = vrot.lane.b32.xlu1 %v4636_v59, %s13801_s14  ;;  %v211_v59 = vld [vmem:[%s19775_s0 + $0x146] sm:$0x3] }
 0x23b   :  { %4465 = vrot.lane.b32.xlu0 %v3424_v6, %s13803_s16  ;;  %v3459_v6 = vrot.slane %v15503_v51, %v14305_v11  ;;  %v1076_v14 = vcombine.low %v210_v40, %v211_v59  ;;  %v1092_v40 = vcombine.low %v212_v20, %v213_v17  ;;  %v12615_v59 = vpack.c.bf16 %v14940_v46, %v14940_v46 }
 0x23c   :  { %v15511_v50 = vpop.permute.xlu1 %4767  ;;  %v5607_v17 = vsel %vm5577_vm2, %v14315_v24, %v14736_v31  ;;  %v5610_v24 = vsel %vm5577_vm2, %v14318_v25, %v14725_v15  ;;  %v5613_v31 = vsel %vm5577_vm2, %v14321_v27, %v14743_v43  ;;  %v1409_v27 = vpop.f32.mrb[56].mxu0 }
 0x23d   :  { %20121 = vst [vmem:[#allocation127_spill] sm:$0xff] %v15511_v50  ;;  %v15524_v52 = vpop.permute.xlu0 %4429  ;;  %v1090_v51 = vrot.slane %v1076_v14, %v13882_v10  ;;  %v3466_v12 = vrot.slane %v3459_v6, %v14305_v11  ;;  %v215_v14 = vld [vmem:[%s19775_s0 + $0x14e] sm:$0x3]  ;;  %v15568_v6 = vcombine.high %v15509_v44, %v15509_v44  ;;  %v1100_v20 = vrot.slane %v1092_v40, %v13882_v10 }
 0x23e   :  { %4131 = vrot.lane.b32.xlu1 %v3452_v28, %s13802_s15  ;;  %v1093_v58 = vcombine.low %v214_v13, %v215_v14  ;;  %v2074_v57 = vrot.slane %v12615_v59, %v14305_v11  ;;  %v5898_v14 = vsel %vm5878_vm3, %v5607_v17, %v14761_v23  ;;  %v5604_v40 = vsel %vm5577_vm2, %v14311_v22, %v14706_v48 }
 0x23f   :  { %4805 = vrot.lane.b32.xlu0 %v3438_v7, %s13801_s14  ;;  %v1091_v45 = vcombine.low %v1083_v29, %v1090_v51  ;;  %20123 = vst [vmem:[#allocation129_spill] sm:$0xff] %v15568_v6  ;;  %v5896_v23 = vsel %vm5878_vm3, %v5604_v40, %v14752_v8  ;;  %v5900_v48 = vsel %vm5878_vm3, %v5610_v24, %v14767_v9  ;;  %v13151_v9 = vpop.f32.mrb[57].mxu0  ;;  %v20137_v40 = vld [vmem:[#allocation16_spill] sm:$0xff] }
 0x240   :  { %v15535_v50 = vpop.permute.xlu1 %4435  ;;  %v1107_v46 = vrot.slane %v1093_v58, %v13882_v10  ;;  %v3494_v58 = vrot.slane %v3487_v56, %v14305_v11  ;;  %v2076_v56 = vcombine.high %v2074_v57, %v2074_v57  ;;  %v5902_v15 = vsel %vm5878_vm3, %v5613_v31, %v14776_v26 }
 0x241   :  { %v15551_v7 = vpop.permute.xlu0 %4433  ;;  %13186 = vmatmul.mubr.msk.f32.gmra.mrb[80].mxu0 %vm1116_vm1, %v1091_v45  ;;  %v15614_v45 = vrot.slane %v2074_v57, %v14305_v11  ;;  %v15626_v43 = vsel %vm6079_vm4, %v5896_v23, %v14781_v30  ;;  %v1410_v8 = vadd.f32 %v15007_v54, %v1409_v27 }
 0x242   :  { %4807 = vrot.lane.b32.xlu1 %v3452_v28, %s13801_s14  ;;  %13188 = vmatprep.mubr.msk.f32.mxu0 %vm13797_vm0, %v20039_v63  ;;  %v1108_v51 = vcombine.low %v1100_v20, %v1107_v46  ;;  %v15637_v46 = vsel %vm6079_vm4, %v5900_v48, %v14810_v38  ;;  %v15662_v38 = vrot.slane %v2076_v56, %v14305_v11  ;;  %v20138_v48 = vld [vmem:[#allocation31_spill] sm:$0xff] }
 0x243   :  { %4133 = vrot.lane.b32.xlu0 %v3466_v12, %s13802_s15  ;;  %v3501_v12 = vrot.slane %v15568_v6, %v14305_v11  ;;  %20124 = vst [vmem:[#allocation130_spill] sm:$0xff] %v15614_v45  ;;  %20125 = vst [vmem:[#allocation131_spill] sm:$0xff] %v15637_v46  ;;  %v1511_v31 = vmax.f32 %v1410_v8, 0.0 }
 0x244   :  { %v15560_v1 = vpop.permute.xlu1 %4771  ;;  %20129 = vst [vmem:[#allocation135_spill] sm:$0xff] %v15662_v38 }
 0x245   :  { %v15573_v29 = vpop.permute.xlu0 %4769  ;;  %13189 = vmatmul.mubr.msk.f32.gmra.mrb[82].mxu0 %vm1116_vm1, %v1108_v51  ;;  %v15620_v25 = vrot.slane %v3501_v12, %v14305_v11  ;;  %v20131_v51 = vld [vmem:[#allocation67_spill] sm:$0xff]  ;;  %v20135_v12 = vld [vmem:[#allocation14_spill] sm:$0xff] }
 0x246   :  { %4135 = vrot.lane.b32.xlu1 %v3480_v0, %s13802_s15  ;;  %13191 = vmatprep.mubr.msk.f32.mxu0 %vm13797_vm0, %v20039_v63 }
 0x247   :  { %4469 = vrot.lane.b32.xlu0 %v3452_v28, %s13803_s16  ;;  %v15611_v28 = vsel %vm6079_vm4, %v5898_v14, %v14697_v42  ;;  %v5619_v42 = vsel %vm5577_vm2, %v14357_v55, %v14799_v47  ;;  %v15647_v55 = vcombine.high %v15533_v41, %v15533_v41  ;;  %v15651_v47 = vsel %vm6079_vm4, %v5902_v15, %v14827_v49  ;;  %v20139_v15 = vld [vmem:[#allocation45_spill] sm:$0xff]  ;;  %v20175_v41 = vld [vmem:[#allocation34_spill] sm:$0xff] }
 0x248   :  { %v15582_v13 = vpop.permute.xlu1 %4099  ;;  %v5906_v26 = vsel %vm5878_vm3, %v5619_v42, %v14815_v53  ;;  %20127 = vst [vmem:[#allocation133_spill] sm:$0xff] %v15651_v47  ;;  %v5625_v53 = vsel %vm5577_vm2, %v14394_v19, %v14886_v35  ;;  %v2116_v49 = vrot.slane %v20131_v51, %v14305_v11  ;;  %v15676_v19 = vcombine.high %v15614_v45, %v15614_v45  ;;  %v20140_v42 = vld [vmem:[#allocation17_spill] sm:$0xff]  ;;  %v20142_v51 = vld [vmem:[#allocation22_spill] sm:$0xff] }
 0x249   :  { %v15594_v59 = vpop.permute.xlu0 %4097  ;;  %20126 = vst [vmem:[#allocation132_spill] sm:$0xff] %v15647_v55  ;;  %v5910_v27 = vsel %vm5878_vm3, %v5625_v53, %v20138_v48  ;;  %v5637_v9 = vsel %vm5577_vm2, %v20140_v42, %v20139_v15  ;;  %v3515_v8 = vrot.slane %v15647_v55, %v14305_v11  ;;  %v20144_v53 = vld [vmem:[#allocation55_spill] sm:$0xff]  ;;  %v20147_v48 = vld [vmem:[#allocation58_spill] sm:$0xff] }
 0x24a   :  { %4475 = vrot.lane.b32.xlu1 %v3494_v58, %s13803_s16  ;;  %20133 = vst [vmem:[#allocation67_spill] sm:$0xff] %v15676_v19  ;;  %v15714_v42 = vrot.slane %v2116_v49, %v14305_v11  ;;  %v2124_v22 = vcombine.high %v2116_v49, %v2116_v49  ;;  %v20170_v55 = vld [vmem:[#allocation18_spill] sm:$0xff] }
 0x24b   :  { %4473 = vrot.lane.b32.xlu0 %v3480_v0, %s13803_s16  ;;  %v5616_v0 = vsel %vm5577_vm2, %v14333_v37, %v14796_v4  ;;  %v15656_v37 = vsel %vm5577_vm2, %v14475_v21, %v14835_v34  ;;  %v20130_v4 = vld [vmem:[#allocation15_spill] sm:$0xff]  ;;  %v3529_v21 = vrot.slane %v15614_v45, %v14305_v11  ;;  %v20134_v34 = vld [vmem:[#allocation38_spill] sm:$0xff] }
 0x24c   :  { %v15616_v20 = vpop.permute.xlu1 %4775  ;;  %20128 = vst [vmem:[#allocation134_spill] sm:$0xff] %v15656_v37  ;;  %v5622_v57 = vsel %vm5577_vm2, %v20130_v4, %v14843_v18  ;;  %v5631_v14 = vsel %vm5577_vm2, %v20135_v12, %v20134_v34  ;;  %v20136_v18 = vld [vmem:[#allocation39_spill] sm:$0xff]  ;;  %v20141_v4 = vld [vmem:[#allocation53_spill] sm:$0xff]  ;;  %20149 = vst [vmem:[#allocation16_spill] sm:$0xff] %v15714_v42 }
 0x24d   :  { %v15641_v30 = vpop.permute.xlu0 %4773  ;;  %v5634_v24 = vsel %vm5577_vm2, %v20137_v40, %v20136_v18  ;;  %v5643_v10 = vsel %vm5577_vm2, %v20142_v51, %v20141_v4  ;;  %v5918_v18 = vsel %vm5878_vm3, %v5637_v9, %v20144_v53  ;;  %v15705_v40 = vcombine.high %v15662_v38, %v15662_v38  ;;  %v20151_v51 = vld [vmem:[#allocation60_spill] sm:$0xff] }
 0x24e   :  { %4815 = vrot.lane.b32.xlu1 %v15620_v25, %s13801_s14  ;;  %v1414_v35 = vpop.f32.mrb[58].mxu0  ;;  %v3557_v9 = vrot.slane %v15676_v19, %v14305_v11  ;;  %v20154_v53 = vld [vmem:[#allocation64_spill] sm:$0xff] }
 0x24f   :  { %4813 = vrot.lane.b32.xlu0 %v3494_v58, %s13801_s14  ;;  %v1415_v23 = vadd.f32 %v15007_v54, %v1414_v35  ;;  %v13154_v56 = vpop.f32.mrb[59].mxu0  ;;  %v20143_v35 = vld [vmem:[#allocation54_spill] sm:$0xff]  ;;  %20145 = vst [vmem:[#allocation38_spill] sm:$0xff] %v15705_v40 }
 0x250   :  { %v15669_v17 = vpop.permute.xlu1 %4783  ;;  %v5916_v12 = vsel %vm5878_vm3, %v5634_v24, %v20143_v35  ;;  %v15720_v24 = vrot.slane %v3529_v21, %v14305_v11  ;;  %v20152_v35 = vld [vmem:[#allocation62_spill] sm:$0xff] }
 0x251   :  { %20132 = vst [vmem:[#allocation15_spill] sm:$0xff] %v15669_v17  ;;  %v15693_v34 = vpop.permute.xlu0 %4437  ;;  %v15707_v56 = vmax.f32 %v1415_v23, 0.0  ;;  %v15711_v15 = vsel %vm6079_vm4, %v5916_v12, %v20147_v48  ;;  %v5922_v23 = vsel %vm5878_vm3, %v5643_v10, %v20151_v51  ;;  %v15728_v12 = vsel %vm6079_vm4, %v5918_v18, %v20152_v35  ;;  %v20159_v51 = vld [vmem:[#allocation40_spill] sm:$0xff]  ;;  %v20161_v35 = vld [vmem:[#allocation41_spill] sm:$0xff] }
 0x252   :  { %4139 = vrot.lane.b32.xlu1 %v15620_v25, %s13802_s15  ;;  %20148 = vst [vmem:[#allocation39_spill] sm:$0xff] %v15711_v15  ;;  %20153 = vst [vmem:[#allocation45_spill] sm:$0xff] %v15728_v12  ;;  %v12616_v48 = vpack.c.bf16 %v20154_v53, %v20154_v53  ;;  %v15744_v10 = vrot.slane %v3515_v8, %v14305_v11  ;;  %v3543_v18 = vrot.slane %v15662_v38, %v14305_v11  ;;  %v20162_v53 = vld [vmem:[#allocation52_spill] sm:$0xff] }
 0x253   :  { %20146 = vst [vmem:[#allocation14_spill] sm:$0xff] %v15707_v56  ;;  %4137 = vrot.lane.b32.xlu0 %v3494_v58, %s13802_s15  ;;  %v15733_v63 = vpack.c.bf16 %v15707_v56, %v1511_v31  ;;  %v20156_v58 = vld [vmem:[#allocation66_spill] sm:$0xff]  ;;  %v15750_v31 = vsel %vm5878_vm3, %v5631_v14, %v20159_v51  ;;  %v5908_v49 = vsel %vm5878_vm3, %v5622_v57, %v20162_v53  ;;  %v20163_v57 = vld [vmem:[#allocation43_spill] sm:$0xff] }
 0x254   :  { %v15716_v4 = vpop.permute.xlu1 %4107  ;;  %v15737_v21 = vsel %vm6079_vm4, %v5922_v23, %v20156_v58  ;;  %20160 = vst [vmem:[#allocation54_spill] sm:$0xff] %v15750_v31  ;;  %v5904_v23 = vsel %vm5878_vm3, %v5616_v0, %v20161_v35  ;;  %v3571_v58 = vrot.slane %v15705_v40, %v14305_v11  ;;  %v6812_v8 = vcombine.low %v15626_v43, %v15711_v15  ;;  %v20165_v35 = vld [vmem:[#allocation36_spill] sm:$0xff]  ;;  %v20167_v40 = vld [vmem:[#allocation47_spill] sm:$0xff]  ;;  %v20177_v56 = vld [vmem:[#allocation74_spill] sm:$0xff] }
 0x255   :  { %20150 = vst [vmem:[#allocation31_spill] sm:$0xff] %v15716_v4  ;;  %20155 = vst [vmem:[#allocation17_spill] sm:$0xff] %v15733_v63  ;;  %v15739_v45 = vpop.permute.xlu0 %4445  ;;  %v6836_v19 = vcombine.low %v15611_v28, %v15728_v12  ;;  %v3585_v38 = vrot.slane %v15714_v42, %v14305_v11  ;;  %v15769_v0 = vrot.slane %v3557_v9, %v14305_v11  ;;  %v20169_v9 = vld [vmem:[#allocation61_spill] sm:$0xff]  ;;  %v20181_v4 = vld [vmem:[#allocation91_spill] sm:$0xff] }
 0x256   :  { %20157 = vst [vmem:[#allocation53_spill] sm:$0xff] %v15737_v21  ;;  %20158 = vst [vmem:[#allocation22_spill] sm:$0xff] %v15739_v45  ;;  %4143 = vrot.lane.b32.xlu1 %v15720_v24, %s13802_s15  ;;  %v15773_v51 = vsel %vm6079_vm4, %v5904_v23, %v20163_v57  ;;  %v6884_v43 = vcombine.low %v15651_v47, %v15737_v21  ;;  %v15779_v28 = vsel %vm6079_vm4, %v5910_v27, %v20165_v35  ;;  %v20173_v35 = vld [vmem:[#allocation20_spill] sm:$0xff]  ;;  %v20188_v12 = vld [vmem:[#allocation75_spill] sm:$0xff] }
 0x257   :  { %4141 = vrot.lane.b32.xlu0 %v15744_v10, %s13802_s15  ;;  %20164 = vst [vmem:[#allocation55_spill] sm:$0xff] %v15773_v51  ;;  %20166 = vst [vmem:[#allocation58_spill] sm:$0xff] %v15779_v28  ;;  %v15782_v53 = vrot.slane %v12616_v48, %v14305_v11  ;;  %v15786_v6 = vsel %vm6079_vm4, %v5906_v26, %v20167_v40  ;;  %v5646_v44 = vsel %vm5577_vm2, %v20170_v55, %v20169_v9  ;;  %v20172_v48 = vld [vmem:[#allocation57_spill] sm:$0xff]  ;;  %v20174_v40 = vld [vmem:[#allocation63_spill] sm:$0xff] }
 0x258   :  { %v15764_v14 = vpop.permute.xlu1 %4103  ;;  %20168 = vst [vmem:[#allocation60_spill] sm:$0xff] %v15786_v6  ;;  %v15792_v23 = vrot.slane %v2124_v22, %v14305_v11  ;;  %v15799_v27 = vrot.slane %v3543_v18, %v14305_v11  ;;  %v5649_v26 = vsel %vm5577_vm2, %v20173_v35, %v20172_v48  ;;  %v5924_v47 = vsel %vm5878_vm3, %v5646_v44, %v20174_v40  ;;  %v1419_v9 = vpop.f32.mrb[60].mxu0  ;;  %v20180_v40 = vld [vmem:[#allocation21_spill] sm:$0xff] }
 0x259   :  { %v15794_v57 = vpop.permute.xlu0 %4101  ;;  %v15808_v55 = vsel %vm6079_vm4, %v5908_v49, %v20175_v41  ;;  %v15811_v22 = vrot.slane %v3571_v58, %v14305_v11  ;;  %v15814_v63 = vrot.slane %v6812_v8, %v14305_v11  ;;  %v15817_v18 = vrot.slane %v6836_v19, %v14305_v11  ;;  %v13157_v41 = vpop.f32.mrb[61].mxu0  ;;  %v20178_v58 = vld [vmem:[#allocation68_spill] sm:$0xff]  ;;  %v20187_v8 = vld [vmem:[#allocation26_spill] sm:$0xff] }
 0x25a   :  { %20171 = vst [vmem:[#allocation62_spill] sm:$0xff] %v15792_v23  ;;  %4147 = vrot.lane.b32.xlu1 %v15769_v0, %s13802_s15  ;;  %20176 = vst [vmem:[#allocation64_spill] sm:$0xff] %v15808_v55  ;;  %v15821_v48 = vsel %vm6079_vm4, %v5924_v47, %v20177_v56  ;;  %v15828_v44 = vrot.slane %v3585_v38, %v14305_v11  ;;  %v15831_v49 = vrot.slane %v6884_v43, %v14305_v11  ;;  %v20179_v56 = vld [vmem:[#allocation69_spill] sm:$0xff] }
 0x25b   :  { %4145 = vrot.lane.b32.xlu0 %v15799_v27, %s13802_s15  ;;  %v5926_v19 = vsel %vm5878_vm3, %v5649_v26, %v20178_v58  ;;  %v1420_v47 = vadd.f32 %v15007_v54, %v1419_v9  ;;  %v15841_v21 = vsel %vm5577_vm2, %v20180_v40, %v20179_v56  ;;  %v20182_v38 = vld [vmem:[#allocation25_spill] sm:$0xff]  ;;  %v15848_v43 = vrot.slane %v15782_v53, %v14305_v11  ;;  %v20184_v9 = vld [vmem:[#allocation72_spill] sm:$0xff]  ;;  %v20185_v58 = vld [vmem:[#allocation19_spill] sm:$0xff] }
 0x25c   :  { %v15823_v35 = vpop.permute.xlu1 %4439  ;;  %v5664_v41 = vsel %vm5577_vm2, %v20182_v38, %v20181_v4  ;;  %v4303_v26 = vrot.slane %v15792_v23, %v14305_v11  ;;  %v5652_v56 = vsel %vm5577_vm2, %v20185_v58, %v20184_v9  ;;  %v20186_v40 = vld [vmem:[#allocation73_spill] sm:$0xff]  ;;  %v6860_v15 = vcombine.low %v15637_v46, %v15383_v32  ;;  %v1424_v31 = vpop.f32.mrb[62].mxu0  ;;  %v20189_v23 = vld [vmem:[#allocation82_spill] sm:$0xff]  ;;  %v20191_v46 = vld [vmem:[#allocation79_spill] sm:$0xff] }
 0x25d   :  { %20183 = vst [vmem:[#allocation66_spill] sm:$0xff] %v15848_v43  ;;  %v15850_v45 = vpop.permute.xlu0 %4441  ;;  %v5667_v4 = vsel %vm5577_vm2, %v20187_v8, %v20186_v40  ;;  %v15868_v37 = vsel %vm6079_vm4, %v5926_v19, %v20188_v12  ;;  %v1513_v9 = vmax.f32 %v1420_v47, 0.0  ;;  %v1425_v8 = vadd.f32 %v15007_v54, %v1424_v31  ;;  %v13160_v58 = vpop.f32.mrb[63].mxu0  ;;  %v20190_v40 = vld [vmem:[#allocation87_spill] sm:$0xff]  ;;  %v20192_v12 = vld [vmem:[#allocation97_spill] sm:$0xff]  ;;  %v20193_v19 = vld [vmem:[#allocation28_spill] sm:$0xff] }
 0x25e   :  { %4151 = vrot.lane.b32.xlu1 %v15828_v44, %s13802_s15  ;;  %v5938_v43 = vsel %vm5878_vm3, %v5667_v4, %v20189_v23  ;;  %v5936_v32 = vsel %vm5878_vm3, %v5664_v41, %v20191_v46  ;;  %v5673_v17 = vsel %vm5577_vm2, %v20193_v19, %v20192_v12  ;;  %v20194_v23 = vld [vmem:[#allocation44_spill] sm:$0xff]  ;;  %v20195_v54 = vld [vmem:[#allocation29_spill] sm:$0xff]  ;;  %v20200_v12 = vld [vmem:[#allocation42_spill] sm:$0xff] }
 0x25f   :  { %4149 = vrot.lane.b32.xlu0 %v15811_v22, %s13802_s15  ;;  %v15877_v38 = vsel %vm6079_vm4, %v5938_v43, %v20190_v40  ;;  %v5700_v4 = vsel %vm5577_vm2, %v20194_v23, %v15505_v33  ;;  %v5942_v47 = vsel %vm5878_vm3, %v5673_v17, %v15325_v16  ;;  %v5676_v31 = vsel %vm5577_vm2, %v20195_v54, %v15332_v39  ;;  %v20197_v41 = vld [vmem:[#allocation32_spill] sm:$0xff]  ;;  %v20198_v40 = vld [vmem:[#allocation37_spill] sm:$0xff]  ;;  %v20199_v17 = vld [vmem:[#allocation51_spill] sm:$0xff] }
 0x260   :  { %v4780_v42 = vpop.permute.xlu1 %4779  ;;  %v5960_v43 = vsel %vm5878_vm3, %v5700_v4, %v15551_v7  ;;  %v15896_v46 = vmax.f32 %v1425_v8, 0.0  ;;  %v5679_v33 = vsel %vm5577_vm2, %v20197_v41, %v15373_v5  ;;  %v5694_v16 = vsel %vm5577_vm2, %v20198_v40, %v15484_v62 }
 0x261   :  { %v4778_v58 = vpop.permute.xlu0 %4777  ;;  %v5703_v39 = vsel %vm5577_vm2, %v20199_v17, %v15487_v3  ;;  %v15909_v7 = vsel %vm6079_vm4, %v5960_v43, %v15641_v30  ;;  %v5697_v8 = vsel %vm5577_vm2, %v20200_v12, %v15480_v2  ;;  %v5956_v19 = vsel %vm5878_vm3, %v5694_v16, %v15524_v52  ;;  %v20202_v52 = vld [vmem:[#allocation48_spill] sm:$0xff] }
 0x262   :  { %4479 = vrot.lane.b32.xlu1 %v15744_v10, %s13803_s16  ;;  %20196 = vst [vmem:[#allocation40_spill] sm:$0xff] %v15896_v46  ;;  %v5962_v5 = vsel %vm5878_vm3, %v5703_v39, %v15535_v50  ;;  %v15923_v62 = vpack.c.bf16 %v15896_v46, %v1513_v9  ;;  %v5958_v3 = vsel %vm5878_vm3, %v5697_v8, %v15498_v60  ;;  %v20207_v17 = vld [vmem:[#allocation104_spill] sm:$0xff] }
 0x263   :  { %4477 = vrot.lane.b32.xlu0 %v15620_v25, %s13803_s16  ;;  %v15929_v2 = vsel %vm6079_vm4, %v5956_v19, %v15573_v29  ;;  %v5706_v30 = vsel %vm5577_vm2, %v20202_v52, %v15594_v59  ;;  %v15936_v50 = vsel %vm6079_vm4, %v5962_v5, %v15616_v20  ;;  %v5944_v25 = vsel %vm5878_vm3, %v5676_v31, %v15457_v61  ;;  %v20203_v59 = vld [vmem:[#allocation113_spill] sm:$0xff]  ;;  %v20204_v61 = vld [vmem:[#allocation83_spill] sm:$0xff]  ;;  %v20208_v12 = vld [vmem:[#allocation76_spill] sm:$0xff] }
 0x264   :  { %v15918_v23 = vpop.permute.xlu1 %4111  ;;  %20201 = vst [vmem:[#allocation41_spill] sm:$0xff] %v15923_v62  ;;  %v15942_v9 = vsel %vm6079_vm4, %v5958_v3, %v15560_v1  ;;  %v6861_v60 = vcombine.low %v15386_v36, %v15909_v7  ;;  %v5964_v29 = vsel %vm5878_vm3, %v5706_v30, %v15693_v34  ;;  %v15954_v20 = vsel %vm6079_vm4, %v5942_v47, %v20203_v59  ;;  %v20205_v1 = vld [vmem:[#allocation56_spill] sm:$0xff]  ;;  %v20206_v34 = vld [vmem:[#allocation95_spill] sm:$0xff]  ;;  %v20211_v30 = vld [vmem:[#allocation81_spill] sm:$0xff] }
 0x265   :  { %v15948_v4 = vpop.permute.xlu0 %4109  ;;  %v15958_v54 = vsel %vm6079_vm4, %v5936_v32, %v20204_v61  ;;  %v5709_v31 = vsel %vm5577_vm2, %v20205_v1, %v15582_v13  ;;  %v15964_v43 = vsel %vm6079_vm4, %v5964_v29, %v4778_v58  ;;  %v5946_v41 = vsel %vm5878_vm3, %v5679_v33, %v20206_v34  ;;  %v20210_v3 = vld [vmem:[#allocation80_spill] sm:$0xff] }
 0x266   :  { %4483 = vrot.lane.b32.xlu1 %v15799_v27, %s13803_s16  ;;  %v6813_v40 = vcombine.low %v15958_v54, %v15929_v2  ;;  %v6885_v47 = vcombine.low %v15954_v20, %v15936_v50  ;;  %v5966_v32 = vsel %vm5878_vm3, %v5709_v31, %v15823_v35  ;;  %v6932_v13 = vcombine.low %v15786_v6, %v15868_v37  ;;  %v20213_v59 = vld [vmem:[#allocation84_spill] sm:$0xff]  ;;  %v20238_v6 = vld [vmem:[#allocation66_spill] sm:$0xff] }
 0x267   :  { %4481 = vrot.lane.b32.xlu0 %v15720_v24, %s13803_s16  ;;  %v6837_v58 = vcombine.low %v15877_v38, %v15942_v9  ;;  %v15983_v33 = vsel %vm6079_vm4, %v5966_v32, %v4780_v42  ;;  %v15987_v39 = vsel %vm6079_vm4, %v5944_v25, %v20207_v17  ;;  %v5928_v35 = vsel %vm5878_vm3, %v5652_v56, %v20208_v12  ;;  %v20220_v17 = vld [vmem:[#allocation101_spill] sm:$0xff]  ;;  %v20221_v12 = vld [vmem:[#allocation35_spill] sm:$0xff] }
 0x268   :  { %v15974_v16 = vpop.permute.xlu1 %4447  ;;  %v15992_v8 = vrot.slane %v6861_v60, %v14305_v11  ;;  %v6909_v19 = vcombine.low %v15987_v39, %v15964_v43  ;;  %v16001_v42 = vrot.slane %v4303_v26, %v14305_v11  ;;  %v5930_v52 = vsel %vm5878_vm3, %v15841_v21, %v20210_v3  ;;  %v20212_v60 = vld [vmem:[#allocation108_spill] sm:$0xff]  ;;  %v20222_v3 = vld [vmem:[#allocation103_spill] sm:$0xff] }
 0x269   :  { %v15996_v5 = vpop.permute.xlu0 %4449  ;;  %v16008_v56 = vsel %vm6079_vm4, %v5928_v35, %v20211_v30  ;;  %v6868_v25 = vrot.slane %v6860_v15, %v14305_v11  ;;  %v16013_v29 = vsel %vm6079_vm4, %v5946_v41, %v20212_v60  ;;  %v16017_v61 = vsel %vm6079_vm4, %v5930_v52, %v20213_v59  ;;  %v20223_v52 = vld [vmem:[#allocation27_spill] sm:$0xff] }
 0x26a   :  { %20209 = vst [vmem:[#allocation52_spill] sm:$0xff] %v15992_v8  ;;  %4487 = vrot.lane.b32.xlu1 %v15811_v22, %s13803_s16  ;;  %v16020_v26 = vrot.slane %v6813_v40, %v14305_v11  ;;  %v16023_v1 = vrot.slane %v6885_v47, %v14305_v11  ;;  %v6933_v21 = vcombine.low %v16013_v29, %v15983_v33 }
 0x26b   :  { %4485 = vrot.lane.b32.xlu0 %v15769_v0, %s13803_s16  ;;  %v20216_v15 = vcombine.low %v15773_v51, %v15821_v48  ;;  %v6940_v41 = vrot.slane %v6932_v13, %v14305_v11  ;;  %v16037_v40 = vrot.slane %v6837_v58, %v14305_v11  ;;  %v20218_v47 = vcombine.high %v15782_v53, %v15782_v53  ;;  %v20231_v51 = vld [vmem:[#allocation15_spill] sm:$0xff] }
 0x26c   :  { %20214 = vst [vmem:[#allocation43_spill] sm:$0xff] %v16020_v26  ;;  %20215 = vst [vmem:[#allocation36_spill] sm:$0xff] %v16023_v1  ;;  %v16027_v31 = vpop.permute.xlu1 %4787  ;;  %v5682_v35 = vsel %vm5577_vm2, %v20221_v12, %v20220_v17  ;;  %v5685_v30 = vsel %vm5577_vm2, %v20223_v52, %v20222_v3  ;;  %v6876_v60 = vcombine.low %v6868_v25, %v15992_v8  ;;  %v20226_v17 = vld [vmem:[#allocation109_spill] sm:$0xff]  ;;  %v20227_v3 = vld [vmem:[#allocation71_spill] sm:$0xff] }
 0x26d   :  { %v6916_v34 = vrot.slane %v20216_v15, %v14305_v11  ;;  %20217 = vst [vmem:[#allocation47_spill] sm:$0xff] %v16037_v40  ;;  %v16043_v32 = vrot.slane %v20218_v47, %v14305_v11  ;;  %v16053_v13 = vrot.slane %v6909_v19, %v14305_v11  ;;  %v16055_v58 = vpop.permute.xlu0 %4785  ;;  %v6956_v53 = vcombine.low %v15808_v55, %v16008_v56  ;;  %v20225_v15 = vld [vmem:[#allocation106_spill] sm:$0xff] }
 0x26e   :  { %4491 = vrot.lane.b32.xlu1 %v16001_v42, %s13803_s16  ;;  %v6980_v59 = vcombine.low %v15779_v28, %v16017_v61  ;;  %v5950_v47 = vsel %vm5878_vm3, %v5685_v30, %v20225_v15  ;;  %v5948_v25 = vsel %vm5878_vm3, %v5682_v35, %v20226_v17  ;;  %v6828_v19 = vcombine.low %v15814_v63, %v16020_v26  ;;  %v20229_v30 = vld [vmem:[#allocation116_spill] sm:$0xff]  ;;  %v20266_v8 = vld [vmem:[#allocation78_spill] sm:$0xff] }
 0x26f   :  { %20219 = vst [vmem:[#allocation61_spill] sm:$0xff] %v16043_v32  ;;  %20224 = vst [vmem:[#allocation18_spill] sm:$0xff] %v16053_v13  ;;  %v6900_v12 = vcombine.low %v15831_v49, %v16023_v1  ;;  %v5715_v52 = vsel %vm5577_vm2, %v20227_v3, %v15764_v14  ;;  %v16075_v55 = vrot.slane %v6933_v21, %v14305_v11  ;;  %4489 = vrot.lane.b32.xlu0 %v15828_v44, %s13803_s16  ;;  %v20230_v49 = vld [vmem:[#allocation59_spill] sm:$0xff] }
 0x270   :  { %v4444_v28 = vpop.permute.xlu1 %4443  ;;  %v16081_v35 = vsel %vm6079_vm4, %v5950_v47, %v20229_v30  ;;  %v6852_v63 = vcombine.low %v15817_v18, %v16037_v40  ;;  %v5712_v15 = vsel %vm5577_vm2, %v20230_v49, %v15794_v57  ;;  %v6883_v21 = vrot.slane %v6876_v60, %v14305_v11  ;;  %v20232_v18 = vld [vmem:[#allocation114_spill] sm:$0xff] }
 0x271   :  { %20228 = vst [vmem:[#allocation57_spill] sm:$0xff] %v16075_v55  ;;  %v5970_v14 = vsel %vm5878_vm3, %v5715_v52, %v4444_v28  ;;  %v5968_v17 = vsel %vm5878_vm3, %v5712_v15, %v15850_v45  ;;  %v6924_v3 = vcombine.low %v6916_v34, %v16053_v13  ;;  %v4782_v30 = vpop.permute.xlu0 %4781  ;;  %v16101_v57 = vsel %vm6079_vm4, %v5948_v25, %v20232_v18  ;;  %v20233_v28 = vld [vmem:[#allocation16_spill] sm:$0xff] }
 0x272   :  { %v16095_v47 = vsel %vm6079_vm4, %v5970_v14, %v20231_v51  ;;  %4819 = vrot.lane.b32.xlu1 %v15720_v24, %s13801_s14  ;;  %v2154_v60 = vcombine.high %v20233_v28, %v20233_v28  ;;  %v16108_v34 = vsel %vm6079_vm4, %v5968_v17, %v4782_v30  ;;  %v6835_v51 = vrot.slane %v6828_v19, %v14305_v11 }
 0x273   :  { %v6981_v45 = vcombine.low %v16081_v35, %v16095_v47  ;;  %v6907_v52 = vrot.slane %v6900_v12, %v14305_v11  ;;  %v6948_v49 = vcombine.low %v6940_v41, %v16075_v55  ;;  %v6957_v24 = vcombine.low %v16101_v57, %v16108_v34  ;;  %4817 = vrot.lane.b32.xlu0 %v15744_v10, %s13801_s14 }
 0x274   :  { %v16115_v25 = vpop.permute.xlu1 %4451  ;;  %v6964_v15 = vrot.slane %v6956_v53, %v14305_v11  ;;  %v6988_v14 = vrot.slane %v6980_v59, %v14305_v11  ;;  %v16126_v19 = vcombine.high %v16043_v32, %v16043_v32  ;;  %v6859_v41 = vrot.slane %v6852_v63, %v14305_v11  ;;  %v20237_v59 = vld [vmem:[#allocation99_spill] sm:$0xff] }
 0x275   :  { %v16122_v17 = vrot.slane %v6981_v45, %v14305_v11  ;;  %v6931_v12 = vrot.slane %v6924_v3, %v14305_v11  ;;  %v16131_v30 = vrot.slane %v6957_v24, %v14305_v11  ;;  %v16133_v18 = vpop.permute.xlu0 %4105  ;;  %v8520_v10 = vcombine.low %v6883_v21, %v6907_v52  ;;  %v20240_v3 = vld [vmem:[#allocation46_spill] sm:$0xff] }
 0x276   :  { %20235 = vst [vmem:[#allocation63_spill] sm:$0xff] %v16126_v19  ;;  %4823 = vrot.lane.b32.xlu1 %v15769_v0, %s13801_s14  ;;  %v2165_v28 = vrot.slane %v20237_v59, %v14305_v11  ;;  %v4643_v45 = vrot.slane %v2154_v60, %v14305_v11  ;;  %v16143_v63 = vcombine.high %v20238_v6, %v20238_v6  ;;  %v20241_v24 = vld [vmem:[#allocation134_spill] sm:$0xff] }
 0x277   :  { %20234 = vst [vmem:[#allocation20_spill] sm:$0xff] %v16122_v17  ;;  %20236 = vst [vmem:[#allocation34_spill] sm:$0xff] %v16131_v30  ;;  %v6996_v53 = vcombine.low %v6988_v14, %v16122_v17  ;;  %v5912_v46 = vsel %vm5878_vm3, %v20241_v24, %v20240_v3  ;;  %v6955_v55 = vrot.slane %v6948_v49, %v14305_v11  ;;  %4821 = vrot.lane.b32.xlu0 %v15799_v27, %s13801_s14  ;;  %v20242_v49 = vld [vmem:[#allocation49_spill] sm:$0xff]  ;;  %v20247_v17 = vld [vmem:[#allocation92_spill] sm:$0xff] }
 0x278   :  { %20239 = vst [vmem:[#allocation74_spill] sm:$0xff] %v16143_v63  ;;  %v6972_v0 = vcombine.low %v6964_v15, %v16131_v30  ;;  %v16150_v21 = vpop.permute.xlu1 %4455  ;;  %v8519_v52 = vcombine.low %v6835_v51, %v6859_v41  ;;  %v3613_v60 = vrot.slane %v16043_v32, %v14305_v11  ;;  %v3599_v14 = vrot.slane %v20238_v6, %v14305_v11  ;;  %v20244_v41 = vld [vmem:[#allocation90_spill] sm:$0xff]  ;;  %v20245_v32 = vld [vmem:[#allocation24_spill] sm:$0xff] }
 0x279   :  { %v7003_v59 = vrot.slane %v6996_v53, %v14305_v11  ;;  %v3641_v3 = vrot.slane %v16126_v19, %v14305_v11  ;;  %v16163_v15 = vsel %vm6079_vm4, %v5912_v46, %v20242_v49  ;;  %v16166_v30 = vpop.permute.xlu0 %4789  ;;  %v8521_v27 = vcombine.low %v6931_v12, %v6955_v55  ;;  %v20248_v12 = vld [vmem:[#allocation50_spill] sm:$0xff] }
 0x27a   :  { %20243 = vst [vmem:[#allocation68_spill] sm:$0xff] %v16163_v15  ;;  %v6979_v24 = vrot.slane %v6972_v0, %v14305_v11  ;;  %4827 = vrot.lane.b32.xlu1 %v15828_v44, %s13801_s14  ;;  %v8536_v51 = vrot.slane %v8520_v10, %v14305_v11  ;;  %v5661_v53 = vsel %vm5577_vm2, %v20245_v32, %v20244_v41  ;;  %v20246_v0 = vld [vmem:[#allocation45_spill] sm:$0xff]  ;;  %v20249_v10 = vld [vmem:[#allocation54_spill] sm:$0xff] }
 0x27b   :  { %v2173_v6 = vcombine.high %v2165_v28, %v2165_v28  ;;  %v4650_v19 = vrot.slane %v4643_v45, %v14305_v11  ;;  %v3627_v46 = vrot.slane %v16143_v63, %v14305_v11  ;;  %v7076_v49 = vcombine.low %v20246_v0, %v15877_v38  ;;  %4825 = vrot.lane.b32.xlu0 %v15811_v22, %s13801_s14  ;;  %v20252_v0 = vld [vmem:[#allocation86_spill] sm:$0xff] }
 0x27c   :  { %v5934_v13 = vsel %vm5878_vm3, %v5661_v53, %v20247_v17  ;;  %v16181_v44 = vpop.permute.xlu1 %4791  ;;  %v8522_v55 = vcombine.low %v6979_v24, %v7003_v59  ;;  %v8529_v32 = vrot.slane %v8519_v52, %v14305_v11  ;;  %v16189_v45 = vsel %vm6079_vm4, %v20249_v10, %v20248_v12 }
 0x27d   :  { %20250 = vst [vmem:[#allocation69_spill] sm:$0xff] %v16189_v45  ;;  %v16192_v41 = vrot.slane %v3613_v60, %v14305_v11  ;;  %v3606_v38 = vrot.slane %v3599_v14, %v14305_v11  ;;  %v16196_v17 = vrot.slane %v3641_v3, %v14305_v11  ;;  %v16199_v53 = vrot.slane %v2165_v28, %v14305_v11  ;;  %v16201_v22 = vpop.permute.xlu0 %4117  ;;  %v20253_v60 = vld [vmem:[#allocation23_spill] sm:$0xff]  ;;  %v20254_v14 = vld [vmem:[#allocation77_spill] sm:$0xff] }
 0x27e   :  { %4831 = vrot.lane.b32.xlu1 %v4650_v19, %s13801_s14  ;;  %v8543_v52 = vrot.slane %v8521_v27, %v14305_v11  ;;  %v8550_v59 = vrot.slane %v8522_v55, %v14305_v11  ;;  %v8552_v24 = vcombine.high %v8529_v32, %v8536_v51  ;;  %v5658_v12 = vsel %vm5577_vm2, %v20253_v60, %v20252_v0  ;;  %v20256_v19 = vld [vmem:[#allocation89_spill] sm:$0xff] }
 0x27f   :  { %20251 = vst [vmem:[#allocation21_spill] sm:$0xff] %v16199_v53  ;;  %v16211_v3 = vsel %vm6079_vm4, %v5934_v13, %v20254_v14  ;;  %v16214_v28 = vrot.slane %v2173_v6, %v14305_v11  ;;  %v8551_v10 = vcombine.low %v8529_v32, %v8536_v51  ;;  %v16217_v63 = vrot.slane %v7076_v49, %v14305_v11  ;;  %v20257_v13 = vld [vmem:[#allocation93_spill] sm:$0xff]  ;;  %v20258_v51 = vld [vmem:[#allocation39_spill] sm:$0xff]  ;;  %v20259_v32 = vld [vmem:[#allocation96_spill] sm:$0xff] }
 0x280   :  { %v5932_v27 = vsel %vm5878_vm3, %v5658_v12, %v20256_v19  ;;  %v16221_v55 = vpop.permute.xlu1 %4119  ;;  %4829 = vrot.lane.b32.xlu0 %v16001_v42, %s13801_s14  ;;  %v8554_v0 = vcombine.high %v8543_v52, %v8550_v59  ;;  %v16226_v60 = vrot.slane %v3627_v46, %v14305_v11  ;;  %v12617_v14 = vpack.c.bf16 %v20259_v32, %v20259_v32  ;;  %v20269_v19 = vld [vmem:[#allocation65_spill] sm:$0xff] }
 0x281   :  { %20255 = vst [vmem:[#allocation91_spill] sm:$0xff] %v16214_v28  ;;  %v16230_v6 = vsel %vm6079_vm4, %v5932_v27, %v20257_v13  ;;  %v8553_v12 = vcombine.low %v8543_v52, %v8550_v59  ;;  %v16238_v62 = vpop.permute.xlu0 %4793  ;;  %v16243_v42 = vrot.slane %v8552_v24, %v14305_v11  ;;  %v3655_v27 = vrot.slane %v16199_v53, %v14305_v11  ;;  %v20262_v13 = vld [vmem:[#allocation70_spill] sm:$0xff] }
 0x282   :  { %4155 = vrot.lane.b32.xlu1 %v16192_v41, %s13802_s15  ;;  %v16246_v46 = vrot.slane %v8554_v0, %v14305_v11  ;;  %v5718_v52 = vsel %vm5577_vm2, %v20262_v13, %v16133_v18  ;;  %v16254_v59 = vrot.slane %v8551_v10, %v14305_v11  ;;  %v3669_v24 = vrot.slane %v16214_v28, %v14305_v11  ;;  %v12561_v0 = vld.sshfl [vmem:[%s19775_s0 + $0x150] sm:$0x3 pattern:$0x76325410]  ;;  %s12551_s0 = sshll.u32 %s13804_s13, 4  ;;  %s12552_s0 = int_to_ptr.vmem [resolvable:$true] %s12551_s0 }
 0x283   :  { %20260 = vst [vmem:[#allocation25_spill] sm:$0xff] %v16243_v42  ;;  %v16257_v32 = vrot.slane %v8553_v12, %v14305_v11  ;;  %v16273_v10 = vcombine.high %v16214_v28, %v16214_v28  ;;  %13192 = vmatmul.mubr.msk.f32.gmra.mrb[84].mxu0 %vm1116_vm1, %v12561_v0  ;;  %v16277_v12 = vrot.slane %v12617_v14, %v14305_v11  ;;  %v20267_v28 = vld [vmem:[#allocation22_spill] sm:$0xff]  ;;  %s13767_s17 = scalar_lea.vmem %s12552_s0, 32  ;;  %p13772_p9 = scmp.lt.s32.totalorder %s12552_s0, %s12552_s0 }
 0x284   :  { %20261 = vst [vmem:[#allocation72_spill] sm:$0xff] %v16246_v46  ;;  %20263 = vst [vmem:[#allocation19_spill] sm:$0xff] %v16254_v59  ;;  %v16266_v49 = vpop.permute.xlu1 %4459  ;;  %4153 = vrot.lane.b32.xlu0 %v3606_v38, %s13802_s15  ;;  %v8585_v18 = vcombine.low %v16243_v42, %v16246_v46  ;;  %v5727_v1 = vsel %vm5577_vm2, %v20266_v8, %v15918_v23  ;;  %v5972_v40 = vsel %vm5878_vm3, %v5718_v52, %v20267_v28  ;;  %v20270_v52 = vld [vmem:[#allocation117_spill] sm:$0xff]  ;;  %v20277_v42 = vld [vmem:[#allocation122_spill] sm:$0xff]  ;;  %p13768_p8 = scmp.ne.s32.totalorder %s12552_s0, %s13767_s17  ;;  %p13773_p10 = scmp.lt.s32.totalorder %s13767_s17, %s13767_s17 }
 0x285   :  { %20264 = vst [vmem:[#allocation73_spill] sm:$0xff] %v16257_v32  ;;  %20265 = vst [vmem:[#allocation26_spill] sm:$0xff] %v16273_v10  ;;  %v8583_v13 = vcombine.low %v16254_v59, %v16257_v32  ;;  %v16290_v0 = vpop.permute.xlu0 %4113  ;;  %v16296_v14 = vcombine.high %v16199_v53, %v16199_v53  ;;  %v5724_v38 = vsel %vm5577_vm2, %v20269_v19, %v15948_v4  ;;  %v20275_v46 = vld [vmem:[#allocation33_spill] sm:$0xff] }
 0x286   :  { %9585 = vmatprep.mubr.bf16.mxu1 %v8585_v18  ;;  %4159 = vrot.lane.b32.xlu1 %v16196_v17, %s13802_s15  ;;  %v5978_v23 = vsel %vm5878_vm3, %v5727_v1, %v16115_v25  ;;  %v16304_v8 = vrot.slane %v3669_v24, %v14305_v11  ;;  %v16307_v28 = vrot.slane %v3655_v27, %v14305_v11  ;;  %v20271_v18 = vld [vmem:[#allocation30_spill] sm:$0xff]  ;;  %v1429_v25 = vpop.f32.mrb[64].mxu0  ;;  %v20272_v27 = vld [vmem:[#allocation31_spill] sm:$0xff]  ;;  %v20273_v24 = vld [vmem:[#allocation85_spill] sm:$0xff]  ;;  %p13774_p11 = por %p13773_p10, %p13772_p9 }
 0x287   :  { %20268 = vst [vmem:[#allocation75_spill] sm:$0xff] %v16296_v14  ;;  %9586 = vmatmul.mubr.bf16.vlgmr.msra.gmra.mrb[0].mxu1 %v8583_v13  ;;  %v5688_v32 = vsel %vm5577_vm2, %v20271_v18, %v20270_v52  ;;  %v5976_v59 = vsel %vm5878_vm3, %v5724_v38, %v15996_v5  ;;  %v16316_v4 = vsel %vm6079_vm4, %v5978_v23, %v16181_v44  ;;  %v16336_v44 = vld [vmem:[%s19777_s2] ss:$0 sm:$0xff]  ;;  %v13163_v23 = vpop.f32.mrb[65].mxu0  ;;  %v20274_v18 = vld [vmem:[#allocation118_spill] sm:$0xff] }
 0x288   :  { %v4796_v19 = vpop.permute.xlu1 %4795  ;;  %4157 = vrot.lane.b32.xlu0 %v16226_v60, %s13802_s15  ;;  %v3697_v1 = vrot.slane %v16273_v10, %v14305_v11  ;;  %v5721_v13 = vsel %vm5577_vm2, %v20273_v24, %v20272_v27  ;;  %v16327_v52 = vsel %vm6079_vm4, %v5972_v40, %v16055_v58  ;;  %v16331_v5 = vsel %vm6079_vm4, %v5976_v59, %v16166_v30  ;;  %v20276_v24 = vld [vmem:[#allocation123_spill] sm:$0xff]  ;;  %v20278_v23 = vld [vmem:[#allocation124_spill] sm:$0xff]  ;;  %p13775_p12 = pnand %p13774_p11, %p13768_p8 }
 0x289   :  { %v1430_v38 = vadd.f32 %v16336_v44, %v1429_v25  ;;  %v5691_v27 = vsel %vm5577_vm2, %v20275_v46, %v20274_v18  ;;  %v5952_v40 = vsel %vm5878_vm3, %v5688_v32, %v20276_v24  ;;  %v5974_v58 = vsel %vm5878_vm3, %v5721_v13, %v15974_v16  ;;  %v4458_v30 = vpop.permute.xlu0 %4457  ;;  %v20279_v32 = vld [vmem:[#allocation127_spill] sm:$0xff]  ;;  %v1434_v24 = vpop.f32.mrb[66].mxu0 }
 0x28a   :  { %4163 = vrot.lane.b32.xlu1 %v16304_v8, %s13802_s15  ;;  %v3683_v59 = vrot.slane %v16296_v14, %v14305_v11  ;;  %v5954_v25 = vsel %vm5878_vm3, %v5691_v27, %v20277_v42  ;;  %v16354_v10 = vsel %vm6079_vm4, %v5952_v40, %v20278_v23  ;;  %v16358_v46 = vsel %vm6079_vm4, %v5974_v58, %v16027_v31  ;;  %v20281_v58 = vld [vmem:[#allocation100_spill] sm:$0xff]  ;;  %v13166_v14 = vpop.f32.mrb[67].mxu0 }
 0x28b   :  { %v7077_v16 = vcombine.low %v15942_v9, %v16316_v4  ;;  %v16364_v13 = vsel %vm6079_vm4, %v5954_v25, %v20279_v32  ;;  %v7005_v18 = vcombine.low %v16354_v10, %v16327_v52  ;;  %v7053_v42 = vcombine.low %v15929_v2, %v16331_v5  ;;  %v20280_v9 = vld [vmem:[#allocation105_spill] sm:$0xff]  ;;  %v20282_v14 = vld [vmem:[#allocation88_spill] sm:$0xff] }
 0x28c   :  { %v4116_v27 = vpop.permute.xlu1 %4115  ;;  %4161 = vrot.lane.b32.xlu0 %v16307_v28, %s13802_s15  ;;  %v16373_v31 = vrot.slane %v3697_v1, %v14305_v11  ;;  %v5736_v40 = vsel %vm5577_vm2, %v20280_v9, %v16201_v22  ;;  %v1515_v23 = vmax.f32 %v1430_v38, 0.0  ;;  %v1435_v32 = vadd.f32 %v16336_v44, %v1434_v24 }
 0x28d   :  { %v5733_v25 = vsel %vm5577_vm2, %v20281_v58, %v4116_v27  ;;  %v7029_v2 = vcombine.low %v16364_v13, %v16358_v46  ;;  %v5984_v53 = vsel %vm5878_vm3, %v5736_v40, %v4458_v30  ;;  %v4798_v26 = vpop.permute.xlu0 %4797  ;;  %v16389_v22 = vrot.slane %v3683_v59, %v14305_v11 }
 0x28e   :  { %v5982_v1 = vsel %vm5878_vm3, %v5733_v25, %v16150_v21  ;;  %4167 = vrot.lane.b32.xlu1 %v16373_v31, %s13802_s15  ;;  %v16392_v38 = vrot.slane %v7077_v16, %v14305_v11  ;;  %v5739_v27 = vsel %vm5577_vm2, %v20282_v14, %v16221_v55  ;;  %v16398_v24 = vsel %vm6079_vm4, %v5984_v53, %v4798_v26  ;;  %v20285_v25 = vld [vmem:[#allocation53_spill] sm:$0xff] }
 0x28f   :  { %v16400_v30 = vmax.f32 %v1435_v32, 0.0  ;;  %v6693_v21 = vcombine.low %v15868_v37, %v16013_v29  ;;  %v16405_v9 = vrot.slane %v7005_v18, %v14305_v11  ;;  %v5986_v59 = vsel %vm5878_vm3, %v5739_v27, %v16266_v49 }
 0x290   :  { %v16410_v16 = vsel %vm6079_vm4, %v5982_v1, %v4796_v19  ;;  %v4800_v40 = vpop.permute.xlu1 %4799  ;;  %4165 = vrot.lane.b32.xlu0 %v16389_v22, %s13802_s15  ;;  %v16415_v26 = vrot.slane %v7053_v42, %v14305_v11  ;;  %v7132_v53 = vcombine.low %v15964_v43, %v16398_v24  ;;  %v6669_v55 = vcombine.low %v15821_v48, %v15987_v39 }
 0x291   :  { %v16420_v37 = vsel %vm6079_vm4, %v5986_v59, %v4800_v40  ;;  %v16423_v29 = vpack.c.bf16 %v16400_v30, %v1515_v23  ;;  %v16428_v49 = vrot.slane %v7029_v2, %v14305_v11  ;;  %v16432_v18 = vpop.permute.xlu0 %4121  ;;  %v20283_v43 = vcombine.low %v16163_v15, %v16230_v6  ;;  %v20292_v40 = vld [vmem:[#allocation102_spill] sm:$0xff] }
 0x292   :  { %v7148_v19 = vcombine.low %v15983_v33, %v16420_v37  ;;  %4495 = vrot.lane.b32.xlu1 %v16226_v60, %s13803_s16  ;;  %v20284_v48 = vcombine.low %v20258_v51, %v15958_v54  ;;  %v7092_v58 = vcombine.low %v16217_v63, %v16392_v38  ;;  %v7116_v33 = vcombine.low %v15936_v50, %v16410_v16 }
 0x293   :  { %v7012_v42 = vrot.slane %v20283_v43, %v14305_v11  ;;  %v6645_v23 = vcombine.low %v20285_v25, %v15954_v20  ;;  %v20286_v32 = vcombine.low %v16189_v45, %v16211_v3  ;;  %v16456_v1 = vrot.slane %v16277_v12, %v14305_v11 }
 0x294   :  { %v7060_v39 = vrot.slane %v20284_v48, %v14305_v11  ;;  %v16459_v54 = vrot.slane %v7148_v19, %v14305_v11  ;;  %v16461_v51 = vpop.permute.xlu1 %4123  ;;  %4493 = vrot.lane.b32.xlu0 %v16192_v41, %s13803_s16  ;;  %v16466_v50 = vrot.slane %v6693_v21, %v14305_v11  ;;  %v16471_v14 = vrot.slane %v7132_v53, %v14305_v11 }
 0x295   :  { %v7036_v2 = vrot.slane %v20286_v32, %v14305_v11  ;;  %20287 = vst [vmem:[#allocation82_spill] sm:$0xff] %v16456_v1  ;;  %v7020_v20 = vcombine.low %v7012_v42, %v16405_v9  ;;  %v16474_v27 = vrot.slane %v6669_v55, %v14305_v11  ;;  %v5730_v19 = vsel %vm5577_vm2, %v20292_v40, %v16290_v0  ;;  %v4454_v41 = vpop.permute.xlu0 %4453 }
 0x296   :  { %20288 = vst [vmem:[#allocation87_spill] sm:$0xff] %v16459_v54  ;;  %20289 = vst [vmem:[#allocation79_spill] sm:$0xff] %v16466_v50  ;;  %v7068_v63 = vcombine.low %v7060_v39, %v16415_v26  ;;  %4499 = vrot.lane.b32.xlu1 %v16307_v28, %s13803_s16  ;;  %v7099_v21 = vrot.slane %v7092_v58, %v14305_v11  ;;  %v16484_v43 = vrot.slane %v7116_v33, %v14305_v11 }
 0x297   :  { %20290 = vst [vmem:[#allocation97_spill] sm:$0xff] %v16471_v14  ;;  %20291 = vst [vmem:[#allocation28_spill] sm:$0xff] %v16474_v27  ;;  %v7044_v59 = vcombine.low %v7036_v2, %v16428_v49  ;;  %v7156_v53 = vcombine.low %v16466_v50, %v16459_v54  ;;  %v5980_v55 = vsel %vm5878_vm3, %v5730_v19, %v4454_v41 }
 0x298   :  { %20293 = vst [vmem:[#allocation44_spill] sm:$0xff] %v16484_v43  ;;  %v16490_v42 = vrot.slane %v6645_v23, %v14305_v11  ;;  %v16494_v0 = vsel %vm6079_vm4, %v5980_v55, %v16238_v62  ;;  %v16496_v48 = vpop.permute.xlu1 %4463  ;;  %4497 = vrot.lane.b32.xlu0 %v16196_v17, %s13803_s16  ;;  %v3711_v39 = vrot.slane %v16456_v1, %v14305_v11  ;;  %v20295_v62 = vld [vmem:[#allocation111_spill] sm:$0xff] }
 0x299   :  { %v7027_v58 = vrot.slane %v7020_v20, %v14305_v11  ;;  %v7075_v33 = vrot.slane %v7068_v63, %v14305_v11  ;;  %v7140_v25 = vcombine.low %v16474_v27, %v16471_v14  ;;  %v7100_v23 = vcombine.low %v15909_v7, %v16494_v0  ;;  %v16515_v19 = vpop.permute.xlu0 %4461 }
 0x29a   :  { %20294 = vst [vmem:[#allocation29_spill] sm:$0xff] %v16490_v42  ;;  %v20296_v32 = vcombine.low %v20295_v62, %v15386_v36  ;;  %v7051_v40 = vrot.slane %v7044_v59, %v14305_v11  ;;  %4503 = vrot.lane.b32.xlu1 %v16389_v22, %s13803_s16  ;;  %v7124_v63 = vcombine.low %v16490_v42, %v16484_v43  ;;  %v20314_v43 = vld [vmem:[#allocation119_spill] sm:$0xff] }
 0x29b   :  { %v8588_v20 = vcombine.low %v7075_v33, %v7099_v21  ;;  %v7163_v41 = vrot.slane %v7156_v53, %v14305_v11  ;;  %v16523_v7 = vrot.slane %v7100_v23, %v14305_v11  ;;  %v16530_v36 = vrot.slane %v3711_v39, %v14305_v11 }
 0x29c   :  { %v16512_v2 = vrot.slane %v20296_v32, %v14305_v11  ;;  %v16525_v55 = vpop.permute.xlu1 %4471  ;;  %4501 = vrot.lane.b32.xlu0 %v16304_v8, %s13803_s16  ;;  %v7147_v59 = vrot.slane %v7140_v25, %v14305_v11  ;;  %v8587_v33 = vcombine.low %v7027_v58, %v7051_v40  ;;  %v7131_v53 = vrot.slane %v7124_v63, %v14305_v11  ;;  %v20298_v63 = vld [vmem:[#allocation121_spill] sm:$0xff] }
 0x29d   :  { %v16535_v62 = vpop.permute.xlu0 %4125  ;;  %v8604_v15 = vrot.slane %v8588_v20, %v14305_v11  ;;  %v2174_v39 = vcombine.high %v16277_v12, %v16277_v12 }
 0x29e   :  { %20297 = vst [vmem:[#allocation32_spill] sm:$0xff] %v16512_v2  ;;  %v7108_v21 = vcombine.low %v16512_v2, %v16523_v7  ;;  %4507 = vrot.lane.b32.xlu1 %v16530_v36, %s13803_s16  ;;  %v8590_v23 = vcombine.low %v7147_v59, %v7163_v41  ;;  %v8597_v40 = vrot.slane %v8587_v33, %v14305_v11  ;;  %v20299_v33 = vld [vmem:[#allocation120_spill] sm:$0xff] }
 0x29f   :  { %v2214_v41 = vrot.slane %v20298_v63, %v14305_v11  ;;  %v16558_v42 = vrot.slane %v2174_v39, %v14305_v11 }
 0x2a0   :  { %v7115_v32 = vrot.slane %v7108_v21, %v14305_v11  ;;  %v16544_v25 = vpop.permute.xlu1 %4127  ;;  %4505 = vrot.lane.b32.xlu0 %v16373_v31, %s13803_s16  ;;  %v8618_v12 = vrot.slane %v8590_v23, %v14305_v11  ;;  %v8620_v59 = vcombine.high %v8597_v40, %v8604_v15  ;;  %v8619_v21 = vcombine.low %v8597_v40, %v8604_v15 }
 0x2a1   :  { %v16549_v45 = vpop.permute.xlu0 %4801  ;;  %v2222_v50 = vcombine.high %v2214_v41, %v2214_v41  ;;  %v16565_v63 = vrot.slane %v2214_v41, %v14305_v11  ;;  %v3725_v41 = vrot.slane %v16558_v42, %v14305_v11 }
 0x2a2   :  { %v8589_v58 = vcombine.low %v7115_v32, %v7131_v53  ;;  %4835 = vrot.lane.b32.xlu1 %v16196_v17, %s13801_s14  ;;  %v12618_v32 = vpack.c.bf16 %v20299_v33, %v20299_v33  ;;  %v16572_v15 = vrot.slane %v8620_v59, %v14305_v11 }
 0x2a3   :  { %20300 = vst [vmem:[#allocation37_spill] sm:$0xff] %v16565_v63 }
 0x2a4   :  { %v8611_v20 = vrot.slane %v8589_v58, %v14305_v11  ;;  %v4468_v53 = vpop.permute.xlu1 %4467  ;;  %4833 = vrot.lane.b32.xlu0 %v16226_v60, %s13801_s14  ;;  %20301 = vst [vmem:[#allocation51_spill] sm:$0xff] %v16572_v15  ;;  %v16578_v60 = vrot.slane %v8619_v21, %v14305_v11 }
 0x2a5   :  { %v16567_v58 = vpop.permute.xlu0 %4809 }
 0x2a6   :  { %v8622_v17 = vcombine.high %v8611_v20, %v8618_v12  ;;  %v8621_v27 = vcombine.low %v8611_v20, %v8618_v12  ;;  %4839 = vrot.lane.b32.xlu1 %v16304_v8, %s13801_s14  ;;  %20303 = vst [vmem:[#allocation48_spill] sm:$0xff] %v16578_v60  ;;  %v2221_v8 = vrot.slane %v12618_v32, %v14305_v11 }
 0x2a8   :  { %v16575_v23 = vrot.slane %v8622_v17, %v14305_v11  ;;  %v16581_v39 = vrot.slane %v8621_v27, %v14305_v11  ;;  %v4804_v40 = vpop.permute.xlu1 %4803  ;;  %4837 = vrot.lane.b32.xlu0 %v16307_v28, %s13801_s14  ;;  %v16595_v27 = vrot.slane %v2222_v50, %v14305_v11  ;;  %v16599_v28 = vcombine.high %v16565_v63, %v16565_v63 }
 0x2a9   :  { %v16601_v21 = vpop.permute.xlu0 %4129  ;;  %v16610_v50 = vrot.slane %v3725_v41, %v14305_v11  ;;  %v2223_v17 = vcombine.high %v2221_v8, %v2221_v8  ;;  %v16613_v59 = vrot.slane %v2221_v8, %v14305_v11 }
 0x2aa   :  { %20302 = vst [vmem:[#allocation42_spill] sm:$0xff] %v16575_v23  ;;  %20304 = vst [vmem:[#allocation113_spill] sm:$0xff] %v16581_v39  ;;  %v8653_v20 = vcombine.low %v16572_v15, %v16575_v23  ;;  %v8651_v12 = vcombine.low %v16578_v60, %v16581_v39  ;;  %4843 = vrot.lane.b32.xlu1 %v16373_v31, %s13801_s14  ;;  %v2204_v23 = vcombine.high %v16456_v1, %v16456_v1  ;;  %v20310_v60 = vld [vmem:[#allocation98_spill] sm:$0xff] }
 0x2ab   :  { %20305 = vst [vmem:[#allocation83_spill] sm:$0xff] %v16595_v27  ;;  %20306 = vst [vmem:[#allocation56_spill] sm:$0xff] %v16599_v28  ;;  %v16626_v41 = vrot.slane %v2223_v17, %v14305_v11  ;;  %v3781_v8 = vrot.slane %v16613_v59, %v14305_v11  ;;  %v16632_v33 = vcombine.high %v16595_v27, %v16595_v27 }
 0x2ac   :  { %9593 = vmatprep.mubr.bf16.mxu1 %v8653_v20  ;;  %v4812_v32 = vpop.permute.xlu1 %4811  ;;  %4841 = vrot.lane.b32.xlu0 %v16389_v22, %s13801_s14  ;;  %20307 = vst [vmem:[#allocation95_spill] sm:$0xff] %v16613_v59  ;;  %v3753_v20 = vrot.slane %v16599_v28, %v14305_v11  ;;  %v3739_v22 = vrot.slane %v16595_v27, %v14305_v11  ;;  %v20312_v27 = vld [vmem:[#allocation107_spill] sm:$0xff] }
 0x2ad   :  { %9594 = vmatmul.mubr.bf16.gmra.mrb[4].mxu1 %v8651_v12  ;;  %v4466_v31 = vpop.permute.xlu0 %4465  ;;  %20308 = vst [vmem:[#allocation104_spill] sm:$0xff] %v16626_v41  ;;  %20309 = vst [vmem:[#allocation76_spill] sm:$0xff] %v16632_v33  ;;  %v16635_v39 = vrot.slane %v2204_v23, %v14305_v11  ;;  %v5745_v15 = vsel %vm5577_vm2, %v20310_v60, %v16461_v51  ;;  %v16648_v63 = vcombine.high %v16613_v59, %v16613_v59  ;;  %v20313_v60 = vld [vmem:[#allocation110_spill] sm:$0xff] }
 0x2ae   :  { %4847 = vrot.lane.b32.xlu1 %v16610_v50, %s13801_s14  ;;  %v16643_v17 = vrot.slane %v3753_v20, %v14305_v11  ;;  %v3746_v28 = vrot.slane %v3739_v22, %v14305_v11  ;;  %v5990_v23 = vsel %vm5878_vm3, %v5745_v15, %v16496_v48  ;;  %v5748_v51 = vsel %vm5577_vm2, %v20312_v27, %v16535_v62  ;;  %v20315_v22 = vld [vmem:[#allocation94_spill] sm:$0xff] }
 0x2af   :  { %20311 = vst [vmem:[#allocation80_spill] sm:$0xff] %v16648_v63  ;;  %v5751_v1 = vsel %vm5577_vm2, %v20313_v60, %v16544_v25  ;;  %v5742_v14 = vsel %vm5577_vm2, %v20315_v22, %v16432_v18  ;;  %v16665_v54 = vsel %vm6079_vm4, %v5990_v23, %v4804_v40  ;;  %v5992_v48 = vsel %vm5878_vm3, %v5748_v51, %v4466_v31 }
 0x2b0   :  { %v4132_v12 = vpop.permute.xlu1 %4131  ;;  %4845 = vrot.lane.b32.xlu0 %v16530_v36, %s13801_s14  ;;  %v5994_v59 = vsel %vm5878_vm3, %v5751_v1, %v4468_v53  ;;  %v5988_v62 = vsel %vm5878_vm3, %v5742_v14, %v16515_v19  ;;  %v3767_v18 = vrot.slane %v16632_v33, %v14305_v11  ;;  %v7180_v27 = vcombine.low %v16095_v47, %v16665_v54 }
 0x2b1   :  { %v4806_v2 = vpop.permute.xlu0 %4805  ;;  %v5757_v20 = vsel %vm5577_vm2, %v20314_v43, %v4132_v12  ;;  %v16682_v53 = vsel %vm6079_vm4, %v5988_v62, %v16549_v45  ;;  %v6789_v45 = vcombine.low %v16211_v3, %v16364_v13  ;;  %v6765_v47 = vcombine.low %v16230_v6, %v16354_v10  ;;  %v20316_v13 = vld [vmem:[#allocation115_spill] sm:$0xff] }
 0x2b2   :  { %4171 = vrot.lane.b32.xlu1 %v16610_v50, %s13802_s15  ;;  %v16673_v43 = vsel %vm6079_vm4, %v5992_v48, %v4806_v2  ;;  %v7164_v3 = vcombine.low %v16108_v34, %v16682_v53  ;;  %v16732_v51 = vrot.slane %v7180_v27, %v14305_v11 }
 0x2b3   :  { %v1439_v1 = vpop.f32.mrb[68].mxu0  ;;  %v7196_v31 = vcombine.low %v16327_v52, %v16673_v43 }
 0x2b4   :  { %v4808_v15 = vpop.permute.xlu1 %4807  ;;  %4169 = vrot.lane.b32.xlu0 %v16530_v36, %s13802_s15  ;;  %v5998_v36 = vsel %vm5878_vm3, %v5757_v20, %v16525_v55  ;;  %v1440_v2 = vadd.f32 %v16336_v44, %v1439_v1  ;;  %v13169_v40 = vpop.f32.mrb[69].mxu0  ;;  %v3809_v55 = vrot.slane %v16648_v63, %v14305_v11  ;;  %v16755_v1 = vrot.slane %v7164_v3, %v14305_v11 }
 0x2b5   :  { %v16676_v25 = vsel %vm6079_vm4, %v5994_v59, %v4808_v15  ;;  %v4134_v19 = vpop.permute.xlu0 %4133  ;;  %v6717_v59 = vcombine.low %v16008_v56, %v16101_v57  ;;  %v16705_v56 = vrot.slane %v3781_v8, %v14305_v11  ;;  %v3795_v57 = vrot.slane %v16626_v41, %v14305_v11 }
 0x2b6   :  { %v7212_v14 = vcombine.low %v16358_v46, %v16676_v25  ;;  %4175 = vrot.lane.b32.xlu1 %v16643_v17, %s13802_s15  ;;  %v6741_v46 = vcombine.low %v16017_v61, %v16081_v35  ;;  %v16714_v61 = vsel %vm6079_vm4, %v5998_v36, %v4812_v32  ;;  %v16717_v35 = vrot.slane %v3767_v18, %v14305_v11 }
 0x2b7   :  { %v1444_v52 = vpop.f32.mrb[70].mxu0  ;;  %v1517_v6 = vmax.f32 %v1440_v2, 0.0  ;;  %v16729_v32 = vrot.slane %v6789_v45, %v14305_v11  ;;  %v7244_v20 = vcombine.low %v16316_v4, %v16714_v61  ;;  %v16741_v22 = vrot.slane %v7196_v31, %v14305_v11  ;;  %v20319_v4 = vld [vmem:[#allocation112_spill] sm:$0xff] }
 0x2b8   :  { %v4136_v12 = vpop.permute.xlu1 %4135  ;;  %4173 = vrot.lane.b32.xlu0 %v3746_v28, %s13802_s15  ;;  %v5754_v28 = vsel %vm5577_vm2, %v20316_v13, %v16601_v21  ;;  %v16723_v8 = vrot.slane %v7212_v14, %v14305_v11  ;;  %v1445_v34 = vadd.f32 %v16336_v44, %v1444_v52  ;;  %v13172_v10 = vpop.f32.mrb[71].mxu0  ;;  %v16736_v21 = vrot.slane %v3809_v55, %v14305_v11 }
 0x2b9   :  { %v4470_v23 = vpop.permute.xlu0 %4469  ;;  %20317 = vst [vmem:[#allocation81_spill] sm:$0xff] %v16729_v32  ;;  %v16752_v18 = vrot.slane %v6741_v46, %v14305_v11  ;;  %v2057_v36 = vcombine.high %v20319_v4, %v20319_v4  ;;  %v16769_v45 = vrot.slane %v3795_v57, %v14305_v11  ;;  %v16775_v55 = vrot.slane %v6717_v59, %v14305_v11  ;;  %v20322_v46 = vld [vmem:[#allocation125_spill] sm:$0xff] }
 0x2ba   :  { %4179 = vrot.lane.b32.xlu1 %v16705_v56, %s13802_s15  ;;  %v5996_v60 = vsel %vm5878_vm3, %v5754_v28, %v4470_v23  ;;  %v16749_v62 = vmax.f32 %v1445_v34, 0.0  ;;  %v7220_v2 = vcombine.low %v16729_v32, %v16723_v8  ;;  %v5763_v31 = vsel %vm5577_vm2, %v20322_v46, %v4136_v12  ;;  %v20325_v34 = vld [vmem:[#allocation43_spill] sm:$0xff] }
 0x2bb   :  { %v16745_v48 = vsel %vm6079_vm4, %v5996_v60, %v16567_v58  ;;  %20318 = vst [vmem:[#allocation108_spill] sm:$0xff] %v16752_v18  ;;  %v16762_v58 = vrot.slane %v6765_v47, %v14305_v11  ;;  %20321 = vst [vmem:[#allocation101_spill] sm:$0xff] %v16775_v55  ;;  %v16785_v3 = vrot.slane %v7244_v20, %v14305_v11 }
 0x2bc   :  { %v4476_v15 = vpop.permute.xlu1 %4475  ;;  %4177 = vrot.lane.b32.xlu0 %v16717_v35, %s13802_s15  ;;  %v7228_v14 = vcombine.low %v16331_v5, %v16745_v48  ;;  %v16772_v27 = vpack.c.bf16 %v16749_v62, %v1517_v6  ;;  %v7188_v5 = vcombine.low %v16752_v18, %v16732_v51  ;;  %v16794_v59 = vrot.slane %v16635_v39, %v14305_v11 }
 0x2bd   :  { %20320 = vst [vmem:[#allocation84_spill] sm:$0xff] %v16762_v58  ;;  %v4474_v40 = vpop.permute.xlu0 %4473  ;;  %20324 = vst [vmem:[#allocation103_spill] sm:$0xff] %v16785_v3  ;;  %v7204_v57 = vcombine.low %v16762_v58, %v16741_v22  ;;  %v6002_v52 = vsel %vm5878_vm3, %v5763_v31, %v4476_v15  ;;  %v7172_v12 = vcombine.low %v16775_v55, %v16755_v1 }
 0x2be   :  { %4183 = vrot.lane.b32.xlu1 %v16736_v21, %s13802_s15  ;;  %v16782_v47 = vrot.slane %v7228_v14, %v14305_v11  ;;  %v5760_v28 = vsel %vm5577_vm2, %v2057_v36, %v4134_v19  ;;  %v7227_v6 = vrot.slane %v7220_v2, %v14305_v11  ;;  %v7195_v15 = vrot.slane %v7188_v5, %v14305_v11  ;;  %v20327_v36 = vld [vmem:[#allocation47_spill] sm:$0xff] }
 0x2bf   :  { %v6000_v60 = vsel %vm5878_vm3, %v5760_v28, %v4474_v40  ;;  %v16816_v4 = vcombine.high %v16626_v41, %v16626_v41  ;;  %v7252_v14 = vcombine.low %v20327_v36, %v16785_v3  ;;  %v7211_v2 = vrot.slane %v7204_v57, %v14305_v11 }
 0x2c0   :  { %20323 = vst [vmem:[#allocation35_spill] sm:$0xff] %v16782_v47  ;;  %v4816_v13 = vpop.permute.xlu1 %4815  ;;  %4181 = vrot.lane.b32.xlu0 %v16769_v45, %s13802_s15  ;;  %v7236_v10 = vcombine.low %v20325_v34, %v16782_v47  ;;  %v7179_v5 = vrot.slane %v7172_v12, %v14305_v11  ;;  %v20344_v47 = vld [vmem:[#allocation126_spill] sm:$0xff] }
 0x2c1   :  { %v16800_v23 = vsel %vm6079_vm4, %v6002_v52, %v4816_v13  ;;  %v4814_v39 = vpop.permute.xlu0 %4813  ;;  %20326 = vst [vmem:[#allocation27_spill] sm:$0xff] %v16816_v4  ;;  %v8656_v31 = vcombine.low %v7211_v2, %v7227_v6  ;;  %v20329_v13 = vld [vmem:[#allocation36_spill] sm:$0xff]  ;;  %v7259_v12 = vrot.slane %v7252_v14, %v14305_v11 }
 0x2c2   :  { %v7276_v20 = vcombine.low %v16410_v16, %v16800_v23  ;;  %4511 = vrot.lane.b32.xlu1 %v16794_v59, %s13803_s16  ;;  %v16812_v19 = vsel %vm6079_vm4, %v6000_v60, %v4814_v39  ;;  %v7243_v52 = vrot.slane %v7236_v10, %v14305_v11  ;;  %v20331_v6 = vld [vmem:[#allocation52_spill] sm:$0xff] }
 0x2c3   :  { %v7260_v40 = vcombine.low %v16494_v0, %v16812_v19  ;;  %v2206_v0 = vcombine.high %v16558_v42, %v16558_v42 }
 0x2c4   :  { %v16822_v16 = vrot.slane %v7276_v20, %v14305_v11  ;;  %v16826_v46 = vpop.permute.xlu1 %4139  ;;  %4509 = vrot.lane.b32.xlu0 %v16610_v50, %s13803_s16  ;;  %v8655_v50 = vcombine.low %v7179_v5, %v7195_v15  ;;  %v3823_v20 = vrot.slane %v16816_v4, %v14305_v11  ;;  %v8657_v42 = vcombine.low %v7243_v52, %v7259_v12 }
 0x2c5   :  { %v16835_v57 = vrot.slane %v7260_v40, %v14305_v11  ;;  %v16837_v34 = vpop.permute.xlu0 %4137  ;;  %v8672_v15 = vrot.slane %v8656_v31, %v14305_v11  ;;  %v4657_v5 = vrot.slane %v2206_v0, %v14305_v11 }
 0x2c6   :  { %20328 = vst [vmem:[#allocation106_spill] sm:$0xff] %v16822_v16  ;;  %v7284_v28 = vcombine.low %v20329_v13, %v16822_v16  ;;  %4515 = vrot.lane.b32.xlu1 %v16717_v35, %s13803_s16  ;;  %v8665_v13 = vrot.slane %v8655_v50, %v14305_v11  ;;  %v8679_v31 = vrot.slane %v8657_v42, %v14305_v11 }
 0x2c7   :  { %20330 = vst [vmem:[#allocation109_spill] sm:$0xff] %v16835_v57  ;;  %v7268_v10 = vcombine.low %v20331_v6, %v16835_v57  ;;  %v4664_v50 = vrot.slane %v4657_v5, %v14305_v11 }
 0x2c8   :  { %v16846_v60 = vpop.permute.xlu1 %4143  ;;  %4513 = vrot.lane.b32.xlu0 %v16643_v17, %s13803_s16  ;;  %v7291_v39 = vrot.slane %v7284_v28, %v14305_v11  ;;  %v16864_v17 = vrot.slane %v3823_v20, %v14305_v11  ;;  %v8688_v12 = vcombine.high %v8665_v13, %v8672_v15  ;;  %v8687_v6 = vcombine.low %v8665_v13, %v8672_v15  ;;  %v20333_v20 = vld [vmem:[#allocation17_spill] sm:$0xff] }
 0x2c9   :  { %v7275_v36 = vrot.slane %v7268_v10, %v14305_v11  ;;  %v16854_v2 = vpop.permute.xlu0 %4141  ;;  %v20332_v10 = vld [vmem:[#allocation14_spill] sm:$0xff] }
 0x2ca   :  { %4519 = vrot.lane.b32.xlu1 %v16769_v45, %s13803_s16  ;;  %v16887_v15 = vrot.slane %v8688_v12, %v14305_v11  ;;  %v16893_v13 = vrot.slane %v8687_v6, %v14305_v11 }
 0x2cb   :  { %v8658_v14 = vcombine.low %v7275_v36, %v7291_v39  ;;  %v12619_v39 = vpack.c.bf16 %v20332_v10, %v20332_v10  ;;  %v2263_v36 = vrot.slane %v20333_v20, %v14305_v11 }
 0x2cc   :  { %v16859_v40 = vpop.permute.xlu1 %4147  ;;  %4517 = vrot.lane.b32.xlu0 %v16705_v56, %s13803_s16  ;;  %20334 = vst [vmem:[#allocation71_spill] sm:$0xff] %v16887_v15  ;;  %20336 = vst [vmem:[#allocation59_spill] sm:$0xff] %v16893_v13 }
 0x2cd   :  { %v16868_v28 = vpop.permute.xlu0 %4145  ;;  %v8686_v52 = vrot.slane %v8658_v14, %v14305_v11  ;;  %v2270_v5 = vrot.slane %v12619_v39, %v14305_v11  ;;  %v2271_v55 = vcombine.high %v2263_v36, %v2263_v36 }
 0x2ce   :  { %4523 = vrot.lane.b32.xlu1 %v16864_v17, %s13803_s16 }
 0x2cf   :  { %v8690_v58 = vcombine.high %v8679_v31, %v8686_v52  ;;  %v8689_v32 = vcombine.low %v8679_v31, %v8686_v52  ;;  %v16900_v31 = vrot.slane %v2263_v36, %v14305_v11  ;;  %v2272_v20 = vcombine.high %v2270_v5, %v2270_v5 }
 0x2d0   :  { %v16878_v0 = vpop.permute.xlu1 %4151  ;;  %4521 = vrot.lane.b32.xlu0 %v16736_v21, %s13803_s16  ;;  %v16933_v36 = vrot.slane %v2270_v5, %v14305_v11 }
 0x2d1   :  { %v16883_v42 = vpop.permute.xlu0 %4149  ;;  %v16890_v14 = vrot.slane %v8690_v58, %v14305_v11  ;;  %v16896_v10 = vrot.slane %v8689_v32, %v14305_v11  ;;  %20338 = vst [vmem:[#allocation114_spill] sm:$0xff] %v16900_v31 }
 0x2d2   :  { %4851 = vrot.lane.b32.xlu1 %v4664_v50, %s13801_s14  ;;  %v3837_v50 = vrot.slane %v16900_v31, %v14305_v11  ;;  %v16954_v5 = vcombine.high %v16933_v36, %v16933_v36 }
 0x2d3   :  { %20335 = vst [vmem:[#allocation116_spill] sm:$0xff] %v16890_v14  ;;  %20337 = vst [vmem:[#allocation15_spill] sm:$0xff] %v16896_v10  ;;  %v8721_v12 = vcombine.low %v16887_v15, %v16890_v14  ;;  %v8719_v58 = vcombine.low %v16893_v13, %v16896_v10 }
 0x2d4   :  { %v4480_v52 = vpop.permute.xlu1 %4479  ;;  %4849 = vrot.lane.b32.xlu0 %v16794_v59, %s13801_s14 }
 0x2d5   :  { %9601 = vmatprep.mubr.bf16.mxu1 %v8721_v12  ;;  %v4478_v39 = vpop.permute.xlu0 %4477  ;;  %v16921_v12 = vrot.slane %v2272_v20, %v14305_v11 }
 0x2d6   :  { %4855 = vrot.lane.b32.xlu1 %v16705_v56, %s13801_s14  ;;  %9602 = vmatmul.mubr.bf16.gmra.mrb[8].mxu1 %v8719_v58  ;;  %v2301_v56 = vcombine.high %v16900_v31, %v16900_v31  ;;  %v20340_v58 = vld [vmem:[#allocation41_spill] sm:$0xff] }
 0x2d7   :  { %20339 = vst [vmem:[#allocation16_spill] sm:$0xff] %v16921_v12  ;;  %v2312_v32 = vrot.slane %v20340_v58, %v14305_v11  ;;  %v16944_v58 = vcombine.high %v16921_v12, %v16921_v12 }
 0x2d8   :  { %v4484_v59 = vpop.permute.xlu1 %4483  ;;  %4853 = vrot.lane.b32.xlu0 %v16717_v35, %s13801_s14  ;;  %v16930_v35 = vrot.slane %v3837_v50, %v14305_v11 }
 0x2d9   :  { %v4482_v18 = vpop.permute.xlu0 %4481  ;;  %20341 = vst [vmem:[#allocation99_spill] sm:$0xff] %v16944_v58  ;;  %v2320_v13 = vcombine.high %v2312_v32, %v2312_v32 }
 0x2da   :  { %4859 = vrot.lane.b32.xlu1 %v16736_v21, %s13801_s14  ;;  %v16936_v21 = vrot.slane %v2271_v55, %v14305_v11 }
 0x2db   :  { %v16971_v4 = vrot.slane %v2320_v13, %v14305_v11 }
 0x2dc   :  { %v4488_v6 = vpop.permute.xlu1 %4487  ;;  %4857 = vrot.lane.b32.xlu0 %v16769_v45, %s13801_s14  ;;  %v1449_v10 = vpop.f32.mrb[72].mxu0  ;;  %v3865_v45 = vrot.slane %v2301_v56, %v14305_v11  ;;  %v3851_v15 = vrot.slane %v16936_v21, %v14305_v11 }
 0x2dd   :  { %v16938_v20 = vpop.permute.xlu0 %4485  ;;  %v13175_v50 = vpop.f32.mrb[73].mxu0  ;;  %v1450_v55 = vadd.f32 %v16336_v44, %v1449_v10  ;;  %v20342_v10 = vld [vmem:[#allocation128_spill] sm:$0xff]  ;;  %20343 = vst [vmem:[#allocation46_spill] sm:$0xff] %v16971_v4 }
 0x2de   :  { %4863 = vrot.lane.b32.xlu1 %v16930_v35, %s13801_s14  ;;  %v16963_v56 = vrot.slane %v3865_v45, %v14305_v11  ;;  %v3893_v50 = vrot.slane %v16944_v58, %v14305_v11  ;;  %v5769_v63 = vsel %vm5577_vm2, %v20342_v10, %v16826_v46  ;;  %v5766_v58 = vsel %vm5577_vm2, %v20344_v47, %v16837_v34 }
 0x2df   :  { %v1519_v57 = vmax.f32 %v1450_v55, 0.0  ;;  %v6006_v41 = vsel %vm5878_vm3, %v5769_v63, %v4480_v52  ;;  %v16981_v33 = vrot.slane %v3851_v15, %v14305_v11  ;;  %v3879_v46 = vrot.slane %v16954_v5, %v14305_v11  ;;  %v20346_v63 = vld [vmem:[#allocation132_spill] sm:$0xff] }
 0x2e0   :  { %v16947_v14 = vpop.permute.xlu1 %4491  ;;  %4861 = vrot.lane.b32.xlu0 %v16864_v17, %s13801_s14  ;;  %v6004_v13 = vsel %vm5878_vm3, %v5766_v58, %v4478_v39  ;;  %v5775_v34 = vsel %vm5577_vm2, %v20346_v63, %v16846_v60  ;;  %v17003_v52 = vrot.slane %v3893_v50, %v14305_v11  ;;  %v20347_v39 = vld [vmem:[#allocation129_spill] sm:$0xff] }
 0x2e1   :  { %v16958_v12 = vpop.permute.xlu0 %4489  ;;  %v1454_v31 = vpop.f32.mrb[74].mxu0  ;;  %v5772_v58 = vsel %vm5577_vm2, %v20347_v39, %v16854_v2  ;;  %v3886_v2 = vrot.slane %v3879_v46, %v14305_v11 }
 0x2e2   :  { %4187 = vrot.lane.b32.xlu1 %v16930_v35, %s13802_s15  ;;  %v1455_v16 = vadd.f32 %v16336_v44, %v1454_v31  ;;  %v13178_v45 = vpop.f32.mrb[75].mxu0  ;;  %v6008_v10 = vsel %vm5878_vm3, %v5772_v58, %v4482_v18 }
 0x2e4   :  { %v4820_v3 = vpop.permute.xlu1 %4819  ;;  %4185 = vrot.lane.b32.xlu0 %v16864_v17, %s13802_s15  ;;  %v16987_v17 = vrot.slane %v2312_v32, %v14305_v11  ;;  %v16994_v47 = vmax.f32 %v1455_v16, 0.0  ;;  %v6010_v32 = vsel %vm5878_vm3, %v5775_v34, %v4484_v59  ;;  %v3921_v16 = vrot.slane %v16971_v4, %v14305_v11 }
 0x2e5   :  { %v16990_v31 = vsel %vm6079_vm4, %v6006_v41, %v4820_v3  ;;  %v4818_v55 = vpop.permute.xlu0 %4817 }
 0x2e6   :  { %20345 = vst [vmem:[#allocation134_spill] sm:$0xff] %v16987_v17  ;;  %4191 = vrot.lane.b32.xlu1 %v16963_v56, %s13802_s15  ;;  %v17000_v15 = vsel %vm6079_vm4, %v6004_v13, %v4818_v55  ;;  %v17013_v60 = vpack.c.bf16 %v16994_v47, %v1519_v57  ;;  %v7308_v59 = vcombine.low %v16420_v37, %v16990_v31  ;;  %v20348_v13 = vld [vmem:[#allocation135_spill] sm:$0xff] }
 0x2e7   :  { %v7292_v41 = vcombine.low %v16398_v24, %v17000_v15  ;;  %v2303_v24 = vcombine.high %v16936_v21, %v16936_v21  ;;  %v3907_v37 = vrot.slane %v16987_v17, %v14305_v11  ;;  %v5781_v55 = vsel %vm5577_vm2, %v20348_v13, %v16859_v40  ;;  %v20349_v40 = vld [vmem:[#allocation130_spill] sm:$0xff] }
 0x2e8   :  { %v4824_v3 = vpop.permute.xlu1 %4823  ;;  %4189 = vrot.lane.b32.xlu0 %v16981_v33, %s13802_s15  ;;  %v17056_v39 = vrot.slane %v7308_v59, %v14305_v11  ;;  %v20350_v59 = vld [vmem:[#allocation38_spill] sm:$0xff] }
 0x2e9   :  { %v17021_v50 = vsel %vm6079_vm4, %v6010_v32, %v4824_v3  ;;  %v4822_v57 = vpop.permute.xlu0 %4821  ;;  %v17037_v63 = vrot.slane %v7292_v41, %v14305_v11  ;;  %v17050_v3 = vrot.slane %v3921_v16, %v14305_v11  ;;  %v5778_v41 = vsel %vm5577_vm2, %v20349_v40, %v16868_v28 }
 0x2ea   :  { %v7340_v45 = vcombine.low %v16665_v54, %v17021_v50  ;;  %4195 = vrot.lane.b32.xlu1 %v17003_v52, %s13802_s15  ;;  %v17040_v18 = vsel %vm6079_vm4, %v6008_v10, %v4822_v57  ;;  %v6014_v54 = vsel %vm5878_vm3, %v5781_v55, %v4488_v6  ;;  %v4331_v58 = vrot.slane %v2303_v24, %v14305_v11  ;;  %v20351_v57 = vld [vmem:[#allocation18_spill] sm:$0xff] }
 0x2eb   :  { %v7324_v46 = vcombine.low %v16682_v53, %v17040_v18  ;;  %v6012_v53 = vsel %vm5878_vm3, %v5778_v41, %v16938_v20  ;;  %v17072_v28 = vrot.slane %v3907_v37, %v14305_v11  ;;  %v5787_v24 = vsel %vm5577_vm2, %v20350_v59, %v16878_v0  ;;  %v20355_v0 = vld [vmem:[#allocation67_spill] sm:$0xff]  ;;  %v20356_v41 = vld [vmem:[#allocation57_spill] sm:$0xff] }
 0x2ec   :  { %v17044_v34 = vrot.slane %v7340_v45, %v14305_v11  ;;  %v4828_v32 = vpop.permute.xlu1 %4827  ;;  %4193 = vrot.lane.b32.xlu0 %v3886_v2, %s13802_s15  ;;  %v7300_v20 = vcombine.low %v20351_v57, %v17037_v63  ;;  %v20352_v2 = vld [vmem:[#allocation20_spill] sm:$0xff]  ;;  %v5784_v40 = vsel %vm5577_vm2, %v20355_v0, %v16883_v42  ;;  %v17111_v42 = vrot.slane %v4331_v58, %v14305_v11 }
 0x2ed   :  { %v17059_v6 = vsel %vm6079_vm4, %v6014_v54, %v4828_v32  ;;  %v17065_v10 = vrot.slane %v7324_v46, %v14305_v11  ;;  %v4826_v45 = vpop.permute.xlu0 %4825  ;;  %v20353_v54 = vld [vmem:[#allocation34_spill] sm:$0xff] }
 0x2ee   :  { %v7372_v16 = vcombine.low %v16676_v25, %v17059_v6  ;;  %4199 = vrot.lane.b32.xlu1 %v17050_v3, %s13802_s15  ;;  %v7348_v13 = vcombine.low %v20352_v2, %v17044_v34  ;;  %v17082_v55 = vsel %vm6079_vm4, %v6012_v53, %v4826_v45  ;;  %v6018_v25 = vsel %vm5878_vm3, %v5787_v24, %v16947_v14 }
 0x2ef   :  { %v7332_v37 = vcombine.low %v20353_v54, %v17065_v10  ;;  %v7316_v53 = vcombine.low %v20356_v41, %v17056_v39  ;;  %v7356_v14 = vcombine.low %v16673_v43, %v17082_v55  ;;  %v7307_v43 = vrot.slane %v7300_v20, %v14305_v11 }
 0x2f0   :  { %v17089_v46 = vrot.slane %v7372_v16, %v14305_v11  ;;  %v4832_v32 = vpop.permute.xlu1 %4831  ;;  %4197 = vrot.lane.b32.xlu0 %v17072_v28, %s13802_s15  ;;  %v6016_v16 = vsel %vm5878_vm3, %v5784_v40, %v16958_v12  ;;  %v7355_v2 = vrot.slane %v7348_v13, %v14305_v11  ;;  %v17134_v20 = vcombine.high %v16987_v17, %v16987_v17 }
 0x2f1   :  { %v17101_v45 = vsel %vm6079_vm4, %v6018_v25, %v4832_v32  ;;  %v7339_v59 = vrot.slane %v7332_v37, %v14305_v11  ;;  %v17116_v25 = vrot.slane %v7356_v14, %v14305_v11  ;;  %v7323_v13 = vrot.slane %v7316_v53, %v14305_v11 }
 0x2f2   :  { %20354 = vst [vmem:[#allocation49_spill] sm:$0xff] %v17089_v46  ;;  %v7404_v24 = vcombine.low %v16714_v61, %v17101_v45  ;;  %v4830_v57 = vpop.permute.xlu0 %4829  ;;  %4527 = vrot.lane.b32.xlu1 %v16981_v33, %s13803_s16  ;;  %v7380_v61 = vcombine.low %v16428_v49, %v17089_v46  ;;  %20359 = vst [vmem:[#allocation45_spill] sm:$0xff] %v17134_v20 }
 0x2f3   :  { %20357 = vst [vmem:[#allocation90_spill] sm:$0xff] %v17116_v25  ;;  %v17119_v12 = vsel %vm6079_vm4, %v6016_v16, %v4830_v57  ;;  %v8724_v32 = vcombine.low %v7339_v59, %v7355_v2  ;;  %v7364_v49 = vcombine.low %v16405_v9, %v17116_v25 }
 0x2f4   :  { %v17124_v54 = vrot.slane %v7404_v24, %v14305_v11  ;;  %v7388_v58 = vcombine.low %v16745_v48, %v17119_v12  ;;  %v17128_v37 = vpop.permute.xlu1 %4155  ;;  %4525 = vrot.lane.b32.xlu0 %v16930_v35, %s13803_s16  ;;  %v8723_v35 = vcombine.low %v7307_v43, %v7323_v13  ;;  %v7387_v53 = vrot.slane %v7380_v61, %v14305_v11 }
 0x2f5   :  { %v7371_v41 = vrot.slane %v7364_v49, %v14305_v11  ;;  %v8740_v16 = vrot.slane %v8724_v32, %v14305_v11 }
 0x2f6   :  { %20358 = vst [vmem:[#allocation24_spill] sm:$0xff] %v17124_v54  ;;  %v7412_v0 = vcombine.low %v16392_v38, %v17124_v54  ;;  %v17142_v48 = vrot.slane %v7388_v58, %v14305_v11  ;;  %v17144_v40 = vpop.permute.xlu0 %4153  ;;  %4531 = vrot.lane.b32.xlu1 %v17111_v42, %s13803_s16  ;;  %v3935_v38 = vrot.slane %v17134_v20, %v14305_v11 }
 0x2f7   :  { %v8725_v59 = vcombine.low %v7371_v41, %v7387_v53 }
 0x2f8   :  { %20360 = vst [vmem:[#allocation92_spill] sm:$0xff] %v17142_v48  ;;  %v7396_v14 = vcombine.low %v16415_v26, %v17142_v48  ;;  %v17152_v9 = vpop.permute.xlu1 %4159  ;;  %4529 = vrot.lane.b32.xlu0 %v16963_v56, %s13803_s16  ;;  %v7419_v24 = vrot.slane %v7412_v0, %v14305_v11  ;;  %v8733_v26 = vrot.slane %v8723_v35, %v14305_v11  ;;  %v1459_v32 = vpop.f32.mrb[76].mxu0 }
 0x2f9   :  { %v17171_v58 = vrot.slane %v3935_v38, %v14305_v11  ;;  %v8747_v0 = vrot.slane %v8725_v59, %v14305_v11  ;;  %v13181_v53 = vpop.f32.mrb[77].mxu0  ;;  %v1460_v46 = vadd.f32 %v16336_v44, %v1459_v32 }
 0x2fa   :  { %v7403_v57 = vrot.slane %v7396_v14, %v14305_v11  ;;  %v17161_v43 = vpop.permute.xlu0 %4157  ;;  %4535 = vrot.lane.b32.xlu1 %v17072_v28, %s13803_s16  ;;  %v8756_v13 = vcombine.high %v8733_v26, %v8740_v16  ;;  %v8755_v41 = vcombine.low %v8733_v26, %v8740_v16  ;;  %v4671_v14 = vrot.slane %v16933_v36, %v14305_v11 }
 0x2fc   :  { %v8726_v2 = vcombine.low %v7403_v57, %v7419_v24  ;;  %v17166_v61 = vpop.permute.xlu1 %4163  ;;  %4533 = vrot.lane.b32.xlu0 %v17003_v52, %s13803_s16  ;;  %v20361_v52 = vld [vmem:[#allocation40_spill] sm:$0xff] }
 0x2fd   :  { %v12620_v38 = vpack.c.bf16 %v20361_v52, %v20361_v52  ;;  %v17200_v52 = vrot.slane %v8755_v41, %v14305_v11 }
 0x2fe   :  { %v17173_v49 = vpop.permute.xlu0 %4161  ;;  %4539 = vrot.lane.b32.xlu1 %v17171_v58, %s13803_s16  ;;  %v8754_v35 = vrot.slane %v8726_v2, %v14305_v11  ;;  %v1464_v59 = vpop.f32.mrb[78].mxu0  ;;  %v17189_v2 = vrot.slane %v8756_v13, %v14305_v11 }
 0x2ff   :  { %v1465_v16 = vadd.f32 %v16336_v44, %v1464_v59  ;;  %v13184_v26 = vpop.f32.mrb[79].mxu0  ;;  %20364 = vst [vmem:[#allocation86_spill] sm:$0xff] %v17200_v52  ;;  %v2319_v13 = vrot.slane %v12620_v38, %v14305_v11  ;;  %v4678_v44 = vrot.slane %v4671_v14, %v14305_v11 }
 0x300   :  { %v17183_v24 = vpop.permute.xlu1 %4167  ;;  %4537 = vrot.lane.b32.xlu0 %v17050_v3, %s13803_s16  ;;  %v8758_v57 = vcombine.high %v8747_v0, %v8754_v35  ;;  %v8757_v20 = vcombine.low %v8747_v0, %v8754_v35  ;;  %20362 = vst [vmem:[#allocation50_spill] sm:$0xff] %v17189_v2  ;;  %v1521_v0 = vmax.f32 %v1460_v46, 0.0  ;;  %v17209_v35 = vcombine.high %v16971_v4, %v16971_v4 }
 0x301   :  { %v17211_v59 = vmax.f32 %v1465_v16, 0.0  ;;  %v2361_v26 = vrot.slane %v16423_v29, %v14305_v11  ;;  %v17234_v14 = vrot.slane %v2319_v13, %v14305_v11 }
 0x302   :  { %v17192_v36 = vpop.permute.xlu0 %4165  ;;  %4867 = vrot.lane.b32.xlu1 %v16963_v56, %s13801_s14  ;;  %v17197_v53 = vrot.slane %v8758_v57, %v14305_v11  ;;  %v17203_v32 = vrot.slane %v8757_v20, %v14305_v11  ;;  %20366 = vst [vmem:[#allocation77_spill] sm:$0xff] %v17209_v35  ;;  %v3949_v20 = vrot.slane %v17209_v35, %v14305_v11 }
 0x303   :  { %20367 = vst [vmem:[#allocation89_spill] sm:$0xff] %v17211_v59  ;;  %v17224_v38 = vpack.c.bf16 %v17211_v59, %v1521_v0  ;;  %20369 = vst [vmem:[#allocation39_spill] sm:$0xff] %v17234_v14 }
 0x304   :  { %20363 = vst [vmem:[#allocation54_spill] sm:$0xff] %v17197_v53  ;;  %20365 = vst [vmem:[#allocation23_spill] sm:$0xff] %v17203_v32  ;;  %v4496_v56 = vpop.permute.xlu1 %4495  ;;  %4865 = vrot.lane.b32.xlu0 %v16981_v33, %s13801_s14  ;;  %v8789_v41 = vcombine.low %v17189_v2, %v17197_v53  ;;  %v8787_v46 = vcombine.low %v17200_v52, %v17203_v32  ;;  %v2321_v33 = vcombine.high %v2319_v13, %v2319_v13 }
 0x305   :  { %20368 = vst [vmem:[#allocation93_spill] sm:$0xff] %v17224_v38  ;;  %v17246_v29 = vrot.slane %v3949_v20, %v14305_v11  ;;  %v3963_v52 = vrot.slane %v17234_v14, %v14305_v11 }
 0x306   :  { %9609 = vmatprep.mubr.bf16.mxu1 %v8789_v41  ;;  %v4494_v57 = vpop.permute.xlu0 %4493  ;;  %4871 = vrot.lane.b32.xlu1 %v4678_v44, %s13801_s14  ;;  %v12621_v44 = vpack.c.bf16 %v16400_v30, %v16400_v30  ;;  %v17241_v41 = vrot.slane %v2321_v33, %v14305_v11 }
 0x307   :  { %9610 = vmatmul.mubr.bf16.gmra.mrb[12].mxu1 %v8787_v46  ;;  %v17297_v54 = vrot.slane %v3963_v52, %v14305_v11 }
 0x308   :  { %v4500_v16 = vpop.permute.xlu1 %4499  ;;  %4869 = vrot.lane.b32.xlu0 %v17111_v42, %s13801_s14  ;;  %20370 = vst [vmem:[#allocation96_spill] sm:$0xff] %v17241_v41  ;;  %v2369_v42 = vcombine.high %v2361_v26, %v2361_v26  ;;  %v2368_v30 = vrot.slane %v12621_v44, %v14305_v11  ;;  %v2353_v20 = vcombine.high %v17241_v41, %v17241_v41 }
 0x30a   :  { %v4498_v0 = vpop.permute.xlu0 %4497  ;;  %4875 = vrot.lane.b32.xlu1 %v17050_v3, %s13801_s14  ;;  %v17254_v3 = vcombine.high %v17234_v14, %v17234_v14  ;;  %v17258_v33 = vrot.slane %v2369_v42, %v14305_v11  ;;  %v20372_v42 = vld [vmem:[#allocation62_spill] sm:$0xff]  ;;  %v17279_v35 = vrot.slane %v2368_v30, %v14305_v11  ;;  %v4005_v59 = vrot.slane %v2353_v20, %v14305_v11 }
 0x30b   :  { %v2156_v2 = vcombine.high %v20372_v42, %v20372_v42 }
 0x30c   :  { %v4504_v46 = vpop.permute.xlu1 %4503  ;;  %4873 = vrot.lane.b32.xlu0 %v17072_v28, %s13801_s14  ;;  %20371 = vst [vmem:[#allocation70_spill] sm:$0xff] %v17254_v3  ;;  %v3977_v28 = vrot.slane %v17241_v41, %v14305_v11  ;;  %v3991_v44 = vrot.slane %v17254_v3, %v14305_v11  ;;  %20373 = vst [vmem:[#allocation78_spill] sm:$0xff] %v17279_v35  ;;  %v17283_v41 = vcombine.high %v17258_v33, %v17258_v33  ;;  %v20374_v3 = vld [vmem:[#allocation66_spill] sm:$0xff] }
 0x30d   :  { %v5793_v42 = vsel %vm5577_vm2, %v20374_v3, %v17128_v37  ;;  %v5790_v48 = vsel %vm5577_vm2, %v2156_v2, %v17144_v40  ;;  %v20375_v37 = vld [vmem:[#allocation74_spill] sm:$0xff] }
 0x30e   :  { %v17248_v13 = vpop.permute.xlu0 %4501  ;;  %4879 = vrot.lane.b32.xlu1 %v17246_v29, %s13801_s14  ;;  %v17288_v14 = vrot.slane %v3977_v28, %v14305_v11  ;;  %v6022_v25 = vsel %vm5878_vm3, %v5793_v42, %v4496_v56  ;;  %v6020_v17 = vsel %vm5878_vm3, %v5790_v48, %v4494_v57  ;;  %v17304_v28 = vrot.slane %v3991_v44, %v14305_v11 }
 0x30f   :  { %v5799_v3 = vsel %vm5577_vm2, %v20375_v37, %v17152_v9  ;;  %v4913_v48 = vrot.slane %v17279_v35, %v14305_v11  ;;  %v17323_v9 = vrot.slane %v4005_v59, %v14305_v11 }
 0x310   :  { %v17260_v32 = vpop.permute.xlu1 %4507  ;;  %4877 = vrot.lane.b32.xlu0 %v17171_v58, %s13801_s14  ;;  %v6026_v52 = vsel %vm5878_vm3, %v5799_v3, %v4500_v16  ;;  %v17331_v16 = vrot.slane %v2361_v26, %v14305_v11  ;;  %v20378_v3 = vld [vmem:[#allocation21_spill] sm:$0xff] }
 0x312   :  { %v17270_v53 = vpop.permute.xlu0 %4505  ;;  %4203 = vrot.lane.b32.xlu1 %v17246_v29, %s13802_s15 }
 0x314   :  { %v4836_v4 = vpop.permute.xlu1 %4835  ;;  %4201 = vrot.lane.b32.xlu0 %v17171_v58, %s13802_s15  ;;  %v2370_v58 = vcombine.high %v2368_v30, %v2368_v30  ;;  %v13743_v30 = vld [vmem:[%s19777_s2] ss:$0 sm:$0xff] }
 0x315   :  { %v17310_v40 = vsel %vm6079_vm4, %v6022_v25, %v4836_v4  ;;  %v4899_v4 = vrot.slane %v17283_v41, %v14305_v11  ;;  %v20376_v25 = vld [vmem:[#allocation61_spill] sm:$0xff] }
 0x316   :  { %v4834_v38 = vpop.permute.xlu0 %4833  ;;  %4207 = vrot.lane.b32.xlu1 %v17288_v14, %s13802_s15  ;;  %v17340_v44 = vrot.slane %v2370_v58, %v14305_v11 }
 0x317   :  { %v17313_v2 = vsel %vm6079_vm4, %v6020_v17, %v4834_v38  ;;  %v1469_v17 = vpop.f32.mrb[80].mxu0  ;;  %v5796_v38 = vsel %vm5577_vm2, %v20376_v25, %v17161_v43  ;;  %v7436_v43 = vcombine.low %v16800_v23, %v17310_v40 }
 0x318   :  { %v7420_v56 = vcombine.low %v16812_v19, %v17313_v2  ;;  %v4840_v57 = vpop.permute.xlu1 %4839  ;;  %4205 = vrot.lane.b32.xlu0 %v17297_v54, %s13802_s15  ;;  %v1470_v59 = vadd.f32 %v13743_v30, %v1469_v17  ;;  %v13187_v20 = vpop.f32.mrb[81].mxu0  ;;  %20377 = vst [vmem:[#allocation22_spill] sm:$0xff] %v17340_v44  ;;  %v6024_v42 = vsel %vm5878_vm3, %v5796_v38, %v4498_v0  ;;  %v20379_v38 = vld [vmem:[#allocation63_spill] sm:$0xff] }
 0x319   :  { %v17334_v19 = vsel %vm6079_vm4, %v6026_v52, %v4840_v57  ;;  %v5805_v52 = vsel %vm5577_vm2, %v20378_v3, %v17166_v61  ;;  %v17359_v0 = vrot.slane %v4913_v48, %v14305_v11  ;;  %v4906_v61 = vrot.slane %v4899_v4, %v14305_v11 }
 0x31a   :  { %v7468_v26 = vcombine.low %v16990_v31, %v17334_v19  ;;  %v4838_v37 = vpop.permute.xlu0 %4837  ;;  %4211 = vrot.lane.b32.xlu1 %v17323_v9, %s13802_s15  ;;  %v17353_v57 = vrot.slane %v7420_v56, %v14305_v11  ;;  %v6030_v23 = vsel %vm5878_vm3, %v5805_v52, %v4504_v46  ;;  %v1474_v56 = vpop.f32.mrb[82].mxu0  ;;  %v5802_v48 = vsel %vm5577_vm2, %v20379_v38, %v17173_v49  ;;  %v20380_v49 = vld [vmem:[#allocation75_spill] sm:$0xff] }
 0x31b   :  { %v17356_v58 = vsel %vm6079_vm4, %v6024_v42, %v4838_v37  ;;  %v1523_v46 = vmax.f32 %v1470_v59, 0.0  ;;  %v1475_v42 = vadd.f32 %v13743_v30, %v1474_v56  ;;  %v17379_v37 = vrot.slane %v7436_v43, %v14305_v11 }
 0x31c   :  { %v17363_v31 = vrot.slane %v7468_v26, %v14305_v11  ;;  %v7452_v17 = vcombine.low %v17000_v15, %v17356_v58  ;;  %v4844_v25 = vpop.permute.xlu1 %4843  ;;  %4209 = vrot.lane.b32.xlu0 %v17304_v28, %s13802_s15  ;;  %v13190_v26 = vpop.f32.mrb[83].mxu0  ;;  %v6028_v15 = vsel %vm5878_vm3, %v5802_v48, %v17248_v13  ;;  %v5811_v30 = vsel %vm5577_vm2, %v20380_v49, %v17183_v24 }
 0x31d   :  { %v17374_v20 = vsel %vm6079_vm4, %v6030_v23, %v4844_v25  ;;  %v7428_v13 = vcombine.low %v16523_v7, %v17353_v57  ;;  %v17396_v43 = vmax.f32 %v1475_v42, 0.0  ;;  %v6034_v23 = vsel %vm5878_vm3, %v5811_v30, %v17260_v32  ;;  %v20382_v25 = vld [vmem:[#allocation97_spill] sm:$0xff]  ;;  %v20383_v7 = vld [vmem:[#allocation91_spill] sm:$0xff] }
 0x31e   :  { %v17382_v3 = vrot.slane %v7452_v17, %v14305_v11  ;;  %v7500_v4 = vcombine.low %v17021_v50, %v17374_v20  ;;  %v4842_v52 = vpop.permute.xlu0 %4841  ;;  %5035 = vrot.lane.b32.xlu1 %v17359_v0, %s13802_s15  ;;  %v20381_v50 = vld [vmem:[#allocation87_spill] sm:$0xff]  ;;  %v5808_v48 = vsel %vm5577_vm2, %v20383_v7, %v17192_v36 }
 0x31f   :  { %v17394_v59 = vsel %vm6079_vm4, %v6028_v15, %v4842_v52  ;;  %v7476_v17 = vcombine.low %v20381_v50, %v17363_v31  ;;  %v17417_v26 = vpack.c.bf16 %v17396_v43, %v1523_v46  ;;  %v6032_v15 = vsel %vm5878_vm3, %v5808_v48, %v17270_v53 }
 0x320   :  { %v7460_v56 = vcombine.low %v20382_v25, %v17382_v3  ;;  %v17405_v38 = vrot.slane %v7500_v4, %v14305_v11  ;;  %v4848_v24 = vpop.permute.xlu1 %4847  ;;  %5033 = vrot.lane.b32.xlu0 %v4906_v61, %s13802_s15  ;;  %v7484_v42 = vcombine.low %v17040_v18, %v17394_v59  ;;  %v20384_v4 = vld [vmem:[#allocation44_spill] sm:$0xff]  ;;  %v4345_v18 = vrot.slane %v17331_v16, %v14305_v11 }
 0x321   :  { %v17414_v32 = vsel %vm6079_vm4, %v6034_v23, %v4848_v24  ;;  %v7444_v52 = vcombine.low %v20384_v4, %v17379_v37  ;;  %v7435_v46 = vrot.slane %v7428_v13, %v14305_v11  ;;  %v7483_v23 = vrot.slane %v7476_v17, %v14305_v11 }
 0x322   :  { %v7467_v61 = vrot.slane %v7460_v56, %v14305_v11  ;;  %v7532_v36 = vcombine.low %v17059_v6, %v17414_v32  ;;  %v4846_v49 = vpop.permute.xlu0 %4845  ;;  %4543 = vrot.lane.b32.xlu1 %v17297_v54, %s13803_s16  ;;  %v17432_v30 = vrot.slane %v7484_v42, %v14305_v11  ;;  %v7508_v6 = vcombine.low %v16732_v51, %v17405_v38 }
 0x323   :  { %v17435_v53 = vsel %vm6079_vm4, %v6032_v15, %v4846_v49  ;;  %v7451_v24 = vrot.slane %v7444_v52, %v14305_v11 }
 0x324   :  { %v17441_v50 = vrot.slane %v7532_v36, %v14305_v11  ;;  %v7516_v25 = vcombine.low %v17082_v55, %v17435_v53  ;;  %v17445_v56 = vpop.permute.xlu1 %4171  ;;  %4541 = vrot.lane.b32.xlu0 %v17246_v29, %s13803_s16  ;;  %v7492_v13 = vcombine.low %v16755_v1, %v17432_v30  ;;  %v8792_v17 = vcombine.low %v7467_v61, %v7483_v23 }
 0x325   :  { %v4352_v29 = vrot.slane %v4345_v18, %v14305_v11  ;;  %v8791_v42 = vcombine.low %v7435_v46, %v7451_v24  ;;  %v7515_v1 = vrot.slane %v7508_v6, %v14305_v11 }
 0x326   :  { %v7540_v51 = vcombine.low %v16723_v8, %v17441_v50  ;;  %v17455_v7 = vrot.slane %v7516_v25, %v14305_v11  ;;  %v17457_v48 = vpop.permute.xlu0 %4169  ;;  %4547 = vrot.lane.b32.xlu1 %v17304_v28, %s13803_s16  ;;  %v7499_v55 = vrot.slane %v7492_v13, %v14305_v11  ;;  %v4927_v8 = vrot.slane %v17340_v44, %v14305_v11 }
 0x327   :  { %v8808_v18 = vrot.slane %v8792_v17, %v14305_v11  ;;  %v8801_v6 = vrot.slane %v8791_v42, %v14305_v11 }
 0x328   :  { %v7524_v15 = vcombine.low %v16741_v22, %v17455_v7  ;;  %v17466_v4 = vpop.permute.xlu1 %4175  ;;  %4545 = vrot.lane.b32.xlu0 %v17288_v14, %s13803_s16  ;;  %v8793_v52 = vcombine.low %v7499_v55, %v7515_v1  ;;  %v7547_v61 = vrot.slane %v7540_v51, %v14305_v11  ;;  %v4934_v23 = vrot.slane %v4927_v8, %v14305_v11 }
 0x329   :  { %v8824_v51 = vcombine.high %v8801_v6, %v8808_v18  ;;  %v8823_v17 = vcombine.low %v8801_v6, %v8808_v18  ;;  %v17513_v18 = vcombine.high %v17279_v35, %v17279_v35 }
 0x32a   :  { %v7531_v36 = vrot.slane %v7524_v15, %v14305_v11  ;;  %v17474_v49 = vpop.permute.xlu0 %4173  ;;  %4551 = vrot.lane.b32.xlu1 %v4352_v29, %s13803_s16  ;;  %v8815_v13 = vrot.slane %v8793_v52, %v14305_v11 }
 0x32b   :  { %v17498_v42 = vrot.slane %v8824_v51, %v14305_v11  ;;  %20389 = vst [vmem:[#allocation85_spill] sm:$0xff] %v17513_v18 }
 0x32c   :  { %v8794_v22 = vcombine.low %v7531_v36, %v7547_v61  ;;  %v17478_v46 = vpop.permute.xlu1 %4179  ;;  %4549 = vrot.lane.b32.xlu0 %v17323_v9, %s13803_s16  ;;  %v17504_v61 = vrot.slane %v8823_v17, %v14305_v11 }
 0x32d   :  { %20385 = vst [vmem:[#allocation65_spill] sm:$0xff] %v17498_v42 }
 0x32e   :  { %v17484_v25 = vpop.permute.xlu0 %4177  ;;  %5069 = vrot.lane.b32.xlu1 %v4934_v23, %s13803_s16  ;;  %v8822_v24 = vrot.slane %v8794_v22, %v14305_v11  ;;  %20387 = vst [vmem:[#allocation30_spill] sm:$0xff] %v17504_v61 }
 0x330   :  { %v17489_v55 = vpop.permute.xlu1 %4183  ;;  %5067 = vrot.lane.b32.xlu0 %v17359_v0, %s13803_s16  ;;  %v8826_v1 = vcombine.high %v8815_v13, %v8822_v24  ;;  %v8825_v15 = vcombine.low %v8815_v13, %v8822_v24  ;;  %v4685_v0 = vrot.slane %v17258_v33, %v14305_v11 }
 0x332   :  { %v17493_v8 = vpop.permute.xlu0 %4181  ;;  %4883 = vrot.lane.b32.xlu1 %v17288_v14, %s13801_s14  ;;  %v17501_v52 = vrot.slane %v8826_v1, %v14305_v11  ;;  %v17507_v36 = vrot.slane %v8825_v15, %v14305_v11  ;;  %v4692_v17 = vrot.slane %v4685_v0, %v14305_v11  ;;  %v4941_v1 = vrot.slane %v17513_v18, %v14305_v11  ;;  %v20394_v18 = vld [vmem:[#allocation26_spill] sm:$0xff] }
 0x334   :  { %20386 = vst [vmem:[#allocation117_spill] sm:$0xff] %v17501_v52  ;;  %20388 = vst [vmem:[#allocation31_spill] sm:$0xff] %v17507_v36  ;;  %v4512_v14 = vpop.permute.xlu1 %4511  ;;  %4881 = vrot.lane.b32.xlu0 %v17297_v54, %s13801_s14  ;;  %v8857_v22 = vcombine.low %v17498_v42, %v17501_v52  ;;  %v8855_v6 = vcombine.low %v17504_v61, %v17507_v36  ;;  %v2410_v54 = vrot.slane %v16772_v27, %v14305_v11 }
 0x335   :  { %v17542_v27 = vrot.slane %v4941_v1, %v14305_v11 }
 0x336   :  { %9617 = vmatprep.mubr.bf16.mxu1 %v8857_v22  ;;  %v4510_v24 = vpop.permute.xlu0 %4509  ;;  %4887 = vrot.lane.b32.xlu1 %v17323_v9, %s13801_s14  ;;  %v12622_v22 = vpack.c.bf16 %v16749_v62, %v16749_v62  ;;  %v17538_v9 = vrot.slane %v2410_v54, %v14305_v11  ;;  %v2418_v0 = vcombine.high %v2410_v54, %v2410_v54 }
 0x337   :  { %9618 = vmatmul.mubr.bf16.gmra.mrb[16].mxu1 %v8855_v6 }
 0x338   :  { %v4516_v51 = vpop.permute.xlu1 %4515  ;;  %4885 = vrot.lane.b32.xlu0 %v17304_v28, %s13801_s14  ;;  %20390 = vst [vmem:[#allocation118_spill] sm:$0xff] %v17538_v9  ;;  %v17546_v28 = vcombine.high %v17340_v44, %v17340_v44  ;;  %v17551_v62 = vrot.slane %v12622_v22, %v14305_v11  ;;  %v17560_v1 = vcombine.high %v17538_v9, %v17538_v9  ;;  %v20393_v22 = vld [vmem:[#allocation82_spill] sm:$0xff] }
 0x339   :  { %v17565_v13 = vrot.slane %v2418_v0, %v14305_v11  ;;  %v5817_v61 = vsel %vm5577_vm2, %v20393_v22, %v17445_v56 }
 0x33a   :  { %v4514_v15 = vpop.permute.xlu0 %4513  ;;  %4891 = vrot.lane.b32.xlu1 %v4692_v17, %s13801_s14  ;;  %20391 = vst [vmem:[#allocation33_spill] sm:$0xff] %v17546_v28  ;;  %20392 = vst [vmem:[#allocation123_spill] sm:$0xff] %v17560_v1  ;;  %v4955_v54 = vrot.slane %v17546_v28, %v14305_v11  ;;  %v17576_v52 = vrot.slane %v17551_v62, %v14305_v11  ;;  %v4997_v0 = vrot.slane %v17560_v1, %v14305_v11 }
 0x33b   :  { %v5814_v28 = vsel %vm5577_vm2, %v20394_v18, %v17457_v48  ;;  %v6038_v35 = vsel %vm5878_vm3, %v5817_v61, %v4512_v14  ;;  %v17601_v48 = vcombine.high %v17565_v13, %v17565_v13  ;;  %v20396_v61 = vld [vmem:[#allocation83_spill] sm:$0xff] }
 0x33c   :  { %v4520_v6 = vpop.permute.xlu1 %4519  ;;  %4889 = vrot.lane.b32.xlu0 %v4352_v29, %s13801_s14  ;;  %v4969_v29 = vrot.slane %v17538_v9, %v14305_v11  ;;  %v17589_v56 = vrot.slane %v4955_v54, %v14305_v11  ;;  %v6036_v22 = vsel %vm5878_vm3, %v5814_v28, %v4510_v24  ;;  %v5823_v18 = vsel %vm5577_vm2, %v20396_v61, %v17466_v4  ;;  %v20397_v4 = vld [vmem:[#allocation37_spill] sm:$0xff] }
 0x33d   :  { %20395 = vst [vmem:[#allocation122_spill] sm:$0xff] %v17601_v48  ;;  %v17617_v54 = vrot.slane %v4997_v0, %v14305_v11 }
 0x33e   :  { %v4518_v33 = vpop.permute.xlu0 %4517  ;;  %5103 = vrot.lane.b32.xlu1 %v17542_v27, %s13801_s14  ;;  %v17580_v9 = vrot.slane %v4969_v29, %v14305_v11  ;;  %v4983_v29 = vrot.slane %v17565_v13, %v14305_v11 }
 0x340   :  { %v17553_v17 = vpop.permute.xlu1 %4523  ;;  %5101 = vrot.lane.b32.xlu0 %v4934_v23, %s13801_s14  ;;  %v17633_v0 = vrot.slane %v4983_v29, %v14305_v11 }
 0x342   :  { %v17567_v36 = vpop.permute.xlu0 %4521  ;;  %5039 = vrot.lane.b32.xlu1 %v17542_v27, %s13802_s15 }
 0x344   :  { %v4852_v42 = vpop.permute.xlu1 %4851  ;;  %5037 = vrot.lane.b32.xlu0 %v4934_v23, %s13802_s15 }
 0x345   :  { %v17593_v44 = vsel %vm6079_vm4, %v6038_v35, %v4852_v42  ;;  %v5025_v35 = vrot.slane %v17576_v52, %v14305_v11  ;;  %v6042_v42 = vsel %vm5878_vm3, %v5823_v18, %v4516_v51 }
 0x346   :  { %v4850_v23 = vpop.permute.xlu0 %4849  ;;  %5043 = vrot.lane.b32.xlu1 %v17580_v9, %s13802_s15 }
 0x347   :  { %v17607_v14 = vsel %vm6079_vm4, %v6036_v22, %v4850_v23  ;;  %v5820_v22 = vsel %vm5577_vm2, %v20397_v4, %v17474_v49  ;;  %v7564_v23 = vcombine.low %v17101_v45, %v17593_v44  ;;  %v5011_v49 = vrot.slane %v17601_v48, %v14305_v11  ;;  %v20398_v45 = vld [vmem:[#allocation76_spill] sm:$0xff] }
 0x348   :  { %v7548_v24 = vcombine.low %v17119_v12, %v17607_v14  ;;  %v4856_v28 = vpop.permute.xlu1 %4855  ;;  %5041 = vrot.lane.b32.xlu0 %v17589_v56, %s13802_s15  ;;  %v6040_v51 = vsel %vm5878_vm3, %v5820_v22, %v4514_v15 }
 0x349   :  { %v17625_v61 = vsel %vm6079_vm4, %v6042_v42, %v4856_v28  ;;  %v5829_v42 = vsel %vm5577_vm2, %v20398_v45, %v17478_v46  ;;  %v17655_v46 = vrot.slane %v5025_v35, %v14305_v11 }
 0x34a   :  { %v7596_v12 = vcombine.low %v17310_v40, %v17625_v61  ;;  %v4854_v18 = vpop.permute.xlu0 %4853  ;;  %5047 = vrot.lane.b32.xlu1 %v17617_v54, %s13802_s15  ;;  %v17641_v28 = vrot.slane %v7548_v24, %v14305_v11  ;;  %v6046_v40 = vsel %vm5878_vm3, %v5829_v42, %v4520_v6  ;;  %v20399_v24 = vld [vmem:[#allocation56_spill] sm:$0xff] }
 0x34b   :  { %v17644_v15 = vsel %vm6079_vm4, %v6040_v51, %v4854_v18  ;;  %v5826_v51 = vsel %vm5577_vm2, %v20399_v24, %v17484_v25  ;;  %v17661_v18 = vrot.slane %v7564_v23, %v14305_v11  ;;  %v17675_v25 = vrot.slane %v5011_v49, %v14305_v11  ;;  %v20400_v23 = vld [vmem:[#allocation104_spill] sm:$0xff] }
 0x34c   :  { %v17648_v4 = vrot.slane %v7596_v12, %v14305_v11  ;;  %v7580_v29 = vcombine.low %v17313_v2, %v17644_v15  ;;  %v4860_v22 = vpop.permute.xlu1 %4859  ;;  %5045 = vrot.lane.b32.xlu0 %v17633_v0, %s13802_s15  ;;  %v6044_v12 = vsel %vm5878_vm3, %v5826_v51, %v4518_v33  ;;  %v5835_v42 = vsel %vm5577_vm2, %v20400_v23, %v17489_v55  ;;  %v20403_v51 = vld [vmem:[#allocation109_spill] sm:$0xff] }
 0x34d   :  { %v17664_v6 = vsel %vm6079_vm4, %v6046_v40, %v4860_v22  ;;  %v20401_v40 = vld [vmem:[#allocation35_spill] sm:$0xff]  ;;  %v6050_v49 = vsel %vm5878_vm3, %v5835_v42, %v17553_v17 }
 0x34e   :  { %v17668_v2 = vrot.slane %v7580_v29, %v14305_v11  ;;  %v7628_v45 = vcombine.low %v17334_v19, %v17664_v6  ;;  %v4858_v35 = vpop.permute.xlu0 %4857  ;;  %5051 = vrot.lane.b32.xlu1 %v17655_v46, %s13802_s15  ;;  %v7556_v33 = vcombine.low %v20401_v40, %v17641_v28  ;;  %v20402_v29 = vld [vmem:[#allocation106_spill] sm:$0xff]  ;;  %v2419_v19 = vcombine.high %v17551_v62, %v17551_v62  ;;  %v20405_v40 = vld [vmem:[#allocation95_spill] sm:$0xff] }
 0x34f   :  { %v7604_v22 = vcombine.low %v20402_v29, %v17648_v4  ;;  %v17685_v24 = vsel %vm6079_vm4, %v6044_v12, %v4858_v35  ;;  %v5832_v12 = vsel %vm5577_vm2, %v20405_v40, %v17493_v8  ;;  %v20406_v35 = vld [vmem:[#allocation103_spill] sm:$0xff] }
 0x350   :  { %v7588_v1 = vcombine.low %v20403_v51, %v17668_v2  ;;  %v17694_v55 = vrot.slane %v7628_v45, %v14305_v11  ;;  %v4864_v23 = vpop.permute.xlu1 %4863  ;;  %5049 = vrot.lane.b32.xlu0 %v17675_v25, %s13802_s15  ;;  %v7572_v62 = vcombine.low %v20406_v35, %v17661_v18  ;;  %v7612_v17 = vcombine.low %v17356_v58, %v17685_v24 }
 0x351   :  { %v17706_v42 = vsel %vm6079_vm4, %v6050_v49, %v4864_v23  ;;  %v6048_v45 = vsel %vm5878_vm3, %v5832_v12, %v17567_v36  ;;  %v7563_v8 = vrot.slane %v7556_v33, %v14305_v11  ;;  %v7611_v40 = vrot.slane %v7604_v22, %v14305_v11 }
 0x352   :  { %20404 = vst [vmem:[#allocation124_spill] sm:$0xff] %v17694_v55  ;;  %v7595_v29 = vrot.slane %v7588_v1, %v14305_v11  ;;  %v7660_v51 = vcombine.low %v17374_v20, %v17706_v42  ;;  %v4862_v48 = vpop.permute.xlu0 %4861  ;;  %5073 = vrot.lane.b32.xlu1 %v17589_v56, %s13803_s16  ;;  %v17718_v58 = vrot.slane %v7612_v17, %v14305_v11 }
 0x353   :  { %v17721_v49 = vsel %vm6079_vm4, %v6048_v45, %v4862_v48  ;;  %v17724_v36 = vrot.slane %v2419_v19, %v14305_v11  ;;  %v7636_v20 = vcombine.low %v17056_v39, %v17694_v55  ;;  %v7579_v48 = vrot.slane %v7572_v62, %v14305_v11 }
 0x354   :  { %v17729_v1 = vrot.slane %v7660_v51, %v14305_v11  ;;  %v7644_v33 = vcombine.low %v17394_v59, %v17721_v49  ;;  %v17733_v23 = vpop.permute.xlu1 %4187  ;;  %5071 = vrot.lane.b32.xlu0 %v17542_v27, %s13803_s16  ;;  %v8860_v22 = vcombine.low %v7595_v29, %v7611_v40  ;;  %v7620_v19 = vcombine.low %v17037_v63, %v17718_v58 }
 0x355   :  { %20407 = vst [vmem:[#allocation127_spill] sm:$0xff] %v17724_v36  ;;  %v8859_v59 = vcombine.low %v7563_v8, %v7579_v48  ;;  %v7643_v62 = vrot.slane %v7636_v20, %v14305_v11 }
 0x356   :  { %20408 = vst [vmem:[#allocation105_spill] sm:$0xff] %v17729_v1  ;;  %v7668_v39 = vcombine.low %v17044_v34, %v17729_v1  ;;  %v17743_v12 = vrot.slane %v7644_v33, %v14305_v11  ;;  %v17745_v35 = vpop.permute.xlu0 %4185  ;;  %5077 = vrot.lane.b32.xlu1 %v17633_v0, %s13803_s16  ;;  %v7627_v27 = vrot.slane %v7620_v19, %v14305_v11  ;;  %v17760_v29 = vpop.f32.mrb[84].mxu0 }
 0x357   :  { %v5059_v34 = vrot.slane %v17724_v36, %v14305_v11  ;;  %v8876_v45 = vrot.slane %v8860_v22, %v14305_v11  ;;  %v8869_v48 = vrot.slane %v8859_v59, %v14305_v11  ;;  %v13193_v19 = vpop.f32.mrb[85].mxu0 }
 0x358   :  { %20409 = vst [vmem:[#allocation100_spill] sm:$0xff] %v17743_v12  ;;  %v7652_v17 = vcombine.low %v17065_v10, %v17743_v12  ;;  %v17753_v63 = vpop.permute.xlu1 %4191  ;;  %5075 = vrot.lane.b32.xlu0 %v17580_v9, %s13803_s16  ;;  %v8861_v51 = vcombine.low %v7627_v27, %v7643_v62  ;;  %v7675_v8 = vrot.slane %v7668_v39, %v14305_v11 }
 0x359   :  { %v5066_v39 = vrot.slane %v5059_v34, %v14305_v11  ;;  %v8892_v62 = vcombine.high %v8869_v48, %v8876_v45 }
 0x35a   :  { %v7659_v40 = vrot.slane %v7652_v17, %v14305_v11  ;;  %v12753_v20 = vpop.f32.mrb[0].mxu1  ;;  %v17764_v33 = vpop.permute.xlu0 %4189  ;;  %5081 = vrot.lane.b32.xlu1 %v17675_v25, %s13803_s16  ;;  %v8883_v59 = vrot.slane %v8861_v51, %v14305_v11 }
 0x35b   :  { %v12754_v10 = vpop.f32.mrb[1].mxu1  ;;  %v17794_v51 = vrot.slane %v8892_v62, %v14305_v11 }
 0x35c   :  { %v8862_v36 = vcombine.low %v7659_v40, %v7675_v8  ;;  %v17769_v55 = vadd.f32 %v12754_v10, %v12753_v20  ;;  %v12756_v22 = vpop.f32.mrb[2].mxu1  ;;  %v17771_v12 = vpop.permute.xlu1 %4195  ;;  %5079 = vrot.lane.b32.xlu0 %v17617_v54, %s13803_s16  ;;  %v8891_v40 = vcombine.low %v8869_v48, %v8876_v45  ;;  %v2459_v20 = vrot.slane %v17013_v60, %v14305_v11 }
 0x35d   :  { %v12757_v27 = vpop.f32.mrb[3].mxu1  ;;  %20412 = vst [vmem:[#allocation102_spill] sm:$0xff] %v17794_v51  ;;  %v2449_v48 = vcombine.high %v17576_v52, %v17576_v52 }
 0x35e   :  { %20410 = vst [vmem:[#allocation88_spill] sm:$0xff] %v17769_v55  ;;  %v17776_v17 = vadd.f32 %v12757_v27, %v12756_v22  ;;  %v17778_v1 = vpop.permute.xlu0 %4193  ;;  %5085 = vrot.lane.b32.xlu1 %v5066_v39, %s13803_s16  ;;  %v8890_v8 = vrot.slane %v8862_v36, %v14305_v11  ;;  %v17800_v60 = vrot.slane %v8891_v40, %v14305_v11 }
 0x35f   :  { %v12623_v27 = vpack.c.bf16 %v16994_v47, %v16994_v47  ;;  %v5093_v40 = vrot.slane %v2449_v48, %v14305_v11 }
 0x360   :  { %20411 = vst [vmem:[#allocation53_spill] sm:$0xff] %v17776_v17  ;;  %v17785_v10 = vpop.permute.xlu1 %4199  ;;  %5083 = vrot.lane.b32.xlu0 %v17655_v46, %s13803_s16  ;;  %v8894_v34 = vcombine.high %v8883_v59, %v8890_v8  ;;  %v8893_v19 = vcombine.low %v8883_v59, %v8890_v8  ;;  %20414 = vst [vmem:[#allocation121_spill] sm:$0xff] %v17800_v60  ;;  %v2467_v59 = vcombine.high %v2459_v20, %v2459_v20 }
 0x361   :  { %v2466_v47 = vrot.slane %v12623_v27, %v14305_v11  ;;  %v17829_v17 = vrot.slane %v2459_v20, %v14305_v11  ;;  %v5100_v27 = vrot.slane %v5093_v40, %v14305_v11 }
 0x362   :  { %v17789_v22 = vpop.permute.xlu0 %4197  ;;  %5107 = vrot.lane.b32.xlu1 %v17580_v9, %s13801_s14  ;;  %v17797_v36 = vrot.slane %v8894_v34, %v14305_v11  ;;  %v17803_v45 = vrot.slane %v8893_v19, %v14305_v11 }
 0x363   :  { %20417 = vst [vmem:[#allocation107_spill] sm:$0xff] %v17829_v17  ;;  %v17847_v48 = vcombine.high %v17829_v17, %v17829_v17  ;;  %v17861_v55 = vrot.slane %v2466_v47, %v14305_v11 }
 0x364   :  { %20413 = vst [vmem:[#allocation111_spill] sm:$0xff] %v17797_v36  ;;  %20415 = vst [vmem:[#allocation120_spill] sm:$0xff] %v17803_v45  ;;  %v4528_v9 = vpop.permute.xlu1 %4527  ;;  %5105 = vrot.lane.b32.xlu0 %v17589_v56, %s13801_s14  ;;  %v8925_v62 = vcombine.low %v17794_v51, %v17797_v36  ;;  %v8923_v8 = vcombine.low %v17800_v60, %v17803_v45  ;;  %v17823_v56 = vrot.slane %v2467_v59, %v14305_v11  ;;  %v20423_v51 = vld [vmem:[#allocation27_spill] sm:$0xff] }
 0x365   :  { %20419 = vst [vmem:[#allocation119_spill] sm:$0xff] %v17847_v48  ;;  %20421 = vst [vmem:[#allocation115_spill] sm:$0xff] %v17861_v55  ;;  %v5155_v60 = vrot.slane %v17847_v48, %v14305_v11 }
 0x366   :  { %9625 = vmatprep.mubr.bf16.mxu1 %v8925_v62  ;;  %v4526_v34 = vpop.permute.xlu0 %4525  ;;  %5111 = vrot.lane.b32.xlu1 %v17617_v54, %s13801_s14  ;;  %20416 = vst [vmem:[#allocation98_spill] sm:$0xff] %v17823_v56  ;;  %v2468_v54 = vcombine.high %v2466_v47, %v2466_v47  ;;  %v5141_v59 = vrot.slane %v17823_v56, %v14305_v11 }
 0x367   :  { %9626 = vmatmul.mubr.bf16.gmra.mrb[20].mxu1 %v8923_v8 }
 0x368   :  { %v4532_v19 = vpop.permute.xlu1 %4531  ;;  %5109 = vrot.lane.b32.xlu0 %v17633_v0, %s13801_s14  ;;  %v17840_v0 = vcombine.high %v17823_v56, %v17823_v56  ;;  %v17856_v52 = vrot.slane %v5141_v59, %v14305_v11 }
 0x36a   :  { %v4530_v62 = vpop.permute.xlu0 %4529  ;;  %5115 = vrot.lane.b32.xlu1 %v17655_v46, %s13801_s14  ;;  %20418 = vst [vmem:[#allocation110_spill] sm:$0xff] %v17840_v0  ;;  %v5127_v46 = vrot.slane %v17829_v17, %v14305_v11 }
 0x36c   :  { %v4536_v8 = vpop.permute.xlu1 %4535  ;;  %5113 = vrot.lane.b32.xlu0 %v17675_v25, %s13801_s14  ;;  %v17850_v25 = vrot.slane %v2468_v54, %v14305_v11  ;;  %v5134_v54 = vrot.slane %v5127_v46, %v14305_v11  ;;  %v5841_v46 = vsel %vm5577_vm2, %v20423_v51, %v17733_v23  ;;  %v5183_v23 = vrot.slane %v17861_v55, %v14305_v11 }
 0x36e   :  { %v4534_v20 = vpop.permute.xlu0 %4533  ;;  %5119 = vrot.lane.b32.xlu1 %v5100_v27, %s13801_s14  ;;  %20420 = vst [vmem:[#allocation94_spill] sm:$0xff] %v17850_v25  ;;  %v5169_v27 = vrot.slane %v17840_v0, %v14305_v11  ;;  %v5197_v47 = vrot.slane %v17850_v25, %v14305_v11  ;;  %v17878_v36 = vcombine.high %v17850_v25, %v17850_v25  ;;  %v20424_v0 = vld [vmem:[#allocation80_spill] sm:$0xff] }
 0x36f   :  { %v5838_v56 = vsel %vm5577_vm2, %v20424_v0, %v17745_v35  ;;  %v17895_v25 = vrot.slane %v5155_v60, %v14305_v11  ;;  %v5847_v35 = vsel %vm5577_vm2, %v16936_v21, %v17753_v63  ;;  %v20426_v63 = vld [vmem:[#allocation114_spill] sm:$0xff] }
 0x370   :  { %v17852_v40 = vpop.permute.xlu1 %4539  ;;  %5117 = vrot.lane.b32.xlu0 %v5066_v39, %s13801_s14  ;;  %v17872_v59 = vrot.slane %v5169_v27, %v14305_v11  ;;  %20422 = vst [vmem:[#allocation112_spill] sm:$0xff] %v17878_v36  ;;  %v6054_v27 = vsel %vm5878_vm3, %v5841_v46, %v4528_v9  ;;  %v6052_v48 = vsel %vm5878_vm3, %v5838_v56, %v4526_v34 }
 0x371   :  { %v6058_v34 = vsel %vm5878_vm3, %v5847_v35, %v4532_v19  ;;  %v17914_v0 = vrot.slane %v5197_v47, %v14305_v11  ;;  %v5225_v21 = vrot.slane %v17878_v36, %v14305_v11  ;;  %v20438_v36 = vld [vmem:[#allocation49_spill] sm:$0xff] }
 0x372   :  { %v17863_v45 = vpop.permute.xlu0 %4537  ;;  %5263 = vrot.lane.b32.xlu1 %v17856_v52, %s13802_s15 }
 0x374   :  { %v4868_v39 = vpop.permute.xlu1 %4867  ;;  %5261 = vrot.lane.b32.xlu0 %v5134_v54, %s13802_s15  ;;  %v17888_v54 = vcombine.high %v17861_v55, %v17861_v55 }
 0x375   :  { %v17903_v51 = vsel %vm6079_vm4, %v6054_v27, %v4868_v39  ;;  %v5853_v27 = vsel %vm5577_vm2, %v16954_v5, %v17771_v12  ;;  %v17958_v5 = vrot.slane %v5225_v21, %v14305_v11  ;;  %v20428_v12 = vld [vmem:[#allocation16_spill] sm:$0xff] }
 0x376   :  { %20425 = vst [vmem:[#allocation125_spill] sm:$0xff] %v17888_v54  ;;  %v4866_v17 = vpop.permute.xlu0 %4865  ;;  %5267 = vrot.lane.b32.xlu1 %v17872_v59, %s13802_s15  ;;  %v7692_v39 = vcombine.low %v17414_v32, %v17903_v51  ;;  %v20427_v32 = vld [vmem:[#allocation93_spill] sm:$0xff] }
 0x377   :  { %v17906_v9 = vsel %vm6079_vm4, %v6052_v48, %v4866_v17  ;;  %v5844_v17 = vsel %vm5577_vm2, %v20426_v63, %v17764_v33  ;;  %v17934_v33 = vrot.slane %v5183_v23, %v14305_v11 }
 0x378   :  { %v7676_v56 = vcombine.low %v17435_v53, %v17906_v9  ;;  %v4872_v60 = vpop.permute.xlu1 %4871  ;;  %5265 = vrot.lane.b32.xlu0 %v17895_v25, %s13802_s15  ;;  %v5211_v53 = vrot.slane %v17888_v54, %v14305_v11  ;;  %v6056_v19 = vsel %vm5878_vm3, %v5844_v17, %v4530_v62 }
 0x379   :  { %v17922_v48 = vsel %vm6079_vm4, %v6058_v34, %v4872_v60  ;;  %v6062_v34 = vsel %vm5878_vm3, %v5853_v27, %v4536_v8  ;;  %v20431_v27 = vld [vmem:[#allocation90_spill] sm:$0xff] }
 0x37a   :  { %v7724_v47 = vcombine.low %v17593_v44, %v17922_v48  ;;  %v4870_v46 = vpop.permute.xlu0 %4869  ;;  %5271 = vrot.lane.b32.xlu1 %v17914_v0, %s13802_s15  ;;  %v17940_v35 = vrot.slane %v7676_v56, %v14305_v11  ;;  %v17947_v44 = vrot.slane %v20427_v32, %v14305_v11  ;;  %v5850_v56 = vsel %vm5577_vm2, %v20428_v12, %v17778_v1  ;;  %v20430_v1 = vld [vmem:[#allocation134_spill] sm:$0xff]  ;;  %v20434_v12 = vld [vmem:[#allocation92_spill] sm:$0xff] }
 0x37b   :  { %v17943_v62 = vsel %vm6079_vm4, %v6056_v19, %v4870_v46  ;;  %v17967_v8 = vrot.slane %v5211_v53, %v14305_v11  ;;  %v6060_v19 = vsel %vm5878_vm3, %v5850_v56, %v4534_v20  ;;  %v5859_v53 = vsel %vm5577_vm2, %v20430_v1, %v17785_v10 }
 0x37c   :  { %v17951_v60 = vrot.slane %v7724_v47, %v14305_v11  ;;  %v7708_v23 = vcombine.low %v17607_v14, %v17943_v62  ;;  %v4876_v63 = vpop.permute.xlu1 %4875  ;;  %5269 = vrot.lane.b32.xlu0 %v17934_v33, %s13802_s15  ;;  %v17971_v14 = vrot.slane %v7692_v39, %v14305_v11  ;;  %v7684_v20 = vcombine.low %v20431_v27, %v17940_v35 }
 0x37d   :  { %v17964_v17 = vsel %vm6079_vm4, %v6062_v34, %v4876_v63  ;;  %v17987_v39 = vrot.slane %v17947_v44, %v14305_v11 }
 0x37e   :  { %v17974_v47 = vrot.slane %v7708_v23, %v14305_v11  ;;  %v7756_v21 = vcombine.low %v17625_v61, %v17964_v17  ;;  %v4874_v46 = vpop.permute.xlu0 %4873  ;;  %5275 = vrot.lane.b32.xlu1 %v17958_v5, %s13802_s15  ;;  %v6066_v61 = vsel %vm5878_vm3, %v5859_v53, %v17852_v40  ;;  %v20433_v23 = vld [vmem:[#allocation24_spill] sm:$0xff]  ;;  %v7700_v54 = vcombine.low %v20438_v36, %v17971_v14 }
 0x37f   :  { %20432 = vst [vmem:[#allocation47_spill] sm:$0xff] %v17987_v39  ;;  %v17990_v32 = vsel %vm6079_vm4, %v6060_v19, %v4874_v46  ;;  %v7732_v63 = vcombine.low %v20433_v23, %v17951_v60  ;;  %v20436_v19 = vld [vmem:[#allocation99_spill] sm:$0xff] }
 0x380   :  { %20429 = vst [vmem:[#allocation43_spill] sm:$0xff] %v17974_v47  ;;  %v12759_v34 = vpop.f32.mrb[4].mxu1  ;;  %v7716_v10 = vcombine.low %v20434_v12, %v17974_v47  ;;  %v17999_v56 = vrot.slane %v7756_v21, %v14305_v11  ;;  %v4880_v27 = vpop.permute.xlu1 %4879  ;;  %5273 = vrot.lane.b32.xlu0 %v17967_v8, %s13802_s15  ;;  %v5856_v46 = vsel %vm5577_vm2, %v20436_v19, %v17789_v22 }
 0x381   :  { %v12760_v1 = vpop.f32.mrb[5].mxu1  ;;  %v7740_v40 = vcombine.low %v17644_v15, %v17990_v32  ;;  %v18011_v23 = vsel %vm6079_vm4, %v6066_v61, %v4880_v27  ;;  %v6064_v21 = vsel %vm5878_vm3, %v5856_v46, %v17863_v45  ;;  %v7691_v15 = vrot.slane %v7684_v20, %v14305_v11 }
 0x382   :  { %20435 = vst [vmem:[#allocation36_spill] sm:$0xff] %v17999_v56  ;;  %v18008_v53 = vadd.f32 %v12760_v1, %v12759_v34  ;;  %v12762_v12 = vpop.f32.mrb[6].mxu1  ;;  %v7723_v55 = vrot.slane %v7716_v10, %v14305_v11  ;;  %v7788_v22 = vcombine.low %v17664_v6, %v18011_v23  ;;  %v4878_v47 = vpop.permute.xlu0 %4877  ;;  %5297 = vrot.lane.b32.xlu1 %v17895_v25, %s13803_s16 }
 0x383   :  { %v12763_v19 = vpop.f32.mrb[7].mxu1  ;;  %v18024_v34 = vrot.slane %v7740_v40, %v14305_v11  ;;  %v18029_v45 = vsel %vm6079_vm4, %v6064_v21, %v4878_v47  ;;  %v7739_v36 = vrot.slane %v7732_v63, %v14305_v11  ;;  %v7764_v6 = vcombine.low %v17379_v37, %v17999_v56  ;;  %v20452_v56 = vld [vmem:[#allocation46_spill] sm:$0xff] }
 0x384   :  { %20437 = vst [vmem:[#allocation52_spill] sm:$0xff] %v18008_v53  ;;  %v18026_v61 = vadd.f32 %v12763_v19, %v12762_v12  ;;  %v18035_v10 = vrot.slane %v7788_v22, %v14305_v11  ;;  %v7772_v1 = vcombine.low %v17685_v24, %v18029_v45  ;;  %v18039_v20 = vpop.permute.xlu1 %4203  ;;  %5295 = vrot.lane.b32.xlu0 %v17856_v52, %s13803_s16 }
 0x385   :  { %v7748_v47 = vcombine.low %v17353_v57, %v18024_v34  ;;  %v7707_v27 = vrot.slane %v7700_v54, %v14305_v11  ;;  %v8928_v63 = vcombine.low %v7723_v55, %v7739_v36  ;;  %v7771_v12 = vrot.slane %v7764_v6, %v14305_v11 }
 0x386   :  { %20439 = vst [vmem:[#allocation14_spill] sm:$0xff] %v18026_v61  ;;  %20440 = vst [vmem:[#allocation17_spill] sm:$0xff] %v18035_v10  ;;  %v7796_v37 = vcombine.low %v17363_v31, %v18035_v10  ;;  %v18049_v46 = vrot.slane %v7772_v1, %v14305_v11  ;;  %v18051_v40 = vpop.permute.xlu0 %4201  ;;  %5301 = vrot.lane.b32.xlu1 %v17934_v33, %s13803_s16  ;;  %v5239_v31 = vrot.slane %v17987_v39, %v14305_v11 }
 0x387   :  { %v7755_v24 = vrot.slane %v7748_v47, %v14305_v11  ;;  %v8927_v52 = vcombine.low %v7691_v15, %v7707_v27 }
 0x388   :  { %20441 = vst [vmem:[#allocation41_spill] sm:$0xff] %v18049_v46  ;;  %v7780_v57 = vcombine.low %v17382_v3, %v18049_v46  ;;  %v18059_v55 = vpop.permute.xlu1 %4207  ;;  %5299 = vrot.lane.b32.xlu0 %v17872_v59, %s13803_s16  ;;  %v7803_v21 = vrot.slane %v7796_v37, %v14305_v11  ;;  %v8944_v3 = vrot.slane %v8928_v63, %v14305_v11 }
 0x389   :  { %v8929_v54 = vcombine.low %v7755_v24, %v7771_v12  ;;  %v5246_v6 = vrot.slane %v5239_v31, %v14305_v11  ;;  %v8937_v1 = vrot.slane %v8927_v52, %v14305_v11  ;;  %v20442_v12 = vld [vmem:[#allocation89_spill] sm:$0xff] }
 0x38a   :  { %v7787_v22 = vrot.slane %v7780_v57, %v14305_v11  ;;  %v18067_v19 = vpop.permute.xlu0 %4205  ;;  %5305 = vrot.lane.b32.xlu1 %v17967_v8, %s13803_s16  ;;  %v12624_v57 = vpack.c.bf16 %v20442_v12, %v20442_v12 }
 0x38b   :  { %v8951_v27 = vrot.slane %v8929_v54, %v14305_v11  ;;  %v8960_v24 = vcombine.high %v8937_v1, %v8944_v3  ;;  %v8959_v63 = vcombine.low %v8937_v1, %v8944_v3 }
 0x38c   :  { %v8930_v15 = vcombine.low %v7787_v22, %v7803_v21  ;;  %v18072_v36 = vpop.permute.xlu1 %4211  ;;  %5303 = vrot.lane.b32.xlu0 %v17914_v0, %s13803_s16  ;;  %v2516_v21 = vcombine.high %v17947_v44, %v17947_v44  ;;  %v2515_v1 = vrot.slane %v12624_v57, %v14305_v11 }
 0x38d   :  { %v18096_v54 = vrot.slane %v8960_v24, %v14305_v11  ;;  %v18102_v44 = vrot.slane %v8959_v63, %v14305_v11 }
 0x38e   :  { %v18078_v47 = vpop.permute.xlu0 %4209  ;;  %5309 = vrot.lane.b32.xlu1 %v5246_v6, %s13803_s16  ;;  %v8958_v37 = vrot.slane %v8930_v15, %v14305_v11 }
 0x38f   :  { %20443 = vst [vmem:[#allocation128_spill] sm:$0xff] %v18096_v54  ;;  %20445 = vst [vmem:[#allocation132_spill] sm:$0xff] %v18102_v44 }
 0x390   :  { %v18087_v22 = vpop.permute.xlu1 %5035  ;;  %5307 = vrot.lane.b32.xlu0 %v17958_v5, %s13803_s16  ;;  %v8962_v52 = vcombine.high %v8951_v27, %v8958_v37  ;;  %v8961_v31 = vcombine.low %v8951_v27, %v8958_v37  ;;  %v18109_v27 = vrot.slane %v2516_v21, %v14305_v11 }
 0x392   :  { %v18091_v61 = vpop.permute.xlu0 %5033  ;;  %5331 = vrot.lane.b32.xlu1 %v17872_v59, %s13801_s14  ;;  %v18099_v3 = vrot.slane %v8962_v52, %v14305_v11  ;;  %v18105_v15 = vrot.slane %v8961_v31, %v14305_v11  ;;  %v5253_v52 = vrot.slane %v18109_v27, %v14305_v11  ;;  %v2517_v31 = vcombine.high %v2515_v1, %v2515_v1 }
 0x394   :  { %20444 = vst [vmem:[#allocation126_spill] sm:$0xff] %v18099_v3  ;;  %20446 = vst [vmem:[#allocation129_spill] sm:$0xff] %v18105_v15  ;;  %v4544_v37 = vpop.permute.xlu1 %4543  ;;  %5329 = vrot.lane.b32.xlu0 %v17895_v25, %s13801_s14  ;;  %v8993_v59 = vcombine.low %v18096_v54, %v18099_v3  ;;  %v8991_v24 = vcombine.low %v18102_v44, %v18105_v15  ;;  %v18124_v25 = vrot.slane %v2515_v1, %v14305_v11 }
 0x395   :  { %v18144_v1 = vrot.slane %v2517_v31, %v14305_v11  ;;  %v2546_v44 = vcombine.high %v17987_v39, %v17987_v39  ;;  %v5862_v39 = vsel %vm5577_vm2, %v20452_v56, %v18051_v40 }
 0x396   :  { %9633 = vmatprep.mubr.bf16.mxu1 %v8993_v59  ;;  %v4542_v57 = vpop.permute.xlu0 %4541  ;;  %5335 = vrot.lane.b32.xlu1 %v17914_v0, %s13801_s14  ;;  %20447 = vst [vmem:[#allocation135_spill] sm:$0xff] %v18124_v25  ;;  %v18134_v59 = vcombine.high %v18124_v25, %v18124_v25  ;;  %v2557_v0 = vrot.slane %v17417_v26, %v14305_v11  ;;  %v20451_v25 = vld [vmem:[#allocation45_spill] sm:$0xff] }
 0x397   :  { %9634 = vmatmul.mubr.bf16.gmra.mrb[24].mxu1 %v8991_v24  ;;  %20449 = vst [vmem:[#allocation38_spill] sm:$0xff] %v18144_v1  ;;  %v5355_v31 = vrot.slane %v18144_v1, %v14305_v11  ;;  %v18166_v15 = vcombine.high %v18144_v1, %v18144_v1  ;;  %v5865_v1 = vsel %vm5577_vm2, %v20451_v25, %v18039_v20  ;;  %v20453_v25 = vld [vmem:[#allocation39_spill] sm:$0xff] }
 0x398   :  { %v4548_v21 = vpop.permute.xlu1 %4547  ;;  %5333 = vrot.lane.b32.xlu0 %v17934_v33, %s13801_s14  ;;  %20448 = vst [vmem:[#allocation130_spill] sm:$0xff] %v18134_v59  ;;  %v18141_v33 = vrot.slane %v5253_v52, %v14305_v11  ;;  %v5369_v26 = vrot.slane %v18134_v59, %v14305_v11  ;;  %v6068_v46 = vsel %vm5878_vm3, %v5862_v39, %v4542_v57 }
 0x399   :  { %v5383_v20 = vrot.slane %v18166_v15, %v14305_v11  ;;  %v5871_v56 = vsel %vm5577_vm2, %v20453_v25, %v18059_v55  ;;  %v5287_v39 = vrot.slane %v2546_v44, %v14305_v11 }
 0x39a   :  { %v4546_v63 = vpop.permute.xlu0 %4545  ;;  %5339 = vrot.lane.b32.xlu1 %v17958_v5, %s13801_s14  ;;  %v18151_v5 = vrot.slane %v2557_v0, %v14305_v11  ;;  %v6074_v57 = vsel %vm5878_vm3, %v5871_v56, %v4548_v21 }
 0x39c   :  { %v4552_v24 = vpop.permute.xlu1 %4551  ;;  %5337 = vrot.lane.b32.xlu0 %v17967_v8, %s13801_s14  ;;  %20450 = vst [vmem:[#allocation18_spill] sm:$0xff] %v18151_v5  ;;  %v2565_v8 = vcombine.high %v2557_v0, %v2557_v0  ;;  %v18172_v0 = vrot.slane %v5369_v26, %v14305_v11  ;;  %v5397_v54 = vrot.slane %v18151_v5, %v14305_v11 }
 0x39d   :  { %v18178_v59 = vcombine.high %v18151_v5, %v18151_v5  ;;  %v6070_v26 = vsel %vm5878_vm3, %v5865_v1, %v4544_v37  ;;  %v5362_v5 = vrot.slane %v5355_v31, %v14305_v11 }
 0x39e   :  { %v18146_v12 = vpop.permute.xlu0 %4549  ;;  %5343 = vrot.lane.b32.xlu1 %v18141_v33, %s13801_s14  ;;  %v18211_v31 = vrot.slane %v5397_v54, %v14305_v11 }
 0x39f   :  { %v5425_v55 = vrot.slane %v18178_v59, %v14305_v11 }
 0x3a0   :  { %v18153_v53 = vpop.permute.xlu1 %5069  ;;  %5341 = vrot.lane.b32.xlu0 %v5246_v6, %s13801_s14 }
 0x3a2   :  { %v18158_v52 = vpop.permute.xlu0 %5067  ;;  %5279 = vrot.lane.b32.xlu1 %v18141_v33, %s13802_s15 }
 0x3a4   :  { %v4884_v3 = vpop.permute.xlu1 %4883  ;;  %5277 = vrot.lane.b32.xlu0 %v5246_v6, %s13802_s15  ;;  %v18187_v6 = vrot.slane %v2565_v8, %v14305_v11 }
 0x3a5   :  { %v18200_v40 = vsel %vm6079_vm4, %v6070_v26, %v4884_v3  ;;  %v20454_v3 = vld [vmem:[#allocation77_spill] sm:$0xff] }
 0x3a6   :  { %v4882_v10 = vpop.permute.xlu0 %4881  ;;  %5491 = vrot.lane.b32.xlu1 %v18172_v0, %s13802_s15  ;;  %v7820_v54 = vcombine.low %v17706_v42, %v18200_v40 }
 0x3a7   :  { %v18203_v37 = vsel %vm6079_vm4, %v6068_v46, %v4882_v10  ;;  %v5868_v10 = vsel %vm5577_vm2, %v20454_v3, %v18067_v19  ;;  %v2399_v46 = vcombine.high %v17331_v16, %v17331_v16  ;;  %v18233_v16 = vrot.slane %v5383_v20, %v14305_v11  ;;  %v20455_v19 = vld [vmem:[#allocation70_spill] sm:$0xff] }
 0x3a8   :  { %v7804_v1 = vcombine.low %v17721_v49, %v18203_v37  ;;  %v4888_v8 = vpop.permute.xlu1 %4887  ;;  %5489 = vrot.lane.b32.xlu0 %v5362_v5, %s13802_s15  ;;  %v5411_v49 = vrot.slane %v18187_v6, %v14305_v11  ;;  %v6072_v21 = vsel %vm5878_vm3, %v5868_v10, %v4546_v63  ;;  %v5877_v56 = vsel %vm5577_vm2, %v20455_v19, %v18072_v36 }
 0x3a9   :  { %v18221_v44 = vsel %vm6079_vm4, %v6074_v57, %v4888_v8  ;;  %v12765_v26 = vpop.f32.mrb[8].mxu1  ;;  %v6078_v8 = vsel %vm5878_vm3, %v5877_v56, %v4552_v24  ;;  %v18272_v56 = vrot.slane %v7820_v54, %v14305_v11 }
 0x3aa   :  { %v7852_v5 = vcombine.low %v17903_v51, %v18221_v44  ;;  %v4886_v25 = vpop.permute.xlu0 %4885  ;;  %5495 = vrot.lane.b32.xlu1 %v18211_v31, %s13802_s15  ;;  %v18239_v63 = vrot.slane %v7804_v1, %v14305_v11  ;;  %v12766_v57 = vpop.f32.mrb[9].mxu1  ;;  %v18245_v51 = vrot.slane %v5287_v39, %v14305_v11  ;;  %v18256_v1 = vrot.slane %v5425_v55, %v14305_v11 }
 0x3ab   :  { %v18242_v42 = vsel %vm6079_vm4, %v6072_v21, %v4886_v25  ;;  %v12768_v10 = vpop.f32.mrb[10].mxu1  ;;  %v20456_v21 = vld [vmem:[#allocation96_spill] sm:$0xff]  ;;  %v18261_v25 = vadd.f32 %v12766_v57, %v12765_v26 }
 0x3ac   :  { %v18249_v3 = vrot.slane %v7852_v5, %v14305_v11  ;;  %v7836_v20 = vcombine.low %v17906_v9, %v18242_v42  ;;  %v4892_v36 = vpop.permute.xlu1 %4891  ;;  %5493 = vrot.lane.b32.xlu0 %v18233_v16, %s13802_s15  ;;  %v5874_v39 = vsel %vm5577_vm2, %v20456_v21, %v18078_v47  ;;  %v12769_v5 = vpop.f32.mrb[11].mxu1  ;;  %v18267_v9 = vrot.slane %v5411_v49, %v14305_v11 }
 0x3ad   :  { %20457 = vst [vmem:[#allocation20_spill] sm:$0xff] %v18261_v25  ;;  %v18264_v24 = vsel %vm6079_vm4, %v6078_v8, %v4892_v36  ;;  %v6076_v19 = vsel %vm5878_vm3, %v5874_v39, %v18146_v12  ;;  %v6285_v49 = vsel %vm5577_vm2, %v17283_v41, %v18087_v22  ;;  %v7812_v12 = vcombine.low %v17432_v30, %v18239_v63 }
 0x3ae   :  { %v18275_v55 = vrot.slane %v7836_v20, %v14305_v11  ;;  %v7884_v47 = vcombine.low %v17922_v48, %v18264_v24  ;;  %v4890_v26 = vpop.permute.xlu0 %4889  ;;  %5499 = vrot.lane.b32.xlu1 %v18256_v1, %s13802_s15  ;;  %v18286_v57 = vadd.f32 %v12769_v5, %v12768_v10  ;;  %v6313_v8 = vsel %vm5878_vm3, %v6285_v49, %v18153_v53 }
 0x3af   :  { %v18289_v54 = vsel %vm6079_vm4, %v6076_v19, %v4890_v26  ;;  %v7860_v48 = vcombine.low %v17441_v50, %v18249_v3  ;;  %v6282_v30 = vsel %vm5577_vm2, %v2399_v46, %v18091_v61 }
 0x3b0   :  { %20458 = vst [vmem:[#allocation34_spill] sm:$0xff] %v18286_v57  ;;  %v7844_v20 = vcombine.low %v17455_v7, %v18275_v55  ;;  %v18298_v36 = vrot.slane %v7884_v47, %v14305_v11  ;;  %v5104_v41 = vpop.permute.xlu1 %5103  ;;  %5497 = vrot.lane.b32.xlu0 %v18267_v9, %s13802_s15  ;;  %v7868_v22 = vcombine.low %v17943_v62, %v18289_v54 }
 0x3b1   :  { %v18307_v53 = vsel %vm6079_vm4, %v6313_v8, %v5104_v41  ;;  %v6311_v50 = vsel %vm5878_vm3, %v6282_v30, %v18158_v52  ;;  %v7828_v7 = vcombine.low %v17405_v38, %v18272_v56  ;;  %v7819_v62 = vrot.slane %v7812_v12, %v14305_v11 }
 0x3b2   :  { %v7851_v10 = vrot.slane %v7844_v20, %v14305_v11  ;;  %v7916_v21 = vcombine.low %v17964_v17, %v18307_v53  ;;  %v5102_v39 = vpop.permute.xlu0 %5101  ;;  %5313 = vrot.lane.b32.xlu1 %v18245_v51, %s13803_s16  ;;  %v18320_v61 = vrot.slane %v7868_v22, %v14305_v11  ;;  %v18327_v38 = vcombine.high %v18187_v6, %v18187_v6 }
 0x3b3   :  { %v18323_v46 = vsel %vm6079_vm4, %v6311_v50, %v5102_v39  ;;  %v7867_v52 = vrot.slane %v7860_v48, %v14305_v11  ;;  %v7892_v17 = vcombine.low %v17661_v18, %v18298_v36  ;;  %v7835_v49 = vrot.slane %v7828_v7, %v14305_v11 }
 0x3b4   :  { %v18333_v5 = vrot.slane %v7916_v21, %v14305_v11  ;;  %v7900_v19 = vcombine.low %v17990_v32, %v18323_v46  ;;  %v18337_v47 = vpop.permute.xlu1 %5039  ;;  %5311 = vrot.lane.b32.xlu0 %v18141_v33, %s13803_s16  ;;  %v7876_v26 = vcombine.low %v17641_v28, %v18320_v61  ;;  %v2548_v32 = vcombine.high %v18109_v27, %v18109_v27 }
 0x3b5   :  { %v8996_v12 = vcombine.low %v7851_v10, %v7867_v52  ;;  %v8995_v28 = vcombine.low %v7819_v62, %v7835_v49  ;;  %v7899_v20 = vrot.slane %v7892_v17, %v14305_v11  ;;  %v5439_v30 = vrot.slane %v18327_v38, %v14305_v11 }
 0x3b6   :  { %v7924_v18 = vcombine.low %v17648_v4, %v18333_v5  ;;  %v18347_v8 = vrot.slane %v7900_v19, %v14305_v11  ;;  %v18349_v48 = vpop.permute.xlu0 %5037  ;;  %5525 = vrot.lane.b32.xlu1 %v18233_v16, %s13803_s16  ;;  %v7883_v33 = vrot.slane %v7876_v26, %v14305_v11  ;;  %v12625_v10 = vpack.c.bf16 %v17396_v43, %v17396_v43 }
 0x3b7   :  { %v18379_v39 = vrot.slane %v5439_v30, %v14305_v11  ;;  %v5321_v62 = vrot.slane %v2548_v32, %v14305_v11  ;;  %v9005_v52 = vrot.slane %v8995_v28, %v14305_v11 }
 0x3b8   :  { %v7908_v41 = vcombine.low %v17668_v2, %v18347_v8  ;;  %v18359_v4 = vpop.permute.xlu1 %5043  ;;  %5523 = vrot.lane.b32.xlu0 %v18172_v0, %s13803_s16  ;;  %v8997_v22 = vcombine.low %v7883_v33, %v7899_v20  ;;  %v7931_v50 = vrot.slane %v7924_v18, %v14305_v11  ;;  %v9012_v2 = vrot.slane %v8996_v12, %v14305_v11 }
 0x3b9   :  { %v2564_v12 = vrot.slane %v12625_v10, %v14305_v11  ;;  %v5328_v32 = vrot.slane %v5321_v62, %v14305_v11  ;;  %v13725_v62 = vld [vmem:[%s19778_s3 + $0xc0] sm:$0xff]  }
 0x3ba   :  { %v7915_v27 = vrot.slane %v7908_v41, %v14305_v11  ;;  %v18367_v7 = vpop.permute.xlu0 %5041  ;;  %5529 = vrot.lane.b32.xlu1 %v18267_v9, %s13803_s16  ;;  %v9019_v43 = vrot.slane %v8997_v22, %v14305_v11  ;;  %v9028_v26 = vcombine.high %v9005_v52, %v9012_v2  ;;  %v9027_v49 = vcombine.low %v9005_v52, %v9012_v2 }
 0x3bb   :  { %12825 = vmatprep.subr.bf16.mxu1 %v13725_v62 }
 0x3bc   :  { %v8998_v21 = vcombine.low %v7915_v27, %v7931_v50  ;;  %v18374_v0 = vpop.permute.xlu1 %5047  ;;  %5527 = vrot.lane.b32.xlu0 %v18211_v31, %s13803_s16  ;;  %v18399_v41 = vrot.slane %v9028_v26, %v14305_v11  ;;  %v18405_v22 = vrot.slane %v9027_v49, %v14305_v11  ;;  %v18411_v27 = vrot.slane %v2564_v12, %v14305_v11  ;;  %v13744_v49 = vld [vmem:[%s19777_s2] ss:$0 sm:$0xff] }
 0x3be   :  { %v18383_v17 = vpop.permute.xlu0 %5045  ;;  %5533 = vrot.lane.b32.xlu1 %v18379_v39, %s13803_s16  ;;  %v9026_v19 = vrot.slane %v8998_v21, %v14305_v11  ;;  %20459 = vst [vmem:[#allocation67_spill] sm:$0xff] %v18399_v41  ;;  %20461 = vst [vmem:[#allocation40_spill] sm:$0xff] %v18405_v22  ;;  %v5453_v26 = vrot.slane %v18411_v27, %v14305_v11 }
 0x3bf   :  { %20463 = vst [vmem:[#allocation66_spill] sm:$0xff] %v18411_v27 }
 0x3c0   :  { %v18390_v18 = vpop.permute.xlu1 %5051  ;;  %5531 = vrot.lane.b32.xlu0 %v18256_v1, %s13803_s16  ;;  %v9030_v33 = vcombine.high %v9019_v43, %v9026_v19  ;;  %v9029_v28 = vcombine.low %v9019_v43, %v9026_v19 }
 0x3c2   :  { %v18395_v20 = vpop.permute.xlu0 %5049  ;;  %5347 = vrot.lane.b32.xlu1 %v5328_v32, %s13801_s14  ;;  %v18402_v30 = vrot.slane %v9030_v33, %v14305_v11  ;;  %v18408_v50 = vrot.slane %v9029_v28, %v14305_v11  ;;  %v1480_v32 = vadd.f32 %v13744_v49, %v17760_v29  ;;  %v13726_v33 = vld [vmem:[%s19778_s3 + $0x80] sm:$0xff]   ;;  %v2596_v29 = vcombine.high %v18411_v27, %v18411_v27 }
 0x3c3   :  { %12826 = vmatpush3.bf16.msra.mxu1 %v13726_v33 }
 0x3c4   :  { %20460 = vst [vmem:[#allocation57_spill] sm:$0xff] %v18402_v30  ;;  %20462 = vst [vmem:[#allocation62_spill] sm:$0xff] %v18408_v50  ;;  %v5074_v2 = vpop.permute.xlu1 %5073  ;;  %5345 = vrot.lane.b32.xlu0 %v18245_v51, %s13801_s14  ;;  %v9061_v10 = vcombine.low %v18399_v41, %v18402_v30  ;;  %v9059_v21 = vcombine.low %v18405_v22, %v18408_v50  ;;  %v5481_v33 = vrot.slane %v2596_v29, %v14305_v11  ;;  %v20466_v29 = vld [vmem:[#allocation22_spill] sm:$0xff] }
 0x3c5   :  { %v20467_v22 = vld [vmem:[#allocation78_spill] sm:$0xff] }
 0x3c6   :  { %9641 = vmatprep.mubr.bf16.mxu1 %v9061_v10  ;;  %v5072_v19 = vpop.permute.xlu0 %5071  ;;  %5559 = vrot.lane.b32.xlu1 %v18211_v31, %s13801_s14  ;;  %v2566_v31 = vcombine.high %v2564_v12, %v2564_v12  ;;  %v18444_v10 = vrot.slane %v5453_v26, %v14305_v11  ;;  %v13727_v12 = vld [vmem:[%s19778_s3 + $0xc8] sm:$0xff]   ;;  %v6288_v30 = vsel %vm5577_vm2, %v20467_v22, %v18349_v48 }
 0x3c7   :  { %9642 = vmatmul.mubr.bf16.gmra.mrb[28].mxu1 %v9059_v21  ;;  %v1525_v21 = vmax.f32 %v1480_v32, 0.0  ;;  %12827 = vmatprep.subr.bf16.mxu1 %v13727_v12  ;;  %v6315_v27 = vsel %vm5878_vm3, %v6288_v30, %v5072_v19 }
 0x3c8   :  { %v5078_v51 = vpop.permute.xlu1 %5077  ;;  %5557 = vrot.lane.b32.xlu0 %v18233_v16, %s13801_s14  ;;  %v18455_v62 = vrot.slane %v2566_v31, %v14305_v11  ;;  %v20465_v31 = vld [vmem:[#allocation10_spill] sm:$0xff] }
 0x3c9   :  { %v1547_v43 = vpack.c.bf16 %v1525_v21, %v1525_v21  ;;  %v1577_v52 = vrot.slane %v20465_v31, %v14305_v11  ;;  %v6291_v21 = vsel %vm5577_vm2, %v20466_v29, %v18337_v47  ;;  %v18487_v31 = vrot.slane %v5481_v33, %v14305_v11 }
 0x3ca   :  { %v5076_v28 = vpop.permute.xlu0 %5075  ;;  %5563 = vrot.lane.b32.xlu1 %v18256_v1, %s13801_s14  ;;  %v13728_v1 = vld [vmem:[%s19778_s3 + $0x88] sm:$0xff]   ;;  %v5467_v12 = vrot.slane %v18455_v62, %v14305_v11 }
 0x3cb   :  { %12828 = vmatpush3.bf16.msra.mxu1 %v13728_v1  ;;  %v2598_v1 = vcombine.high %v18455_v62, %v18455_v62  ;;  %v2605_v50 = vrot.slane %v1547_v43, %v14305_v11  ;;  %v1585_v41 = vcombine.high %v1577_v52, %v1577_v52  ;;  %v20468_v43 = vld [vmem:[#allocation33_spill] sm:$0xff] }
 0x3cc   :  { %v5082_v16 = vpop.permute.xlu1 %5081  ;;  %5561 = vrot.lane.b32.xlu0 %v18267_v9, %s13801_s14  ;;  %v20464_v9 = vld [vmem:[#allocation9_spill] sm:$0xff]  ;;  %v6297_v33 = vsel %vm5577_vm2, %v20468_v43, %v18359_v4  ;;  %v18519_v4 = vrot.slane %v1577_v52, %v14305_v11 }
 0x3cd   :  { %v12605_v26 = vpack.c.bf16 %v20464_v9, %v20464_v9  ;;  %v5515_v22 = vrot.slane %v2598_v1, %v14305_v11  ;;  %v6321_v30 = vsel %vm5878_vm3, %v6297_v33, %v5078_v51  ;;  %v2612_v19 = vrot.slane %v2605_v50, %v14305_v11 }
 0x3ce   :  { %v18457_v49 = vpop.permute.xlu0 %5079  ;;  %5567 = vrot.lane.b32.xlu1 %v18444_v10, %s13801_s14  ;;  %20469 = vst [vmem:[#allocation74_spill] sm:$0xff] %v18519_v4  ;;  %v18534_v50 = vrot.slane %v1585_v41, %v14305_v11 }
 0x3cf   :  { %v18479_v9 = vrot.slane %v12605_v26, %v14305_v11  ;;  %v6317_v26 = vsel %vm5878_vm3, %v6291_v21, %v5074_v2 }
 0x3d0   :  { %v18463_v32 = vpop.permute.xlu1 %5085  ;;  %5565 = vrot.lane.b32.xlu0 %v18379_v39, %s13801_s14  ;;  %20472 = vst [vmem:[#allocation21_spill] sm:$0xff] %v18534_v50 }
 0x3d2   :  { %v18470_v57 = vpop.permute.xlu0 %5083  ;;  %5503 = vrot.lane.b32.xlu1 %v18444_v10, %s13802_s15 }
 0x3d4   :  { %v5108_v25 = vpop.permute.xlu1 %5107  ;;  %5501 = vrot.lane.b32.xlu0 %v18379_v39, %s13802_s15  ;;  %v18501_v39 = vrot.slane %v5467_v12, %v14305_v11 }
 0x3d5   :  { %v18496_v47 = vsel %vm6079_vm4, %v6317_v26, %v5108_v25  ;;  %v1586_v25 = vcombine.high %v18479_v9, %v18479_v9 }
 0x3d6   :  { %v5106_v29 = vpop.permute.xlu0 %5105  ;;  %5507 = vrot.lane.b32.xlu1 %v18487_v31, %s13802_s15  ;;  %v7948_v21 = vcombine.low %v18011_v23, %v18496_v47  ;;  %v6303_v23 = vsel %vm5577_vm2, %v17565_v13, %v18374_v0 }
 0x3d7   :  { %v18507_v48 = vsel %vm6079_vm4, %v6315_v27, %v5106_v29  ;;  %v20470_v27 = vld [vmem:[#allocation85_spill] sm:$0xff] }
 0x3d8   :  { %v7932_v2 = vcombine.low %v18029_v45, %v18507_v48  ;;  %v5112_v12 = vpop.permute.xlu1 %5111  ;;  %5505 = vrot.lane.b32.xlu0 %v18501_v39, %s13802_s15  ;;  %v6294_v1 = vsel %vm5577_vm2, %v20470_v27, %v18367_v7  ;;  %v18531_v45 = vrot.slane %v18479_v9, %v14305_v11  ;;  %v20473_v27 = vld [vmem:[#allocation118_spill] sm:$0xff] }
 0x3d9   :  { %v18527_v51 = vsel %vm6079_vm4, %v6321_v30, %v5112_v12  ;;  %v6319_v52 = vsel %vm5878_vm3, %v6294_v1, %v5076_v28  ;;  %v18551_v28 = vrot.slane %v5515_v22, %v14305_v11  ;;  %v5549_v30 = vrot.slane %v2612_v19, %v14305_v11  ;;  %v13729_v22 = vld [vmem:[%s19778_s3 + $0xd0] sm:$0xff]  }
 0x3da   :  { %20471 = vst [vmem:[#allocation61_spill] sm:$0xff] %v18531_v45  ;;  %v7980_v26 = vcombine.low %v18200_v40, %v18527_v51  ;;  %v12771_v29 = vpop.f32.mrb[12].mxu1  ;;  %v5110_v7 = vpop.permute.xlu0 %5109  ;;  %5537 = vrot.lane.b32.xlu1 %v18501_v39, %s13803_s16  ;;  %v18545_v43 = vrot.slane %v7932_v2, %v14305_v11  ;;  %v6325_v40 = vsel %vm5878_vm3, %v6303_v23, %v5082_v16 }
 0x3db   :  { %v18548_v41 = vsel %vm6079_vm4, %v6319_v52, %v5110_v7  ;;  %v12772_v33 = vpop.f32.mrb[13].mxu1  ;;  %v6300_v16 = vsel %vm5577_vm2, %v20473_v27, %v18383_v17  ;;  %v18569_v19 = vrot.slane %v7948_v21, %v14305_v11  ;;  %12829 = vmatprep.subr.bf16.mxu1 %v13729_v22  ;;  %v20479_v27 = vld [vmem:[#allocation100_spill] sm:$0xff] }
 0x3dc   :  { %v18556_v12 = vrot.slane %v7980_v26, %v14305_v11  ;;  %v7964_v13 = vcombine.low %v18203_v37, %v18548_v41  ;;  %v12774_v0 = vpop.f32.mrb[14].mxu1  ;;  %v5116_v2 = vpop.permute.xlu1 %5115  ;;  %5535 = vrot.lane.b32.xlu0 %v18444_v10, %s13803_s16  ;;  %v18571_v1 = vadd.f32 %v12772_v33, %v12771_v29  ;;  %v20475_v26 = vld [vmem:[#allocation122_spill] sm:$0xff]  ;;  %v6323_v7 = vsel %vm5878_vm3, %v6300_v16, %v18457_v49  ;;  %v20476_v33 = vld [vmem:[#allocation105_spill] sm:$0xff] }
 0x3dd   :  { %v18574_v37 = vsel %vm6079_vm4, %v6325_v40, %v5116_v2  ;;  %v12775_v52 = vpop.f32.mrb[15].mxu1  ;;  %v6309_v10 = vsel %vm5577_vm2, %v20475_v26, %v18390_v18  ;;  %v13730_v29 = vld [vmem:[%s19778_s3 + $0x90] sm:$0xff]   ;;  %v7940_v18 = vcombine.low %v17718_v58, %v18545_v43 }
 0x3de   :  { %20474 = vst [vmem:[#allocation63_spill] sm:$0xff] %v18571_v1  ;;  %v18582_v23 = vrot.slane %v7964_v13, %v14305_v11  ;;  %v8012_v17 = vcombine.low %v18221_v44, %v18574_v37  ;;  %v5114_v21 = vpop.permute.xlu0 %5113  ;;  %5541 = vrot.lane.b32.xlu1 %v18551_v28, %s13803_s16  ;;  %v7988_v49 = vcombine.low %v20476_v33, %v18556_v12 }
 0x3df   :  { %v18595_v40 = vadd.f32 %v12775_v52, %v12774_v0  ;;  %v18598_v13 = vsel %vm6079_vm4, %v6323_v7, %v5114_v21  ;;  %v18602_v44 = vcombine.high %v18519_v4, %v18519_v4  ;;  %v6329_v2 = vsel %vm5878_vm3, %v6309_v10, %v18463_v32  ;;  %v20480_v0 = vld [vmem:[#allocation123_spill] sm:$0xff]  ;;  %v20481_v52 = vld [vmem:[#allocation124_spill] sm:$0xff]  ;;  %12830 = vmatpush3.bf16.msra.mxu1 %v13730_v29 }
 0x3e0   :  { %v7972_v16 = vcombine.low %v20479_v27, %v18582_v23  ;;  %v18609_v58 = vrot.slane %v8012_v17, %v14305_v11  ;;  %v5120_v26 = vpop.permute.xlu1 %5119  ;;  %5539 = vrot.lane.b32.xlu0 %v18487_v31, %s13803_s16  ;;  %v6306_v22 = vsel %vm5577_vm2, %v20480_v0, %v18395_v20  ;;  %v7956_v7 = vcombine.low %v20481_v52, %v18569_v19 }
 0x3e1   :  { %20477 = vst [vmem:[#allocation75_spill] sm:$0xff] %v18595_v40  ;;  %20478 = vst [vmem:[#allocation87_spill] sm:$0xff] %v18602_v44  ;;  %v7996_v32 = vcombine.low %v18242_v42, %v18598_v13  ;;  %v18621_v10 = vsel %vm6079_vm4, %v6329_v2, %v5120_v26  ;;  %v6327_v17 = vsel %vm5878_vm3, %v6306_v22, %v18470_v57  ;;  %v13731_v42 = vld [vmem:[%s19778_s3 + $0xd8] sm:$0xff]  }
 0x3e2   :  { %v7979_v21 = vrot.slane %v7972_v16, %v14305_v11  ;;  %v8044_v33 = vcombine.low %v18264_v24, %v18621_v10  ;;  %v5118_v27 = vpop.permute.xlu0 %5117  ;;  %5571 = vrot.lane.b32.xlu1 %v18487_v31, %s13801_s14  ;;  %v5556_v20 = vrot.slane %v5549_v30, %v14305_v11  ;;  %v7947_v29 = vrot.slane %v7940_v18, %v14305_v11  ;;  %v13732_v24 = vld [vmem:[%s19778_s3 + $0x98] sm:$0xff]  }
 0x3e3   :  { %v7995_v2 = vrot.slane %v7988_v49, %v14305_v11  ;;  %v18637_v57 = vrot.slane %v7996_v32, %v14305_v11  ;;  %v18640_v16 = vsel %vm6079_vm4, %v6327_v17, %v5118_v27  ;;  %v8020_v31 = vcombine.low %v17971_v14, %v18609_v58  ;;  %12831 = vmatprep.subr.bf16.mxu1 %v13731_v42 }
 0x3e4   :  { %v18648_v30 = vrot.slane %v8044_v33, %v14305_v11  ;;  %v8028_v18 = vcombine.low %v18289_v54, %v18640_v16  ;;  %v18652_v49 = vpop.permute.xlu1 %5263  ;;  %5569 = vrot.lane.b32.xlu0 %v18501_v39, %s13801_s14  ;;  %v2633_v26 = vrot.slane %v18602_v44, %v14305_v11  ;;  %v7963_v0 = vrot.slane %v7956_v7, %v14305_v11  ;;  %v20485_v33 = vld [vmem:[#allocation43_spill] sm:$0xff] }
 0x3e5   :  { %v9064_v22 = vcombine.low %v7979_v21, %v7995_v2  ;;  %v8004_v14 = vcombine.low %v17940_v35, %v18637_v57  ;;  %v2619_v52 = vrot.slane %v18534_v50, %v14305_v11  ;;  %v18673_v7 = vcombine.high %v18534_v50, %v18534_v50  ;;  %12832 = vmatpush3.bf16.msra.mxu1 %v13732_v24 }
 0x3e6   :  { %20482 = vst [vmem:[#allocation97_spill] sm:$0xff] %v18648_v30  ;;  %v8052_v54 = vcombine.low %v17951_v60, %v18648_v30  ;;  %v18666_v32 = vrot.slane %v8028_v18, %v14305_v11  ;;  %v18668_v39 = vpop.permute.xlu0 %5261  ;;  %5575 = vrot.lane.b32.xlu1 %v5556_v20, %s13801_s14  ;;  %v9063_v35 = vcombine.low %v7947_v29, %v7963_v0 }
 0x3e7   :  { %20484 = vst [vmem:[#allocation44_spill] sm:$0xff] %v18673_v7  ;;  %v8011_v17 = vrot.slane %v8004_v14, %v14305_v11  ;;  %v2661_v21 = vrot.slane %v18531_v45, %v14305_v11  ;;  %v8027_v60 = vrot.slane %v8020_v31, %v14305_v11  ;;  %v18686_v20 = vrot.slane %v2633_v26, %v14305_v11 }
 0x3e8   :  { %20483 = vst [vmem:[#allocation91_spill] sm:$0xff] %v18666_v32  ;;  %v8036_v27 = vcombine.low %v20485_v33, %v18666_v32  ;;  %v18681_v42 = vpop.permute.xlu1 %5267  ;;  %5573 = vrot.lane.b32.xlu0 %v18551_v28, %s13801_s14  ;;  %v18690_v29 = vcombine.high %v18531_v45, %v18531_v45  ;;  %v18696_v2 = vrot.slane %v1586_v25, %v14305_v11 }
 0x3e9   :  { %v2626_v24 = vrot.slane %v2619_v52, %v14305_v11  ;;  %v9080_v31 = vrot.slane %v9064_v22, %v14305_v11  ;;  %v9065_v18 = vcombine.low %v8011_v17, %v8027_v60  ;;  %v8059_v28 = vrot.slane %v8052_v54, %v14305_v11 }
 0x3ea   :  { %20486 = vst [vmem:[#allocation82_spill] sm:$0xff] %v18690_v29  ;;  %20487 = vst [vmem:[#allocation26_spill] sm:$0xff] %v18696_v2  ;;  %v8043_v26 = vrot.slane %v8036_v27, %v14305_v11  ;;  %v18702_v0 = vpop.permute.xlu0 %5265  ;;  %4015 = vrot.lane.b32.xlu1 %v18686_v20, %s13802_s15  ;;  %v2647_v14 = vrot.slane %v18673_v7, %v14305_v11  ;;  %v9073_v9 = vrot.slane %v9063_v35, %v14305_v11 }
 0x3eb   :  { %v18713_v22 = vrot.slane %v2661_v21, %v14305_v11  ;;  %v2689_v52 = vrot.slane %v18690_v29, %v14305_v11  ;;  %v2675_v54 = vrot.slane %v18696_v2, %v14305_v11  ;;  %v18721_v60 = vcombine.high %v18696_v2, %v18696_v2 }
 0x3ec   :  { %v9066_v25 = vcombine.low %v8043_v26, %v8059_v28  ;;  %v18709_v33 = vpop.permute.xlu1 %5271  ;;  %4013 = vrot.lane.b32.xlu0 %v2626_v24, %s13802_s15  ;;  %v9096_v17 = vcombine.high %v9073_v9, %v9080_v31  ;;  %v18728_v27 = vrot.slane %v2647_v14, %v14305_v11  ;;  %v9087_v21 = vrot.slane %v9065_v18, %v14305_v11  ;;  %v20489_v26 = vld [vmem:[#allocation11_spill] sm:$0xff] }
 0x3ed   :  { %20488 = vst [vmem:[#allocation83_spill] sm:$0xff] %v18721_v60  ;;  %v9095_v28 = vcombine.low %v9073_v9, %v9080_v31  ;;  %v2717_v40 = vrot.slane %v20489_v26, %v14305_v11  ;;  %v18739_v29 = vrot.slane %v2689_v52, %v14305_v11  ;;  %v13733_v18 = vld [vmem:[%s19778_s3 + $0xe0] sm:$0xff]   ;;  %v18748_v14 = vrot.slane %v2675_v54, %v14305_v11 }
 0x3ee   :  { %v18723_v35 = vpop.permute.xlu0 %5269  ;;  %4019 = vrot.lane.b32.xlu1 %v18713_v22, %s13802_s15  ;;  %v9094_v24 = vrot.slane %v9066_v25, %v14305_v11  ;;  %v13734_v31 = vld [vmem:[%s19778_s3 + $0xa0] sm:$0xff]   ;;  %v18751_v9 = vrot.slane %v9096_v17, %v14305_v11  ;;  %v2703_v25 = vrot.slane %v18721_v60, %v14305_v11  ;;  %12833 = vmatprep.subr.bf16.mxu1 %v13733_v18 }
 0x3ef   :  { %v18769_v17 = vrot.slane %v2717_v40, %v14305_v11  ;;  %12834 = vmatpush3.bf16.msra.mxu1 %v13734_v31 }
 0x3f0   :  { %v18734_v1 = vpop.permute.xlu1 %5275  ;;  %4017 = vrot.lane.b32.xlu0 %v18728_v27, %s13802_s15  ;;  %v9098_v45 = vcombine.high %v9087_v21, %v9094_v24  ;;  %v9097_v2 = vcombine.low %v9087_v21, %v9094_v24  ;;  %20490 = vst [vmem:[#allocation37_spill] sm:$0xff] %v18751_v9  ;;  %v18763_v24 = vrot.slane %v9095_v28, %v14305_v11  ;;  %v13735_v28 = vld [vmem:[%s19778_s3 + $0xe8] sm:$0xff]  }
 0x3f1   :  { %v18784_v18 = vrot.slane %v2703_v25, %v14305_v11  ;;  %12835 = vmatprep.subr.bf16.mxu1 %v13735_v28  ;;  %v20494_v28 = vld [vmem:[#allocation127_spill] sm:$0xff] }
 0x3f2   :  { %v18755_v52 = vpop.permute.xlu0 %5273  ;;  %4023 = vrot.lane.b32.xlu1 %v18739_v29, %s13802_s15  ;;  %v18760_v21 = vrot.slane %v9098_v45, %v14305_v11  ;;  %20492 = vst [vmem:[#allocation56_spill] sm:$0xff] %v18763_v24  ;;  %v18766_v54 = vrot.slane %v9097_v2, %v14305_v11 }
 0x3f4   :  { %20491 = vst [vmem:[#allocation76_spill] sm:$0xff] %v18760_v21  ;;  %20493 = vst [vmem:[#allocation104_spill] sm:$0xff] %v18766_v54  ;;  %v5298_v26 = vpop.permute.xlu1 %5297  ;;  %4021 = vrot.lane.b32.xlu0 %v18748_v14, %s13802_s15  ;;  %v9129_v60 = vcombine.low %v18751_v9, %v18760_v21  ;;  %v9127_v45 = vcombine.low %v18763_v24, %v18766_v54  ;;  %v2451_v24 = vcombine.high %v20494_v28, %v20494_v28  ;;  %v20495_v9 = vld [vmem:[#allocation107_spill] sm:$0xff]  ;;  %v20496_v28 = vld [vmem:[#allocation12_spill] sm:$0xff] }
 0x3f6   :  { %9649 = vmatprep.mubr.bf16.mxu1 %v9129_v60  ;;  %v5296_v40 = vpop.permute.xlu0 %5295  ;;  %4027 = vrot.lane.b32.xlu1 %v18769_v17, %s13802_s15  ;;  %v13736_v60 = vld [vmem:[%s19778_s3 + $0xa8] sm:$0xff]   ;;  %v6352_v44 = vsel %vm5577_vm2, %v2451_v24, %v18668_v39 }
 0x3f7   :  { %9650 = vmatmul.mubr.bf16.gmra.mrb[32].mxu1 %v9127_v45  ;;  %v6381_v4 = vsel %vm5878_vm3, %v6352_v44, %v5296_v40 }
 0x3f8   :  { %v5302_v31 = vpop.permute.xlu1 %5301  ;;  %4025 = vrot.lane.b32.xlu0 %v18784_v18, %s13802_s15  ;;  %12836 = vmatpush3.bf16.msra.mxu1 %v13736_v60 }
 0x3fa   :  { %v5300_v21 = vpop.permute.xlu0 %5299  ;;  %4355 = vrot.lane.b32.xlu1 %v18728_v27, %s13803_s16 }
 0x3fc   :  { %v5306_v25 = vpop.permute.xlu1 %5305  ;;  %4353 = vrot.lane.b32.xlu0 %v18686_v20, %s13803_s16  ;;  %v6355_v20 = vsel %vm5577_vm2, %v20495_v9, %v18652_v49  ;;  %v20497_v49 = vld [vmem:[#allocation119_spill] sm:$0xff] }
 0x3fd   :  { %v6383_v7 = vsel %vm5878_vm3, %v6355_v20, %v5298_v26  ;;  %v6361_v9 = vsel %vm5577_vm2, %v20497_v49, %v18681_v42  ;;  %v20499_v20 = vld [vmem:[#allocation115_spill] sm:$0xff] }
 0x3fe   :  { %v5304_v45 = vpop.permute.xlu0 %5303  ;;  %4359 = vrot.lane.b32.xlu1 %v18748_v14, %s13803_s16  ;;  %v6387_v39 = vsel %vm5878_vm3, %v6361_v9, %v5302_v31 }
 0x400   :  { %v5310_v2 = vpop.permute.xlu1 %5309  ;;  %4357 = vrot.lane.b32.xlu0 %v18713_v22, %s13803_s16 }
 0x402   :  { %v18802_v54 = vpop.permute.xlu0 %5307  ;;  %4363 = vrot.lane.b32.xlu1 %v18784_v18, %s13803_s16 }
 0x404   :  { %v5332_v60 = vpop.permute.xlu1 %5331  ;;  %4361 = vrot.lane.b32.xlu0 %v18739_v29, %s13803_s16 }
 0x405   :  { %v18818_v50 = vsel %vm6079_vm4, %v6383_v7, %v5332_v60  ;;  %v20498_v7 = vld [vmem:[#allocation98_spill] sm:$0xff] }
 0x406   :  { %v5330_v32 = vpop.permute.xlu0 %5329  ;;  %4367 = vrot.lane.b32.xlu1 %v20496_v28, %s13803_s16  ;;  %v6358_v26 = vsel %vm5577_vm2, %v20498_v7, %v18702_v0  ;;  %v8076_v40 = vcombine.low %v18307_v53, %v18818_v50  ;;  %v6367_v0 = vsel %vm5577_vm2, %v20499_v20, %v18709_v33  ;;  %v13737_v33 = vld [vmem:[%s19778_s3 + $0xf0] sm:$0xff]  }
 0x407   :  { %v18826_v30 = vsel %vm6079_vm4, %v6381_v4, %v5330_v32  ;;  %v6385_v4 = vsel %vm5878_vm3, %v6358_v26, %v5300_v21  ;;  %v6391_v21 = vsel %vm5878_vm3, %v6367_v0, %v5306_v25  ;;  %12837 = vmatprep.subr.bf16.mxu1 %v13737_v33 }
 0x408   :  { %v8060_v24 = vcombine.low %v18323_v46, %v18826_v30  ;;  %v5336_v44 = vpop.permute.xlu1 %5335  ;;  %4365 = vrot.lane.b32.xlu0 %v18769_v17, %s13803_s16  ;;  %v8083_v25 = vrot.slane %v8076_v40, %v14305_v11 }
 0x409   :  { %v18839_v42 = vsel %vm6079_vm4, %v6387_v39, %v5336_v44 }
 0x40a   :  { %v8108_v32 = vcombine.low %v18496_v47, %v18839_v42  ;;  %v12777_v46 = vpop.f32.mrb[16].mxu1  ;;  %v5334_v31 = vpop.permute.xlu0 %5333  ;;  %4695 = vrot.lane.b32.xlu1 %v18713_v22, %s13801_s14  ;;  %v8067_v60 = vrot.slane %v8060_v24, %v14305_v11  ;;  %v20500_v22 = vld [vmem:[#allocation110_spill] sm:$0xff] }
 0x40b   :  { %v18851_v53 = vsel %vm6079_vm4, %v6385_v4, %v5334_v31  ;;  %v12778_v49 = vpop.f32.mrb[17].mxu1  ;;  %v6364_v24 = vsel %vm5577_vm2, %v20500_v22, %v18723_v35  ;;  %v20501_v35 = vld [vmem:[#allocation125_spill] sm:$0xff] }
 0x40c   :  { %v8115_v9 = vrot.slane %v8108_v32, %v14305_v11  ;;  %v8092_v47 = vcombine.low %v18507_v48, %v18851_v53  ;;  %v12780_v39 = vpop.f32.mrb[18].mxu1  ;;  %v5340_v44 = vpop.permute.xlu1 %5339  ;;  %4693 = vrot.lane.b32.xlu0 %v18728_v27, %s13801_s14  ;;  %v18866_v7 = vadd.f32 %v12778_v49, %v12777_v46  ;;  %v6389_v4 = vsel %vm5878_vm3, %v6364_v24, %v5304_v45  ;;  %v20502_v49 = vld [vmem:[#allocation17_spill] sm:$0xff] }
 0x40d   :  { %v18869_v26 = vsel %vm6079_vm4, %v6391_v21, %v5340_v44  ;;  %v12781_v48 = vpop.f32.mrb[19].mxu1  ;;  %v6373_v40 = vsel %vm5577_vm2, %v20501_v35, %v18734_v1  ;;  %v8068_v46 = vcombine.low %v18024_v34, %v8067_v60  ;;  %v20503_v21 = vld [vmem:[#allocation41_spill] sm:$0xff]  ;;  %v20504_v34 = vld [vmem:[#allocation94_spill] sm:$0xff]  ;;  %v20505_v60 = vld [vmem:[#allocation36_spill] sm:$0xff] }
 0x40e   :  { %v8099_v27 = vrot.slane %v8092_v47, %v14305_v11  ;;  %v8140_v32 = vcombine.low %v18527_v51, %v18869_v26  ;;  %v5338_v31 = vpop.permute.xlu0 %5337  ;;  %4699 = vrot.lane.b32.xlu1 %v18739_v29, %s13801_s14  ;;  %v18881_v20 = vadd.f32 %v12781_v48, %v12780_v39  ;;  %v6395_v45 = vsel %vm5878_vm3, %v6373_v40, %v5310_v2 }
 0x40f   :  { %v18884_v0 = vsel %vm6079_vm4, %v6389_v4, %v5338_v31  ;;  %v8116_v51 = vcombine.low %v20502_v49, %v8115_v9  ;;  %v6370_v1 = vsel %vm5577_vm2, %v20504_v34, %v18755_v52  ;;  %v8084_v39 = vcombine.low %v20505_v60, %v8083_v25  ;;  %v13738_v9 = vld [vmem:[%s19778_s3 + $0xb0] sm:$0xff]   ;;  %v13740_v31 = vld [vmem:[%s19778_s3 + $0xb8] sm:$0xff]  }
 0x410   :  { %v8100_v47 = vcombine.low %v20503_v21, %v8099_v27  ;;  %v8147_v29 = vrot.slane %v8140_v32, %v14305_v11  ;;  %v5344_v44 = vpop.permute.xlu1 %5343  ;;  %4697 = vrot.lane.b32.xlu0 %v18748_v14, %s13801_s14  ;;  %v8124_v33 = vcombine.low %v18548_v41, %v18884_v0  ;;  %v6393_v22 = vsel %vm5878_vm3, %v6370_v1, %v18802_v54 }
 0x411   :  { %v18899_v2 = vsel %vm6079_vm4, %v6395_v45, %v5344_v44  ;;  %v8075_v41 = vrot.slane %v8068_v46, %v14305_v11  ;;  %12838 = vmatpush3.bf16.msra.mxu1 %v13738_v9  ;;  %v8123_v4 = vrot.slane %v8116_v51, %v14305_v11  ;;  %v8091_v35 = vrot.slane %v8084_v39, %v14305_v11 }
 0x412   :  { %v8107_v14 = vrot.slane %v8100_v47, %v14305_v11  ;;  %v8172_v52 = vcombine.low %v18574_v37, %v18899_v2  ;;  %v5342_v24 = vpop.permute.xlu0 %5341  ;;  %4703 = vrot.lane.b32.xlu1 %v18769_v17, %s13801_s14  ;;  %v8131_v25 = vrot.slane %v8124_v33, %v14305_v11  ;;  %v8148_v54 = vcombine.low %v18272_v56, %v8147_v29  ;;  %v13739_v17 = vld [vmem:[%s19778_s3 + $0xf8] sm:$0xff]  }
 0x413   :  { %v18914_v48 = vsel %vm6079_vm4, %v6393_v22, %v5342_v24  ;;  %12839 = vmatprep.subr.bf16.mxu1 %v13739_v17  ;;  %v9131_v51 = vcombine.low %v8075_v41, %v8091_v35 }
 0x414   :  { %v8179_v27 = vrot.slane %v8172_v52, %v14305_v11  ;;  %v8156_v37 = vcombine.low %v18598_v13, %v18914_v48  ;;  %v5280_v32 = vpop.permute.xlu1 %5279  ;;  %4701 = vrot.lane.b32.xlu0 %v18784_v18, %s13801_s14  ;;  %v8132_v56 = vcombine.low %v18239_v63, %v8131_v25  ;;  %v9132_v40 = vcombine.low %v8107_v14, %v8123_v4  ;;  %v20506_v18 = vld [vmem:[#allocation13_spill] sm:$0xff] }
 0x415   :  { %12840 = vmatpush3.bf16.msra.mxu1 %v13740_v31  ;;  %v8155_v21 = vrot.slane %v8148_v54, %v14305_v11  ;;  %v20507_v63 = vmov 0.0|0.0   ;;  %v9141_v9 = vrot.slane %v9131_v51, %v14305_v11 }
 0x416   :  { %v8180_v46 = vcombine.low %v18249_v3, %v8179_v27  ;;  %v8163_v13 = vrot.slane %v8156_v37, %v14305_v11  ;;  %v5278_v45 = vpop.permute.xlu0 %5277  ;;  %4707 = vrot.lane.b32.xlu1 %v20506_v18, %s13801_s14  ;;  %v8139_v49 = vrot.slane %v8132_v56, %v14305_v11  ;;  %13561 = vmatprep.subr.bf16.mxu1 %v20507_v63 }
 0x417   :  { %v9148_v60 = vrot.slane %v9132_v40, %v14305_v11 }
 0x418   :  { %v8164_v47 = vcombine.low %v18275_v55, %v8163_v13  ;;  %v5492_v29 = vpop.permute.xlu1 %5491  ;;  %4705 = vrot.lane.b32.xlu0 %v20496_v28, %s13801_s14  ;;  %v9133_v3 = vcombine.low %v8139_v49, %v8155_v21  ;;  %v8187_v44 = vrot.slane %v8180_v46, %v14305_v11 }
 0x419   :  { %v9164_v28 = vcombine.high %v9141_v9, %v9148_v60  ;;  %v9163_v52 = vcombine.low %v9141_v9, %v9148_v60 }
 0x41a   :  { %v8171_v34 = vrot.slane %v8164_v47, %v14305_v11  ;;  %v5490_v1 = vpop.permute.xlu0 %5489  ;;  %v9155_v55 = vrot.slane %v9133_v3, %v14305_v11 }
 0x41b   :  { %v18950_v54 = vrot.slane %v9164_v28, %v14305_v11  ;;  %v18956_v37 = vrot.slane %v9163_v52, %v14305_v11  ;;  %v20510_v52 = vld [vmem:[#allocation38_spill] sm:$0xff] }
 0x41c   :  { %v9134_v39 = vcombine.low %v8171_v34, %v8187_v44  ;;  %v5496_v33 = vpop.permute.xlu1 %5495  ;;  %v20508_v34 = vld [vmem:[#allocation47_spill] sm:$0xff] }
 0x41d   :  { %v6379_v60 = vsel %vm5577_vm2, %v20508_v34, %v5280_v32  ;;  %v20511_v34 = vld [vmem:[#allocation135_spill] sm:$0xff] }
 0x41e   :  { %v5494_v22 = vpop.permute.xlu0 %5493  ;;  %v9162_v14 = vrot.slane %v9134_v39, %v14305_v11  ;;  %v20509_v39 = vld [vmem:[#allocation112_spill] sm:$0xff] }
 0x41f   :  { %v6376_v9 = vsel %vm5577_vm2, %v20509_v39, %v5278_v45 }
 0x420   :  { %v5500_v24 = vpop.permute.xlu1 %5499  ;;  %v9166_v41 = vcombine.high %v9155_v55, %v9162_v14  ;;  %v9165_v25 = vcombine.low %v9155_v55, %v9162_v14 }
 0x422   :  { %v18947_v4 = vpop.permute.xlu0 %5497  ;;  %v18953_v27 = vrot.slane %v9166_v41, %v14305_v11  ;;  %v18959_v17 = vrot.slane %v9165_v25, %v14305_v11  ;;  %v6425_v41 = vsel %vm5577_vm2, %v20510_v52, %v5492_v29 }
 0x424   :  { %v5314_v31 = vpop.permute.xlu1 %5313  ;;  %v9197_v35 = vcombine.low %v18950_v54, %v18953_v27  ;;  %v9195_v56 = vcombine.low %v18956_v37, %v18959_v17  ;;  %v9198_v40 = vcombine.high %v18950_v54, %v18953_v27  ;;  %v9196_v46 = vcombine.high %v18956_v37, %v18959_v17 }
 0x425   :  { %v6399_v55 = vsel %vm5878_vm3, %v6379_v60, %v5314_v31  ;;  %v6422_v31 = vsel %vm5577_vm2, %v20511_v34, %v5490_v1 }
 0x426   :  { %9657 = vmatprep.mubr.bf16.mxu1 %v9197_v35  ;;  %v5312_v13 = vpop.permute.xlu0 %5311 }
 0x427   :  { %9658 = vmatmul.mubr.bf16.gmra.mrb[36].mxu1 %v9195_v56  ;;  %v6397_v14 = vsel %vm5878_vm3, %v6376_v9, %v5312_v13 }
 0x428   :  { %v5526_v18 = vpop.permute.xlu1 %5525 }
 0x429   :  { %v6453_v56 = vsel %vm5878_vm3, %v6425_v41, %v5526_v18  ;;  %v6431_v18 = vsel %vm5577_vm2, %v18166_v15, %v5496_v33  ;;  %v20512_v41 = vld [vmem:[#allocation130_spill] sm:$0xff] }
 0x42a   :  { %v5524_v49 = vpop.permute.xlu0 %5523 }
 0x42b   :  { %v6451_v60 = vsel %vm5878_vm3, %v6422_v31, %v5524_v49 }
 0x42c   :  { %v5530_v51 = vpop.permute.xlu1 %5529 }
 0x42d   :  { %v6457_v1 = vsel %vm5878_vm3, %v6431_v18, %v5530_v51 }
 0x42e   :  { %v5528_v21 = vpop.permute.xlu0 %5527 }
 0x430   :  { %v5534_v47 = vpop.permute.xlu1 %5533 }
 0x432   :  { %v5532_v3 = vpop.permute.xlu0 %5531 }
 0x434   :  { %v5348_v44 = vpop.permute.xlu1 %5347 }
 0x435   :  { %v18978_v25 = vsel %vm6079_vm4, %v6399_v55, %v5348_v44 }
 0x436   :  { %v5346_v28 = vpop.permute.xlu0 %5345  ;;  %v8204_v29 = vcombine.low %v18621_v10, %v18978_v25 }
 0x437   :  { %v18981_v35 = vsel %vm6079_vm4, %v6397_v14, %v5346_v28 }
 0x438   :  { %v8188_v32 = vcombine.low %v18640_v16, %v18981_v35  ;;  %v5560_v45 = vpop.permute.xlu1 %5559 }
 0x439   :  { %v6473_v13 = vsel %vm6079_vm4, %v6453_v56, %v5560_v45  ;;  %v8211_v45 = vrot.slane %v8204_v29, %v14305_v11 }
 0x43a   :  { %v8236_v44 = vcombine.low %v18818_v50, %v6473_v13  ;;  %v12783_v39 = vpop.f32.mrb[20].mxu1  ;;  %v5558_v9 = vpop.permute.xlu0 %5557  ;;  %v8195_v16 = vrot.slane %v8188_v32, %v14305_v11  ;;  %v6428_v50 = vsel %vm5577_vm2, %v20512_v41, %v5494_v22 }
 0x43b   :  { %v6471_v55 = vsel %vm6079_vm4, %v6451_v60, %v5558_v9  ;;  %v12784_v14 = vpop.f32.mrb[21].mxu1  ;;  %v6455_v32 = vsel %vm5878_vm3, %v6428_v50, %v5528_v21 }
 0x43c   :  { %v8243_v28 = vrot.slane %v8236_v44, %v14305_v11  ;;  %v8220_v49 = vcombine.low %v18826_v30, %v6471_v55  ;;  %v12786_v52 = vpop.f32.mrb[22].mxu1  ;;  %v5564_v10 = vpop.permute.xlu1 %5563  ;;  %v19002_v56 = vadd.f32 %v12784_v14, %v12783_v39  ;;  %v6437_v30 = vsel %vm5577_vm2, %v18187_v6, %v5500_v24 }
 0x43d   :  { %v6477_v15 = vsel %vm6079_vm4, %v6457_v1, %v5564_v10  ;;  %v12787_v33 = vpop.f32.mrb[23].mxu1  ;;  %v8196_v13 = vcombine.low %v18320_v61, %v8195_v16  ;;  %v6461_v44 = vsel %vm5878_vm3, %v6437_v30, %v5534_v47  ;;  %v8212_v16 = vcombine.low %v18298_v36, %v8211_v45 }
 0x43e   :  { %v8227_v51 = vrot.slane %v8220_v49, %v14305_v11  ;;  %v8268_v34 = vcombine.low %v18839_v42, %v6477_v15  ;;  %v5562_v31 = vpop.permute.xlu0 %5561  ;;  %v19012_v22 = vadd.f32 %v12787_v33, %v12786_v52  ;;  %v8244_v21 = vcombine.low %v18333_v5, %v8243_v28  ;;  %v20513_v42 = vld [vmem:[#allocation18_spill] sm:$0xff] }
 0x43f   :  { %v6475_v60 = vsel %vm6079_vm4, %v6455_v32, %v5562_v31  ;;  %v6434_v18 = vsel %vm5577_vm2, %v20513_v42, %v18947_v4  ;;  %v8203_v55 = vrot.slane %v8196_v13, %v14305_v11 }
 0x440   :  { %v8228_v29 = vcombine.low %v18347_v8, %v8227_v51  ;;  %v8275_v39 = vrot.slane %v8268_v34, %v14305_v11  ;;  %v5568_v9 = vpop.permute.xlu1 %5567  ;;  %v8252_v6 = vcombine.low %v18851_v53, %v6475_v60  ;;  %v6459_v24 = vsel %vm5878_vm3, %v6434_v18, %v5532_v3 }
 0x441   :  { %v6481_v61 = vsel %vm6079_vm4, %v6461_v44, %v5568_v9  ;;  %v8251_v4 = vrot.slane %v8244_v21, %v14305_v11 }
 0x442   :  { %v8235_v47 = vrot.slane %v8228_v29, %v14305_v11  ;;  %v8300_v5 = vcombine.low %v18869_v26, %v6481_v61  ;;  %v5566_v8 = vpop.permute.xlu0 %5565  ;;  %v8259_v14 = vrot.slane %v8252_v6, %v14305_v11  ;;  %v8276_v53 = vcombine.low %v18569_v19, %v8275_v39 }
 0x443   :  { %v6479_v1 = vsel %vm6079_vm4, %v6459_v24, %v5566_v8  ;;  %v8219_v26 = vrot.slane %v8212_v16, %v14305_v11 }
 0x444   :  { %v8307_v28 = vrot.slane %v8300_v5, %v14305_v11  ;;  %v8284_v3 = vcombine.low %v18884_v0, %v6479_v1  ;;  %v5504_v36 = vpop.permute.xlu1 %5503  ;;  %v8260_v49 = vcombine.low %v18545_v43, %v8259_v14  ;;  %v9200_v52 = vcombine.low %v8235_v47, %v8251_v4 }
 0x445   :  { %v9199_v33 = vcombine.low %v8203_v55, %v8219_v26  ;;  %v8283_v19 = vrot.slane %v8276_v53, %v14305_v11  ;;  %v6443_v18 = vsel %vm5577_vm2, %v18327_v38, %v5504_v36 }
 0x446   :  { %v8308_v10 = vcombine.low %v18556_v12, %v8307_v28  ;;  %v8291_v41 = vrot.slane %v8284_v3, %v14305_v11  ;;  %v5502_v50 = vpop.permute.xlu0 %5501  ;;  %v8267_v15 = vrot.slane %v8260_v49, %v14305_v11  ;;  %v9216_v31 = vrot.slane %v9200_v52, %v14305_v11 }
 0x447   :  { %v9209_v13 = vrot.slane %v9199_v33, %v14305_v11  ;;  %v6440_v4 = vsel %vm5577_vm2, %v18178_v59, %v5502_v50  ;;  %v20514_v50 = vld [vmem:[#allocation66_spill] sm:$0xff] }
 0x448   :  { %v8292_v32 = vcombine.low %v18582_v23, %v8291_v41  ;;  %v5508_v45 = vpop.permute.xlu1 %5507  ;;  %v9201_v0 = vcombine.low %v8267_v15, %v8283_v19  ;;  %v8315_v51 = vrot.slane %v8308_v10, %v14305_v11 }
 0x449   :  { %v9232_v29 = vcombine.high %v9209_v13, %v9216_v31  ;;  %v9231_v23 = vcombine.low %v9209_v13, %v9216_v31  ;;  %v6449_v49 = vsel %vm5577_vm2, %v18455_v62, %v5508_v45 }
 0x44a   :  { %v8299_v43 = vrot.slane %v8292_v32, %v14305_v11  ;;  %v5506_v34 = vpop.permute.xlu0 %5505  ;;  %v9223_v44 = vrot.slane %v9201_v0, %v14305_v11 }
 0x44b   :  { %v19051_v61 = vrot.slane %v9232_v29, %v14305_v11  ;;  %v19057_v16 = vrot.slane %v9231_v23, %v14305_v11  ;;  %v6446_v15 = vsel %vm5577_vm2, %v20514_v50, %v5506_v34 }
 0x44c   :  { %v9202_v12 = vcombine.low %v8299_v43, %v8315_v51  ;;  %v5538_v30 = vpop.permute.xlu1 %5537 }
 0x44d   :  { %v6465_v5 = vsel %vm5878_vm3, %v6443_v18, %v5538_v30 }
 0x44e   :  { %v5536_v60 = vpop.permute.xlu0 %5535  ;;  %v9230_v21 = vrot.slane %v9202_v12, %v14305_v11  ;;  %v20515_v12 = vld [vmem:[#allocation97_spill] sm:$0xff] }
 0x44f   :  { %v6463_v28 = vsel %vm5878_vm3, %v6440_v4, %v5536_v60 }
 0x450   :  { %v5542_v39 = vpop.permute.xlu1 %5541  ;;  %v9234_v9 = vcombine.high %v9223_v44, %v9230_v21  ;;  %v9233_v42 = vcombine.low %v9223_v44, %v9230_v21  ;;  %v20516_v44 = vld [vmem:[#allocation91_spill] sm:$0xff] }
 0x451   :  { %v6469_v52 = vsel %vm5878_vm3, %v6449_v49, %v5542_v39 }
 0x452   :  { %v5540_v6 = vpop.permute.xlu0 %5539  ;;  %v19054_v24 = vrot.slane %v9234_v9, %v14305_v11  ;;  %v19060_v47 = vrot.slane %v9233_v42, %v14305_v11 }
 0x453   :  { %v6467_v33 = vsel %vm5878_vm3, %v6446_v15, %v5540_v6 }
 0x454   :  { %v5572_v8 = vpop.permute.xlu1 %5571  ;;  %v9265_v55 = vcombine.low %v19051_v61, %v19054_v24  ;;  %v9263_v38 = vcombine.low %v19057_v16, %v19060_v47  ;;  %v9266_v14 = vcombine.high %v19051_v61, %v19054_v24  ;;  %v9264_v1 = vcombine.high %v19057_v16, %v19060_v47  ;;  %v10468_v61 = vld [vmem:[#allocation2 + $0x8] sm:$0xff]  ;;  %v10469_v24 = vld [vmem:[#allocation2 + $0x10] sm:$0xff]  ;;  %v10470_v47 = vld [vmem:[#allocation2 + $0x18] sm:$0xff] }
 0x455   :  { %v6485_v53 = vsel %vm6079_vm4, %v6465_v5, %v5572_v8 }
 0x456   :  { %v8332_v3 = vcombine.low %v18899_v2, %v6485_v53  ;;  %v5570_v36 = vpop.permute.xlu0 %5569  ;;  %9665 = vmatprep.mubr.bf16.mxu1 %v9265_v55 }
 0x457   :  { %v6483_v26 = vsel %vm6079_vm4, %v6463_v28, %v5570_v36  ;;  %9666 = vmatmul.mubr.bf16.gmra.mrb[40].mxu1 %v9263_v38 }
 0x458   :  { %v8339_v10 = vrot.slane %v8332_v3, %v14305_v11  ;;  %v8316_v59 = vcombine.low %v18914_v48, %v6483_v26  ;;  %v5576_v41 = vpop.permute.xlu1 %5575 }
 0x459   :  { %v6489_v2 = vsel %vm6079_vm4, %v6469_v52, %v5576_v41 }
 0x45a   :  { %v8323_v19 = vrot.slane %v8316_v59, %v14305_v11  ;;  %v8364_v62 = vcombine.low %v18978_v25, %v6489_v2  ;;  %v5574_v32 = vpop.permute.xlu0 %5573  ;;  %v8340_v0 = vcombine.low %v18609_v58, %v8339_v10 }
 0x45b   :  { %v6487_v45 = vsel %vm6079_vm4, %v6467_v33, %v5574_v32  ;;  %v20517_v32 = vld [vmem:[#allocation21_spill] sm:$0xff] }
 0x45c   :  { %v8324_v51 = vcombine.low %v18637_v57, %v8323_v19  ;;  %v8371_v48 = vrot.slane %v8364_v62, %v14305_v11  ;;  %v8348_v43 = vcombine.low %v18981_v35, %v6487_v45  ;;  %v4016_v34 = vpop.permute.xlu1 %4015  ;;  %v8347_v25 = vrot.slane %v8340_v0, %v14305_v11  ;;  %v20518_v0 = vld [vmem:[#allocation74_spill] sm:$0xff] }
 0x45d   :  { %v5583_v45 = vsel %vm5577_vm2, %v20517_v32, %v4016_v34 }
 0x45e   :  { %v8331_v31 = vrot.slane %v8324_v51, %v14305_v11  ;;  %v8372_v30 = vcombine.low %v20515_v12, %v8371_v48  ;;  %v8355_v13 = vrot.slane %v8348_v43, %v14305_v11  ;;  %v4014_v60 = vpop.permute.xlu0 %4013  ;;  %v20519_v12 = vld [vmem:[#allocation44_spill] sm:$0xff] }
 0x45f   :  { %v5580_v51 = vsel %vm5577_vm2, %v20518_v0, %v4014_v60 }
 0x460   :  { %v8356_v21 = vcombine.low %v20516_v44, %v8355_v13  ;;  %v4020_v29 = vpop.permute.xlu1 %4019  ;;  %v8379_v58 = vrot.slane %v8372_v30, %v14305_v11  ;;  %v9267_v39 = vcombine.low %v8331_v31, %v8347_v25 }
 0x461   :  { %v5589_v30 = vsel %vm5577_vm2, %v20519_v12, %v4020_v29 }
 0x462   :  { %v8363_v57 = vrot.slane %v8356_v21, %v14305_v11  ;;  %v4018_v23 = vpop.permute.xlu0 %4017  ;;  %v9275_v18 = vrot.slane %v9267_v39, %v14305_v11  ;;  %v20520_v21 = vld [vmem:[#allocation131_spill] sm:$0xff] }
 0x464   :  { %v4024_v35 = vpop.permute.xlu1 %4023  ;;  %v9268_v9 = vcombine.low %v8363_v57, %v8379_v58  ;;  %v20521_v57 = vld [vmem:[#allocation87_spill] sm:$0xff] }
 0x465   :  { %v5586_v60 = vsel %vm5577_vm2, %v20521_v57, %v4018_v23 }
 0x466   :  { %v4022_v42 = vpop.permute.xlu0 %4021  ;;  %v9282_v6 = vrot.slane %v9268_v9, %v14305_v11 }
 0x468   :  { %v4028_v5 = vpop.permute.xlu1 %4027  ;;  %v9284_v8 = vcombine.high %v9275_v18, %v9282_v6  ;;  %v9283_v55 = vcombine.low %v9275_v18, %v9282_v6  ;;  %v20522_v18 = vld [vmem:[#allocation133_spill] sm:$0xff] }
 0x46a   :  { %v12789_v38 = vpop.f32.mrb[24].mxu1  ;;  %v4026_v4 = vpop.permute.xlu0 %4025  ;;  %v19103_v53 = vrot.slane %v9284_v8, %v14305_v11  ;;  %v19106_v28 = vrot.slane %v9283_v55, %v14305_v11  ;;  %v20523_v8 = vld [vmem:[#allocation60_spill] sm:$0xff] }
 0x46b   :  { %v12790_v3 = vpop.f32.mrb[25].mxu1 }
 0x46c   :  { %v19108_v36 = vadd.f32 %v12790_v3, %v12789_v38  ;;  %v12792_v49 = vpop.f32.mrb[26].mxu1  ;;  %9673 = vmatprep.mubr.bf16.mxu1 %v19103_v53  ;;  %v4356_v26 = vpop.permute.xlu1 %4355  ;;  %v20524_v38 = vld [vmem:[#allocation26_spill] sm:$0xff]  ;;  %v9299_v37 = vcombine.high %v19106_v28, %v19106_v28 }
 0x46d   :  { %v12793_v52 = vpop.f32.mrb[27].mxu1  ;;  %9674 = vmatmul.mubr.bf16.gmra.mrb[44].mxu1 %v19106_v28  ;;  %v5882_v48 = vsel %vm5878_vm3, %v5583_v45, %v4356_v26  ;;  %v5595_v3 = vsel %vm5577_vm2, %v20524_v38, %v4024_v35  ;;  %v10505_v28 = vld [vmem:[#allocation2 + $0x130] sm:$0xff] }
 0x46e   :  { %v19112_v10 = vadd.f32 %v12793_v52, %v12792_v49  ;;  %v4354_v59 = vpop.permute.xlu0 %4353 }
 0x46f   :  { %v5880_v43 = vsel %vm5878_vm3, %v5580_v51, %v4354_v59  ;;  %v20525_v59 = vld [vmem:[#allocation55_spill] sm:$0xff] }
 0x470   :  { %v4360_v41 = vpop.permute.xlu1 %4359 }
 0x471   :  { %v5886_v44 = vsel %vm5878_vm3, %v5589_v30, %v4360_v41  ;;  %v20529_v30 = vld [vmem:[#allocation32_spill] sm:$0xff] }
 0x472   :  { %v4358_v50 = vpop.permute.xlu0 %4357 }
 0x473   :  { %v5884_v9 = vsel %vm5878_vm3, %v5586_v60, %v4358_v50  ;;  %v20526_v50 = vld [vmem:[#allocation61_spill] sm:$0xff]  ;;  %v20532_v60 = vld [vmem:[#allocation82_spill] sm:$0xff] }
 0x474   :  { %v4364_v15 = vpop.permute.xlu1 %4363  ;;  %v5592_v32 = vsel %vm5577_vm2, %v20526_v50, %v4022_v42  ;;  %v20538_v50 = vld [vmem:[#allocation101_spill] sm:$0xff] }
 0x475   :  { %v5890_v52 = vsel %vm5878_vm3, %v5595_v3, %v4364_v15  ;;  %v20528_v15 = vld [vmem:[#allocation83_spill] sm:$0xff] }
 0x476   :  { %v4362_v2 = vpop.permute.xlu0 %4361  ;;  %v5601_v12 = vsel %vm5577_vm2, %v20528_v15, %v4028_v5 }
 0x477   :  { %v5888_v0 = vsel %vm5878_vm3, %v5592_v32, %v4362_v2 }
 0x478   :  { %v4368_v33 = vpop.permute.xlu1 %4367 }
 0x479   :  { %v5894_v42 = vsel %vm5878_vm3, %v5601_v12, %v4368_v33  ;;  %v20540_v12 = vld [vmem:[#allocation84_spill] sm:$0xff] }
 0x47a   :  { %v4366_v19 = vpop.permute.xlu0 %4365 }
 0x47c   :  { %v4696_v62 = vpop.permute.xlu1 %4695 }
 0x47d   :  { %v6083_v13 = vsel %vm6079_vm4, %v5882_v48, %v4696_v62  ;;  %v20527_v48 = vld [vmem:[#allocation58_spill] sm:$0xff] }
 0x47e   :  { %v4694_v31 = vpop.permute.xlu0 %4693  ;;  %v6644_v6 = vcombine.low %v6083_v13, %v20522_v18 }
 0x47f   :  { %v6081_v25 = vsel %vm6079_vm4, %v5880_v43, %v4694_v31 }
 0x480   :  { %v6620_v58 = vcombine.low %v6081_v25, %v20520_v21  ;;  %v4700_v34 = vpop.permute.xlu1 %4699  ;;  %v6652_v35 = vrot.slane %v6644_v6, %v14305_v11 }
 0x481   :  { %v6087_v39 = vsel %vm6079_vm4, %v5886_v44, %v4700_v34  ;;  %v20530_v44 = vld [vmem:[#allocation79_spill] sm:$0xff] }
 0x482   :  { %v6692_v29 = vcombine.low %v6087_v39, %v20523_v8  ;;  %v4698_v55 = vpop.permute.xlu0 %4697  ;;  %v6628_v49 = vrot.slane %v6620_v58, %v14305_v11  ;;  %v20531_v58 = vld [vmem:[#allocation28_spill] sm:$0xff]  ;;  %v5598_v39 = vsel %vm5577_vm2, %v20532_v60, %v4026_v4  ;;  %v20534_v8 = vld [vmem:[#allocation29_spill] sm:$0xff] }
 0x483   :  { %v6085_v26 = vsel %vm6079_vm4, %v5884_v9, %v4698_v55  ;;  %v20533_v9 = vld [vmem:[#allocation64_spill] sm:$0xff]  ;;  %v5892_v6 = vsel %vm5878_vm3, %v5598_v39, %v4366_v19  ;;  %v20535_v55 = vld [vmem:[#allocation69_spill] sm:$0xff] }
 0x484   :  { %v6700_v23 = vrot.slane %v6692_v29, %v14305_v11  ;;  %v6668_v41 = vcombine.low %v6085_v26, %v20525_v59  ;;  %v4704_v62 = vpop.permute.xlu1 %4703  ;;  %v6636_v13 = vcombine.low %v6628_v49, %v20529_v30  ;;  %v6660_v29 = vcombine.low %v6652_v35, %v20534_v8  ;;  %v20537_v19 = vld [vmem:[#allocation68_spill] sm:$0xff]  ;;  %v20539_v35 = vld [vmem:[#allocation81_spill] sm:$0xff] }
 0x485   :  { %v6091_v45 = vsel %vm6079_vm4, %v5890_v52, %v4704_v62 }
 0x486   :  { %v6676_v51 = vrot.slane %v6668_v41, %v14305_v11  ;;  %v6740_v43 = vcombine.low %v6091_v45, %v20527_v48  ;;  %v4702_v31 = vpop.permute.xlu0 %4701  ;;  %v6708_v21 = vcombine.low %v6700_v23, %v20530_v44  ;;  %v6643_v49 = vrot.slane %v6636_v13, %v14305_v11  ;;  %v20536_v23 = vld [vmem:[#allocation108_spill] sm:$0xff] }
 0x487   :  { %v6089_v25 = vsel %vm6079_vm4, %v5888_v0, %v4702_v31  ;;  %v6667_v45 = vrot.slane %v6660_v29, %v14305_v11 }
 0x488   :  { %v6684_v2 = vcombine.low %v6676_v51, %v20531_v58  ;;  %v6748_v34 = vrot.slane %v6740_v43, %v14305_v11  ;;  %v4708_v57 = vpop.permute.xlu1 %4707  ;;  %v6716_v18 = vcombine.low %v6089_v25, %v20533_v9  ;;  %v6715_v4 = vrot.slane %v6708_v21, %v14305_v11 }
 0x489   :  { %v6095_v5 = vsel %vm6079_vm4, %v5894_v42, %v4708_v57  ;;  %v8451_v31 = vcombine.low %v6643_v49, %v6667_v45  ;;  %v20548_v45 = vld [vmem:[#allocation51_spill] sm:$0xff] }
 0x48a   :  { %v6691_v33 = vrot.slane %v6684_v2, %v14305_v11  ;;  %v6788_v38 = vcombine.low %v6095_v5, %v20535_v55  ;;  %v4706_v3 = vpop.permute.xlu0 %4705  ;;  %v6724_v26 = vrot.slane %v6716_v18, %v14305_v11  ;;  %v6756_v59 = vcombine.low %v6748_v34, %v20536_v23 }
 0x48b   :  { %v6093_v52 = vsel %vm6079_vm4, %v5892_v6, %v4706_v3  ;;  %v8461_v58 = vrot.slane %v8451_v31, %v14305_v11  ;;  %v20554_v31 = vld [vmem:[#allocation71_spill] sm:$0xff] }
 0x48c   :  { %v6796_v41 = vrot.slane %v6788_v38, %v14305_v11  ;;  %v6764_v62 = vcombine.low %v6093_v52, %v20537_v19  ;;  %v6732_v32 = vcombine.low %v6724_v26, %v20538_v50  ;;  %v8452_v0 = vcombine.low %v6691_v33, %v6715_v4  ;;  %v20546_v50 = vld [vmem:[#allocation73_spill] sm:$0xff] }
 0x48d   :  { %v6763_v15 = vrot.slane %v6756_v59, %v14305_v11  ;;  %v20541_v59 = vld [vmem:[#allocation25_spill] sm:$0xff] }
 0x48e   :  { %v6804_v51 = vcombine.low %v6796_v41, %v20539_v35  ;;  %v6772_v48 = vrot.slane %v6764_v62, %v14305_v11  ;;  %v6739_v43 = vrot.slane %v6732_v32, %v14305_v11  ;;  %v8468_v44 = vrot.slane %v8452_v0, %v14305_v11  ;;  %v20542_v41 = vld [vmem:[#allocation72_spill] sm:$0xff]  ;;  %v20545_v62 = vld [vmem:[#allocation19_spill] sm:$0xff]  ;;  %v20549_v0 = vld [vmem:[#allocation42_spill] sm:$0xff] }
 0x48f   :  { %v20543_v19 = vcombine.high %v20541_v59, %v20542_v41  ;;  %v20547_v32 = vcombine.high %v20545_v62, %v20546_v50  ;;  %v20550_v35 = vcombine.high %v20548_v45, %v20549_v0  ;;  %v20576_v62 = vld [vmem:[#allocation120_spill] sm:$0xff]  ;;  %v20579_v45 = vld [vmem:[#allocation126_spill] sm:$0xff] }
 0x490   :  { %v6780_v30 = vcombine.low %v6772_v48, %v20540_v12  ;;  %v8453_v13 = vcombine.low %v6739_v43, %v6763_v15  ;;  %v6811_v25 = vrot.slane %v6804_v51, %v14305_v11  ;;  %v8483_v57 = vcombine.low %v8461_v58, %v8468_v44  ;;  %v20551_v51 = vld [vmem:[#allocation48_spill] sm:$0xff]  ;;  %v20552_v48 = vld [vmem:[#allocation113_spill] sm:$0xff] }
 0x491   :  { %v8484_v60 = vcombine.high %v8461_v58, %v8468_v44  ;;  %v20553_v43 = vcombine.high %v20551_v51, %v20552_v48  ;;  %v20555_v15 = vld [vmem:[#allocation116_spill] sm:$0xff]  ;;  %v20561_v44 = vld [vmem:[#allocation54_spill] sm:$0xff]  ;;  %v20582_v51 = vld [vmem:[#allocation129_spill] sm:$0xff] }
 0x492   :  { %v6787_v42 = vrot.slane %v6780_v30, %v14305_v11  ;;  %v8475_v2 = vrot.slane %v8453_v13, %v14305_v11  ;;  %v8493_v8 = vrot.slane %v8483_v57, %v14305_v11  ;;  %v20556_v12 = vcombine.high %v20554_v31, %v20555_v15  ;;  %v20557_v30 = vld [vmem:[#allocation59_spill] sm:$0xff]  ;;  %v20563_v58 = vld [vmem:[#allocation86_spill] sm:$0xff]  ;;  %v20566_v57 = vld [vmem:[#allocation65_spill] sm:$0xff] }
 0x493   :  { %v8500_v5 = vrot.slane %v8484_v60, %v14305_v11  ;;  %v20558_v13 = vld [vmem:[#allocation15_spill] sm:$0xff]  ;;  %v20567_v60 = vld [vmem:[#allocation117_spill] sm:$0xff] }
 0x494   :  { %v8454_v21 = vcombine.low %v6787_v42, %v6811_v25  ;;  %v20559_v25 = vcombine.high %v20557_v30, %v20558_v13  ;;  %v20560_v42 = vld [vmem:[#allocation50_spill] sm:$0xff]  ;;  %v20585_v31 = vld [vmem:[#allocation57_spill] sm:$0xff] }
 0x495   :  { %v20588_v30 = vld [vmem:[#allocation62_spill] sm:$0xff] }
 0x496   :  { %v8482_v34 = vrot.slane %v8454_v21, %v14305_v11  ;;  %v20562_v21 = vcombine.high %v20560_v42, %v20561_v44  ;;  %v20591_v42 = vld [vmem:[#allocation76_spill] sm:$0xff] }
 0x498   :  { %v8485_v39 = vcombine.low %v8475_v2, %v8482_v34  ;;  %v8486_v9 = vcombine.high %v8475_v2, %v8482_v34  ;;  %v20564_v2 = vld [vmem:[#allocation23_spill] sm:$0xff] }
 0x499   :  { %v20565_v34 = vcombine.high %v20563_v58, %v20564_v2  ;;  %v20594_v58 = vld [vmem:[#allocation104_spill] sm:$0xff] }
 0x49a   :  { %v12795_v18 = vpop.f32.mrb[28].mxu1  ;;  %v8514_v6 = vrot.slane %v8486_v9, %v14305_v11  ;;  %v8507_v29 = vrot.slane %v8485_v39, %v14305_v11  ;;  %v20544_v11 = vmov 0.0   ;;  %v20568_v39 = vcombine.high %v20566_v57, %v20567_v60  ;;  %v10503_v9 = vld [vmem:[#allocation2 + $0x120] sm:$0xff] }
 0x49b   :  { %v12796_v33 = vpop.f32.mrb[29].mxu1 }
 0x49c   :  { %v19186_v55 = vadd.f32 %v12796_v33, %v12795_v18  ;;  %v12798_v38 = vpop.f32.mrb[30].mxu1  ;;  %v8517_v3 = vcombine.low %v8500_v5, %v8514_v6  ;;  %v8518_v49 = vcombine.high %v8500_v5, %v8514_v6  ;;  %v8515_v26 = vcombine.low %v8493_v8, %v8507_v29  ;;  %v10504_v18 = vld [vmem:[#allocation2 + $0x128] sm:$0xff]  ;;  %v20569_v6 = vld [vmem:[#allocation30_spill] sm:$0xff] }
 0x49d   :  { %v12799_v52 = vpop.f32.mrb[31].mxu1  ;;  %v8516_v4 = vcombine.high %v8493_v8, %v8507_v29  ;;  %v13562_v5 = vpack.c.bf16 %v10504_v18, %v10503_v9  ;;  %v20570_v8 = vld [vmem:[#allocation31_spill] sm:$0xff]  ;;  %v20572_v33 = vld [vmem:[#allocation102_spill] sm:$0xff] }
 0x49e   :  { %v19188_v23 = vadd.f32 %v12799_v52, %v12798_v38  ;;  %9577 = vmatprep.mubr.bf16.mxu0 %v8517_v3  ;;  %9713 = vmatprep.mubr.bf16.mxu1 %v8518_v49  ;;  %v20571_v29 = vcombine.high %v20569_v6, %v20570_v8  ;;  %v20573_v38 = vld [vmem:[#allocation111_spill] sm:$0xff] }
 0x49f   :  { %9578 = vmatmul.mubr.bf16.vlgmr.msra.gmra.mrb[88].mxu0 %v8515_v26  ;;  %9714 = vmatmul.mubr.bf16.vlgmr.msra.gmra.mrb[48].mxu1 %v8516_v4  ;;  %v20574_v3 = vcombine.high %v20572_v33, %v20573_v38 }
 0x4a0   :  { %9721 = vmatprep.mubr.bf16.mxu1 %v20543_v19  ;;  %13202 = vmatprep.mubr.msk.f32.mxu0 %vm13797_vm0, %v20544_v11  ;;  %v20575_v19 = vld [vmem:[#allocation121_spill] sm:$0xff] }
 0x4a1   :  { %13563 = vmatpush3.bf16.msra.mxu1 %v13562_v5  ;;  %v20577_v50 = vcombine.high %v20575_v19, %v20576_v62 }
 0x4a2   :  { %13564 = vmatprep.subr.bf16.mxu1 %v20507_v63 }
 0x4a7   :  { %9722 = vmatmul.mubr.bf16.gmra.mrb[52].mxu1 %v20547_v32  ;;  %v20578_v32 = vld [vmem:[#allocation128_spill] sm:$0xff] }
 0x4a8   :  { %9729 = vmatprep.mubr.bf16.mxu1 %v20550_v35  ;;  %v20580_v0 = vcombine.high %v20578_v32, %v20579_v45  ;;  %v20581_v35 = vld [vmem:[#allocation132_spill] sm:$0xff] }
 0x4a9   :  { %v20583_v48 = vcombine.high %v20581_v35, %v20582_v51 }
 0x4af   :  { %9730 = vmatmul.mubr.bf16.gmra.mrb[56].mxu1 %v20553_v43  ;;  %v20584_v43 = vld [vmem:[#allocation67_spill] sm:$0xff] }
 0x4b0   :  { %9737 = vmatprep.mubr.bf16.mxu1 %v20556_v12  ;;  %v20586_v15 = vcombine.high %v20584_v43, %v20585_v31  ;;  %v20587_v12 = vld [vmem:[#allocation40_spill] sm:$0xff] }
 0x4b1   :  { %v20589_v13 = vcombine.high %v20587_v12, %v20588_v30 }
 0x4b7   :  { %9738 = vmatmul.mubr.bf16.gmra.mrb[60].mxu1 %v20559_v25  ;;  %v20590_v25 = vld [vmem:[#allocation37_spill] sm:$0xff] }
 0x4b8   :  { %9745 = vmatprep.mubr.bf16.mxu1 %v20562_v21  ;;  %v20592_v44 = vcombine.high %v20590_v25, %v20591_v42  ;;  %v20593_v21 = vld [vmem:[#allocation56_spill] sm:$0xff] }
 0x4b9   :  { %v20595_v2 = vcombine.high %v20593_v21, %v20594_v58  ;;  %v20596_v58 = vld [vmem:[#allocation88_spill] sm:$0xff] }
 0x4bf   :  { %9746 = vmatmul.mubr.bf16.gmra.mrb[64].mxu1 %v20565_v34  ;;  %v9300_v34 = vcombine.high %v19103_v53, %v19103_v53 }
 0x4c0   :  { %9753 = vmatprep.mubr.bf16.mxu1 %v20568_v39  ;;  %v10506_v39 = vld [vmem:[#allocation2 + $0x138] sm:$0xff] }
 0x4c1   :  { %v13565_v5 = vpack.c.bf16 %v10506_v39, %v10505_v28 }
 0x4c3   :  { %13566 = vmatpush3.bf16.msra.mxu1 %v13565_v5 }
 0x4c4   :  { %13573 = vmatprep.subr.bf16.mxu1 %v20507_v63 }
 0x4c7   :  { %9754 = vmatmul.mubr.bf16.gmra.mrb[68].mxu1 %v20571_v29 }
 0x4c8   :  { %9761 = vmatprep.mubr.bf16.mxu1 %v20574_v3 }
 0x4ca   :  { %v12801_v49 = vpop.f32.mrb[32].mxu1 }
 0x4cb   :  { %v12802_v26 = vpop.f32.mrb[33].mxu1 }
 0x4cc   :  { %v19226_v52 = vadd.f32 %v12802_v26, %v12801_v49  ;;  %v12804_v4 = vpop.f32.mrb[34].mxu1 }
 0x4cd   :  { %v12805_v59 = vpop.f32.mrb[35].mxu1 }
 0x4ce   :  { %v19228_v41 = vadd.f32 %v12805_v59, %v12804_v4 }
 0x4cf   :  { %9762 = vmatmul.mubr.bf16.gmra.mrb[72].mxu1 %v20577_v50 }
 0x4d0   :  { %9769 = vmatprep.mubr.bf16.mxu1 %v20580_v0  ;;  %v19285_v0 = vld [vmem:[%s19779_s4] ss:$0 sm:$0xff] }
 0x4d7   :  { %9770 = vmatmul.mubr.bf16.gmra.mrb[76].mxu1 %v20583_v48 }
 0x4d8   :  { %9777 = vmatprep.mubr.bf16.mxu1 %v20586_v15 }
 0x4df   :  { %9778 = vmatmul.mubr.bf16.gmra.mrb[80].mxu1 %v20589_v13 }
 0x4e0   :  { %9785 = vmatprep.mubr.bf16.mxu1 %v20592_v44 }
 0x4e7   :  { %9786 = vmatmul.mubr.bf16.gmra.mrb[84].mxu1 %v20595_v2  ;;  %v9588_v2 = vadd.f32 %v20596_v58, %v19285_v0 }
 0x4e8   :  { %9793 = vmatprep.mubr.bf16.mxu1 %v9198_v40 }
 0x4ef   :  { %9794 = vmatmul.mubr.bf16.gmra.mrb[88].mxu1 %v9196_v46  ;;  %v10467_v46 = vld [vmem:[#allocation2] sm:$0xff] }
 0x4f0   :  { %9801 = vmatprep.mubr.bf16.mxu1 %v9266_v14  ;;  %v13508_v16 = vpack.c.bf16 %v10468_v61, %v10467_v46  ;;  %v13511_v14 = vpack.c.bf16 %v10470_v47, %v10469_v24  ;;  %v20598_v61 = vld [vmem:[#allocation8_spill] sm:$0xff] }
 0x4f2   :  { %13509 = vmatpush3.bf16.msra.mxu0 %v13508_v16 }
 0x4f3   :  { %13510 = vmatprep.subr.bf16.mxu0 %v20507_v63 }
 0x4f6   :  { %13512 = vmatpush3.bf16.msra.mxu0 %v13511_v14 }
 0x4f7   :  { %9802 = vmatmul.mubr.bf16.gmra.mrb[92].mxu1 %v9264_v1  ;;  %13513 = vmatprep.subr.bf16.mxu0 %v20507_v63 }
 0x4f8   :  { %9809 = vmatprep.mubr.bf16.mxu1 %v9300_v34 }
 0x4fa   :  { %v12807_v57 = vpop.f32.mrb[36].mxu1 }
 0x4fb   :  { %v12808_v60 = vpop.f32.mrb[37].mxu1 }
 0x4fc   :  { %v19265_v54 = vadd.f32 %v12808_v60, %v12807_v57  ;;  %v12810_v27 = vpop.f32.mrb[38].mxu1 }
 0x4fd   :  { %v12811_v40 = vpop.f32.mrb[39].mxu1 }
 0x4fe   :  { %v19269_v17 = vadd.f32 %v12811_v40, %v12810_v27  ;;  %v20597_v27 = vld [vmem:[#allocation53_spill] sm:$0xff] }
 0x4ff   :  { %9810 = vmatmul.mubr.bf16.gmra.mrb[96].mxu1 %v9299_v37  ;;  %v9591_v40 = vadd.f32 %v20597_v27, %v19285_v0 }
 0x500   :  { %13301 = vmatprep.mubr.msk.f32.mxu1 %vm13797_vm0, %v20544_v11 }
 0x52a   :  { %v12813_v1 = vpop.f32.mrb[40].mxu1 }
 0x52b   :  { %v12814_v53 = vpop.f32.mrb[41].mxu1 }
 0x52c   :  { %v19275_v9 = vadd.f32 %v12814_v53, %v12813_v1  ;;  %v12816_v18 = vpop.f32.mrb[42].mxu1 }
 0x52d   :  { %v12817_v6 = vpop.f32.mrb[43].mxu1 }
 0x52e   :  { %v19277_v8 = vadd.f32 %v12817_v6, %v12816_v18  ;;  %v20599_v6 = vld [vmem:[#allocation52_spill] sm:$0xff] }
 0x540   :  { %v12819_v29 = vpop.f32.mrb[44].mxu1 }
 0x541   :  { %v12820_v33 = vpop.f32.mrb[45].mxu1 }
 0x542   :  { %v19280_v38 = vadd.f32 %v12820_v33, %v12819_v29  ;;  %v12822_v3 = vpop.f32.mrb[46].mxu1  ;;  %v9596_v29 = vadd.f32 %v20599_v6, %v19285_v0  ;;  %v20600_v33 = vld [vmem:[#allocation14_spill] sm:$0xff] }
 0x543   :  { %v12823_v49 = vpop.f32.mrb[47].mxu1  ;;  %v9599_v3 = vadd.f32 %v20600_v33, %v19285_v0 }
 0x572   :  { %v12747_v26 = vpop.f32.mrb[88].mxu0  ;;  %v12841_v4 = vpop.f32.mrb[48].mxu1 }
 0x573   :  { %v12748_v59 = vpop.f32.mrb[89].mxu0  ;;  %v12842_v19 = vpop.f32.mrb[49].mxu1 }
 0x574   :  { %v12749_v62 = vadd.f32 %v12748_v59, %v12747_v26  ;;  %v12843_v50 = vadd.f32 %v12842_v19, %v12841_v4  ;;  %v12750_v32 = vpop.f32.mrb[90].mxu0  ;;  %v12844_v45 = vpop.f32.mrb[50].mxu1  ;;  %v10471_v59 = vld [vmem:[#allocation2 + $0x20] sm:$0xff]  ;;  %v10472_v19 = vld [vmem:[#allocation2 + $0x28] sm:$0xff] }
 0x575   :  { %v12751_v35 = vpop.f32.mrb[91].mxu0  ;;  %v12845_v51 = vpop.f32.mrb[51].mxu1 }
 0x576   :  { %v9580_v48 = vadd.f32 %v12749_v62, %v19285_v0  ;;  %v12752_v43 = vadd.f32 %v12751_v35, %v12750_v32  ;;  %v12846_v31 = vadd.f32 %v12845_v51, %v12844_v45 }
 0x578   :  { %v9716_v15 = vadd.f32 %v12843_v50, %v9580_v48  ;;  %v9583_v12 = vadd.f32 %v12752_v43, %v19285_v0 }
 0x57a   :  { %v9817_v30 = vmax.f32 %v9716_v15, 0.0  ;;  %v9719_v13 = vadd.f32 %v12846_v31, %v9583_v12  ;;  %v12847_v25 = vpop.f32.mrb[52].mxu1 }
 0x57b   :  { %v12848_v42 = vpop.f32.mrb[53].mxu1 }
 0x57c   :  { %v12849_v44 = vadd.f32 %v12848_v42, %v12847_v25  ;;  %v12850_v21 = vpop.f32.mrb[54].mxu1  ;;  %v9867_v34 = vcombine.high %v9817_v30, %v9817_v30  ;;  %v9818_v60 = vmax.f32 %v9719_v13, 0.0  ;;  %v9874_v24 = vrot.slane %v9817_v30, %v20598_v61 }
 0x57d   :  { %v12851_v57 = vpop.f32.mrb[55].mxu1  ;;  %v13514_v13 = vpack.c.bf16 %v10472_v19, %v10471_v59 }
 0x57e   :  { %v9724_v37 = vadd.f32 %v12849_v44, %v9588_v2  ;;  %v12852_v46 = vadd.f32 %v12851_v57, %v12850_v21  ;;  %v9881_v16 = vrot.slane %v9867_v34, %v20598_v61  ;;  %v9884_v1 = vcombine.high %v9818_v60, %v9818_v60 }
 0x57f   :  { %v9891_v53 = vrot.slane %v9818_v60, %v20598_v61  ;;  %v9882_v49 = vcombine.high %v9874_v24, %v9874_v24 }
 0x580   :  { %v9819_v47 = vmax.f32 %v9724_v37, 0.0  ;;  %v9727_v14 = vadd.f32 %v12852_v46, %v9591_v40  ;;  %v9883_v62 = vcombine.high %v9881_v16, %v9881_v16  ;;  %v9898_v51 = vrot.slane %v9884_v1, %v20598_v61 }
 0x581   :  { %v9899_v48 = vcombine.high %v9891_v53, %v9891_v53  ;;  %v10392_v25 = vmax.f32 %v9874_v24, %v9882_v49 }
 0x582   :  { %v12853_v28 = vpop.f32.mrb[56].mxu1  ;;  %v9901_v39 = vcombine.high %v9819_v47, %v9819_v47  ;;  %v9820_v18 = vmax.f32 %v9727_v14, 0.0  ;;  %v9908_v42 = vrot.slane %v9819_v47, %v20598_v61  ;;  %v10393_v58 = vmax.f32 %v9881_v16, %v9883_v62  ;;  %v10473_v47 = vld [vmem:[#allocation2 + $0x30] sm:$0xff] }
 0x583   :  { %v12854_v5 = vpop.f32.mrb[57].mxu1  ;;  %v9900_v60 = vcombine.high %v9898_v51, %v9898_v51  ;;  %v19305_v27 = vmax.f32 %v9891_v53, %v9899_v48  ;;  %v20601_v53 = vld [vmem:[#allocation20_spill] sm:$0xff] }
 0x584   :  { %v12855_v26 = vadd.f32 %v12854_v5, %v12853_v28  ;;  %v12856_v4 = vpop.f32.mrb[58].mxu1  ;;  %v9915_v50 = vrot.slane %v9901_v39, %v20598_v61  ;;  %v9918_v32 = vcombine.high %v9820_v18, %v9820_v18  ;;  %v9925_v45 = vrot.slane %v9820_v18, %v20598_v61  ;;  %v10474_v18 = vld [vmem:[#allocation2 + $0x38] sm:$0xff] }
 0x585   :  { %v12857_v35 = vpop.f32.mrb[59].mxu1  ;;  %v9916_v5 = vcombine.high %v9908_v42, %v9908_v42  ;;  %v9604_v33 = vadd.f32 %v20601_v53, %v19285_v0  ;;  %v19318_v19 = vmax.f32 %v9898_v51, %v9900_v60  ;;  %v10477_v60 = vld [vmem:[#allocation2 + $0x50] sm:$0xff] }
 0x586   :  { %v9732_v43 = vadd.f32 %v12855_v26, %v9596_v29  ;;  %v12858_v31 = vadd.f32 %v12857_v35, %v12856_v4  ;;  %v9917_v15 = vcombine.high %v9915_v50, %v9915_v50  ;;  %v9932_v12 = vrot.slane %v9918_v32, %v20598_v61 }
 0x587   :  { %v9933_v30 = vcombine.high %v9925_v45, %v9925_v45  ;;  %v13517_v32 = vpack.c.bf16 %v10474_v18, %v10473_v47  ;;  %v20604_v47 = vld [vmem:[#allocation75_spill] sm:$0xff] }
 0x588   :  { %v9821_v44 = vmax.f32 %v9732_v43, 0.0  ;;  %v9735_v21 = vadd.f32 %v12858_v31, %v9599_v3  ;;  %v10397_v2 = vmax.f32 %v9915_v50, %v9917_v15  ;;  %v9934_v34 = vcombine.high %v9932_v12, %v9932_v12  ;;  %v20602_v3 = vld [vmem:[#allocation34_spill] sm:$0xff]  ;;  %v10475_v43 = vld [vmem:[#allocation2 + $0x40] sm:$0xff]  ;;  %v10476_v31 = vld [vmem:[#allocation2 + $0x48] sm:$0xff] }
 0x589   :  { %v10398_v57 = vmax.f32 %v9925_v45, %v9933_v30  ;;  %v9607_v49 = vadd.f32 %v20602_v3, %v19285_v0  ;;  %v19325_v15 = vmax.f32 %v9908_v42, %v9916_v5  ;;  %v9615_v18 = vadd.f32 %v20604_v47, %v19285_v0  ;;  %v10480_v3 = vld [vmem:[#allocation2 + $0x68] sm:$0xff] }
 0x58a   :  { %v9935_v40 = vcombine.high %v9821_v44, %v9821_v44  ;;  %v9942_v37 = vrot.slane %v9821_v44, %v20598_v61  ;;  %v12859_v46 = vpop.f32.mrb[60].mxu1  ;;  %v10442_v14 = vmax.f32 %v10392_v25, %v10397_v2  ;;  %v19308_v1 = vmax.f32 %v9932_v12, %v9934_v34 }
 0x58b   :  { %v10443_v28 = vmax.f32 %v10393_v58, %v10398_v57  ;;  %v9822_v24 = vmax.f32 %v9735_v21, 0.0  ;;  %v12860_v39 = vpop.f32.mrb[61].mxu1  ;;  %v13520_v21 = vpack.c.bf16 %v10476_v31, %v10475_v43 }
 0x58c   :  { %v9949_v16 = vrot.slane %v9935_v40, %v20598_v61  ;;  %v9950_v6 = vcombine.high %v9942_v37, %v9942_v37  ;;  %v12862_v29 = vpop.f32.mrb[62].mxu1  ;;  %v10444_v26 = vmax.f32 %v19305_v27, %v19308_v1  ;;  %v12861_v4 = vadd.f32 %v12860_v39, %v12859_v46  ;;  %13203 = vmatmul.mubr.msk.f32.vlgmr.msra.gmra.mrb[86].mxu0 %vm5577_vm2, %v10442_v14  ;;  %v10478_v40 = vld [vmem:[#allocation2 + $0x58] sm:$0xff] }
 0x58d   :  { %v12863_v59 = vpop.f32.mrb[63].mxu1  ;;  %13515 = vmatpush3.bf16.msra.mxu0 %v13514_v13  ;;  %v9952_v45 = vcombine.high %v9822_v24, %v9822_v24  ;;  %13213 = vmatprep.mubr.msk.f32.mxu0 %vm13797_vm0, %v20544_v11  ;;  %v9959_v58 = vrot.slane %v9822_v24, %v20598_v61  ;;  %v13523_v53 = vpack.c.bf16 %v10478_v40, %v10477_v60 }
 0x58e   :  { %v9951_v62 = vcombine.high %v9949_v16, %v9949_v16  ;;  %v19320_v50 = vmax.f32 %v9942_v37, %v9950_v6  ;;  %v9740_v35 = vadd.f32 %v12861_v4, %v9604_v33  ;;  %v12864_v48 = vadd.f32 %v12863_v59, %v12862_v29  ;;  %13516 = vmatprep.subr.bf16.mxu0 %v20507_v63  ;;  %v20603_v37 = vld [vmem:[#allocation63_spill] sm:$0xff] }
 0x58f   :  { %v9966_v2 = vrot.slane %v9952_v45, %v20598_v61  ;;  %v9612_v46 = vadd.f32 %v20603_v37, %v19285_v0  ;;  %v10479_v33 = vld [vmem:[#allocation2 + $0x60] sm:$0xff]  ;;  %v9620_v45 = vadd.f32 %v18866_v7, %v19285_v0 }
 0x590   :  { %v19327_v12 = vmax.f32 %v9949_v16, %v9951_v62  ;;  %v10445_v51 = vmax.f32 %v19318_v19, %v19320_v50  ;;  %v9823_v30 = vmax.f32 %v9740_v35, 0.0  ;;  %v9743_v13 = vadd.f32 %v12864_v48, %v9607_v49  ;;  %v10489_v50 = vld [vmem:[#allocation2 + $0xb0] sm:$0xff] }
 0x591   :  { %13518 = vmatpush3.bf16.msra.mxu0 %v13517_v32  ;;  %v9967_v49 = vcombine.high %v9959_v58, %v9959_v58  ;;  %v9968_v4 = vcombine.high %v9966_v2, %v9966_v2  ;;  %v10481_v32 = vld [vmem:[#allocation2 + $0x70] sm:$0xff]  ;;  %v9623_v35 = vadd.f32 %v18881_v20, %v19285_v0 }
 0x592   :  { %v10446_v25 = vmax.f32 %v19325_v15, %v19327_v12  ;;  %v12865_v44 = vpop.f32.mrb[64].mxu1  ;;  %v9969_v34 = vcombine.high %v9823_v30, %v9823_v30  ;;  %v9824_v42 = vmax.f32 %v9743_v13, 0.0  ;;  %13519 = vmatprep.subr.bf16.mxu0 %v20507_v63  ;;  %v9976_v5 = vrot.slane %v9823_v30, %v20598_v61 }
 0x593   :  { %v12866_v57 = vpop.f32.mrb[65].mxu1  ;;  %v19353_v37 = vmax.f32 %v9959_v58, %v9967_v49  ;;  %v19355_v7 = vmax.f32 %v9966_v2, %v9968_v4  ;;  %v10484_v4 = vld [vmem:[#allocation2 + $0x88] sm:$0xff] }
 0x594   :  { %v12867_v14 = vadd.f32 %v12866_v57, %v12865_v44  ;;  %v12868_v39 = vpop.f32.mrb[66].mxu1  ;;  %v9986_v24 = vcombine.high %v9824_v42, %v9824_v42  ;;  %13214 = vmatmul.mubr.msk.f32.vlgmr.msra.gmra.mrb[92].mxu0 %vm5577_vm2, %v10443_v28  ;;  %v9983_v59 = vrot.slane %v9969_v34, %v20598_v61  ;;  %v10482_v28 = vld [vmem:[#allocation2 + $0x78] sm:$0xff]  ;;  %v9984_v31 = vcombine.high %v9976_v5, %v9976_v5 }
 0x595   :  { %v12869_v16 = vpop.f32.mrb[67].mxu1  ;;  %13521 = vmatpush3.bf16.msra.mxu0 %v13520_v21  ;;  %13224 = vmatprep.mubr.msk.f32.mxu0 %vm13797_vm0, %v20544_v11  ;;  %v9993_v30 = vrot.slane %v9824_v42, %v20598_v61  ;;  %v13526_v44 = vpack.c.bf16 %v10480_v3, %v10479_v33  ;;  %v13529_v40 = vpack.c.bf16 %v10482_v28, %v10481_v32 }
 0x596   :  { %v9748_v6 = vadd.f32 %v12867_v14, %v9612_v46  ;;  %v12870_v29 = vadd.f32 %v12869_v16, %v12868_v39  ;;  %v10000_v62 = vrot.slane %v9986_v24, %v20598_v61  ;;  %13522 = vmatprep.subr.bf16.mxu0 %v20507_v63  ;;  %v9985_v46 = vcombine.high %v9983_v59, %v9983_v59 }
 0x597   :  { %v19362_v16 = vmax.f32 %v9976_v5, %v9984_v31  ;;  %v10483_v5 = vld [vmem:[#allocation2 + $0x80] sm:$0xff] }
 0x598   :  { %v9825_v48 = vmax.f32 %v9748_v6, 0.0  ;;  %v9751_v43 = vadd.f32 %v12870_v29, %v9615_v18  ;;  %v10002_v13 = vcombine.high %v10000_v62, %v10000_v62  ;;  %v10001_v6 = vcombine.high %v9993_v30, %v9993_v30 }
 0x599   :  { %13524 = vmatpush3.bf16.msra.mxu0 %v13523_v53 }
 0x59a   :  { %v10003_v21 = vcombine.high %v9825_v48, %v9825_v48  ;;  %v10010_v34 = vrot.slane %v9825_v48, %v20598_v61  ;;  %v9826_v57 = vmax.f32 %v9751_v43, 0.0  ;;  %v12871_v60 = vpop.f32.mrb[68].mxu1  ;;  %v19357_v20 = vmax.f32 %v10000_v62, %v10002_v13  ;;  %13525 = vmatprep.subr.bf16.mxu0 %v20507_v63 }
 0x59b   :  { %v12872_v14 = vpop.f32.mrb[69].mxu1  ;;  %v19373_v62 = vmax.f32 %v9983_v59, %v9985_v46  ;;  %v13532_v13 = vpack.c.bf16 %v10484_v4, %v10483_v5  ;;  %v10511_v59 = vld [vmem:[#allocation2 + $0x160] sm:$0xff]  ;;  %v9628_v46 = vadd.f32 %v19002_v56, %v19285_v0  ;;  %v10488_v4 = vld [vmem:[#allocation2 + $0xa8] sm:$0xff] }
 0x59c   :  { %v10017_v42 = vrot.slane %v10003_v21, %v20598_v61  ;;  %v10018_v39 = vcombine.high %v10010_v34, %v10010_v34  ;;  %v10020_v47 = vcombine.high %v9826_v57, %v9826_v57  ;;  %v10027_v18 = vrot.slane %v9826_v57, %v20598_v61  ;;  %v12874_v24 = vpop.f32.mrb[70].mxu1  ;;  %13225 = vmatmul.mubr.msk.f32.vlgmr.msra.gmra.mrb[94].mxu0 %vm5577_vm2, %v10444_v26 }
 0x59d   :  { %v10447_v58 = vmax.f32 %v19353_v37, %v19357_v20  ;;  %v12873_v2 = vadd.f32 %v12872_v14, %v12871_v60  ;;  %v12875_v29 = vpop.f32.mrb[71].mxu1  ;;  %13527 = vmatpush3.bf16.msra.mxu0 %v13526_v44  ;;  %13235 = vmatprep.mubr.msk.f32.mxu0 %vm13797_vm0, %v20544_v11  ;;  %v10512_v44 = vld [vmem:[#allocation2 + $0x168] sm:$0xff]  ;;  %v10527_v37 = vld [vmem:[#allocation2 + $0x1e0] sm:$0xff] }
 0x59e   :  { %v10019_v53 = vcombine.high %v10017_v42, %v10017_v42  ;;  %v19370_v33 = vmax.f32 %v10010_v34, %v10018_v39  ;;  %v10034_v3 = vrot.slane %v10020_v47, %v20598_v61  ;;  %v10035_v49 = vcombine.high %v10027_v18, %v10027_v18  ;;  %13528 = vmatprep.subr.bf16.mxu0 %v20507_v63  ;;  %v10528_v20 = vld [vmem:[#allocation2 + $0x1e8] sm:$0xff] }
 0x59f   :  { %v9756_v32 = vadd.f32 %v12873_v2, %v9620_v45  ;;  %v12876_v28 = vadd.f32 %v12875_v29, %v12874_v24  ;;  %v10406_v45 = vmax.f32 %v9993_v30, %v10001_v6  ;;  %v13574_v24 = vpack.c.bf16 %v10512_v44, %v10511_v59  ;;  %v10514_v29 = vld [vmem:[#allocation2 + $0x178] sm:$0xff] }
 0x5a0   :  { %v19378_v27 = vmax.f32 %v10017_v42, %v10019_v53  ;;  %v10448_v1 = vmax.f32 %v19355_v7, %v19370_v33  ;;  %v10036_v26 = vcombine.high %v10034_v3, %v10034_v3  ;;  %v19382_v48 = vmax.f32 %v10027_v18, %v10035_v49  ;;  %v10486_v42 = vld [vmem:[#allocation2 + $0x98] sm:$0xff] }
 0x5a1   :  { %v9827_v43 = vmax.f32 %v9756_v32, 0.0  ;;  %v9759_v31 = vadd.f32 %v12876_v28, %v9623_v35  ;;  %13530 = vmatpush3.bf16.msra.mxu0 %v13529_v40  ;;  %v10485_v35 = vld [vmem:[#allocation2 + $0x90] sm:$0xff]  ;;  %v9631_v6 = vadd.f32 %v19012_v22, %v19285_v0  ;;  %v10487_v22 = vld [vmem:[#allocation2 + $0xa0] sm:$0xff] }
 0x5a2   :  { %v10449_v21 = vmax.f32 %v19362_v16, %v19378_v27  ;;  %v10411_v34 = vmax.f32 %v10034_v3, %v10036_v26  ;;  %v10450_v57 = vmax.f32 %v19373_v62, %v19382_v48  ;;  %v12877_v60 = vpop.f32.mrb[72].mxu1  ;;  %13531 = vmatprep.subr.bf16.mxu0 %v20507_v63  ;;  %v10513_v40 = vld [vmem:[#allocation2 + $0x170] sm:$0xff]  ;;  %v13535_v5 = vpack.c.bf16 %v10486_v42, %v10485_v35 }
 0x5a3   :  { %v12878_v14 = vpop.f32.mrb[73].mxu1  ;;  %v10037_v47 = vcombine.high %v9827_v43, %v9827_v43  ;;  %v10044_v2 = vrot.slane %v9827_v43, %v20598_v61  ;;  %v9828_v53 = vmax.f32 %v9759_v31, 0.0  ;;  %v13577_v26 = vpack.c.bf16 %v10514_v29, %v10513_v40 }
 0x5a4   :  { %v10451_v39 = vmax.f32 %v10406_v45, %v10411_v34  ;;  %v12879_v30 = vadd.f32 %v12878_v14, %v12877_v60  ;;  %v12880_v18 = vpop.f32.mrb[74].mxu1  ;;  %13236 = vmatmul.mubr.msk.f32.vlgmr.msra.gmra.mrb[96].mxu0 %vm5577_vm2, %v10445_v51  ;;  %v10490_v51 = vld [vmem:[#allocation2 + $0xb8] sm:$0xff]  ;;  %v13538_v45 = vpack.c.bf16 %v10488_v4, %v10487_v22  ;;  %v19407_v34 = vld [vmem:[#allocation2 + $0xc0] sm:$0xff]  ;;  %v19409_v60 = vld [vmem:[#allocation2 + $0xc8] sm:$0xff]  ;;  %v9639_v14 = vadd.f32 %v19112_v10, %v19285_v0 }
 0x5a5   :  { %v12881_v56 = vpop.f32.mrb[75].mxu1  ;;  %13533 = vmatpush3.bf16.msra.mxu0 %v13532_v13  ;;  %v10051_v32 = vrot.slane %v10037_v47, %v20598_v61  ;;  %13246 = vmatprep.mubr.msk.f32.mxu0 %vm13797_vm0, %v20544_v11  ;;  %v10052_v43 = vcombine.high %v10044_v2, %v10044_v2  ;;  %v10061_v31 = vrot.slane %v9828_v53, %v20598_v61 }
 0x5a6   :  { %v9764_v3 = vadd.f32 %v12879_v30, %v9628_v46  ;;  %v12882_v49 = vadd.f32 %v12881_v56, %v12880_v18  ;;  %13302 = vmatmul.mubr.msk.f32.vlgmr.msra.gmra.mrb[100].mxu1 %vm5577_vm2, %v10451_v39  ;;  %13534 = vmatprep.subr.bf16.mxu0 %v20507_v63  ;;  %v9636_v46 = vadd.f32 %v19108_v36, %v19285_v0 }
 0x5a7   :  { %13575 = vmatpush3.bf16.msra.mxu1 %v13574_v24  ;;  %13323 = vmatprep.mubr.msk.f32.mxu1 %vm13797_vm0, %v20544_v11  ;;  %v10054_v35 = vcombine.high %v9828_v53, %v9828_v53  ;;  %v13541_v39 = vpack.c.bf16 %v10490_v51, %v10489_v50  ;;  %v10053_v47 = vcombine.high %v10051_v32, %v10051_v32 }
 0x5a8   :  { %v9829_v28 = vmax.f32 %v9764_v3, 0.0  ;;  %v9767_v19 = vadd.f32 %v12882_v49, %v9631_v6  ;;  %13576 = vmatprep.subr.bf16.mxu1 %v20507_v63  ;;  %v19418_v56 = vmax.f32 %v10044_v2, %v10052_v43  ;;  %v13544_v10 = vpack.c.bf16 %v19409_v60, %v19407_v34  ;;  %v10519_v2 = vld [vmem:[#allocation2 + $0x1a0] sm:$0xff] }
 0x5a9   :  { %13536 = vmatpush3.bf16.msra.mxu0 %v13535_v5  ;;  %v10069_v29 = vcombine.high %v10061_v31, %v10061_v31  ;;  %v10520_v5 = vld [vmem:[#allocation2 + $0x1a8] sm:$0xff]  ;;  %v10068_v22 = vrot.slane %v10054_v35, %v20598_v61  ;;  %v10413_v12 = vmax.f32 %v10051_v32, %v10053_v47  ;;  %v10493_v32 = vld [vmem:[#allocation2 + $0xd0] sm:$0xff] }
 0x5aa   :  { %v10071_v13 = vcombine.high %v9829_v28, %v9829_v28  ;;  %v9830_v59 = vmax.f32 %v9767_v19, 0.0  ;;  %v12883_v44 = vpop.f32.mrb[76].mxu1  ;;  %13537 = vmatprep.subr.bf16.mxu0 %v20507_v63  ;;  %v10078_v51 = vrot.slane %v9829_v28, %v20598_v61 }
 0x5ab   :  { %v12884_v42 = vpop.f32.mrb[77].mxu1  ;;  %13578 = vmatpush3.bf16.msra.mxu1 %v13577_v26  ;;  %v10070_v35 = vcombine.high %v10068_v22, %v10068_v22 }
 0x5ac   :  { %v10085_v30 = vrot.slane %v10071_v13, %v20598_v61  ;;  %v10088_v18 = vcombine.high %v9830_v59, %v9830_v59  ;;  %v10095_v24 = vrot.slane %v9830_v59, %v20598_v61  ;;  %v12886_v6 = vpop.f32.mrb[78].mxu1  ;;  %v12885_v40 = vadd.f32 %v12884_v42, %v12883_v44  ;;  %13247 = vmatmul.mubr.msk.f32.vlgmr.msra.gmra.mrb[98].mxu0 %vm5577_vm2, %v10446_v25 }
 0x5ad   :  { %v12887_v36 = vpop.f32.mrb[79].mxu1  ;;  %13585 = vmatprep.subr.bf16.mxu1 %v20507_v63  ;;  %13539 = vmatpush3.bf16.msra.mxu0 %v13538_v45  ;;  %v13586_v13 = vpack.c.bf16 %v10520_v5, %v10519_v2  ;;  %v19435_v59 = vmax.f32 %v10061_v31, %v10069_v29  ;;  %v10521_v31 = vld [vmem:[#allocation2 + $0x1b0] sm:$0xff]  ;;  %v10415_v5 = vmax.f32 %v10068_v22, %v10070_v35 }
 0x5ae   :  { %v10087_v53 = vcombine.high %v10085_v30, %v10085_v30  ;;  %v10102_v3 = vrot.slane %v10088_v18, %v20598_v61  ;;  %v10103_v49 = vcombine.high %v10095_v24, %v10095_v24  ;;  %v9772_v4 = vadd.f32 %v12885_v40, %v9636_v46  ;;  %13540 = vmatprep.subr.bf16.mxu0 %v20507_v63  ;;  %v10494_v46 = vld [vmem:[#allocation2 + $0xd8] sm:$0xff]  ;;  %v10497_v35 = vld [vmem:[#allocation2 + $0xf0] sm:$0xff] }
 0x5af   :  { %v12888_v15 = vadd.f32 %v12887_v36, %v12886_v6  ;;  %13257 = vmatprep.mubr.msk.f32.mxu0 %vm13797_vm0, %v20544_v11  ;;  %v9644_v18 = vadd.f32 %v19186_v55, %v19285_v0  ;;  %v10086_v36 = vcombine.high %v10078_v51, %v10078_v51 }
 0x5b0   :  { %v19432_v25 = vmax.f32 %v10085_v30, %v10087_v53  ;;  %v10104_v19 = vcombine.high %v10102_v3, %v10102_v3  ;;  %v10418_v50 = vmax.f32 %v10095_v24, %v10103_v49  ;;  %v9831_v26 = vmax.f32 %v9772_v4, 0.0 }
 0x5b1   :  { %v9775_v43 = vadd.f32 %v12888_v15, %v9639_v14  ;;  %13542 = vmatpush3.bf16.msra.mxu0 %v13541_v39  ;;  %v10522_v14 = vld [vmem:[#allocation2 + $0x1b8] sm:$0xff]  ;;  %v9647_v24 = vadd.f32 %v19188_v23, %v19285_v0 }
 0x5b2   :  { %v10452_v44 = vmax.f32 %v19418_v56, %v19432_v25  ;;  %v19439_v45 = vmax.f32 %v10102_v3, %v10104_v19  ;;  %v10453_v34 = vmax.f32 %v10413_v12, %v10418_v50  ;;  %v12889_v60 = vpop.f32.mrb[80].mxu1  ;;  %v10105_v42 = vcombine.high %v9831_v26, %v9831_v26  ;;  %13543 = vmatprep.subr.bf16.mxu0 %v20507_v63  ;;  %v10495_v19 = vld [vmem:[#allocation2 + $0xe0] sm:$0xff]  ;;  %v10496_v50 = vld [vmem:[#allocation2 + $0xe8] sm:$0xff] }
 0x5b3   :  { %v10112_v47 = vrot.slane %v9831_v26, %v20598_v61  ;;  %v9832_v28 = vmax.f32 %v9775_v43, 0.0  ;;  %v12890_v30 = vpop.f32.mrb[81].mxu1  ;;  %v13547_v3 = vpack.c.bf16 %v10494_v46, %v10493_v32  ;;  %v13589_v2 = vpack.c.bf16 %v10522_v14, %v10521_v31  ;;  %v19473_v14 = vld [vmem:[#allocation2 + $0x100] sm:$0xff] }
 0x5b4   :  { %v10454_v39 = vmax.f32 %v19435_v59, %v19439_v45  ;;  %v12891_v6 = vadd.f32 %v12890_v30, %v12889_v60  ;;  %v12892_v40 = vpop.f32.mrb[82].mxu1  ;;  %13324 = vmatmul.mubr.msk.f32.vlgmr.msra.gmra.mrb[102].mxu1 %vm5577_vm2, %v10453_v34  ;;  %v10119_v29 = vrot.slane %v10105_v42, %v20598_v61  ;;  %13258 = vmatmul.mubr.msk.f32.vlgmr.msra.gmra.mrb[100].mxu0 %vm5577_vm2, %v10447_v58  ;;  %v10498_v42 = vld [vmem:[#allocation2 + $0xf8] sm:$0xff] }
 0x5b5   :  { %v10120_v53 = vcombine.high %v10112_v47, %v10112_v47  ;;  %v12893_v55 = vpop.f32.mrb[83].mxu1  ;;  %13545 = vmatpush3.bf16.msra.mxu0 %v13544_v10  ;;  %13587 = vmatpush3.bf16.msra.mxu1 %v13586_v13  ;;  %v10122_v12 = vcombine.high %v9832_v28, %v9832_v28  ;;  %v19459_v58 = vmax.f32 %v10078_v51, %v10086_v36  ;;  %v10529_v51 = vld [vmem:[#allocation2 + $0x1f0] sm:$0xff] }
 0x5b6   :  { %v9780_v49 = vadd.f32 %v12891_v6, %v9644_v18  ;;  %v12894_v23 = vadd.f32 %v12893_v55, %v12892_v40  ;;  %v10121_v4 = vcombine.high %v10119_v29, %v10119_v29  ;;  %13546 = vmatprep.subr.bf16.mxu0 %v20507_v63  ;;  %13588 = vmatprep.subr.bf16.mxu1 %v20507_v63  ;;  %v19475_v18 = vld [vmem:[#allocation2 + $0x108] sm:$0xff] }
 0x5b7   :  { %v10420_v15 = vmax.f32 %v10112_v47, %v10120_v53  ;;  %13268 = vmatprep.mubr.msk.f32.mxu0 %vm13797_vm0, %v20544_v11  ;;  %13345 = vmatprep.mubr.msk.f32.mxu1 %vm13797_vm0, %v20544_v11  ;;  %v9652_v13 = vadd.f32 %v19226_v52, %v19285_v0  ;;  %v10129_v34 = vrot.slane %v9832_v28, %v20598_v61  ;;  %v10530_v28 = vld [vmem:[#allocation2 + $0x1f8] sm:$0xff] }
 0x5b8   :  { %v9833_v26 = vmax.f32 %v9780_v49, 0.0  ;;  %v9783_v43 = vadd.f32 %v12894_v23, %v9647_v24  ;;  %v19461_v10 = vmax.f32 %v10119_v29, %v10121_v4  ;;  %v13550_v46 = vpack.c.bf16 %v10496_v50, %v10495_v19  ;;  %v10535_v49 = vld [vmem:[#allocation2 + $0x220] sm:$0xff]  ;;  %v19493_v4 = vld [vmem:[#allocation2 + $0x110] sm:$0xff]  ;;  %v19500_v19 = vld [vmem:[#allocation2 + $0x238] sm:$0xff] }
 0x5b9   :  { %v10455_v22 = vmax.f32 %v10415_v5, %v10420_v15  ;;  %13548 = vmatpush3.bf16.msra.mxu0 %v13547_v3  ;;  %13590 = vmatpush3.bf16.msra.mxu1 %v13589_v2  ;;  %v10136_v30 = vrot.slane %v10122_v12, %v20598_v61  ;;  %v13598_v52 = vpack.c.bf16 %v10528_v20, %v10527_v37  ;;  %v10536_v5 = vld [vmem:[#allocation2 + $0x228] sm:$0xff]  ;;  %v19495_v15 = vld [vmem:[#allocation2 + $0x118] sm:$0xff]  ;;  %v19498_v12 = vld [vmem:[#allocation2 + $0x230] sm:$0xff] }
 0x5ba   :  { %v9834_v60 = vmax.f32 %v9783_v43, 0.0  ;;  %v12895_v32 = vpop.f32.mrb[84].mxu1  ;;  %v10456_v47 = vmax.f32 %v19459_v58, %v19461_v10  ;;  %13549 = vmatprep.subr.bf16.mxu0 %v20507_v63  ;;  %13597 = vmatprep.subr.bf16.mxu1 %v20507_v63  ;;  %v9655_v24 = vadd.f32 %v19228_v41, %v19285_v0  ;;  %v9660_v6 = vadd.f32 %v19265_v54, %v19285_v0  ;;  %v10541_v10 = vld [vmem:[#allocation2 + $0x250] sm:$0xff] }
 0x5bb   :  { %v12896_v31 = vpop.f32.mrb[85].mxu1  ;;  %v10139_v40 = vcombine.high %v9833_v26, %v9833_v26  ;;  %v19483_v53 = vadd.f32 %v19269_v17, %v19285_v0  ;;  %v13553_v41 = vpack.c.bf16 %v10498_v42, %v10497_v35  ;;  %v10137_v23 = vcombine.high %v10129_v34, %v10129_v34 }
 0x5bc   :  { %v10156_v36 = vcombine.high %v9834_v60, %v9834_v60  ;;  %v12898_v29 = vpop.f32.mrb[86].mxu1  ;;  %v12897_v55 = vadd.f32 %v12896_v31, %v12895_v32  ;;  %13269 = vmatmul.mubr.msk.f32.vlgmr.msra.gmra.mrb[102].mxu0 %vm5577_vm2, %v10448_v1  ;;  %13346 = vmatmul.mubr.msk.f32.vlgmr.msra.gmra.mrb[104].mxu1 %vm5577_vm2, %v10455_v22  ;;  %v13601_v2 = vpack.c.bf16 %v10530_v28, %v10529_v51 }
 0x5bd   :  { %v12899_v3 = vpop.f32.mrb[87].mxu1  ;;  %13551 = vmatpush3.bf16.msra.mxu0 %v13550_v46  ;;  %v13556_v17 = vpack.c.bf16 %v19475_v18, %v19473_v14  ;;  %v10138_v7 = vcombine.high %v10136_v30, %v10136_v30  ;;  %13599 = vmatpush3.bf16.msra.mxu1 %v13598_v52  ;;  %v10146_v50 = vrot.slane %v9833_v26, %v20598_v61 }
 0x5be   :  { %v10170_v54 = vrot.slane %v10156_v36, %v20598_v61  ;;  %v9788_v33 = vadd.f32 %v12897_v55, %v9652_v13  ;;  %v12900_v1 = vadd.f32 %v12899_v3, %v12898_v29  ;;  %13552 = vmatprep.subr.bf16.mxu0 %v20507_v63  ;;  %v10153_v43 = vrot.slane %v10139_v40, %v20598_v61 }
 0x5bf   :  { %13600 = vmatprep.subr.bf16.mxu1 %v20507_v63  ;;  %13279 = vmatprep.mubr.msk.f32.mxu0 %vm13797_vm0, %v20544_v11  ;;  %v13610_v13 = vpack.c.bf16 %v10536_v5, %v10535_v49  ;;  %v13559_v32 = vpack.c.bf16 %v19495_v15, %v19493_v4  ;;  %v10422_v46 = vmax.f32 %v10129_v34, %v10137_v23 }
 0x5c0   :  { %v10172_v37 = vcombine.high %v10170_v54, %v10170_v54  ;;  %v9835_v20 = vmax.f32 %v9788_v33, 0.0  ;;  %v9791_v22 = vadd.f32 %v12900_v1, %v9655_v24  ;;  %13367 = vmatprep.mubr.msk.f32.mxu1 %vm13797_vm0, %v20544_v11  ;;  %v10163_v26 = vrot.slane %v9834_v60, %v20598_v61  ;;  %v10508_v33 = vld [vmem:[#allocation2 + $0x148] sm:$0xff] }
 0x5c1   :  { %13554 = vmatpush3.bf16.msra.mxu0 %v13553_v41  ;;  %v13613_v51 = vpack.c.bf16 %v19500_v19, %v19498_v12  ;;  %v19514_v31 = vmax.f32 %v10136_v30, %v10138_v7  ;;  %13602 = vmatpush3.bf16.msra.mxu1 %v13601_v2  ;;  %v10154_v24 = vcombine.high %v10146_v50, %v10146_v50  ;;  %v10507_v7 = vld [vmem:[#allocation2 + $0x140] sm:$0xff] }
 0x5c2   :  { %v10427_v35 = vmax.f32 %v10170_v54, %v10172_v37  ;;  %v12901_v42 = vpop.f32.mrb[88].mxu1  ;;  %v10173_v52 = vcombine.high %v9835_v20, %v9835_v20  ;;  %v10180_v28 = vrot.slane %v9835_v20, %v20598_v61  ;;  %v9836_v14 = vmax.f32 %v9791_v22, 0.0  ;;  %13555 = vmatprep.subr.bf16.mxu0 %v20507_v63  ;;  %13609 = vmatprep.subr.bf16.mxu1 %v20507_v63 }
 0x5c3   :  { %v12902_v18 = vpop.f32.mrb[89].mxu1  ;;  %v10155_v34 = vcombine.high %v10153_v43, %v10153_v43  ;;  %v10171_v49 = vcombine.high %v10163_v26, %v10163_v26  ;;  %v10424_v1 = vmax.f32 %v10146_v50, %v10154_v24  ;;  %v10543_v50 = vld [vmem:[#allocation2 + $0x260] sm:$0xff]  ;;  %v13568_v20 = vpack.c.bf16 %v10508_v33, %v10507_v7 }
 0x5c4   :  { %v10457_v40 = vmax.f32 %v10422_v46, %v10427_v35  ;;  %v12903_v60 = vadd.f32 %v12902_v18, %v12901_v42  ;;  %v12904_v36 = vpop.f32.mrb[90].mxu1  ;;  %v10187_v29 = vrot.slane %v10173_v52, %v20598_v61  ;;  %v10188_v55 = vcombine.high %v10180_v28, %v10180_v28  ;;  %13280 = vmatmul.mubr.msk.f32.vlgmr.msra.gmra.mrb[104].mxu0 %vm5577_vm2, %v10449_v21  ;;  %v10509_v42 = vld [vmem:[#allocation2 + $0x150] sm:$0xff]  ;;  %v10510_v52 = vld [vmem:[#allocation2 + $0x158] sm:$0xff] }
 0x5c5   :  { %v10190_v30 = vcombine.high %v9836_v14, %v9836_v14  ;;  %v10197_v3 = vrot.slane %v9836_v14, %v20598_v61  ;;  %v12905_v41 = vpop.f32.mrb[91].mxu1  ;;  %13557 = vmatpush3.bf16.msra.mxu0 %v13556_v17  ;;  %v19529_v16 = vmax.f32 %v10153_v43, %v10155_v34  ;;  %13290 = vmatprep.mubr.msk.f32.mxu0 %vm13797_vm0, %v20544_v11  ;;  %v10544_v43 = vld [vmem:[#allocation2 + $0x268] sm:$0xff]  ;;  %v10545_v34 = vld [vmem:[#allocation2 + $0x270] sm:$0xff] }
 0x5c6   :  { %v9796_v23 = vadd.f32 %v12903_v60, %v9660_v6  ;;  %v12906_v54 = vadd.f32 %v12905_v41, %v12904_v36  ;;  %13368 = vmatmul.mubr.msk.f32.vlgmr.msra.gmra.mrb[106].mxu1 %vm5577_vm2, %v10457_v40  ;;  %v10189_v2 = vcombine.high %v10187_v29, %v10187_v29  ;;  %v19526_v5 = vmax.f32 %v10180_v28, %v10188_v55  ;;  %v10546_v40 = vld [vmem:[#allocation2 + $0x278] sm:$0xff]  ;;  %v10551_v41 = vld [vmem:[#allocation2 + $0x2a0] sm:$0xff] }
 0x5c7   :  { %v10204_v4 = vrot.slane %v10190_v30, %v20598_v61  ;;  %v10205_v15 = vcombine.high %v10197_v3, %v10197_v3  ;;  %13611 = vmatpush3.bf16.msra.mxu1 %v13610_v13  ;;  %13558 = vmatprep.subr.bf16.mxu0 %v20507_v63  ;;  %v19540_v37 = vmax.f32 %v10163_v26, %v10171_v49  ;;  %v10515_v30 = vld [vmem:[#allocation2 + $0x180] sm:$0xff]  ;;  %v10552_v49 = vld [vmem:[#allocation2 + $0x2a8] sm:$0xff] }
 0x5c8   :  { %v9837_v27 = vmax.f32 %v9796_v23, 0.0  ;;  %v9799_v21 = vadd.f32 %v12906_v54, %v19483_v53  ;;  %13612 = vmatprep.subr.bf16.mxu1 %v20507_v63  ;;  %v10429_v6 = vmax.f32 %v10187_v29, %v10189_v2  ;;  %v10458_v17 = vmax.f32 %v19514_v31, %v19526_v5  ;;  %13389 = vmatprep.mubr.msk.f32.mxu1 %vm13797_vm0, %v20544_v11  ;;  %v10517_v54 = vld [vmem:[#allocation2 + $0x190] sm:$0xff]  ;;  %v10518_v2 = vld [vmem:[#allocation2 + $0x198] sm:$0xff]  ;;  %v10555_v5 = vld [vmem:[#allocation2 + $0x2c0] sm:$0xff] }
 0x5c9   :  { %v10206_v12 = vcombine.high %v10204_v4, %v10204_v4  ;;  %v19536_v19 = vmax.f32 %v10197_v3, %v10205_v15  ;;  %13560 = vmatpush3.bf16.msra.mxu0 %v13559_v32  ;;  %v13622_v32 = vpack.c.bf16 %v10544_v43, %v10543_v50  ;;  %v9668_v14 = vadd.f32 %v19275_v9, %v19285_v0  ;;  %v10516_v3 = vld [vmem:[#allocation2 + $0x188] sm:$0xff] }
 0x5ca   :  { %v12907_v53 = vpop.f32.mrb[92].mxu1  ;;  %v10459_v22 = vmax.f32 %v10424_v1, %v10429_v6  ;;  %13567 = vmatprep.subr.bf16.mxu0 %v20507_v63  ;;  %v10207_v26 = vcombine.high %v9837_v27, %v9837_v27  ;;  %v9838_v60 = vmax.f32 %v9799_v21, 0.0  ;;  %v13571_v36 = vpack.c.bf16 %v10510_v52, %v10509_v42  ;;  %v10553_v1 = vld [vmem:[#allocation2 + $0x2b0] sm:$0xff] }
 0x5cb   :  { %v19544_v13 = vmax.f32 %v10204_v4, %v10206_v12  ;;  %v10460_v46 = vmax.f32 %v19529_v16, %v19536_v19  ;;  %13614 = vmatpush3.bf16.msra.mxu1 %v13613_v51  ;;  %v12908_v35 = vpop.f32.mrb[93].mxu1  ;;  %v9671_v29 = vadd.f32 %v19277_v8, %v19285_v0  ;;  %v10214_v62 = vrot.slane %v9837_v27, %v20598_v61  ;;  %v10554_v27 = vld [vmem:[#allocation2 + $0x2b8] sm:$0xff]  ;;  %v10563_v19 = vld [vmem:[#allocation2 + $0x300] sm:$0xff] }
 0x5cc   :  { %v12910_v28 = vpop.f32.mrb[94].mxu1  ;;  %13621 = vmatprep.subr.bf16.mxu1 %v20507_v63  ;;  %v12909_v24 = vadd.f32 %v12908_v35, %v12907_v53  ;;  %13291 = vmatmul.mubr.msk.f32.vlgmr.msra.gmra.mrb[106].mxu0 %vm5577_vm2, %v10450_v57  ;;  %v10221_v48 = vrot.slane %v10207_v26, %v20598_v61  ;;  %v13625_v57 = vpack.c.bf16 %v10546_v40, %v10545_v34  ;;  %v19573_v53 = vld [vmem:[#allocation2 + $0x1c0] sm:$0xff] }
 0x5cd   :  { %v10461_v18 = vmax.f32 %v19540_v37, %v19544_v13  ;;  %v12911_v51 = vpop.f32.mrb[95].mxu1  ;;  %13569 = vmatpush3.bf16.msra.mxu0 %v13568_v20  ;;  %13312 = vmatprep.mubr.msk.f32.mxu0 %vm13797_vm0, %v20544_v11  ;;  %v9676_v4 = vadd.f32 %v19280_v38, %v19285_v0  ;;  %v10224_v15 = vcombine.high %v9838_v60, %v9838_v60  ;;  %v10524_v20 = vld [vmem:[#allocation2 + $0x1c8] sm:$0xff]  ;;  %v10559_v37 = vld [vmem:[#allocation2 + $0x2e0] sm:$0xff] }
 0x5ce   :  { %v9804_v55 = vadd.f32 %v12909_v24, %v9668_v14  ;;  %v12912_v9 = vadd.f32 %v12911_v51, %v12910_v28  ;;  %13390 = vmatmul.mubr.msk.f32.vlgmr.msra.gmra.mrb[108].mxu1 %vm5577_vm2, %v10459_v22  ;;  %13570 = vmatprep.subr.bf16.mxu0 %v20507_v63  ;;  %v13580_v33 = vpack.c.bf16 %v10516_v3, %v10515_v30  ;;  %v10560_v13 = vld [vmem:[#allocation2 + $0x2e8] sm:$0xff] }
 0x5cf   :  { %13623 = vmatpush3.bf16.msra.mxu1 %v13622_v32  ;;  %13411 = vmatprep.mubr.msk.f32.mxu1 %vm13797_vm0, %v20544_v11  ;;  %v10231_v21 = vrot.slane %v9838_v60, %v20598_v61  ;;  %v13634_v43 = vpack.c.bf16 %v10552_v49, %v10551_v41  ;;  %v10222_v22 = vcombine.high %v10214_v62, %v10214_v62  ;;  %v10526_v41 = vld [vmem:[#allocation2 + $0x1d8] sm:$0xff] }
 0x5d0   :  { %v9839_v8 = vmax.f32 %v9804_v55, 0.0  ;;  %v9807_v23 = vadd.f32 %v12912_v9, %v9671_v29  ;;  %13624 = vmatprep.subr.bf16.mxu1 %v20507_v63  ;;  %v10223_v35 = vcombine.high %v10221_v48, %v10221_v48  ;;  %v13583_v42 = vpack.c.bf16 %v10518_v2, %v10517_v54 }
 0x5d1   :  { %13572 = vmatpush3.bf16.msra.mxu0 %v13571_v36  ;;  %v13637_v14 = vpack.c.bf16 %v10554_v27, %v10553_v1  ;;  %v10238_v24 = vrot.slane %v10224_v15, %v20598_v61  ;;  %v13592_v34 = vpack.c.bf16 %v10524_v20, %v19573_v53  ;;  %v10239_v40 = vcombine.high %v10231_v21, %v10231_v21  ;;  %v10562_v1 = vld [vmem:[#allocation2 + $0x2f8] sm:$0xff]  ;;  %v10532_v53 = vld [vmem:[#allocation2 + $0x208] sm:$0xff] }
 0x5d2   :  { %v12913_v7 = vpop.f32.mrb[96].mxu1  ;;  %v10241_v6 = vcombine.high %v9839_v8, %v9839_v8  ;;  %v9840_v12 = vmax.f32 %v9807_v23, 0.0  ;;  %13579 = vmatprep.subr.bf16.mxu0 %v20507_v63  ;;  %v19589_v56 = vmax.f32 %v10214_v62, %v10222_v22  ;;  %v10433_v25 = vmax.f32 %v10221_v48, %v10223_v35  ;;  %v10533_v35 = vld [vmem:[#allocation2 + $0x210] sm:$0xff] }
 0x5d3   :  { %v12914_v50 = vpop.f32.mrb[97].mxu1  ;;  %13626 = vmatpush3.bf16.msra.mxu1 %v13625_v57  ;;  %v10525_v57 = vld [vmem:[#allocation2 + $0x1d0] sm:$0xff]  ;;  %v19601_v49 = vmax.f32 %v10231_v21, %v10239_v40 }
 0x5d4   :  { %v12915_v38 = vadd.f32 %v12914_v50, %v12913_v7  ;;  %v12916_v0 = vpop.f32.mrb[98].mxu1  ;;  %v10255_v52 = vrot.slane %v10241_v6, %v20598_v61  ;;  %v10258_v26 = vcombine.high %v9840_v12, %v9840_v12  ;;  %v10265_v28 = vrot.slane %v9840_v12, %v20598_v61  ;;  %13313 = vmatmul.mubr.msk.f32.vlgmr.msra.gmra.mrb[108].mxu0 %vm5577_vm2, %v10452_v44  ;;  %v10557_v40 = vld [vmem:[#allocation2 + $0x2d0] sm:$0xff] }
 0x5d5   :  { %v12917_v32 = vpop.f32.mrb[99].mxu1  ;;  %13581 = vmatpush3.bf16.msra.mxu0 %v13580_v33  ;;  %13633 = vmatprep.subr.bf16.mxu1 %v20507_v63  ;;  %v10248_v44 = vrot.slane %v9839_v8, %v20598_v61  ;;  %v13646_v7 = vpack.c.bf16 %v10560_v13, %v10559_v37  ;;  %v10561_v33 = vld [vmem:[#allocation2 + $0x2f0] sm:$0xff]  ;;  %v13595_v21 = vpack.c.bf16 %v10526_v41, %v10525_v57  ;;  %v12455_v37 = vld [vmem:[%s19782_s7 + $0x20] sm:$0xff]  ;;  %v12456_v13 = vld [vmem:[%s19782_s7 + $0x28] sm:$0xff] }
 0x5d6   :  { %v9812_v51 = vadd.f32 %v12915_v38, %v9676_v4  ;;  %v10257_v60 = vcombine.high %v10255_v52, %v10255_v52  ;;  %v10272_v36 = vrot.slane %v10258_v26, %v20598_v61  ;;  %v10273_v29 = vcombine.high %v10265_v28, %v10265_v28  ;;  %13412 = vmatmul.mubr.msk.f32.vlgmr.msra.gmra.mrb[110].mxu1 %vm5577_vm2, %v10461_v18  ;;  %v10534_v38 = vld [vmem:[#allocation2 + $0x218] sm:$0xff]  ;;  %v10548_v32 = vld [vmem:[#allocation2 + $0x288] sm:$0xff]  ;;  %v12459_v41 = vld [vmem:[%s19782_s7 + $0x40] sm:$0xff] }
 0x5d7   :  { %13635 = vmatpush3.bf16.msra.mxu1 %v13634_v43  ;;  %13582 = vmatprep.subr.bf16.mxu0 %v20507_v63  ;;  %v10240_v18 = vcombine.high %v10238_v24, %v10238_v24  ;;  %v10256_v2 = vcombine.high %v10248_v44, %v10248_v44  ;;  %v10531_v43 = vld [vmem:[#allocation2 + $0x200] sm:$0xff]  ;;  %v13607_v0 = vpack.c.bf16 %v10534_v38, %v10533_v35 }
 0x5d8   :  { %v9841_v55 = vmax.f32 %v9812_v51, 0.0  ;;  %v19593_v9 = vmax.f32 %v10255_v52, %v10257_v60  ;;  %v10274_v30 = vcombine.high %v10272_v36, %v10272_v36  ;;  %v10438_v3 = vmax.f32 %v10265_v28, %v10273_v29  ;;  %13636 = vmatprep.subr.bf16.mxu1 %v20507_v63  ;;  %13334 = vmatprep.mubr.msk.f32.mxu0 %vm13797_vm0, %v20544_v11  ;;  %v10540_v52 = vld [vmem:[#allocation2 + $0x248] sm:$0xff]  ;;  %v10547_v28 = vld [vmem:[#allocation2 + $0x280] sm:$0xff]  ;;  %v10550_v51 = vld [vmem:[#allocation2 + $0x298] sm:$0xff] }
 0x5d9   :  { %13584 = vmatpush3.bf16.msra.mxu0 %v13583_v42  ;;  %13433 = vmatprep.mubr.msk.f32.mxu1 %vm13797_vm0, %v20544_v11  ;;  %v10435_v6 = vmax.f32 %v10238_v24, %v10240_v18  ;;  %v19620_v59 = vmax.f32 %v10248_v44, %v10256_v2  ;;  %v13604_v22 = vpack.c.bf16 %v10532_v53, %v10531_v43  ;;  %v10539_v42 = vld [vmem:[#allocation2 + $0x240] sm:$0xff]  ;;  %v10549_v24 = vld [vmem:[#allocation2 + $0x290] sm:$0xff]  ;;  %v10558_v60 = vld [vmem:[#allocation2 + $0x2d8] sm:$0xff] }
 0x5da   :  { %v10275_v62 = vcombine.high %v9841_v55, %v9841_v55  ;;  %v10282_v48 = vrot.slane %v9841_v55, %v20598_v61  ;;  %v10462_v8 = vmax.f32 %v19589_v56, %v19593_v9  ;;  %v19605_v23 = vmax.f32 %v10272_v36, %v10274_v30  ;;  %13591 = vmatprep.subr.bf16.mxu0 %v20507_v63  ;;  %v10565_v29 = vld [vmem:[#allocation2 + $0x310] sm:$0xff]  ;;  %v12451_v44 = vld [vmem:[%s19782_s7] sm:$0xff]  ;;  %v12452_v55 = vld [vmem:[%s19782_s7 + $0x8] sm:$0xff] }
 0x5db   :  { %v10463_v54 = vmax.f32 %v10433_v25, %v10438_v3  ;;  %13638 = vmatpush3.bf16.msra.mxu1 %v13637_v14  ;;  %v13616_v58 = vpack.c.bf16 %v10540_v52, %v10539_v42  ;;  %v13628_v14 = vpack.c.bf16 %v10548_v32, %v10547_v28  ;;  %v13631_v31 = vpack.c.bf16 %v10550_v51, %v10549_v24  ;;  %v10566_v25 = vld [vmem:[#allocation2 + $0x318] sm:$0xff]  ;;  %v12457_v18 = vld [vmem:[%s19782_s7 + $0x30] sm:$0xff] }
 0x5dc   :  { %v10289_v4 = vrot.slane %v10275_v62, %v20598_v61  ;;  %v10290_v15 = vcombine.high %v10282_v48, %v10282_v48  ;;  %v10464_v27 = vmax.f32 %v19601_v49, %v19605_v23  ;;  %13335 = vmatmul.mubr.msk.f32.vlgmr.msra.gmra.mrb[110].mxu0 %vm5577_vm2, %v10454_v39  ;;  %13645 = vmatprep.subr.bf16.mxu1 %v20507_v63  ;;  %v12454_v30 = vld [vmem:[%s19782_s7 + $0x18] sm:$0xff]  ;;  %v12460_v49 = vld [vmem:[%s19782_s7 + $0x48] sm:$0xff] }
 0x5dd   :  { %13593 = vmatpush3.bf16.msra.mxu0 %v13592_v34  ;;  %13356 = vmatprep.mubr.msk.f32.mxu0 %vm13797_vm0, %v20544_v11  ;;  %v13649_v61 = vpack.c.bf16 %v10562_v1, %v10561_v33  ;;  %v13643_v16 = vpack.c.bf16 %v10558_v60, %v10557_v40  ;;  %v13655_v56 = vpack.c.bf16 %v10566_v25, %v10565_v29  ;;  %v12464_v33 = vld [vmem:[%s19782_s7 + $0x68] sm:$0xff]  ;;  %v12465_v1 = vld [vmem:[%s19782_s7 + $0x70] sm:$0xff] }
 0x5de   :  { %v10291_v12 = vcombine.high %v10289_v4, %v10289_v4  ;;  %v10440_v50 = vmax.f32 %v10282_v48, %v10290_v15  ;;  %13434 = vmatmul.mubr.msk.f32.vlgmr.msra.gmra.mrb[112].mxu1 %vm5577_vm2, %v10463_v54  ;;  %13594 = vmatprep.subr.bf16.mxu0 %v20507_v63  ;;  %v13658_v9 = vpack.c.bf16 %v12452_v55, %v12451_v44  ;;  %v12458_v48 = vld [vmem:[%s19782_s7 + $0x38] sm:$0xff] }
 0x5df   :  { %13647 = vmatpush3.bf16.msra.mxu1 %v13646_v7  ;;  %13455 = vmatprep.mubr.msk.f32.mxu1 %vm13797_vm0, %v20544_v11  ;;  %v13664_v62 = vpack.c.bf16 %v12456_v13, %v12455_v37  ;;  %v13667_v57 = vpack.c.bf16 %v12458_v48, %v12457_v18  ;;  %v13670_v23 = vpack.c.bf16 %v12460_v49, %v12459_v41  ;;  %v12462_v54 = vld [vmem:[%s19782_s7 + $0x58] sm:$0xff]  ;;  %v12463_v7 = vld [vmem:[%s19782_s7 + $0x60] sm:$0xff] }
 0x5e0   :  { %v19622_v45 = vmax.f32 %v10289_v4, %v10291_v12  ;;  %v10465_v39 = vmax.f32 %v10435_v6, %v10440_v50  ;;  %13648 = vmatprep.subr.bf16.mxu1 %v20507_v63 }
 0x5e1   :  { %13596 = vmatpush3.bf16.msra.mxu0 %v13595_v21  ;;  %v12466_v21 = vld [vmem:[%s19782_s7 + $0x78] sm:$0xff] }
 0x5e2   :  { %v10466_v20 = vmax.f32 %v19620_v59, %v19622_v45  ;;  %13603 = vmatprep.subr.bf16.mxu0 %v20507_v63  ;;  %v13679_v43 = vpack.c.bf16 %v12466_v21, %v12465_v1 }
 0x5e3   :  { %13650 = vmatpush3.bf16.msra.mxu1 %v13649_v61 }
 0x5e4   :  { %13357 = vmatmul.mubr.msk.f32.vlgmr.msra.gmra.mrb[112].mxu0 %vm5577_vm2, %v10456_v47  ;;  %13657 = vmatprep.subr.bf16.mxu1 %v20507_v63  ;;  %v10542_v47 = vld [vmem:[#allocation2 + $0x258] sm:$0xff] }
 0x5e5   :  { %13605 = vmatpush3.bf16.msra.mxu0 %v13604_v22  ;;  %13378 = vmatprep.mubr.msk.f32.mxu0 %vm13797_vm0, %v20544_v11  ;;  %v13619_v26 = vpack.c.bf16 %v10542_v47, %v10541_v10 }
 0x5e6   :  { %13456 = vmatmul.mubr.msk.f32.vlgmr.msra.gmra.mrb[114].mxu1 %vm5577_vm2, %v10465_v39  ;;  %13606 = vmatprep.subr.bf16.mxu0 %v20507_v63 }
 0x5e7   :  { %13501 = vmatprep.mubr.msk.f32.mxu1 %vm13797_vm0, %v20544_v11  ;;  %13659 = vmatpush3.bf16.msra.mxu1 %v13658_v9 }
 0x5e8   :  { %13660 = vmatprep.subr.bf16.mxu1 %v20507_v63 }
 0x5e9   :  { %13608 = vmatpush3.bf16.msra.mxu0 %v13607_v0 }
 0x5ea   :  { %13615 = vmatprep.subr.bf16.mxu0 %v20507_v63 }
 0x5ec   :  { %13379 = vmatmul.mubr.msk.f32.vlgmr.msra.gmra.mrb[114].mxu0 %vm5577_vm2, %v10458_v17  ;;  %v10556_v17 = vld [vmem:[#allocation2 + $0x2c8] sm:$0xff] }
 0x5ed   :  { %13617 = vmatpush3.bf16.msra.mxu0 %v13616_v58  ;;  %13400 = vmatprep.mubr.msk.f32.mxu0 %vm13797_vm0, %v20544_v11  ;;  %v13640_v34 = vpack.c.bf16 %v10556_v17, %v10555_v5 }
 0x5ee   :  { %13618 = vmatprep.subr.bf16.mxu0 %v20507_v63 }
 0x5f1   :  { %13620 = vmatpush3.bf16.msra.mxu0 %v13619_v26 }
 0x5f2   :  { %13627 = vmatprep.subr.bf16.mxu0 %v20507_v63 }
 0x5f4   :  { %13401 = vmatmul.mubr.msk.f32.vlgmr.msra.gmra.mrb[116].mxu0 %vm5577_vm2, %v10460_v46  ;;  %v10564_v46 = vld [vmem:[#allocation2 + $0x308] sm:$0xff] }
 0x5f5   :  { %13629 = vmatpush3.bf16.msra.mxu0 %v13628_v14  ;;  %13422 = vmatprep.mubr.msk.f32.mxu0 %vm13797_vm0, %v20544_v11  ;;  %v13652_v36 = vpack.c.bf16 %v10564_v46, %v10563_v19 }
 0x5f6   :  { %13630 = vmatprep.subr.bf16.mxu0 %v20507_v63 }
 0x5f9   :  { %13632 = vmatpush3.bf16.msra.mxu0 %v13631_v31 }
 0x5fa   :  { %13639 = vmatprep.subr.bf16.mxu0 %v20507_v63 }
 0x5fc   :  { %13423 = vmatmul.mubr.msk.f32.vlgmr.msra.gmra.mrb[118].mxu0 %vm5577_vm2, %v10462_v8  ;;  %v12461_v8 = vld [vmem:[%s19782_s7 + $0x50] sm:$0xff] }
 0x5fd   :  { %13641 = vmatpush3.bf16.msra.mxu0 %v13640_v34  ;;  %13444 = vmatprep.mubr.msk.f32.mxu0 %vm13797_vm0, %v20544_v11  ;;  %v13673_v2 = vpack.c.bf16 %v12462_v54, %v12461_v8 }
 0x5fe   :  { %13642 = vmatprep.subr.bf16.mxu0 %v20507_v63 }
 0x601   :  { %13644 = vmatpush3.bf16.msra.mxu0 %v13643_v16 }
 0x602   :  { %13651 = vmatprep.subr.bf16.mxu0 %v20507_v63 }
 0x604   :  { %13445 = vmatmul.mubr.msk.f32.vlgmr.msra.gmra.mrb[120].mxu0 %vm5577_vm2, %v10464_v27  ;;  %v13676_v27 = vpack.c.bf16 %v12464_v33, %v12463_v7 }
 0x605   :  { %13653 = vmatpush3.bf16.msra.mxu0 %v13652_v36  ;;  %13466 = vmatprep.mubr.msk.f32.mxu0 %vm13797_vm0, %v20544_v11  ;;  %v12453_v11 = vld [vmem:[%s19782_s7 + $0x10] sm:$0xff] }
 0x606   :  { %13654 = vmatprep.subr.bf16.mxu0 %v20507_v63  ;;  %v13661_v3 = vpack.c.bf16 %v12454_v30, %v12453_v11 }
 0x608   :  { %13662 = vmatpush3.bf16.msra.mxu1 %v13661_v3 }
 0x609   :  { %13656 = vmatpush3.bf16.msra.mxu0 %v13655_v56  ;;  %13663 = vmatprep.subr.bf16.mxu1 %v20507_v63 }
 0x60c   :  { %13467 = vmatmul.mubr.msk.f32.vlgmr.msra.gmra.mrb[122].mxu0 %vm5577_vm2, %v10466_v20  ;;  %13665 = vmatpush3.bf16.msra.mxu1 %v13664_v62 }
 0x60d   :  { %13666 = vmatprep.subr.bf16.mxu1 %v20507_v63 }
 0x610   :  { %13668 = vmatpush3.bf16.msra.mxu1 %v13667_v57 }
 0x611   :  { %13669 = vmatprep.subr.bf16.mxu1 %v20507_v63 }
 0x614   :  { %13671 = vmatpush3.bf16.msra.mxu1 %v13670_v23 }
 0x615   :  { %13672 = vmatprep.subr.bf16.mxu1 %v20507_v63 }
 0x618   :  { %13674 = vmatpush3.bf16.msra.mxu1 %v13673_v2 }
 0x619   :  { %13675 = vmatprep.subr.bf16.mxu1 %v20507_v63 }
 0x61c   :  { %13677 = vmatpush3.bf16.msra.mxu1 %v13676_v27 }
 0x61d   :  { %13678 = vmatprep.subr.bf16.mxu1 %v20507_v63 }
 0x620   :  { %13680 = vmatpush3.bf16.msra.mxu1 %v13679_v43 }
 0x65f   :  { %v10636_v4 = vpop.f32.mrb[86].mxu0 }
 0x660   :  { %v13204_v15 = vpop.f32.mrb[87].mxu0  ;;  %v12393_v12 = vsel %vm12392_vm5, %v10636_v4, 0.0 }
 0x667   :  { %v10709_v6 = vpop.f32.mrb[92].mxu0 }
 0x668   :  { %v12394_v50 = vsel %vm12392_vm5, %v10709_v6, 0.0  ;;  %v13215_v61 = vpop.f32.mrb[93].mxu0 }
 0x669   :  { %v12395_v53 = vadd.f32 %v12394_v50, %v12393_v12 }
 0x66f   :  { %v10782_v59 = vpop.f32.mrb[94].mxu0 }
 0x670   :  { %v12396_v45 = vsel %vm12392_vm5, %v10782_v59, 0.0  ;;  %v13226_v39 = vpop.f32.mrb[95].mxu0 }
 0x671   :  { %v12397_v20 = vadd.f32 %v12396_v45, %v12395_v53 }
 0x677   :  { %v10855_v22 = vpop.f32.mrb[96].mxu0 }
 0x678   :  { %v12398_v35 = vsel %vm12392_vm5, %v10855_v22, 0.0  ;;  %v13237_v38 = vpop.f32.mrb[97].mxu0 }
 0x679   :  { %v11293_v0 = vpop.f32.mrb[100].mxu1  ;;  %v12399_v42 = vadd.f32 %v12398_v35, %v12397_v20 }
 0x67a   :  { %v13303_v52 = vpop.f32.mrb[101].mxu1  ;;  %v12410_v30 = vsel %vm12392_vm5, %v11293_v0, 0.0 }
 0x67f   :  { %v10928_v58 = vpop.f32.mrb[98].mxu0 }
 0x680   :  { %v12400_v10 = vsel %vm12392_vm5, %v10928_v58, 0.0  ;;  %v13248_v47 = vpop.f32.mrb[99].mxu0 }
 0x681   :  { %v12401_v26 = vadd.f32 %v12400_v10, %v12399_v42 }
 0x687   :  { %v11439_v28 = vpop.f32.mrb[102].mxu1  ;;  %v11001_v63 = vpop.f32.mrb[100].mxu0 }
 0x688   :  { %v13325_v32 = vpop.f32.mrb[103].mxu1  ;;  %v12402_v14 = vsel %vm12392_vm5, %v11001_v63, 0.0  ;;  %v13259_v24 = vpop.f32.mrb[101].mxu0  ;;  %v12414_v41 = vsel %vm12392_vm5, %v11439_v28, 0.0 }
 0x689   :  { %v12403_v51 = vadd.f32 %v12402_v14, %v12401_v26 }
 0x68f   :  { %v11074_v31 = vpop.f32.mrb[102].mxu0  ;;  %v11585_v5 = vpop.f32.mrb[104].mxu1 }
 0x690   :  { %v12404_v17 = vsel %vm12392_vm5, %v11074_v31, 0.0  ;;  %v13270_v34 = vpop.f32.mrb[103].mxu0  ;;  %v13347_v40 = vpop.f32.mrb[105].mxu1  ;;  %v12418_v7 = vsel %vm12392_vm5, %v11585_v5, 0.0 }
 0x691   :  { %v12405_v60 = vadd.f32 %v12404_v17, %v12403_v51 }
 0x697   :  { %v11147_v16 = vpop.f32.mrb[104].mxu0 }
 0x698   :  { %v12406_v19 = vsel %vm12392_vm5, %v11147_v16, 0.0  ;;  %v13281_v46 = vpop.f32.mrb[105].mxu0  ;;  %v12684_v16 = vld [vmem:[%s19781_s6] ss:$0 sm:$0xff] }
 0x699   :  { %v11731_v36 = vpop.f32.mrb[106].mxu1  ;;  %v12407_v29 = vadd.f32 %v12406_v19, %v12405_v60 }
 0x69a   :  { %v13369_v25 = vpop.f32.mrb[107].mxu1  ;;  %v12422_v61 = vsel %vm12392_vm5, %v11731_v36, 0.0 }
 0x69b   :  { %v12685_v25 = vld [vmem:[%s19783_s8] ss:$0 sm:$0xff] }
 0x69f   :  { %v11220_v56 = vpop.f32.mrb[106].mxu0 }
 0x6a0   :  { %v12408_v44 = vsel %vm12392_vm5, %v11220_v56, 0.0  ;;  %v13292_v55 = vpop.f32.mrb[107].mxu0 }
 0x6a1   :  { %v12409_v11 = vadd.f32 %v12408_v44, %v12407_v29  ;;  %v11877_v9 = vpop.f32.mrb[108].mxu1 }
 0x6a2   :  { %v13391_v3 = vpop.f32.mrb[109].mxu1  ;;  %v12426_v22 = vsel %vm12392_vm5, %v11877_v9, 0.0 }
 0x6a3   :  { %v12411_v37 = vadd.f32 %v12410_v30, %v12409_v11 }
 0x6a7   :  { %v11366_v13 = vpop.f32.mrb[108].mxu0 }
 0x6a8   :  { %v12412_v18 = vsel %vm12392_vm5, %v11366_v13, 0.0  ;;  %v13314_v62 = vpop.f32.mrb[109].mxu0 }
 0x6a9   :  { %v12413_v48 = vadd.f32 %v12412_v18, %v12411_v37  ;;  %v12023_v57 = vpop.f32.mrb[110].mxu1 }
 0x6aa   :  { %v13413_v49 = vpop.f32.mrb[111].mxu1  ;;  %v12430_v58 = vsel %vm12392_vm5, %v12023_v57, 0.0 }
 0x6ab   :  { %v12415_v8 = vadd.f32 %v12414_v41, %v12413_v48 }
 0x6af   :  { %v11512_v23 = vpop.f32.mrb[110].mxu0 }
 0x6b0   :  { %v12416_v54 = vsel %vm12392_vm5, %v11512_v23, 0.0  ;;  %v13336_v2 = vpop.f32.mrb[111].mxu0 }
 0x6b1   :  { %v12417_v4 = vadd.f32 %v12416_v54, %v12415_v8  ;;  %v12169_v15 = vpop.f32.mrb[112].mxu1 }
 0x6b2   :  { %v13435_v33 = vpop.f32.mrb[113].mxu1  ;;  %v12434_v32 = vsel %vm12392_vm5, %v12169_v15, 0.0 }
 0x6b3   :  { %v12419_v1 = vadd.f32 %v12418_v7, %v12417_v4 }
 0x6b7   :  { %v11658_v27 = vpop.f32.mrb[112].mxu0 }
 0x6b8   :  { %v12420_v21 = vsel %vm12392_vm5, %v11658_v27, 0.0  ;;  %v13358_v6 = vpop.f32.mrb[113].mxu0 }
 0x6b9   :  { %v12421_v12 = vadd.f32 %v12420_v21, %v12419_v1  ;;  %v12315_v50 = vpop.f32.mrb[114].mxu1 }
 0x6ba   :  { %v13457_v43 = vpop.f32.mrb[115].mxu1  ;;  %v12438_v17 = vsel %vm12392_vm5, %v12315_v50, 0.0 }
 0x6bb   :  { %v12423_v53 = vadd.f32 %v12422_v61, %v12421_v12 }
 0x6bf   :  { %v11804_v59 = vpop.f32.mrb[114].mxu0 }
 0x6c0   :  { %v12424_v45 = vsel %vm12392_vm5, %v11804_v59, 0.0  ;;  %v13380_v39 = vpop.f32.mrb[115].mxu0 }
 0x6c1   :  { %v12425_v20 = vadd.f32 %v12424_v45, %v12423_v53 }
 0x6c3   :  { %v12427_v35 = vadd.f32 %v12426_v22, %v12425_v20 }
 0x6c7   :  { %v11950_v38 = vpop.f32.mrb[116].mxu0 }
 0x6c8   :  { %v12428_v0 = vsel %vm12392_vm5, %v11950_v38, 0.0  ;;  %v13402_v42 = vpop.f32.mrb[117].mxu0 }
 0x6c9   :  { %v12429_v52 = vadd.f32 %v12428_v0, %v12427_v35 }
 0x6cb   :  { %v12431_v10 = vadd.f32 %v12430_v58, %v12429_v52 }
 0x6cf   :  { %v12096_v47 = vpop.f32.mrb[118].mxu0 }
 0x6d0   :  { %v12432_v26 = vsel %vm12392_vm5, %v12096_v47, 0.0  ;;  %v13424_v28 = vpop.f32.mrb[119].mxu0 }
 0x6d1   :  { %v12433_v63 = vadd.f32 %v12432_v26, %v12431_v10 }
 0x6d3   :  { %v12435_v14 = vadd.f32 %v12434_v32, %v12433_v63 }
 0x6d7   :  { %v12242_v24 = vpop.f32.mrb[120].mxu0 }
 0x6d8   :  { %v12436_v51 = vsel %vm12392_vm5, %v12242_v24, 0.0  ;;  %v13446_v31 = vpop.f32.mrb[121].mxu0 }
 0x6d9   :  { %v12437_v5 = vadd.f32 %v12436_v51, %v12435_v14 }
 0x6db   :  { %v12439_v34 = vadd.f32 %v12438_v17, %v12437_v5 }
 0x6df   :  { %v12388_v40 = vpop.f32.mrb[122].mxu0 }
 0x6e0   :  { %v12440_v60 = vsel %vm12392_vm5, %v12388_v40, 0.0  ;;  %v13468_v19 = vpop.f32.mrb[123].mxu0 }
 0x6e1   :  { %v12441_v46 = vadd.f32 %v12440_v60, %v12439_v34 }
 0x6e3   :  { %v12449_v36 = vadd.f32 %v12684_v16, %v12441_v46 }
 0x6e5   :  { %v12450_v29 = vmax.f32 %v12449_v36, 0.0 }
 0x6e7   :  { %13502 = vmatmul.mubr.f32.vlgmr.msra.gmra.mrb[116].mxu1 %v12450_v29 }
 0x7ba   :  { %v12540_v56 = vpop.f32.mrb[116].mxu1 }
 0x7bb   :  { %v12541_v44 = vadd.f32 %v12685_v25, %v12540_v56  ;;  %v13503_v55 = vpop.f32.mrb[117].mxu1 }
 0x7bd   :  { %12544 = vst [vmem:[#allocation5] sm:$0x3] %v12541_v44 }
 0x7be   :  { %13778 = shalt.err (!%p13775_p12)
}
 0x7bf   :  { %s13779_s19 = scalar_lea.hbm %s19784_s9, 32 }
 0x7c0   :  { %p13780_p13 = scmp.ne.s32.totalorder %s19784_s9, %s13779_s19  ;;  %p13783_p0 = scmp.lt.u32.totalorder %s13779_s19, %s19784_s9 }
 0x7c2   :  { %p13785_p1 = pnand %p13783_p0, %p13780_p13 }
 0x7c4   :  { %13788 = shalt.err (!%p13785_p1)
}
 0x7c5   :  { %12554 = dma.vmem_to_hbm [thread:$0]  %s12552_s0, 32, %s19784_s9, [#allocation4]  }
 0x7c6   :  { %13791 = dma.done.wait [#allocation4], 32  }
 0x7c7   :  { %13792 = vsyncadd [#allocation4], 4294967264 }
 0x7c8   :  { %12558 = vsyncpa [#allocation3], 1 }
 0x7c9   :  { %12559 = vsyncpa [#allocation4], 1 }

</bundles_post_ra>
